<compile_context>
chip_gen: v7x
topology: tpu7x:2x2x1
jax: 0.10.0
libtpu: 0.0.40
codegen_flags: <defaults>
</compile_context>

<pallas_src>
import jax
import jax.numpy as jnp
from jax import lax
from jax.experimental import pallas as pl
from jax.experimental.pallas import tpu as pltpu

E_LAMBDA = 1e-4   # SimAM default e_lambda


# ----------------------------------------------------------------------------
# Fused kernel: pad(x) -> cv1 -> SiLU -> pad -> cv2 -> SiLU -> SimAM -> +x
# One batch element per grid step.
# ----------------------------------------------------------------------------
def _make_fused_kernel(H, W, Cm, C2):
    Wp = W + 2              # padded width
    LOUT = H * Wp           # conv output rows in "padded width" layout
    HW = H * W

    def kernel(x_ref, w1_ref, b1_ref, w2_ref, b2_ref, o_ref, xpad, ypad):
        # x_ref : (1, H, W, C1) f32    original input (conv input + residual)
        # w1_ref: (9, C1, Cm)  bf16    conv taps (BN folded), index = dy*3 + dx
        # b1_ref: (1, Cm)      f32     folded BN bias
        # w2_ref: (9, Cm, C2)  bf16
        # b2_ref: (1, C2)      f32
        # o_ref : (1, H, W, C2) f32
        # xpad  : ((H+3)*Wp, C1) f32 VMEM  zero-padded conv1 input (flattened)
        # ypad  : ((H+3)*Wp, Cm) f32 VMEM  zero-padded cv1 activation (flattened)

        # ---- build the zero-padded conv1 input slab in VMEM (no XLA pad) ----
        xpad[...] = jnp.zeros_like(xpad)
        for y in range(H):                     # interior rows, static offsets
            xpad[pl.ds((y + 1) * Wp + 1, W), :] = x_ref[0, y, :, :]

        # valid-column mask for padded-width layout (column index < W)
        col = lax.broadcasted_iota(jnp.int32, (LOUT, 1), 0) % Wp
        valid = col < W

        def conv3x3(src, w_ref, b_ref, cout):
            # bias folded into accumulator init; taps are contiguous
            # sublane-offset windows of the flattened padded slab.
            acc = jnp.broadcast_to(b_ref[...], (LOUT, cout))
            for dy in range(3):
                for dx in range(3):
                    patch = src[pl.ds(dy * Wp + dx, LOUT), :].astype(jnp.bfloat16)
                    acc = acc + jnp.dot(patch, w_ref[dy * 3 + dx, :, :],
                                        preferred_element_type=jnp.float32)
            return acc

        # ---- cv1: conv + folded BN + SiLU ----
        a1 = conv3x3(xpad, w1_ref, b1_ref, Cm)
        z1 = a1 * jax.nn.sigmoid(a1)
        z1 = jnp.where(valid, z1, 0.0)         # zero garbage cols -> become halo

        # ---- stage cv1 activation as zero-padded cv2 input (single offset store)
        ypad[...] = jnp.zeros_like(ypad)
        ypad[pl.ds(Wp + 1, LOUT), :] = z1

        # ---- cv2: conv + folded BN + SiLU ----
        a2 = conv3x3(ypad, w2_ref, b2_ref, C2)
        z2 = a2 * jax.nn.sigmoid(a2)

        # ---- SimAM: per-channel stats over the H*W valid positions ----
        z2m = jnp.where(valid, z2, 0.0)
        sum_z = jnp.sum(z2m, axis=0, keepdims=True)            # (1, C2)
        sum_zz = jnp.sum(z2m * z2m, axis=0, keepdims=True)      # (1, C2)
        mu = sum_z * (1.0 / HW)
        var_sum = jnp.maximum(sum_zz - HW * mu * mu, 0.0)       # sum (z - mu)^2
        inv = pl.reciprocal(4.0 * (var_sum * (1.0 / (HW - 1)) + E_LAMBDA),
                            approx=True)
        e_y = (z2 - mu) ** 2 * inv + 0.5
        att = z2 * jax.nn.sigmoid(e_y)          # padded-width layout, garbage cols

        # ---- residual add + per-row lane-dense stores (drop garbage columns) ----
        for y in range(H):
            row = att[y * Wp:y * Wp + W, :]
            o_ref[0, y, :, :] = (x_ref[0, y, :, :] + row).astype(o_ref.dtype)

    return kernel


# ----------------------------------------------------------------------------
# Wrapper
# ----------------------------------------------------------------------------
def bottleneck_attention_forward(x, w1, b1, w2, b2):
    """Bottleneck_Attention forward (shortcut=True, g=1, k=(3,3), e=0.5).

    x  : (B, H, W, C1) float32, NHWC
    w1 : (3, 3, C1, C_) HWIO with BN folded;  b1: (C_,)
    w2 : (3, 3, C_, C2) HWIO with BN folded;  b2: (C2,)
    """
    B, H, W, C1 = x.shape
    Cm = w1.shape[3]
    C2 = w2.shape[3]
    assert w1.shape == (3, 3, C1, Cm) and w2.shape == (3, 3, Cm, C2)
    assert C1 == C2, "shortcut path requires c1 == c2"

    Wp = W + 2
    NPAD = (H + 3) * Wp   # padded slab rows (+1 extra zero row for tap windows)

    w1r = w1.reshape(9, C1, Cm).astype(jnp.bfloat16)
    w2r = w2.reshape(9, Cm, C2).astype(jnp.bfloat16)
    b1r = b1.reshape(1, Cm).astype(jnp.float32)
    b2r = b2.reshape(1, C2).astype(jnp.float32)

    kernel = _make_fused_kernel(H, W, Cm, C2)

    return pl.pallas_call(
        kernel,
        out_shape=jax.ShapeDtypeStruct((B, H, W, C2), jnp.float32),
        grid_spec=pltpu.PrefetchScalarGridSpec(
            num_scalar_prefetch=0,
            grid=(B,),
            in_specs=[
                pl.BlockSpec((1, H, W, C1), lambda i: (i, 0, 0, 0)),
                pl.BlockSpec((9, C1, Cm), lambda i: (0, 0, 0)),
                pl.BlockSpec((1, Cm), lambda i: (0, 0)),
                pl.BlockSpec((9, Cm, C2), lambda i: (0, 0, 0)),
                pl.BlockSpec((1, C2), lambda i: (0, 0)),
            ],
            out_specs=pl.BlockSpec((1, H, W, C2), lambda i: (i, 0, 0, 0)),
            scratch_shapes=[
                pltpu.VMEM((NPAD, C1), jnp.float32),   # padded x slab
                pltpu.VMEM((NPAD, Cm), jnp.float32),   # padded cv1 activation
            ],
        ),
        compiler_params=pltpu.CompilerParams(
            dimension_semantics=("parallel",)),
    )(x, w1r, b1r, w2r, b2r)


# ----------------------------------------------------------------------------
# Pure-JAX reference mirroring the PyTorch forward (for validation)
# ----------------------------------------------------------------------------
def _conv3x3_silu_ref(x, w, b):
    B, H, W, Cin = x.shape
    xp = jnp.pad(x, ((0, 0), (1, 1), (1, 1), (0, 0)))
    acc = jnp.zeros((B, H, W, w.shape[3]), jnp.float32)
    for dy in range(3):
        for dx in range(3):
            acc = acc + jnp.einsum("bhwc,cd->bhwd",
                                   xp[:, dy:dy + H, dx:dx + W, :], w[dy, dx],
                                   precision=jax.lax.Precision.HIGHEST)
    acc = acc + b[None, None, None, :]
    return acc * jax.nn.sigmoid(acc)


def bottleneck_attention_reference(x, w1, b1, w2, b2):
    z = _conv3x3_silu_ref(_conv3x3_silu_ref(x, w1, b1), w2, b2)
    B, H, W, C = z.shape
    n = H * W - 1
    mu = jnp.mean(z, axis=(1, 2), keepdims=True)
    d = (z - mu) ** 2
    s = jnp.sum(d, axis=(1, 2), keepdims=True)
    y = d / (4.0 * (s / n + E_LAMBDA)) + 0.5
    return x + z * jax.nn.sigmoid(y)


if __name__ == "__main__":
    key = jax.random.PRNGKey(0)
    B, H, W = 2, 16, 16
    C1 = C2 = 64
    CM = int(C2 * 0.5)                      # e = 0.5 -> hidden channels

    ks = jax.random.split(key, 11)
    x = jax.random.normal(ks[0], (B, H, W, C1), dtype=jnp.float32)

    def make_folded_conv_bn(kw, kg, kb, km, kv, cin, cout):
        # Conv2d(bias=False) weight + BatchNorm2d params, folded for inference.
        w = jax.random.normal(kw, (3, 3, cin, cout), jnp.float32) / jnp.sqrt(9.0 * cin)
        gamma = 1.0 + 0.1 * jax.random.normal(kg, (cout,), jnp.float32)
        beta = 0.1 * jax.random.normal(kb, (cout,), jnp.float32)
        mean = 0.1 * jax.random.normal(km, (cout,), jnp.float32)
        var = 0.5 + jax.random.uniform(kv, (cout,), jnp.float32)
        eps = 1e-3                           # ultralytics Conv BN eps
        scale = gamma / jnp.sqrt(var + eps)
        return w * scale[None, None, None, :], beta - mean * scale

    w1, b1 = make_folded_conv_bn(ks[1], ks[2], ks[3], ks[4], ks[5], C1, CM)
    w2, b2 = make_folded_conv_bn(ks[6], ks[7], ks[8], ks[9], ks[10], CM, C2)

    out = bottleneck_attention_forward(x, w1, b1, w2, b2)
    out = jax.block_until_ready(out)

    ref = bottleneck_attention_reference(x, w1, b1, w2, b2)
    assert out.shape == (B, H, W, C2)
    max_err = float(jnp.max(jnp.abs(out - ref)))
    # Tolerance covers bf16 MXU operands + approx reciprocal vs HIGHEST-precision
    # f32 XLA reference (per review, traded for ~3-4x MXU throughput).
    assert jnp.allclose(out, ref, atol=8e-2, rtol=5e-2), max_err

    print("KERNEL_OK")
</pallas_src>

<mosaic_0001>
module attributes {stable_mosaic.version = 11 : i64} {
  func.func @kernel(%arg0: i32, %arg1: memref<1x16x16x64xf32, #tpu.memory_space<vmem>>, %arg2: memref<9x64x32xbf16, #tpu.memory_space<vmem>>, %arg3: memref<1x32xf32, #tpu.memory_space<vmem>>, %arg4: memref<9x32x64xbf16, #tpu.memory_space<vmem>>, %arg5: memref<1x64xf32, #tpu.memory_space<vmem>>, %arg6: memref<1x16x16x64xf32, #tpu.memory_space<vmem>>, %arg7: memref<342x64xf32, #tpu.memory_space<vmem>>, %arg8: memref<342x32xf32, #tpu.memory_space<vmem>>) attributes {dimension_semantics = [#tpu.dimension_semantics<parallel>], iteration_bounds = array<i64: 2>, scalar_prefetch = 0 : i64, scratch_operands = 2 : i64, tpu.core_type = #tpu.core_type<tc>, window_params = [{transform_indices = @transform_0, window_bounds = array<i64: 1, 16, 16, 64>}, {pipeline_mode = #tpu.pipeline_mode<synchronous>, transform_indices = @transform_1, window_bounds = array<i64: 9, 64, 32>}, {pipeline_mode = #tpu.pipeline_mode<synchronous>, transform_indices = @transform_2, window_bounds = array<i64: 1, 32>}, {pipeline_mode = #tpu.pipeline_mode<synchronous>, transform_indices = @transform_3, window_bounds = array<i64: 9, 32, 64>}, {pipeline_mode = #tpu.pipeline_mode<synchronous>, transform_indices = @transform_4, window_bounds = array<i64: 1, 64>}, {transform_indices = @transform_5, window_bounds = array<i64: 1, 16, 16, 64>}]} {
    %cst = arith.constant 0.000000e+00 : f32
    %0 = vector.broadcast %cst : f32 to vector<342x64xf32>
    %c0 = arith.constant 0 : index
    %c0_0 = arith.constant 0 : index
    %1 = vector.load %arg7[%c0, %c0_0] : memref<342x64xf32, #tpu.memory_space<vmem>>, vector<342x64xf32>
    tpu.vector_store %arg7[%c0, %c0_0], %0 {strides = array<i32>} : memref<342x64xf32, #tpu.memory_space<vmem>>, vector<342x64xf32>,
    %c0_1 = arith.constant 0 : index
    %c0_2 = arith.constant 0 : index
    %c0_3 = arith.constant 0 : index
    %c0_4 = arith.constant 0 : index
    %2 = vector.load %arg1[%c0_1, %c0_2, %c0_3, %c0_4] : memref<1x16x16x64xf32, #tpu.memory_space<vmem>>, vector<1x1x16x64xf32>
    %3 = vector.shape_cast %2 : vector<1x1x16x64xf32> to vector<16x64xf32>
    %c19 = arith.constant 19 : index
    %c0_5 = arith.constant 0 : index
    %4 = vector.load %arg7[%c19, %c0_5] : memref<342x64xf32, #tpu.memory_space<vmem>>, vector<16x64xf32>
    tpu.vector_store %arg7[%c19, %c0_5], %3 {strides = array<i32>} : memref<342x64xf32, #tpu.memory_space<vmem>>, vector<16x64xf32>,
    %c0_6 = arith.constant 0 : index
    %c1 = arith.constant 1 : index
    %c0_7 = arith.constant 0 : index
    %c0_8 = arith.constant 0 : index
    %5 = vector.load %arg1[%c0_6, %c1, %c0_7, %c0_8] : memref<1x16x16x64xf32, #tpu.memory_space<vmem>>, vector<1x1x16x64xf32>
    %6 = vector.shape_cast %5 : vector<1x1x16x64xf32> to vector<16x64xf32>
    %c37 = arith.constant 37 : index
    %c0_9 = arith.constant 0 : index
    %7 = vector.load %arg7[%c37, %c0_9] : memref<342x64xf32, #tpu.memory_space<vmem>>, vector<16x64xf32>
    tpu.vector_store %arg7[%c37, %c0_9], %6 {strides = array<i32>} : memref<342x64xf32, #tpu.memory_space<vmem>>, vector<16x64xf32>,
    %c0_10 = arith.constant 0 : index
    %c2 = arith.constant 2 : index
    %c0_11 = arith.constant 0 : index
    %c0_12 = arith.constant 0 : index
    %8 = vector.load %arg1[%c0_10, %c2, %c0_11, %c0_12] : memref<1x16x16x64xf32, #tpu.memory_space<vmem>>, vector<1x1x16x64xf32>
    %9 = vector.shape_cast %8 : vector<1x1x16x64xf32> to vector<16x64xf32>
    %c55 = arith.constant 55 : index
    %c0_13 = arith.constant 0 : index
    %10 = vector.load %arg7[%c55, %c0_13] : memref<342x64xf32, #tpu.memory_space<vmem>>, vector<16x64xf32>
    tpu.vector_store %arg7[%c55, %c0_13], %9 {strides = array<i32>} : memref<342x64xf32, #tpu.memory_space<vmem>>, vector<16x64xf32>,
    %c0_14 = arith.constant 0 : index
    %c3 = arith.constant 3 : index
    %c0_15 = arith.constant 0 : index
    %c0_16 = arith.constant 0 : index
    %11 = vector.load %arg1[%c0_14, %c3, %c0_15, %c0_16] : memref<1x16x16x64xf32, #tpu.memory_space<vmem>>, vector<1x1x16x64xf32>
    %12 = vector.shape_cast %11 : vector<1x1x16x64xf32> to vector<16x64xf32>
    %c73 = arith.constant 73 : index
    %c0_17 = arith.constant 0 : index
    %13 = vector.load %arg7[%c73, %c0_17] : memref<342x64xf32, #tpu.memory_space<vmem>>, vector<16x64xf32>
    tpu.vector_store %arg7[%c73, %c0_17], %12 {strides = array<i32>} : memref<342x64xf32, #tpu.memory_space<vmem>>, vector<16x64xf32>,
    %c0_18 = arith.constant 0 : index
    %c4 = arith.constant 4 : index
    %c0_19 = arith.constant 0 : index
    %c0_20 = arith.constant 0 : index
    %14 = vector.load %arg1[%c0_18, %c4, %c0_19, %c0_20] : memref<1x16x16x64xf32, #tpu.memory_space<vmem>>, vector<1x1x16x64xf32>
    %15 = vector.shape_cast %14 : vector<1x1x16x64xf32> to vector<16x64xf32>
    %c91 = arith.constant 91 : index
    %c0_21 = arith.constant 0 : index
    %16 = vector.load %arg7[%c91, %c0_21] : memref<342x64xf32, #tpu.memory_space<vmem>>, vector<16x64xf32>
    tpu.vector_store %arg7[%c91, %c0_21], %15 {strides = array<i32>} : memref<342x64xf32, #tpu.memory_space<vmem>>, vector<16x64xf32>,
    %c0_22 = arith.constant 0 : index
    %c5 = arith.constant 5 : index
    %c0_23 = arith.constant 0 : index
    %c0_24 = arith.constant 0 : index
    %17 = vector.load %arg1[%c0_22, %c5, %c0_23, %c0_24] : memref<1x16x16x64xf32, #tpu.memory_space<vmem>>, vector<1x1x16x64xf32>
    %18 = vector.shape_cast %17 : vector<1x1x16x64xf32> to vector<16x64xf32>
    %c109 = arith.constant 109 : index
    %c0_25 = arith.constant 0 : index
    %19 = vector.load %arg7[%c109, %c0_25] : memref<342x64xf32, #tpu.memory_space<vmem>>, vector<16x64xf32>
    tpu.vector_store %arg7[%c109, %c0_25], %18 {strides = array<i32>} : memref<342x64xf32, #tpu.memory_space<vmem>>, vector<16x64xf32>,
    %c0_26 = arith.constant 0 : index
    %c6 = arith.constant 6 : index
    %c0_27 = arith.constant 0 : index
    %c0_28 = arith.constant 0 : index
    %20 = vector.load %arg1[%c0_26, %c6, %c0_27, %c0_28] : memref<1x16x16x64xf32, #tpu.memory_space<vmem>>, vector<1x1x16x64xf32>
    %21 = vector.shape_cast %20 : vector<1x1x16x64xf32> to vector<16x64xf32>
    %c127 = arith.constant 127 : index
    %c0_29 = arith.constant 0 : index
    %22 = vector.load %arg7[%c127, %c0_29] : memref<342x64xf32, #tpu.memory_space<vmem>>, vector<16x64xf32>
    tpu.vector_store %arg7[%c127, %c0_29], %21 {strides = array<i32>} : memref<342x64xf32, #tpu.memory_space<vmem>>, vector<16x64xf32>,
    %c0_30 = arith.constant 0 : index
    %c7 = arith.constant 7 : index
    %c0_31 = arith.constant 0 : index
    %c0_32 = arith.constant 0 : index
    %23 = vector.load %arg1[%c0_30, %c7, %c0_31, %c0_32] : memref<1x16x16x64xf32, #tpu.memory_space<vmem>>, vector<1x1x16x64xf32>
    %24 = vector.shape_cast %23 : vector<1x1x16x64xf32> to vector<16x64xf32>
    %c145 = arith.constant 145 : index
    %c0_33 = arith.constant 0 : index
    %25 = vector.load %arg7[%c145, %c0_33] : memref<342x64xf32, #tpu.memory_space<vmem>>, vector<16x64xf32>
    tpu.vector_store %arg7[%c145, %c0_33], %24 {strides = array<i32>} : memref<342x64xf32, #tpu.memory_space<vmem>>, vector<16x64xf32>,
    %c0_34 = arith.constant 0 : index
    %c8 = arith.constant 8 : index
    %c0_35 = arith.constant 0 : index
    %c0_36 = arith.constant 0 : index
    %26 = vector.load %arg1[%c0_34, %c8, %c0_35, %c0_36] : memref<1x16x16x64xf32, #tpu.memory_space<vmem>>, vector<1x1x16x64xf32>
    %27 = vector.shape_cast %26 : vector<1x1x16x64xf32> to vector<16x64xf32>
    %c163 = arith.constant 163 : index
    %c0_37 = arith.constant 0 : index
    %28 = vector.load %arg7[%c163, %c0_37] : memref<342x64xf32, #tpu.memory_space<vmem>>, vector<16x64xf32>
    tpu.vector_store %arg7[%c163, %c0_37], %27 {strides = array<i32>} : memref<342x64xf32, #tpu.memory_space<vmem>>, vector<16x64xf32>,
    %c0_38 = arith.constant 0 : index
    %c9 = arith.constant 9 : index
    %c0_39 = arith.constant 0 : index
    %c0_40 = arith.constant 0 : index
    %29 = vector.load %arg1[%c0_38, %c9, %c0_39, %c0_40] : memref<1x16x16x64xf32, #tpu.memory_space<vmem>>, vector<1x1x16x64xf32>
    %30 = vector.shape_cast %29 : vector<1x1x16x64xf32> to vector<16x64xf32>
    %c181 = arith.constant 181 : index
    %c0_41 = arith.constant 0 : index
    %31 = vector.load %arg7[%c181, %c0_41] : memref<342x64xf32, #tpu.memory_space<vmem>>, vector<16x64xf32>
    tpu.vector_store %arg7[%c181, %c0_41], %30 {strides = array<i32>} : memref<342x64xf32, #tpu.memory_space<vmem>>, vector<16x64xf32>,
    %c0_42 = arith.constant 0 : index
    %c10 = arith.constant 10 : index
    %c0_43 = arith.constant 0 : index
    %c0_44 = arith.constant 0 : index
    %32 = vector.load %arg1[%c0_42, %c10, %c0_43, %c0_44] : memref<1x16x16x64xf32, #tpu.memory_space<vmem>>, vector<1x1x16x64xf32>
    %33 = vector.shape_cast %32 : vector<1x1x16x64xf32> to vector<16x64xf32>
    %c199 = arith.constant 199 : index
    %c0_45 = arith.constant 0 : index
    %34 = vector.load %arg7[%c199, %c0_45] : memref<342x64xf32, #tpu.memory_space<vmem>>, vector<16x64xf32>
    tpu.vector_store %arg7[%c199, %c0_45], %33 {strides = array<i32>} : memref<342x64xf32, #tpu.memory_space<vmem>>, vector<16x64xf32>,
    %c0_46 = arith.constant 0 : index
    %c11 = arith.constant 11 : index
    %c0_47 = arith.constant 0 : index
    %c0_48 = arith.constant 0 : index
    %35 = vector.load %arg1[%c0_46, %c11, %c0_47, %c0_48] : memref<1x16x16x64xf32, #tpu.memory_space<vmem>>, vector<1x1x16x64xf32>
    %36 = vector.shape_cast %35 : vector<1x1x16x64xf32> to vector<16x64xf32>
    %c217 = arith.constant 217 : index
    %c0_49 = arith.constant 0 : index
    %37 = vector.load %arg7[%c217, %c0_49] : memref<342x64xf32, #tpu.memory_space<vmem>>, vector<16x64xf32>
    tpu.vector_store %arg7[%c217, %c0_49], %36 {strides = array<i32>} : memref<342x64xf32, #tpu.memory_space<vmem>>, vector<16x64xf32>,
    %c0_50 = arith.constant 0 : index
    %c12 = arith.constant 12 : index
    %c0_51 = arith.constant 0 : index
    %c0_52 = arith.constant 0 : index
    %38 = vector.load %arg1[%c0_50, %c12, %c0_51, %c0_52] : memref<1x16x16x64xf32, #tpu.memory_space<vmem>>, vector<1x1x16x64xf32>
    %39 = vector.shape_cast %38 : vector<1x1x16x64xf32> to vector<16x64xf32>
    %c235 = arith.constant 235 : index
    %c0_53 = arith.constant 0 : index
    %40 = vector.load %arg7[%c235, %c0_53] : memref<342x64xf32, #tpu.memory_space<vmem>>, vector<16x64xf32>
    tpu.vector_store %arg7[%c235, %c0_53], %39 {strides = array<i32>} : memref<342x64xf32, #tpu.memory_space<vmem>>, vector<16x64xf32>,
    %c0_54 = arith.constant 0 : index
    %c13 = arith.constant 13 : index
    %c0_55 = arith.constant 0 : index
    %c0_56 = arith.constant 0 : index
    %41 = vector.load %arg1[%c0_54, %c13, %c0_55, %c0_56] : memref<1x16x16x64xf32, #tpu.memory_space<vmem>>, vector<1x1x16x64xf32>
    %42 = vector.shape_cast %41 : vector<1x1x16x64xf32> to vector<16x64xf32>
    %c253 = arith.constant 253 : index
    %c0_57 = arith.constant 0 : index
    %43 = vector.load %arg7[%c253, %c0_57] : memref<342x64xf32, #tpu.memory_space<vmem>>, vector<16x64xf32>
    tpu.vector_store %arg7[%c253, %c0_57], %42 {strides = array<i32>} : memref<342x64xf32, #tpu.memory_space<vmem>>, vector<16x64xf32>,
    %c0_58 = arith.constant 0 : index
    %c14 = arith.constant 14 : index
    %c0_59 = arith.constant 0 : index
    %c0_60 = arith.constant 0 : index
    %44 = vector.load %arg1[%c0_58, %c14, %c0_59, %c0_60] : memref<1x16x16x64xf32, #tpu.memory_space<vmem>>, vector<1x1x16x64xf32>
    %45 = vector.shape_cast %44 : vector<1x1x16x64xf32> to vector<16x64xf32>
    %c271 = arith.constant 271 : index
    %c0_61 = arith.constant 0 : index
    %46 = vector.load %arg7[%c271, %c0_61] : memref<342x64xf32, #tpu.memory_space<vmem>>, vector<16x64xf32>
    tpu.vector_store %arg7[%c271, %c0_61], %45 {strides = array<i32>} : memref<342x64xf32, #tpu.memory_space<vmem>>, vector<16x64xf32>,
    %c0_62 = arith.constant 0 : index
    %c15 = arith.constant 15 : index
    %c0_63 = arith.constant 0 : index
    %c0_64 = arith.constant 0 : index
    %47 = vector.load %arg1[%c0_62, %c15, %c0_63, %c0_64] : memref<1x16x16x64xf32, #tpu.memory_space<vmem>>, vector<1x1x16x64xf32>
    %48 = vector.shape_cast %47 : vector<1x1x16x64xf32> to vector<16x64xf32>
    %c289 = arith.constant 289 : index
    %c0_65 = arith.constant 0 : index
    %49 = vector.load %arg7[%c289, %c0_65] : memref<342x64xf32, #tpu.memory_space<vmem>>, vector<16x64xf32>
    tpu.vector_store %arg7[%c289, %c0_65], %48 {strides = array<i32>} : memref<342x64xf32, #tpu.memory_space<vmem>>, vector<16x64xf32>,
    %50 = tpu.iota {dimensions = array<i32: 0>} : vector<288x1xi32>
    %c18_i32 = arith.constant 18 : i32
    %c0_i32 = arith.constant 0 : i32
    %51 = arith.cmpi eq, %c18_i32, %c0_i32 : i32
    %c1_i32 = arith.constant 1 : i32
    %52 = arith.select %51, %c1_i32, %c18_i32 : i32
    %53 = vector.broadcast %52 : i32 to vector<288x1xi32>
    %54 = arith.remsi %50, %53 : vector<288x1xi32>
    %c0_i32_66 = arith.constant 0 : i32
    %55 = vector.broadcast %c0_i32_66 : i32 to vector<288x1xi32>
    %56 = arith.cmpi ne, %54, %55 : vector<288x1xi32>
    %c0_i32_67 = arith.constant 0 : i32
    %57 = vector.broadcast %c0_i32_67 : i32 to vector<288x1xi32>
    %58 = arith.cmpi slt, %54, %57 : vector<288x1xi32>
    %c0_i32_68 = arith.constant 0 : i32
    %59 = arith.cmpi slt, %52, %c0_i32_68 : i32
    %60 = vector.broadcast %59 : i1 to vector<288x1xi1>
    %61 = vector.broadcast %60 : vector<288x1xi1> to vector<288x1xi1>
    %62 = arith.xori %58, %61 : vector<288x1xi1>
    %63 = arith.andi %62, %56 : vector<288x1xi1>
    %64 = vector.broadcast %52 : i32 to vector<288x1xi32>
    %65 = arith.addi %54, %64 : vector<288x1xi32>
    %66 = arith.select %63, %65, %54 : vector<288x1xi1>, vector<288x1xi32>
    %c16_i32 = arith.constant 16 : i32
    %67 = vector.broadcast %c16_i32 : i32 to vector<288x1xi32>
    %68 = arith.cmpi slt, %66, %67 : vector<288x1xi32>
    %c0_69 = arith.constant 0 : index
    %c0_70 = arith.constant 0 : index
    %69 = vector.load %arg3[%c0_69, %c0_70] : memref<1x32xf32, #tpu.memory_space<vmem>>, vector<1x32xf32>
    %70 = vector.shape_cast %69 : vector<1x32xf32> to vector<1x32xf32>
    %71 = vector.broadcast %70 : vector<1x32xf32> to vector<288x32xf32>
    %c0_71 = arith.constant 0 : index
    %c0_72 = arith.constant 0 : index
    %72 = vector.load %arg7[%c0_71, %c0_72] : memref<342x64xf32, #tpu.memory_space<vmem>>, vector<288x64xf32>
    %73 = arith.truncf %72 : vector<288x64xf32> to vector<288x64xbf16>
    %c0_73 = arith.constant 0 : index
    %c0_74 = arith.constant 0 : index
    %c0_75 = arith.constant 0 : index
    %74 = vector.load %arg2[%c0_73, %c0_74, %c0_75] : memref<9x64x32xbf16, #tpu.memory_space<vmem>>, vector<1x64x32xbf16>
    %75 = vector.shape_cast %74 : vector<1x64x32xbf16> to vector<64x32xbf16>
    %cst_76 = arith.constant dense<0.000000e+00> : vector<288x32xf32>
    %76 = tpu.matmul %73, %75, %cst_76 {dimension_numbers = #tpu.dot_dimension_numbers<[1], [0], [0], [1], [0, 0, 1, 1], [], []>} : vector<288x64xbf16>, vector<64x32xbf16>, vector<288x32xf32> -> vector<288x32xf32>
    %77 = arith.addf %71, %76 : vector<288x32xf32>
    %c1_77 = arith.constant 1 : index
    %c0_78 = arith.constant 0 : index
    %78 = vector.load %arg7[%c1_77, %c0_78] : memref<342x64xf32, #tpu.memory_space<vmem>>, vector<288x64xf32>
    %79 = arith.truncf %78 : vector<288x64xf32> to vector<288x64xbf16>
    %c1_79 = arith.constant 1 : index
    %c0_80 = arith.constant 0 : index
    %c0_81 = arith.constant 0 : index
    %80 = vector.load %arg2[%c1_79, %c0_80, %c0_81] : memref<9x64x32xbf16, #tpu.memory_space<vmem>>, vector<1x64x32xbf16>
    %81 = vector.shape_cast %80 : vector<1x64x32xbf16> to vector<64x32xbf16>
    %cst_82 = arith.constant dense<0.000000e+00> : vector<288x32xf32>
    %82 = tpu.matmul %79, %81, %cst_82 {dimension_numbers = #tpu.dot_dimension_numbers<[1], [0], [0], [1], [0, 0, 1, 1], [], []>} : vector<288x64xbf16>, vector<64x32xbf16>, vector<288x32xf32> -> vector<288x32xf32>
    %83 = arith.addf %77, %82 : vector<288x32xf32>
    %c2_83 = arith.constant 2 : index
    %c0_84 = arith.constant 0 : index
    %84 = vector.load %arg7[%c2_83, %c0_84] : memref<342x64xf32, #tpu.memory_space<vmem>>, vector<288x64xf32>
    %85 = arith.truncf %84 : vector<288x64xf32> to vector<288x64xbf16>
    %c2_85 = arith.constant 2 : index
    %c0_86 = arith.constant 0 : index
    %c0_87 = arith.constant 0 : index
    %86 = vector.load %arg2[%c2_85, %c0_86, %c0_87] : memref<9x64x32xbf16, #tpu.memory_space<vmem>>, vector<1x64x32xbf16>
    %87 = vector.shape_cast %86 : vector<1x64x32xbf16> to vector<64x32xbf16>
    %cst_88 = arith.constant dense<0.000000e+00> : vector<288x32xf32>
    %88 = tpu.matmul %85, %87, %cst_88 {dimension_numbers = #tpu.dot_dimension_numbers<[1], [0], [0], [1], [0, 0, 1, 1], [], []>} : vector<288x64xbf16>, vector<64x32xbf16>, vector<288x32xf32> -> vector<288x32xf32>
    %89 = arith.addf %83, %88 : vector<288x32xf32>
    %c18 = arith.constant 18 : index
    %c0_89 = arith.constant 0 : index
    %90 = vector.load %arg7[%c18, %c0_89] : memref<342x64xf32, #tpu.memory_space<vmem>>, vector<288x64xf32>
    %91 = arith.truncf %90 : vector<288x64xf32> to vector<288x64xbf16>
    %c3_90 = arith.constant 3 : index
    %c0_91 = arith.constant 0 : index
    %c0_92 = arith.constant 0 : index
    %92 = vector.load %arg2[%c3_90, %c0_91, %c0_92] : memref<9x64x32xbf16, #tpu.memory_space<vmem>>, vector<1x64x32xbf16>
    %93 = vector.shape_cast %92 : vector<1x64x32xbf16> to vector<64x32xbf16>
    %cst_93 = arith.constant dense<0.000000e+00> : vector<288x32xf32>
    %94 = tpu.matmul %91, %93, %cst_93 {dimension_numbers = #tpu.dot_dimension_numbers<[1], [0], [0], [1], [0, 0, 1, 1], [], []>} : vector<288x64xbf16>, vector<64x32xbf16>, vector<288x32xf32> -> vector<288x32xf32>
    %95 = arith.addf %89, %94 : vector<288x32xf32>
    %c19_94 = arith.constant 19 : index
    %c0_95 = arith.constant 0 : index
    %96 = vector.load %arg7[%c19_94, %c0_95] : memref<342x64xf32, #tpu.memory_space<vmem>>, vector<288x64xf32>
    %97 = arith.truncf %96 : vector<288x64xf32> to vector<288x64xbf16>
    %c4_96 = arith.constant 4 : index
    %c0_97 = arith.constant 0 : index
    %c0_98 = arith.constant 0 : index
    %98 = vector.load %arg2[%c4_96, %c0_97, %c0_98] : memref<9x64x32xbf16, #tpu.memory_space<vmem>>, vector<1x64x32xbf16>
    %99 = vector.shape_cast %98 : vector<1x64x32xbf16> to vector<64x32xbf16>
    %cst_99 = arith.constant dense<0.000000e+00> : vector<288x32xf32>
    %100 = tpu.matmul %97, %99, %cst_99 {dimension_numbers = #tpu.dot_dimension_numbers<[1], [0], [0], [1], [0, 0, 1, 1], [], []>} : vector<288x64xbf16>, vector<64x32xbf16>, vector<288x32xf32> -> vector<288x32xf32>
    %101 = arith.addf %95, %100 : vector<288x32xf32>
    %c20 = arith.constant 20 : index
    %c0_100 = arith.constant 0 : index
    %102 = vector.load %arg7[%c20, %c0_100] : memref<342x64xf32, #tpu.memory_space<vmem>>, vector<288x64xf32>
    %103 = arith.truncf %102 : vector<288x64xf32> to vector<288x64xbf16>
    %c5_101 = arith.constant 5 : index
    %c0_102 = arith.constant 0 : index
    %c0_103 = arith.constant 0 : index
    %104 = vector.load %arg2[%c5_101, %c0_102, %c0_103] : memref<9x64x32xbf16, #tpu.memory_space<vmem>>, vector<1x64x32xbf16>
    %105 = vector.shape_cast %104 : vector<1x64x32xbf16> to vector<64x32xbf16>
    %cst_104 = arith.constant dense<0.000000e+00> : vector<288x32xf32>
    %106 = tpu.matmul %103, %105, %cst_104 {dimension_numbers = #tpu.dot_dimension_numbers<[1], [0], [0], [1], [0, 0, 1, 1], [], []>} : vector<288x64xbf16>, vector<64x32xbf16>, vector<288x32xf32> -> vector<288x32xf32>
    %107 = arith.addf %101, %106 : vector<288x32xf32>
    %c36 = arith.constant 36 : index
    %c0_105 = arith.constant 0 : index
    %108 = vector.load %arg7[%c36, %c0_105] : memref<342x64xf32, #tpu.memory_space<vmem>>, vector<288x64xf32>
    %109 = arith.truncf %108 : vector<288x64xf32> to vector<288x64xbf16>
    %c6_106 = arith.constant 6 : index
    %c0_107 = arith.constant 0 : index
    %c0_108 = arith.constant 0 : index
    %110 = vector.load %arg2[%c6_106, %c0_107, %c0_108] : memref<9x64x32xbf16, #tpu.memory_space<vmem>>, vector<1x64x32xbf16>
    %111 = vector.shape_cast %110 : vector<1x64x32xbf16> to vector<64x32xbf16>
    %cst_109 = arith.constant dense<0.000000e+00> : vector<288x32xf32>
    %112 = tpu.matmul %109, %111, %cst_109 {dimension_numbers = #tpu.dot_dimension_numbers<[1], [0], [0], [1], [0, 0, 1, 1], [], []>} : vector<288x64xbf16>, vector<64x32xbf16>, vector<288x32xf32> -> vector<288x32xf32>
    %113 = arith.addf %107, %112 : vector<288x32xf32>
    %c37_110 = arith.constant 37 : index
    %c0_111 = arith.constant 0 : index
    %114 = vector.load %arg7[%c37_110, %c0_111] : memref<342x64xf32, #tpu.memory_space<vmem>>, vector<288x64xf32>
    %115 = arith.truncf %114 : vector<288x64xf32> to vector<288x64xbf16>
    %c7_112 = arith.constant 7 : index
    %c0_113 = arith.constant 0 : index
    %c0_114 = arith.constant 0 : index
    %116 = vector.load %arg2[%c7_112, %c0_113, %c0_114] : memref<9x64x32xbf16, #tpu.memory_space<vmem>>, vector<1x64x32xbf16>
    %117 = vector.shape_cast %116 : vector<1x64x32xbf16> to vector<64x32xbf16>
    %cst_115 = arith.constant dense<0.000000e+00> : vector<288x32xf32>
    %118 = tpu.matmul %115, %117, %cst_115 {dimension_numbers = #tpu.dot_dimension_numbers<[1], [0], [0], [1], [0, 0, 1, 1], [], []>} : vector<288x64xbf16>, vector<64x32xbf16>, vector<288x32xf32> -> vector<288x32xf32>
    %119 = arith.addf %113, %118 : vector<288x32xf32>
    %c38 = arith.constant 38 : index
    %c0_116 = arith.constant 0 : index
    %120 = vector.load %arg7[%c38, %c0_116] : memref<342x64xf32, #tpu.memory_space<vmem>>, vector<288x64xf32>
    %121 = arith.truncf %120 : vector<288x64xf32> to vector<288x64xbf16>
    %c8_117 = arith.constant 8 : index
    %c0_118 = arith.constant 0 : index
    %c0_119 = arith.constant 0 : index
    %122 = vector.load %arg2[%c8_117, %c0_118, %c0_119] : memref<9x64x32xbf16, #tpu.memory_space<vmem>>, vector<1x64x32xbf16>
    %123 = vector.shape_cast %122 : vector<1x64x32xbf16> to vector<64x32xbf16>
    %cst_120 = arith.constant dense<0.000000e+00> : vector<288x32xf32>
    %124 = tpu.matmul %121, %123, %cst_120 {dimension_numbers = #tpu.dot_dimension_numbers<[1], [0], [0], [1], [0, 0, 1, 1], [], []>} : vector<288x64xbf16>, vector<64x32xbf16>, vector<288x32xf32> -> vector<288x32xf32>
    %125 = arith.addf %119, %124 : vector<288x32xf32>
    %126 = arith.negf %125 : vector<288x32xf32>
    %127 = math.exp %126 : vector<288x32xf32>
    %cst_121 = arith.constant 1.000000e+00 : f32
    %128 = vector.broadcast %cst_121 : f32 to vector<288x32xf32>
    %129 = arith.addf %128, %127 : vector<288x32xf32>
    %130 = arith.divf %128, %129 : vector<288x32xf32>
    %131 = arith.mulf %125, %130 : vector<288x32xf32>
    %cst_122 = arith.constant 0.000000e+00 : f32
    %132 = vector.shape_cast %68 : vector<288x1xi1> to vector<288x1xi1>
    %133 = vector.broadcast %132 : vector<288x1xi1> to vector<288x32xi1>
    %134 = vector.broadcast %cst_122 : f32 to vector<288x32xf32>
    %135 = arith.select %133, %131, %134 : vector<288x32xi1>, vector<288x32xf32>
    %cst_123 = arith.constant 0.000000e+00 : f32
    %136 = vector.broadcast %cst_123 : f32 to vector<342x32xf32>
    %c0_124 = arith.constant 0 : index
    %c0_125 = arith.constant 0 : index
    %137 = vector.load %arg8[%c0_124, %c0_125] : memref<342x32xf32, #tpu.memory_space<vmem>>, vector<342x32xf32>
    tpu.vector_store %arg8[%c0_124, %c0_125], %136 {strides = array<i32>} : memref<342x32xf32, #tpu.memory_space<vmem>>, vector<342x32xf32>,
    %c19_126 = arith.constant 19 : index
    %c0_127 = arith.constant 0 : index
    %138 = vector.load %arg8[%c19_126, %c0_127] : memref<342x32xf32, #tpu.memory_space<vmem>>, vector<288x32xf32>
    tpu.vector_store %arg8[%c19_126, %c0_127], %135 {strides = array<i32>} : memref<342x32xf32, #tpu.memory_space<vmem>>, vector<288x32xf32>,
    %c0_128 = arith.constant 0 : index
    %c0_129 = arith.constant 0 : index
    %139 = vector.load %arg5[%c0_128, %c0_129] : memref<1x64xf32, #tpu.memory_space<vmem>>, vector<1x64xf32>
    %140 = vector.shape_cast %139 : vector<1x64xf32> to vector<1x64xf32>
    %141 = vector.broadcast %140 : vector<1x64xf32> to vector<288x64xf32>
    %c0_130 = arith.constant 0 : index
    %c0_131 = arith.constant 0 : index
    %142 = vector.load %arg8[%c0_130, %c0_131] : memref<342x32xf32, #tpu.memory_space<vmem>>, vector<288x32xf32>
    %143 = arith.truncf %142 : vector<288x32xf32> to vector<288x32xbf16>
    %c0_132 = arith.constant 0 : index
    %c0_133 = arith.constant 0 : index
    %c0_134 = arith.constant 0 : index
    %144 = vector.load %arg4[%c0_132, %c0_133, %c0_134] : memref<9x32x64xbf16, #tpu.memory_space<vmem>>, vector<1x32x64xbf16>
    %145 = vector.shape_cast %144 : vector<1x32x64xbf16> to vector<32x64xbf16>
    %cst_135 = arith.constant dense<0.000000e+00> : vector<288x64xf32>
    %146 = tpu.matmul %143, %145, %cst_135 {dimension_numbers = #tpu.dot_dimension_numbers<[1], [0], [0], [1], [0, 0, 1, 1], [], []>} : vector<288x32xbf16>, vector<32x64xbf16>, vector<288x64xf32> -> vector<288x64xf32>
    %147 = arith.addf %141, %146 : vector<288x64xf32>
    %c1_136 = arith.constant 1 : index
    %c0_137 = arith.constant 0 : index
    %148 = vector.load %arg8[%c1_136, %c0_137] : memref<342x32xf32, #tpu.memory_space<vmem>>, vector<288x32xf32>
    %149 = arith.truncf %148 : vector<288x32xf32> to vector<288x32xbf16>
    %c1_138 = arith.constant 1 : index
    %c0_139 = arith.constant 0 : index
    %c0_140 = arith.constant 0 : index
    %150 = vector.load %arg4[%c1_138, %c0_139, %c0_140] : memref<9x32x64xbf16, #tpu.memory_space<vmem>>, vector<1x32x64xbf16>
    %151 = vector.shape_cast %150 : vector<1x32x64xbf16> to vector<32x64xbf16>
    %cst_141 = arith.constant dense<0.000000e+00> : vector<288x64xf32>
    %152 = tpu.matmul %149, %151, %cst_141 {dimension_numbers = #tpu.dot_dimension_numbers<[1], [0], [0], [1], [0, 0, 1, 1], [], []>} : vector<288x32xbf16>, vector<32x64xbf16>, vector<288x64xf32> -> vector<288x64xf32>
    %153 = arith.addf %147, %152 : vector<288x64xf32>
    %c2_142 = arith.constant 2 : index
    %c0_143 = arith.constant 0 : index
    %154 = vector.load %arg8[%c2_142, %c0_143] : memref<342x32xf32, #tpu.memory_space<vmem>>, vector<288x32xf32>
    %155 = arith.truncf %154 : vector<288x32xf32> to vector<288x32xbf16>
    %c2_144 = arith.constant 2 : index
    %c0_145 = arith.constant 0 : index
    %c0_146 = arith.constant 0 : index
    %156 = vector.load %arg4[%c2_144, %c0_145, %c0_146] : memref<9x32x64xbf16, #tpu.memory_space<vmem>>, vector<1x32x64xbf16>
    %157 = vector.shape_cast %156 : vector<1x32x64xbf16> to vector<32x64xbf16>
    %cst_147 = arith.constant dense<0.000000e+00> : vector<288x64xf32>
    %158 = tpu.matmul %155, %157, %cst_147 {dimension_numbers = #tpu.dot_dimension_numbers<[1], [0], [0], [1], [0, 0, 1, 1], [], []>} : vector<288x32xbf16>, vector<32x64xbf16>, vector<288x64xf32> -> vector<288x64xf32>
    %159 = arith.addf %153, %158 : vector<288x64xf32>
    %c18_148 = arith.constant 18 : index
    %c0_149 = arith.constant 0 : index
    %160 = vector.load %arg8[%c18_148, %c0_149] : memref<342x32xf32, #tpu.memory_space<vmem>>, vector<288x32xf32>
    %161 = arith.truncf %160 : vector<288x32xf32> to vector<288x32xbf16>
    %c3_150 = arith.constant 3 : index
    %c0_151 = arith.constant 0 : index
    %c0_152 = arith.constant 0 : index
    %162 = vector.load %arg4[%c3_150, %c0_151, %c0_152] : memref<9x32x64xbf16, #tpu.memory_space<vmem>>, vector<1x32x64xbf16>
    %163 = vector.shape_cast %162 : vector<1x32x64xbf16> to vector<32x64xbf16>
    %cst_153 = arith.constant dense<0.000000e+00> : vector<288x64xf32>
    %164 = tpu.matmul %161, %163, %cst_153 {dimension_numbers = #tpu.dot_dimension_numbers<[1], [0], [0], [1], [0, 0, 1, 1], [], []>} : vector<288x32xbf16>, vector<32x64xbf16>, vector<288x64xf32> -> vector<288x64xf32>
    %165 = arith.addf %159, %164 : vector<288x64xf32>
    %c19_154 = arith.constant 19 : index
    %c0_155 = arith.constant 0 : index
    %166 = vector.load %arg8[%c19_154, %c0_155] : memref<342x32xf32, #tpu.memory_space<vmem>>, vector<288x32xf32>
    %167 = arith.truncf %166 : vector<288x32xf32> to vector<288x32xbf16>
    %c4_156 = arith.constant 4 : index
    %c0_157 = arith.constant 0 : index
    %c0_158 = arith.constant 0 : index
    %168 = vector.load %arg4[%c4_156, %c0_157, %c0_158] : memref<9x32x64xbf16, #tpu.memory_space<vmem>>, vector<1x32x64xbf16>
    %169 = vector.shape_cast %168 : vector<1x32x64xbf16> to vector<32x64xbf16>
    %cst_159 = arith.constant dense<0.000000e+00> : vector<288x64xf32>
    %170 = tpu.matmul %167, %169, %cst_159 {dimension_numbers = #tpu.dot_dimension_numbers<[1], [0], [0], [1], [0, 0, 1, 1], [], []>} : vector<288x32xbf16>, vector<32x64xbf16>, vector<288x64xf32> -> vector<288x64xf32>
    %171 = arith.addf %165, %170 : vector<288x64xf32>
    %c20_160 = arith.constant 20 : index
    %c0_161 = arith.constant 0 : index
    %172 = vector.load %arg8[%c20_160, %c0_161] : memref<342x32xf32, #tpu.memory_space<vmem>>, vector<288x32xf32>
    %173 = arith.truncf %172 : vector<288x32xf32> to vector<288x32xbf16>
    %c5_162 = arith.constant 5 : index
    %c0_163 = arith.constant 0 : index
    %c0_164 = arith.constant 0 : index
    %174 = vector.load %arg4[%c5_162, %c0_163, %c0_164] : memref<9x32x64xbf16, #tpu.memory_space<vmem>>, vector<1x32x64xbf16>
    %175 = vector.shape_cast %174 : vector<1x32x64xbf16> to vector<32x64xbf16>
    %cst_165 = arith.constant dense<0.000000e+00> : vector<288x64xf32>
    %176 = tpu.matmul %173, %175, %cst_165 {dimension_numbers = #tpu.dot_dimension_numbers<[1], [0], [0], [1], [0, 0, 1, 1], [], []>} : vector<288x32xbf16>, vector<32x64xbf16>, vector<288x64xf32> -> vector<288x64xf32>
    %177 = arith.addf %171, %176 : vector<288x64xf32>
    %c36_166 = arith.constant 36 : index
    %c0_167 = arith.constant 0 : index
    %178 = vector.load %arg8[%c36_166, %c0_167] : memref<342x32xf32, #tpu.memory_space<vmem>>, vector<288x32xf32>
    %179 = arith.truncf %178 : vector<288x32xf32> to vector<288x32xbf16>
    %c6_168 = arith.constant 6 : index
    %c0_169 = arith.constant 0 : index
    %c0_170 = arith.constant 0 : index
    %180 = vector.load %arg4[%c6_168, %c0_169, %c0_170] : memref<9x32x64xbf16, #tpu.memory_space<vmem>>, vector<1x32x64xbf16>
    %181 = vector.shape_cast %180 : vector<1x32x64xbf16> to vector<32x64xbf16>
    %cst_171 = arith.constant dense<0.000000e+00> : vector<288x64xf32>
    %182 = tpu.matmul %179, %181, %cst_171 {dimension_numbers = #tpu.dot_dimension_numbers<[1], [0], [0], [1], [0, 0, 1, 1], [], []>} : vector<288x32xbf16>, vector<32x64xbf16>, vector<288x64xf32> -> vector<288x64xf32>
    %183 = arith.addf %177, %182 : vector<288x64xf32>
    %c37_172 = arith.constant 37 : index
    %c0_173 = arith.constant 0 : index
    %184 = vector.load %arg8[%c37_172, %c0_173] : memref<342x32xf32, #tpu.memory_space<vmem>>, vector<288x32xf32>
    %185 = arith.truncf %184 : vector<288x32xf32> to vector<288x32xbf16>
    %c7_174 = arith.constant 7 : index
    %c0_175 = arith.constant 0 : index
    %c0_176 = arith.constant 0 : index
    %186 = vector.load %arg4[%c7_174, %c0_175, %c0_176] : memref<9x32x64xbf16, #tpu.memory_space<vmem>>, vector<1x32x64xbf16>
    %187 = vector.shape_cast %186 : vector<1x32x64xbf16> to vector<32x64xbf16>
    %cst_177 = arith.constant dense<0.000000e+00> : vector<288x64xf32>
    %188 = tpu.matmul %185, %187, %cst_177 {dimension_numbers = #tpu.dot_dimension_numbers<[1], [0], [0], [1], [0, 0, 1, 1], [], []>} : vector<288x32xbf16>, vector<32x64xbf16>, vector<288x64xf32> -> vector<288x64xf32>
    %189 = arith.addf %183, %188 : vector<288x64xf32>
    %c38_178 = arith.constant 38 : index
    %c0_179 = arith.constant 0 : index
    %190 = vector.load %arg8[%c38_178, %c0_179] : memref<342x32xf32, #tpu.memory_space<vmem>>, vector<288x32xf32>
    %191 = arith.truncf %190 : vector<288x32xf32> to vector<288x32xbf16>
    %c8_180 = arith.constant 8 : index
    %c0_181 = arith.constant 0 : index
    %c0_182 = arith.constant 0 : index
    %192 = vector.load %arg4[%c8_180, %c0_181, %c0_182] : memref<9x32x64xbf16, #tpu.memory_space<vmem>>, vector<1x32x64xbf16>
    %193 = vector.shape_cast %192 : vector<1x32x64xbf16> to vector<32x64xbf16>
    %cst_183 = arith.constant dense<0.000000e+00> : vector<288x64xf32>
    %194 = tpu.matmul %191, %193, %cst_183 {dimension_numbers = #tpu.dot_dimension_numbers<[1], [0], [0], [1], [0, 0, 1, 1], [], []>} : vector<288x32xbf16>, vector<32x64xbf16>, vector<288x64xf32> -> vector<288x64xf32>
    %195 = arith.addf %189, %194 : vector<288x64xf32>
    %196 = arith.negf %195 : vector<288x64xf32>
    %197 = math.exp %196 : vector<288x64xf32>
    %cst_184 = arith.constant 1.000000e+00 : f32
    %198 = vector.broadcast %cst_184 : f32 to vector<288x64xf32>
    %199 = arith.addf %198, %197 : vector<288x64xf32>
    %200 = arith.divf %198, %199 : vector<288x64xf32>
    %201 = arith.mulf %195, %200 : vector<288x64xf32>
    %cst_185 = arith.constant 0.000000e+00 : f32
    %202 = vector.shape_cast %68 : vector<288x1xi1> to vector<288x1xi1>
    %203 = vector.broadcast %202 : vector<288x1xi1> to vector<288x64xi1>
    %204 = vector.broadcast %cst_185 : f32 to vector<288x64xf32>
    %205 = arith.select %203, %201, %204 : vector<288x64xi1>, vector<288x64xf32>
    %cst_186 = arith.constant dense<0.000000e+00> : vector<64xf32>
    %206 = vector.multi_reduction <add>, %205, %cst_186 [0] : vector<288x64xf32> to vector<64xf32>
    %207 = vector.shape_cast %206 : vector<64xf32> to vector<1x64xf32>
    %208 = arith.mulf %205, %205 : vector<288x64xf32>
    %cst_187 = arith.constant dense<0.000000e+00> : vector<64xf32>
    %209 = vector.multi_reduction <add>, %208, %cst_187 [0] : vector<288x64xf32> to vector<64xf32>
    %210 = vector.shape_cast %209 : vector<64xf32> to vector<1x64xf32>
    %cst_188 = arith.constant 3.906250e-03 : f32
    %211 = vector.broadcast %cst_188 : f32 to vector<1x64xf32>
    %212 = arith.mulf %207, %211 : vector<1x64xf32>
    %cst_189 = arith.constant 2.560000e+02 : f32
    %213 = vector.broadcast %cst_189 : f32 to vector<1x64xf32>
    %214 = arith.mulf %213, %212 : vector<1x64xf32>
    %215 = arith.mulf %214, %212 : vector<1x64xf32>
    %216 = arith.subf %210, %215 : vector<1x64xf32>
    %cst_190 = arith.constant 0.000000e+00 : f32
    %217 = vector.broadcast %cst_190 : f32 to vector<1x64xf32>
    %218 = arith.maximumf %216, %217 : vector<1x64xf32>
    %cst_191 = arith.constant 0.00392156886 : f32
    %219 = vector.broadcast %cst_191 : f32 to vector<1x64xf32>
    %220 = arith.mulf %218, %219 : vector<1x64xf32>
    %cst_192 = arith.constant 9.99999974E-5 : f32
    %221 = vector.broadcast %cst_192 : f32 to vector<1x64xf32>
    %222 = arith.addf %220, %221 : vector<1x64xf32>
    %cst_193 = arith.constant 4.000000e+00 : f32
    %223 = vector.broadcast %cst_193 : f32 to vector<1x64xf32>
    %224 = arith.mulf %223, %222 : vector<1x64xf32>
    %225 = tpu.reciprocal %224 {approx = true} : vector<1x64xf32> -> vector<1x64xf32>
    %226 = vector.broadcast %212 : vector<1x64xf32> to vector<288x64xf32>
    %227 = arith.subf %201, %226 : vector<288x64xf32>
    %228 = arith.mulf %227, %227 : vector<288x64xf32>
    %229 = vector.broadcast %225 : vector<1x64xf32> to vector<288x64xf32>
    %230 = arith.mulf %228, %229 : vector<288x64xf32>
    %cst_194 = arith.constant 5.000000e-01 : f32
    %231 = vector.broadcast %cst_194 : f32 to vector<288x64xf32>
    %232 = arith.addf %230, %231 : vector<288x64xf32>
    %233 = arith.negf %232 : vector<288x64xf32>
    %234 = math.exp %233 : vector<288x64xf32>
    %cst_195 = arith.constant 1.000000e+00 : f32
    %235 = vector.broadcast %cst_195 : f32 to vector<288x64xf32>
    %236 = arith.addf %235, %234 : vector<288x64xf32>
    %237 = arith.divf %235, %236 : vector<288x64xf32>
    %238 = arith.mulf %201, %237 : vector<288x64xf32>
    %239 = vector.extract_strided_slice %238 {offsets = [0, 0], sizes = [16, 64], strides = [1, 1]} : vector<288x64xf32> to vector<16x64xf32>
    %c0_196 = arith.constant 0 : index
    %c0_197 = arith.constant 0 : index
    %c0_198 = arith.constant 0 : index
    %c0_199 = arith.constant 0 : index
    %240 = vector.load %arg1[%c0_196, %c0_197, %c0_198, %c0_199] : memref<1x16x16x64xf32, #tpu.memory_space<vmem>>, vector<1x1x16x64xf32>
    %241 = vector.shape_cast %240 : vector<1x1x16x64xf32> to vector<16x64xf32>
    %242 = arith.addf %241, %239 : vector<16x64xf32>
    %c0_200 = arith.constant 0 : index
    %c0_201 = arith.constant 0 : index
    %c0_202 = arith.constant 0 : index
    %c0_203 = arith.constant 0 : index
    %243 = vector.load %arg6[%c0_200, %c0_201, %c0_202, %c0_203] : memref<1x16x16x64xf32, #tpu.memory_space<vmem>>, vector<1x1x16x64xf32>
    %244 = vector.shape_cast %243 : vector<1x1x16x64xf32> to vector<16x64xf32>
    %245 = vector.shape_cast %242 : vector<16x64xf32> to vector<1x1x16x64xf32>
    tpu.vector_store %arg6[%c0_200, %c0_201, %c0_202, %c0_203], %245 {strides = array<i32>} : memref<1x16x16x64xf32, #tpu.memory_space<vmem>>, vector<1x1x16x64xf32>,
    %246 = vector.extract_strided_slice %238 {offsets = [18, 0], sizes = [16, 64], strides = [1, 1]} : vector<288x64xf32> to vector<16x64xf32>
    %c0_204 = arith.constant 0 : index
    %c1_205 = arith.constant 1 : index
    %c0_206 = arith.constant 0 : index
    %c0_207 = arith.constant 0 : index
    %247 = vector.load %arg1[%c0_204, %c1_205, %c0_206, %c0_207] : memref<1x16x16x64xf32, #tpu.memory_space<vmem>>, vector<1x1x16x64xf32>
    %248 = vector.shape_cast %247 : vector<1x1x16x64xf32> to vector<16x64xf32>
    %249 = arith.addf %248, %246 : vector<16x64xf32>
    %c0_208 = arith.constant 0 : index
    %c1_209 = arith.constant 1 : index
    %c0_210 = arith.constant 0 : index
    %c0_211 = arith.constant 0 : index
    %250 = vector.load %arg6[%c0_208, %c1_209, %c0_210, %c0_211] : memref<1x16x16x64xf32, #tpu.memory_space<vmem>>, vector<1x1x16x64xf32>
    %251 = vector.shape_cast %250 : vector<1x1x16x64xf32> to vector<16x64xf32>
    %252 = vector.shape_cast %249 : vector<16x64xf32> to vector<1x1x16x64xf32>
    tpu.vector_store %arg6[%c0_208, %c1_209, %c0_210, %c0_211], %252 {strides = array<i32>} : memref<1x16x16x64xf32, #tpu.memory_space<vmem>>, vector<1x1x16x64xf32>,
    %253 = vector.extract_strided_slice %238 {offsets = [36, 0], sizes = [16, 64], strides = [1, 1]} : vector<288x64xf32> to vector<16x64xf32>
    %c0_212 = arith.constant 0 : index
    %c2_213 = arith.constant 2 : index
    %c0_214 = arith.constant 0 : index
    %c0_215 = arith.constant 0 : index
    %254 = vector.load %arg1[%c0_212, %c2_213, %c0_214, %c0_215] : memref<1x16x16x64xf32, #tpu.memory_space<vmem>>, vector<1x1x16x64xf32>
    %255 = vector.shape_cast %254 : vector<1x1x16x64xf32> to vector<16x64xf32>
    %256 = arith.addf %255, %253 : vector<16x64xf32>
    %c0_216 = arith.constant 0 : index
    %c2_217 = arith.constant 2 : index
    %c0_218 = arith.constant 0 : index
    %c0_219 = arith.constant 0 : index
    %257 = vector.load %arg6[%c0_216, %c2_217, %c0_218, %c0_219] : memref<1x16x16x64xf32, #tpu.memory_space<vmem>>, vector<1x1x16x64xf32>
    %258 = vector.shape_cast %257 : vector<1x1x16x64xf32> to vector<16x64xf32>
    %259 = vector.shape_cast %256 : vector<16x64xf32> to vector<1x1x16x64xf32>
    tpu.vector_store %arg6[%c0_216, %c2_217, %c0_218, %c0_219], %259 {strides = array<i32>} : memref<1x16x16x64xf32, #tpu.memory_space<vmem>>, vector<1x1x16x64xf32>,
    %260 = vector.extract_strided_slice %238 {offsets = [54, 0], sizes = [16, 64], strides = [1, 1]} : vector<288x64xf32> to vector<16x64xf32>
    %c0_220 = arith.constant 0 : index
    %c3_221 = arith.constant 3 : index
    %c0_222 = arith.constant 0 : index
    %c0_223 = arith.constant 0 : index
    %261 = vector.load %arg1[%c0_220, %c3_221, %c0_222, %c0_223] : memref<1x16x16x64xf32, #tpu.memory_space<vmem>>, vector<1x1x16x64xf32>
    %262 = vector.shape_cast %261 : vector<1x1x16x64xf32> to vector<16x64xf32>
    %263 = arith.addf %262, %260 : vector<16x64xf32>
    %c0_224 = arith.constant 0 : index
    %c3_225 = arith.constant 3 : index
    %c0_226 = arith.constant 0 : index
    %c0_227 = arith.constant 0 : index
    %264 = vector.load %arg6[%c0_224, %c3_225, %c0_226, %c0_227] : memref<1x16x16x64xf32, #tpu.memory_space<vmem>>, vector<1x1x16x64xf32>
    %265 = vector.shape_cast %264 : vector<1x1x16x64xf32> to vector<16x64xf32>
    %266 = vector.shape_cast %263 : vector<16x64xf32> to vector<1x1x16x64xf32>
    tpu.vector_store %arg6[%c0_224, %c3_225, %c0_226, %c0_227], %266 {strides = array<i32>} : memref<1x16x16x64xf32, #tpu.memory_space<vmem>>, vector<1x1x16x64xf32>,
    %267 = vector.extract_strided_slice %238 {offsets = [72, 0], sizes = [16, 64], strides = [1, 1]} : vector<288x64xf32> to vector<16x64xf32>
    %c0_228 = arith.constant 0 : index
    %c4_229 = arith.constant 4 : index
    %c0_230 = arith.constant 0 : index
    %c0_231 = arith.constant 0 : index
    %268 = vector.load %arg1[%c0_228, %c4_229, %c0_230, %c0_231] : memref<1x16x16x64xf32, #tpu.memory_space<vmem>>, vector<1x1x16x64xf32>
    %269 = vector.shape_cast %268 : vector<1x1x16x64xf32> to vector<16x64xf32>
    %270 = arith.addf %269, %267 : vector<16x64xf32>
    %c0_232 = arith.constant 0 : index
    %c4_233 = arith.constant 4 : index
    %c0_234 = arith.constant 0 : index
    %c0_235 = arith.constant 0 : index
    %271 = vector.load %arg6[%c0_232, %c4_233, %c0_234, %c0_235] : memref<1x16x16x64xf32, #tpu.memory_space<vmem>>, vector<1x1x16x64xf32>
    %272 = vector.shape_cast %271 : vector<1x1x16x64xf32> to vector<16x64xf32>
    %273 = vector.shape_cast %270 : vector<16x64xf32> to vector<1x1x16x64xf32>
    tpu.vector_store %arg6[%c0_232, %c4_233, %c0_234, %c0_235], %273 {strides = array<i32>} : memref<1x16x16x64xf32, #tpu.memory_space<vmem>>, vector<1x1x16x64xf32>,
    %274 = vector.extract_strided_slice %238 {offsets = [90, 0], sizes = [16, 64], strides = [1, 1]} : vector<288x64xf32> to vector<16x64xf32>
    %c0_236 = arith.constant 0 : index
    %c5_237 = arith.constant 5 : index
    %c0_238 = arith.constant 0 : index
    %c0_239 = arith.constant 0 : index
    %275 = vector.load %arg1[%c0_236, %c5_237, %c0_238, %c0_239] : memref<1x16x16x64xf32, #tpu.memory_space<vmem>>, vector<1x1x16x64xf32>
    %276 = vector.shape_cast %275 : vector<1x1x16x64xf32> to vector<16x64xf32>
    %277 = arith.addf %276, %274 : vector<16x64xf32>
    %c0_240 = arith.constant 0 : index
    %c5_241 = arith.constant 5 : index
    %c0_242 = arith.constant 0 : index
    %c0_243 = arith.constant 0 : index
    %278 = vector.load %arg6[%c0_240, %c5_241, %c0_242, %c0_243] : memref<1x16x16x64xf32, #tpu.memory_space<vmem>>, vector<1x1x16x64xf32>
    %279 = vector.shape_cast %278 : vector<1x1x16x64xf32> to vector<16x64xf32>
    %280 = vector.shape_cast %277 : vector<16x64xf32> to vector<1x1x16x64xf32>
    tpu.vector_store %arg6[%c0_240, %c5_241, %c0_242, %c0_243], %280 {strides = array<i32>} : memref<1x16x16x64xf32, #tpu.memory_space<vmem>>, vector<1x1x16x64xf32>,
    %281 = vector.extract_strided_slice %238 {offsets = [108, 0], sizes = [16, 64], strides = [1, 1]} : vector<288x64xf32> to vector<16x64xf32>
    %c0_244 = arith.constant 0 : index
    %c6_245 = arith.constant 6 : index
    %c0_246 = arith.constant 0 : index
    %c0_247 = arith.constant 0 : index
    %282 = vector.load %arg1[%c0_244, %c6_245, %c0_246, %c0_247] : memref<1x16x16x64xf32, #tpu.memory_space<vmem>>, vector<1x1x16x64xf32>
    %283 = vector.shape_cast %282 : vector<1x1x16x64xf32> to vector<16x64xf32>
    %284 = arith.addf %283, %281 : vector<16x64xf32>
    %c0_248 = arith.constant 0 : index
    %c6_249 = arith.constant 6 : index
    %c0_250 = arith.constant 0 : index
    %c0_251 = arith.constant 0 : index
    %285 = vector.load %arg6[%c0_248, %c6_249, %c0_250, %c0_251] : memref<1x16x16x64xf32, #tpu.memory_space<vmem>>, vector<1x1x16x64xf32>
    %286 = vector.shape_cast %285 : vector<1x1x16x64xf32> to vector<16x64xf32>
    %287 = vector.shape_cast %284 : vector<16x64xf32> to vector<1x1x16x64xf32>
    tpu.vector_store %arg6[%c0_248, %c6_249, %c0_250, %c0_251], %287 {strides = array<i32>} : memref<1x16x16x64xf32, #tpu.memory_space<vmem>>, vector<1x1x16x64xf32>,
    %288 = vector.extract_strided_slice %238 {offsets = [126, 0], sizes = [16, 64], strides = [1, 1]} : vector<288x64xf32> to vector<16x64xf32>
    %c0_252 = arith.constant 0 : index
    %c7_253 = arith.constant 7 : index
    %c0_254 = arith.constant 0 : index
    %c0_255 = arith.constant 0 : index
    %289 = vector.load %arg1[%c0_252, %c7_253, %c0_254, %c0_255] : memref<1x16x16x64xf32, #tpu.memory_space<vmem>>, vector<1x1x16x64xf32>
    %290 = vector.shape_cast %289 : vector<1x1x16x64xf32> to vector<16x64xf32>
    %291 = arith.addf %290, %288 : vector<16x64xf32>
    %c0_256 = arith.constant 0 : index
    %c7_257 = arith.constant 7 : index
    %c0_258 = arith.constant 0 : index
    %c0_259 = arith.constant 0 : index
    %292 = vector.load %arg6[%c0_256, %c7_257, %c0_258, %c0_259] : memref<1x16x16x64xf32, #tpu.memory_space<vmem>>, vector<1x1x16x64xf32>
    %293 = vector.shape_cast %292 : vector<1x1x16x64xf32> to vector<16x64xf32>
    %294 = vector.shape_cast %291 : vector<16x64xf32> to vector<1x1x16x64xf32>
    tpu.vector_store %arg6[%c0_256, %c7_257, %c0_258, %c0_259], %294 {strides = array<i32>} : memref<1x16x16x64xf32, #tpu.memory_space<vmem>>, vector<1x1x16x64xf32>,
    %295 = vector.extract_strided_slice %238 {offsets = [144, 0], sizes = [16, 64], strides = [1, 1]} : vector<288x64xf32> to vector<16x64xf32>
    %c0_260 = arith.constant 0 : index
    %c8_261 = arith.constant 8 : index
    %c0_262 = arith.constant 0 : index
    %c0_263 = arith.constant 0 : index
    %296 = vector.load %arg1[%c0_260, %c8_261, %c0_262, %c0_263] : memref<1x16x16x64xf32, #tpu.memory_space<vmem>>, vector<1x1x16x64xf32>
    %297 = vector.shape_cast %296 : vector<1x1x16x64xf32> to vector<16x64xf32>
    %298 = arith.addf %297, %295 : vector<16x64xf32>
    %c0_264 = arith.constant 0 : index
    %c8_265 = arith.constant 8 : index
    %c0_266 = arith.constant 0 : index
    %c0_267 = arith.constant 0 : index
    %299 = vector.load %arg6[%c0_264, %c8_265, %c0_266, %c0_267] : memref<1x16x16x64xf32, #tpu.memory_space<vmem>>, vector<1x1x16x64xf32>
    %300 = vector.shape_cast %299 : vector<1x1x16x64xf32> to vector<16x64xf32>
    %301 = vector.shape_cast %298 : vector<16x64xf32> to vector<1x1x16x64xf32>
    tpu.vector_store %arg6[%c0_264, %c8_265, %c0_266, %c0_267], %301 {strides = array<i32>} : memref<1x16x16x64xf32, #tpu.memory_space<vmem>>, vector<1x1x16x64xf32>,
    %302 = vector.extract_strided_slice %238 {offsets = [162, 0], sizes = [16, 64], strides = [1, 1]} : vector<288x64xf32> to vector<16x64xf32>
    %c0_268 = arith.constant 0 : index
    %c9_269 = arith.constant 9 : index
    %c0_270 = arith.constant 0 : index
    %c0_271 = arith.constant 0 : index
    %303 = vector.load %arg1[%c0_268, %c9_269, %c0_270, %c0_271] : memref<1x16x16x64xf32, #tpu.memory_space<vmem>>, vector<1x1x16x64xf32>
    %304 = vector.shape_cast %303 : vector<1x1x16x64xf32> to vector<16x64xf32>
    %305 = arith.addf %304, %302 : vector<16x64xf32>
    %c0_272 = arith.constant 0 : index
    %c9_273 = arith.constant 9 : index
    %c0_274 = arith.constant 0 : index
    %c0_275 = arith.constant 0 : index
    %306 = vector.load %arg6[%c0_272, %c9_273, %c0_274, %c0_275] : memref<1x16x16x64xf32, #tpu.memory_space<vmem>>, vector<1x1x16x64xf32>
    %307 = vector.shape_cast %306 : vector<1x1x16x64xf32> to vector<16x64xf32>
    %308 = vector.shape_cast %305 : vector<16x64xf32> to vector<1x1x16x64xf32>
    tpu.vector_store %arg6[%c0_272, %c9_273, %c0_274, %c0_275], %308 {strides = array<i32>} : memref<1x16x16x64xf32, #tpu.memory_space<vmem>>, vector<1x1x16x64xf32>,
    %309 = vector.extract_strided_slice %238 {offsets = [180, 0], sizes = [16, 64], strides = [1, 1]} : vector<288x64xf32> to vector<16x64xf32>
    %c0_276 = arith.constant 0 : index
    %c10_277 = arith.constant 10 : index
    %c0_278 = arith.constant 0 : index
    %c0_279 = arith.constant 0 : index
    %310 = vector.load %arg1[%c0_276, %c10_277, %c0_278, %c0_279] : memref<1x16x16x64xf32, #tpu.memory_space<vmem>>, vector<1x1x16x64xf32>
    %311 = vector.shape_cast %310 : vector<1x1x16x64xf32> to vector<16x64xf32>
    %312 = arith.addf %311, %309 : vector<16x64xf32>
    %c0_280 = arith.constant 0 : index
    %c10_281 = arith.constant 10 : index
    %c0_282 = arith.constant 0 : index
    %c0_283 = arith.constant 0 : index
    %313 = vector.load %arg6[%c0_280, %c10_281, %c0_282, %c0_283] : memref<1x16x16x64xf32, #tpu.memory_space<vmem>>, vector<1x1x16x64xf32>
    %314 = vector.shape_cast %313 : vector<1x1x16x64xf32> to vector<16x64xf32>
    %315 = vector.shape_cast %312 : vector<16x64xf32> to vector<1x1x16x64xf32>
    tpu.vector_store %arg6[%c0_280, %c10_281, %c0_282, %c0_283], %315 {strides = array<i32>} : memref<1x16x16x64xf32, #tpu.memory_space<vmem>>, vector<1x1x16x64xf32>,
    %316 = vector.extract_strided_slice %238 {offsets = [198, 0], sizes = [16, 64], strides = [1, 1]} : vector<288x64xf32> to vector<16x64xf32>
    %c0_284 = arith.constant 0 : index
    %c11_285 = arith.constant 11 : index
    %c0_286 = arith.constant 0 : index
    %c0_287 = arith.constant 0 : index
    %317 = vector.load %arg1[%c0_284, %c11_285, %c0_286, %c0_287] : memref<1x16x16x64xf32, #tpu.memory_space<vmem>>, vector<1x1x16x64xf32>
    %318 = vector.shape_cast %317 : vector<1x1x16x64xf32> to vector<16x64xf32>
    %319 = arith.addf %318, %316 : vector<16x64xf32>
    %c0_288 = arith.constant 0 : index
    %c11_289 = arith.constant 11 : index
    %c0_290 = arith.constant 0 : index
    %c0_291 = arith.constant 0 : index
    %320 = vector.load %arg6[%c0_288, %c11_289, %c0_290, %c0_291] : memref<1x16x16x64xf32, #tpu.memory_space<vmem>>, vector<1x1x16x64xf32>
    %321 = vector.shape_cast %320 : vector<1x1x16x64xf32> to vector<16x64xf32>
    %322 = vector.shape_cast %319 : vector<16x64xf32> to vector<1x1x16x64xf32>
    tpu.vector_store %arg6[%c0_288, %c11_289, %c0_290, %c0_291], %322 {strides = array<i32>} : memref<1x16x16x64xf32, #tpu.memory_space<vmem>>, vector<1x1x16x64xf32>,
    %323 = vector.extract_strided_slice %238 {offsets = [216, 0], sizes = [16, 64], strides = [1, 1]} : vector<288x64xf32> to vector<16x64xf32>
    %c0_292 = arith.constant 0 : index
    %c12_293 = arith.constant 12 : index
    %c0_294 = arith.constant 0 : index
    %c0_295 = arith.constant 0 : index
    %324 = vector.load %arg1[%c0_292, %c12_293, %c0_294, %c0_295] : memref<1x16x16x64xf32, #tpu.memory_space<vmem>>, vector<1x1x16x64xf32>
    %325 = vector.shape_cast %324 : vector<1x1x16x64xf32> to vector<16x64xf32>
    %326 = arith.addf %325, %323 : vector<16x64xf32>
    %c0_296 = arith.constant 0 : index
    %c12_297 = arith.constant 12 : index
    %c0_298 = arith.constant 0 : index
    %c0_299 = arith.constant 0 : index
    %327 = vector.load %arg6[%c0_296, %c12_297, %c0_298, %c0_299] : memref<1x16x16x64xf32, #tpu.memory_space<vmem>>, vector<1x1x16x64xf32>
    %328 = vector.shape_cast %327 : vector<1x1x16x64xf32> to vector<16x64xf32>
    %329 = vector.shape_cast %326 : vector<16x64xf32> to vector<1x1x16x64xf32>
    tpu.vector_store %arg6[%c0_296, %c12_297, %c0_298, %c0_299], %329 {strides = array<i32>} : memref<1x16x16x64xf32, #tpu.memory_space<vmem>>, vector<1x1x16x64xf32>,
    %330 = vector.extract_strided_slice %238 {offsets = [234, 0], sizes = [16, 64], strides = [1, 1]} : vector<288x64xf32> to vector<16x64xf32>
    %c0_300 = arith.constant 0 : index
    %c13_301 = arith.constant 13 : index
    %c0_302 = arith.constant 0 : index
    %c0_303 = arith.constant 0 : index
    %331 = vector.load %arg1[%c0_300, %c13_301, %c0_302, %c0_303] : memref<1x16x16x64xf32, #tpu.memory_space<vmem>>, vector<1x1x16x64xf32>
    %332 = vector.shape_cast %331 : vector<1x1x16x64xf32> to vector<16x64xf32>
    %333 = arith.addf %332, %330 : vector<16x64xf32>
    %c0_304 = arith.constant 0 : index
    %c13_305 = arith.constant 13 : index
    %c0_306 = arith.constant 0 : index
    %c0_307 = arith.constant 0 : index
    %334 = vector.load %arg6[%c0_304, %c13_305, %c0_306, %c0_307] : memref<1x16x16x64xf32, #tpu.memory_space<vmem>>, vector<1x1x16x64xf32>
    %335 = vector.shape_cast %334 : vector<1x1x16x64xf32> to vector<16x64xf32>
    %336 = vector.shape_cast %333 : vector<16x64xf32> to vector<1x1x16x64xf32>
    tpu.vector_store %arg6[%c0_304, %c13_305, %c0_306, %c0_307], %336 {strides = array<i32>} : memref<1x16x16x64xf32, #tpu.memory_space<vmem>>, vector<1x1x16x64xf32>,
    %337 = vector.extract_strided_slice %238 {offsets = [252, 0], sizes = [16, 64], strides = [1, 1]} : vector<288x64xf32> to vector<16x64xf32>
    %c0_308 = arith.constant 0 : index
    %c14_309 = arith.constant 14 : index
    %c0_310 = arith.constant 0 : index
    %c0_311 = arith.constant 0 : index
    %338 = vector.load %arg1[%c0_308, %c14_309, %c0_310, %c0_311] : memref<1x16x16x64xf32, #tpu.memory_space<vmem>>, vector<1x1x16x64xf32>
    %339 = vector.shape_cast %338 : vector<1x1x16x64xf32> to vector<16x64xf32>
    %340 = arith.addf %339, %337 : vector<16x64xf32>
    %c0_312 = arith.constant 0 : index
    %c14_313 = arith.constant 14 : index
    %c0_314 = arith.constant 0 : index
    %c0_315 = arith.constant 0 : index
    %341 = vector.load %arg6[%c0_312, %c14_313, %c0_314, %c0_315] : memref<1x16x16x64xf32, #tpu.memory_space<vmem>>, vector<1x1x16x64xf32>
    %342 = vector.shape_cast %341 : vector<1x1x16x64xf32> to vector<16x64xf32>
    %343 = vector.shape_cast %340 : vector<16x64xf32> to vector<1x1x16x64xf32>
    tpu.vector_store %arg6[%c0_312, %c14_313, %c0_314, %c0_315], %343 {strides = array<i32>} : memref<1x16x16x64xf32, #tpu.memory_space<vmem>>, vector<1x1x16x64xf32>,
    %344 = vector.extract_strided_slice %238 {offsets = [270, 0], sizes = [16, 64], strides = [1, 1]} : vector<288x64xf32> to vector<16x64xf32>
    %c0_316 = arith.constant 0 : index
    %c15_317 = arith.constant 15 : index
    %c0_318 = arith.constant 0 : index
    %c0_319 = arith.constant 0 : index
    %345 = vector.load %arg1[%c0_316, %c15_317, %c0_318, %c0_319] : memref<1x16x16x64xf32, #tpu.memory_space<vmem>>, vector<1x1x16x64xf32>
    %346 = vector.shape_cast %345 : vector<1x1x16x64xf32> to vector<16x64xf32>
    %347 = arith.addf %346, %344 : vector<16x64xf32>
    %c0_320 = arith.constant 0 : index
    %c15_321 = arith.constant 15 : index
    %c0_322 = arith.constant 0 : index
    %c0_323 = arith.constant 0 : index
    %348 = vector.load %arg6[%c0_320, %c15_321, %c0_322, %c0_323] : memref<1x16x16x64xf32, #tpu.memory_space<vmem>>, vector<1x1x16x64xf32>
    %349 = vector.shape_cast %348 : vector<1x1x16x64xf32> to vector<16x64xf32>
    %350 = vector.shape_cast %347 : vector<16x64xf32> to vector<1x1x16x64xf32>
    tpu.vector_store %arg6[%c0_320, %c15_321, %c0_322, %c0_323], %350 {strides = array<i32>} : memref<1x16x16x64xf32, #tpu.memory_space<vmem>>, vector<1x1x16x64xf32>,
    return
  }
  func.func @transform_0(%arg0: i32) -> (i32, i32, i32, i32) {
    %c0_i32 = arith.constant 0 : i32
    %c0_i32_0 = arith.constant 0 : i32
    %c0_i32_1 = arith.constant 0 : i32
    %c0_i32_2 = arith.constant 0 : i32
    return %arg0, %c0_i32, %c0_i32_0, %c0_i32_1 : i32, i32, i32, i32
  }
  func.func @transform_1(%arg0: i32) -> (i32, i32, i32) {
    %c0_i32 = arith.constant 0 : i32
    %c0_i32_0 = arith.constant 0 : i32
    %c0_i32_1 = arith.constant 0 : i32
    %c0_i32_2 = arith.constant 0 : i32
    return %c0_i32, %c0_i32_0, %c0_i32_1 : i32, i32, i32
  }
  func.func @transform_2(%arg0: i32) -> (i32, i32) {
    %c0_i32 = arith.constant 0 : i32
    %c0_i32_0 = arith.constant 0 : i32
    %c0_i32_1 = arith.constant 0 : i32
    return %c0_i32, %c0_i32_0 : i32, i32
  }
  func.func @transform_3(%arg0: i32) -> (i32, i32, i32) {
    %c0_i32 = arith.constant 0 : i32
    %c0_i32_0 = arith.constant 0 : i32
    %c0_i32_1 = arith.constant 0 : i32
    %c0_i32_2 = arith.constant 0 : i32
    return %c0_i32, %c0_i32_0, %c0_i32_1 : i32, i32, i32
  }
  func.func @transform_4(%arg0: i32) -> (i32, i32) {
    %c0_i32 = arith.constant 0 : i32
    %c0_i32_0 = arith.constant 0 : i32
    %c0_i32_1 = arith.constant 0 : i32
    return %c0_i32, %c0_i32_0 : i32, i32
  }
  func.func @transform_5(%arg0: i32) -> (i32, i32, i32, i32) {
    %c0_i32 = arith.constant 0 : i32
    %c0_i32_0 = arith.constant 0 : i32
    %c0_i32_1 = arith.constant 0 : i32
    %c0_i32_2 = arith.constant 0 : i32
    return %arg0, %c0_i32, %c0_i32_0, %c0_i32_1 : i32, i32, i32, i32
  }
}

</mosaic_0001>

<bundles_post_ra>
// kernel: tpu_custom_call.1
= control target key start
LH: loop header
LB: loop body
LE: loop exit
PB: predicated region body
PF: predicated region fallthrough
CT: control target
= control target key end

     0   :  { %10 = vsyncpa [#allocation5], 0  ;;  %s15553_s0 = inlined_call_operand.hbm [shape: f32[2,16,16,64], index: 0, kind: input, shape index: {}]   ;;  %s15554_s1 = inlined_call_operand.vmem [shape: bf16[9,64,32], index: 1, kind: input, shape index: {}]   ;;  %s15555_s2 = inlined_call_operand.vmem [shape: f32[1,32], index: 2, kind: input, shape index: {}]   ;;  %s15556_s3 = inlined_call_operand.vmem [shape: bf16[9,32,64], index: 3, kind: input, shape index: {}]   ;;  %s15557_s4 = inlined_call_operand.vmem [shape: f32[1,64], index: 4, kind: input, shape index: {}]   ;;  %s15558_s5 = inlined_call_operand.hbm [shape: f32[2,16,16,64], index: 5, kind: output, shape index: {}]  }
   0x1   :  { %12 = vsyncpa [#allocation5 + $0x1], 0 }
   0x2   :  { %13 = vsyncpa [#allocation6], 0 }
   0x3   :  { %15 = vsyncpa [#allocation6 + $0x1], 0  ;;  %s12112_s18 = smov 0   ;;  %s12114_s19 = smov 0  }
   0x4   :  { %s12116_s20 = smov 0   ;;  %s12118_s21 = smov 0  }
   0x5 LB: > { %s12133_s22 = sadd.s32 4294967295, %s12073_s21   ;;  %s8894_s23 = sadd.s32 4294967294, %s12073_s21   ;;  %s12073_s21 = sphi %s12118_s21, %s16478_s21   ;;  %s12069_s20 = sphi %s12116_s20, %s16477_s20   ;;  %s12065_s19 = sphi %s12114_s19, %s16476_s19   ;;  %s12061_s18 = sphi %s12112_s18, %s16475_s18  }
   0x6   : > { %s12137_s24 = sadd.s32 1, %s12073_s21   ;;  %s28_s25 = sadd.s32 1, %s12069_s20 }
   0x7   : > { %s25_s26 = ssub.s32 %s12073_s21, %s12137_s24  ;;  %p35_p0 = scmp.ne.s32.totalorder %s12069_s20, %s12065_s19 }
   0x8   : > { %p26_p1 = scmp.eq.s32.totalorder %s25_s26, 0  ;;  %p36_p2 = scmp.eq.s32.totalorder %s12073_s21, 0 }
   0x9   : > { %p41_p3 = scmp.ne.s32.totalorder %s12065_s19, %s12061_s18  ;;  %p42_p4 = scmp.eq.s32.totalorder %s12133_s22, 0 }
   0xa   : > { %s12149_s27 = scalar_select %p26_p1, %s12069_s20, %s28_s25  }
   0xb   : > { %p12151_p5 = por %p36_p2, %p35_p0  ;;  %p12155_p6 = por %p42_p4, %p41_p3 }
   0xc   : > { %p149_p7 = scmp.eq.s32.totalorder %s12133_s22, 1  ;;  %p155_p8 = scmp.eq.s32.totalorder %s8894_s23, 1 }
   0xd   : > { %p11450_p10 = scmp.lt.s32.totalorder %s12073_s21, 2  ;;  %s187_s7 = sand.u32 1, %s12069_s20  }
   0xe   : > { %p12162_p11 = por %p149_p7, %p35_p0  ;;  %p12166_p12 = por %p155_p8, %p41_p3 }
   0xf   : > { %s9582_s8 = sshll.u32 %s12073_s21, 12  ;;  %s8897_s9 = sshll.u32 %s187_s7, 8 }
  0x10   : > { %s15731_s30 = scalar_select %p12162_p11, 1, 0 }
  0x11   : > { %s15732_s6 = scalar_select %p12166_p12, 1, 0 }
  0x12   : > { %s12175_s12 = scalar_lea.hbm %s15553_s0, %s9582_s8  ;;  %s191_s13 = scalar_lea.vmem [#allocation4], %s8897_s9 }
  0x13   : > { %s198_s14 = sshll.u32 %s191_s13, 4  ;;  %p12179_p13 = pnand %p11450_p10, %p12151_p5  ;;  %s12183_s14 = int_to_ptr.vmem [resolvable:$true] %s198_s14 }
  0x14   : > { %s12185_s16 = scalar_lea.sflag [#allocation5], %s187_s7  ;;  %s11977_s17 = scalar_lea.hbm %s12175_s12, 4096 }
  0x15   : > { %p11978_p0 = scmp.ne.s32.totalorder %s12175_s12, %s11977_s17  ;;  %p11979_p1 = pneg %p12179_p13 }
  0x16   : > { %s11982_s26 = scalar_lea.hbm %s15553_s0, 8192  ;;  %p11983_p4 = scmp.lt.u32.totalorder %s12175_s12, %s15553_s0 }
  0x17   : > { %p11980_p2 = pnand %p11979_p1, %p11978_p0  ;;  %p11984_p5 = scmp.lt.u32.totalorder %s11982_s26, %s11977_s17 }
  0x18   : > { %p11986_p8 = scmp.lt.u32.totalorder %s11977_s17, %s12175_s12 }
  0x19   : > { %p11981_p3 = pneg %p11980_p2  ;;  %p11985_p7 = por %p11984_p5, %p11983_p4 }
  0x1b   : > { %p11987_p10 = por %p11986_p8, %p11985_p7 }
  0x1d   : > { %p11988_p9 = pnand %p11987_p10, %p11981_p3 }
  0x1f   : > { %11991 = shalt.err (!%p11988_p9)
}
  0x20   : > { %s11992_s7 = scalar_lea.vmem %s12183_s14, 4096  ;;  %s12075_s9 = smov [#allocation4]  }
  0x21   : > { %p11993_p0 = scmp.ne.s32.totalorder %s12183_s14, %s11992_s7  ;;  %s11997_s10 = sshll.u32 %s12075_s9, 4  ;;  %s11998_s10 = int_to_ptr.vmem [resolvable:$false] %s11997_s10 }
  0x22   : > { %s11999_s11 = scalar_lea.vmem %s11998_s10, 8192  ;;  %p12000_p11 = scmp.lt.s32.totalorder %s12183_s14, %s11998_s10 }
  0x23   : > { %p11995_p2 = pnand %p11993_p0, %p11979_p1  ;;  %p12001_p4 = scmp.lt.s32.totalorder %s11999_s11, %s11992_s7 }
  0x25   : > { %p11996_p12 = pneg %p11995_p2  ;;  %p12002_p5 = por %p12001_p4, %p12000_p11 }
  0x27   : > { %p12003_p7 = pnand %p12002_p5, %p11996_p12 }
  0x29   : > { %12006 = shalt.err (!%p12003_p7)
}
  0x2a   : > { %s12076_s13 = smov 128   ;;  %s12077_s17 = smov 8  }
  0x2b   : > { %11445 = dma.hbm_to_vmem [thread:$0]  (!%p12179_p13), %s12175_s12, 4096, %s12183_s14, %s12185_s16, %s12076_s13, %s12076_s13, %s12077_s17  }
  0x2c   : > { %p8900_p9 = scmp.ge.s32.totalorder %s12073_s21, 1  ;;  %p206_p1 = scmp.lt.s32.totalorder %s12073_s21, 3 }
  0x2e   : > { %p207_p3 = pnand %p8900_p9, %p206_p1 }
  0x30   : > { %210 = sbr.rel (%p207_p3) target bundleno = 2073 (0x819), region = 40 }
  0x37   : > { %s12216_s23 = sand.u32 1, %s12065_s19  }
  0x38   : > { %s8901_s25 = sshll.u32 %s12216_s23, 8  ;;  %s213_s26 = scalar_lea.sflag [#allocation5], %s12216_s23 }
  0x39   : > { %s12222_s28 = scalar_lea.vmem [#allocation4], %s8901_s25 }
  0x3a   : > { %12052 = dma.done.wait (%p12155_p6), %s213_s26, 4096  }
  0x3b   : > { %12054 = vsyncadd (%p12155_p6), %s213_s26, 4294963200  ;;  %vm15560_vm0 = vcmask 523264   ;;  %vm15561_vm1 = vcmask 261120   ;;  %v12078_v0 = vmov 0.0   ;;  %v11489_v1 = vld [vmem:[%s15554_s1] sm:$0xff]   ;;  %v11490_v2 = vld [vmem:[%s15554_s1 + $0x8] sm:$0xff]  }
  0x3c   : > { %245 = vst.msk [vmem:[#allocation2] sm:$0xff] %vm15560_vm0, %v12078_v0  ;;  %246 = vst.msk [vmem:[#allocation2 + $0x8] sm:$0xff] %vm15560_vm0, %v12078_v0  ;;  %9962 = vmatprep.subr.bf16.mxu0 %v11489_v1  ;;  %v11491_v3 = vld [vmem:[%s15554_s1 + $0x10] sm:$0xff]   ;;  %v290_v8 = vld [vmem:[%s12222_s28 + $0x8] sm:$0xff]  ;;  %s15282_s10 = scalar_lea.vmem [#allocation7], %s8901_s25  ;;  %s9583_s25 = sshll.u32 %s12133_s22, 12 }
  0x3d   : > { %247 = vst.msk [vmem:[#allocation2 + $0x10] sm:$0xff] %vm15560_vm0, %v12078_v0  ;;  %248 = vst.msk [vmem:[#allocation2 + $0x18] sm:$0xff] %vm15560_vm0, %v12078_v0  ;;  %9963 = vmatpush3.bf16.msra.mxu0 %v11489_v1  ;;  %v289_v6 = vld [vmem:[%s12222_s28] sm:$0xff]  ;;  %v11492_v9 = vld [vmem:[%s15554_s1 + $0x18] sm:$0xff]   ;;  %s8821_s11 = sshll.u32 %s15282_s10, 4  ;;  %s15499_s13 = scalar_lea.hbm %s15558_s5, %s9583_s25  ;;  %s15501_s11 = int_to_ptr.vmem [resolvable:$true] %s8821_s11 }
  0x3e   : > { %249 = vst.msk [vmem:[#allocation2 + $0x20] sm:$0xff] %vm15560_vm0, %v12078_v0  ;;  %250 = vst.msk [vmem:[#allocation2 + $0x28] sm:$0xff] %vm15560_vm0, %v12078_v0  ;;  %9964 = vmatprep.subr.bf16.mxu0 %v11490_v2  ;;  %v8903_v10 = vld [vmem:[%s12222_s28 + $0x10] sm:$0xff]  ;;  %v8904_v11 = vld [vmem:[%s12222_s28 + $0x18] sm:$0xff]  ;;  %s8808_s17 = scalar_lea.sflag [#allocation6], %s12216_s23  ;;  %s12007_s26 = scalar_lea.vmem %s15501_s11, 4096 }
  0x3f   : > { %251 = vst.msk [vmem:[#allocation2 + $0x30] sm:$0xff] %vm15560_vm0, %v12078_v0  ;;  %252 = vst.msk [vmem:[#allocation2 + $0x38] sm:$0xff] %vm15560_vm0, %v12078_v0  ;;  %v8905_v12 = vld [vmem:[%s12222_s28 + $0x20] sm:$0xff]  ;;  %v8906_v13 = vld [vmem:[%s12222_s28 + $0x28] sm:$0xff]  ;;  %p12008_p6 = scmp.ne.s32.totalorder %s15501_s11, %s12007_s26  ;;  %p16472_p11 = scmp.ne.s32.totalorder %s15731_s30, 0 }
  0x40   : > { %253 = vst.msk [vmem:[#allocation2 + $0x40] sm:$0xff] %vm15560_vm0, %v12078_v0  ;;  %254 = vst.msk [vmem:[#allocation2 + $0x48] sm:$0xff] %vm15560_vm0, %v12078_v0  ;;  %v8907_v14 = vld [vmem:[%s12222_s28 + $0x30] sm:$0xff]  ;;  %v8908_v15 = vld [vmem:[%s12222_s28 + $0x38] sm:$0xff]  ;;  %s12079_s29 = smov [#allocation7]  }
  0x41   : > { %255 = vst.msk [vmem:[#allocation2 + $0x50] sm:$0xff] %vm15560_vm0, %v12078_v0  ;;  %256 = vst.msk [vmem:[#allocation2 + $0x58] sm:$0xff] %vm15560_vm0, %v12078_v0  ;;  %9965 = vmatpush3.bf16.msra.mxu0 %v11490_v2  ;;  %v8909_v16 = vld [vmem:[%s12222_s28 + $0x40] sm:$0xff]  ;;  %v8910_v17 = vld [vmem:[%s12222_s28 + $0x48] sm:$0xff]  ;;  %p12009_p12 = pnand %p12008_p6, %p16472_p11  ;;  %s12011_s12 = sshll.u32 %s12079_s29, 4  ;;  %s12012_s12 = int_to_ptr.vmem [resolvable:$false] %s12011_s12 }
  0x42   : > { %257 = vst.msk [vmem:[#allocation2 + $0x60] sm:$0xff] %vm15560_vm0, %v12078_v0  ;;  %258 = vst.msk [vmem:[#allocation2 + $0x68] sm:$0xff] %vm15560_vm0, %v12078_v0  ;;  %9966 = vmatprep.subr.bf16.mxu0 %v11491_v3  ;;  %v11493_v18 = vld [vmem:[%s15554_s1 + $0x20] sm:$0xff]   ;;  %v8912_v20 = vld [vmem:[%s12222_s28 + $0x58] sm:$0xff]  ;;  %s12013_s14 = scalar_lea.vmem %s12012_s12, 8192  ;;  %p12014_p8 = scmp.lt.s32.totalorder %s15501_s11, %s12012_s12 }
  0x43   : > { %259 = vst.msk [vmem:[#allocation2 + $0x70] sm:$0xff] %vm15560_vm0, %v12078_v0  ;;  %260 = vst.msk [vmem:[#allocation2 + $0x78] sm:$0xff] %vm15560_vm0, %v12078_v0  ;;  %v1024_v4 = vld [vmem:[#allocation2] sm:$0xff]  ;;  %v1025_v5 = vld [vmem:[#allocation2 + $0x8] sm:$0xff]  ;;  %p12010_p13 = pneg %p12009_p12  ;;  %p12015_p10 = scmp.lt.s32.totalorder %s12013_s14, %s12007_s26 }
  0x44   : > { %261 = vst.msk [vmem:[#allocation2 + $0x80] sm:$0xff] %vm15560_vm0, %v12078_v0  ;;  %262 = vst.msk [vmem:[#allocation2 + $0x88] sm:$0xff] %vm15560_vm0, %v12078_v0  ;;  %v1060_v7 = vpack.c.bf16 %v1025_v5, %v1024_v4  ;;  %v8911_v19 = vld [vmem:[%s12222_s28 + $0x50] sm:$0xff]  ;;  %v8913_v21 = vld [vmem:[%s12222_s28 + $0x60] sm:$0xff] }
  0x45   : > { %263 = vst.msk [vmem:[#allocation2 + $0x90] sm:$0xff] %vm15560_vm0, %v12078_v0  ;;  %264 = vst.msk [vmem:[#allocation2 + $0x98] sm:$0xff] %vm15560_vm0, %v12078_v0  ;;  %9967 = vmatpush3.bf16.msra.mxu0 %v11491_v3  ;;  %v8914_v22 = vld [vmem:[%s12222_s28 + $0x68] sm:$0xff]  ;;  %v8915_v23 = vld [vmem:[%s12222_s28 + $0x70] sm:$0xff]  ;;  %p12016_p0 = por %p12015_p10, %p12014_p8 }
  0x46   : > { %265 = vst.msk [vmem:[#allocation2 + $0xa0] sm:$0xff] %vm15560_vm0, %v12078_v0  ;;  %266 = vst.msk [vmem:[#allocation2 + $0xa8] sm:$0xff] %vm15560_vm0, %v12078_v0  ;;  %9970 = vmatprep.mubr.msk.bf16.mxu0 %vm15560_vm0, %v1060_v7  ;;  %v8916_v24 = vld [vmem:[%s12222_s28 + $0x78] sm:$0xff]  ;;  %9968 = vmatprep.subr.bf16.mxu0 %v11492_v9  ;;  %v8917_v27 = vld [vmem:[%s12222_s28 + $0x80] sm:$0xff] }
  0x47   : > { %267 = vst.msk [vmem:[#allocation2 + $0xb0] sm:$0xff] %vm15560_vm0, %v12078_v0  ;;  %268 = vst.msk [vmem:[#allocation2 + $0xb8] sm:$0xff] %vm15560_vm0, %v12078_v0  ;;  %v8918_v31 = vld [vmem:[%s12222_s28 + $0x88] sm:$0xff]  ;;  %v11494_v33 = vld [vmem:[%s15554_s1 + $0x28] sm:$0xff]   ;;  %p12017_p2 = pnand %p12016_p0, %p12010_p13 }
  0x48   : > { %269 = vst.msk [vmem:[#allocation2 + $0xc0] sm:$0xff] %vm15560_vm0, %v12078_v0  ;;  %270 = vst.msk [vmem:[#allocation2 + $0xc8] sm:$0xff] %vm15560_vm0, %v12078_v0  ;;  %v8919_v34 = vld [vmem:[%s12222_s28 + $0x90] sm:$0xff]  ;;  %v8920_v35 = vld [vmem:[%s12222_s28 + $0x98] sm:$0xff] }
  0x49   : > { %271 = vst.msk [vmem:[#allocation2 + $0xd0] sm:$0xff] %vm15560_vm0, %v12078_v0  ;;  %272 = vst.msk [vmem:[#allocation2 + $0xd8] sm:$0xff] %vm15560_vm0, %v12078_v0  ;;  %9969 = vmatpush3.bf16.msra.mxu0 %v11492_v9  ;;  %v11495_v36 = vld [vmem:[%s15554_s1 + $0x30] sm:$0xff]   ;;  %v8922_v42 = vld [vmem:[%s12222_s28 + $0xa8] sm:$0xff] }
  0x4a   : > { %273 = vst.msk [vmem:[#allocation2 + $0xe0] sm:$0xff] %vm15560_vm0, %v12078_v0  ;;  %274 = vst.msk [vmem:[#allocation2 + $0xe8] sm:$0xff] %vm15560_vm0, %v12078_v0  ;;  %10006 = vmatprep.subr.bf16.mxu0 %v11493_v18  ;;  %v8921_v41 = vld [vmem:[%s12222_s28 + $0xa0] sm:$0xff]  ;;  %v8923_v43 = vld [vmem:[%s12222_s28 + $0xb0] sm:$0xff] }
  0x4b   : > { %275 = vst.msk [vmem:[#allocation2 + $0xf0] sm:$0xff] %vm15560_vm0, %v12078_v0  ;;  %276 = vst.msk [vmem:[#allocation2 + $0xf8] sm:$0xff] %vm15560_vm0, %v12078_v0  ;;  %v11496_v45 = vld [vmem:[%s15554_s1 + $0x38] sm:$0xff]   ;;  %v8924_v47 = vld [vmem:[%s12222_s28 + $0xb8] sm:$0xff] }
  0x4c   : > { %277 = vst.msk [vmem:[#allocation2 + $0x100] sm:$0xff] %vm15560_vm0, %v12078_v0  ;;  %278 = vst.msk [vmem:[#allocation2 + $0x108] sm:$0xff] %vm15560_vm0, %v12078_v0  ;;  %v8925_v48 = vld [vmem:[%s12222_s28 + $0xc0] sm:$0xff]  ;;  %v8926_v49 = vld [vmem:[%s12222_s28 + $0xc8] sm:$0xff] }
  0x4d   : > { %279 = vst.msk [vmem:[#allocation2 + $0x110] sm:$0xff] %vm15560_vm0, %v12078_v0  ;;  %280 = vst.msk [vmem:[#allocation2 + $0x118] sm:$0xff] %vm15560_vm0, %v12078_v0  ;;  %v8927_v50 = vld [vmem:[%s12222_s28 + $0xd0] sm:$0xff]  ;;  %v8928_v51 = vld [vmem:[%s12222_s28 + $0xd8] sm:$0xff] }
  0x4e   : > { %281 = vst.msk [vmem:[#allocation2 + $0x120] sm:$0xff] %vm15560_vm0, %v12078_v0  ;;  %282 = vst.msk [vmem:[#allocation2 + $0x128] sm:$0xff] %vm15560_vm0, %v12078_v0  ;;  %v8929_v52 = vld [vmem:[%s12222_s28 + $0xe0] sm:$0xff]  ;;  %v8930_v53 = vld [vmem:[%s12222_s28 + $0xe8] sm:$0xff] }
  0x4f   : > { %283 = vst.msk [vmem:[#allocation2 + $0x130] sm:$0xff] %vm15560_vm0, %v12078_v0  ;;  %284 = vst.msk [vmem:[#allocation2 + $0x138] sm:$0xff] %vm15560_vm0, %v12078_v0  ;;  %v12484_v58 = vld [vmem:[%s15554_s1 + $0x40] sm:$0xff]  }
  0x50   : > { %285 = vst.msk [vmem:[#allocation2 + $0x140] sm:$0xff] %vm15560_vm0, %v12078_v0  ;;  %291 = vst.msk [vmem:[#allocation2 + $0x13] sm:$0xff] %vm15560_vm0, %v289_v6 }
  0x51   : > { %4570 = vst.msk [vmem:[#allocation3] sm:$0xff] %vm15561_vm1, %v12078_v0  ;;  %4571 = vst.msk [vmem:[#allocation3 + $0x8] sm:$0xff] %vm15561_vm1, %v12078_v0 }
  0x52   : > { %4572 = vst.msk [vmem:[#allocation3 + $0x10] sm:$0xff] %vm15561_vm1, %v12078_v0  ;;  %4573 = vst.msk [vmem:[#allocation3 + $0x18] sm:$0xff] %vm15561_vm1, %v12078_v0 }
  0x53   : > { %4574 = vst.msk [vmem:[#allocation3 + $0x20] sm:$0xff] %vm15561_vm1, %v12078_v0  ;;  %4575 = vst.msk [vmem:[#allocation3 + $0x28] sm:$0xff] %vm15561_vm1, %v12078_v0 }
  0x54   : > { %4576 = vst.msk [vmem:[#allocation3 + $0x30] sm:$0xff] %vm15561_vm1, %v12078_v0  ;;  %4577 = vst.msk [vmem:[#allocation3 + $0x38] sm:$0xff] %vm15561_vm1, %v12078_v0 }
  0x55   : > { %4578 = vst.msk [vmem:[#allocation3 + $0x40] sm:$0xff] %vm15561_vm1, %v12078_v0  ;;  %4579 = vst.msk [vmem:[#allocation3 + $0x48] sm:$0xff] %vm15561_vm1, %v12078_v0 }
  0x56   : > { %4580 = vst.msk [vmem:[#allocation3 + $0x50] sm:$0xff] %vm15561_vm1, %v12078_v0  ;;  %4581 = vst.msk [vmem:[#allocation3 + $0x58] sm:$0xff] %vm15561_vm1, %v12078_v0 }
  0x57   : > { %4582 = vst.msk [vmem:[#allocation3 + $0x60] sm:$0xff] %vm15561_vm1, %v12078_v0  ;;  %4583 = vst.msk [vmem:[#allocation3 + $0x68] sm:$0xff] %vm15561_vm1, %v12078_v0  ;;  %v1026_v25 = vld [vmem:[#allocation2 + $0x10] sm:$0xff] }
  0x58   : > { %4584 = vst.msk [vmem:[#allocation3 + $0x70] sm:$0xff] %vm15561_vm1, %v12078_v0  ;;  %4585 = vst.msk [vmem:[#allocation3 + $0x78] sm:$0xff] %vm15561_vm1, %v12078_v0 }
  0x59   : > { %4586 = vst.msk [vmem:[#allocation3 + $0x80] sm:$0xff] %vm15561_vm1, %v12078_v0  ;;  %4587 = vst.msk [vmem:[#allocation3 + $0x88] sm:$0xff] %vm15561_vm1, %v12078_v0 }
  0x5a   : > { %4588 = vst.msk [vmem:[#allocation3 + $0x90] sm:$0xff] %vm15561_vm1, %v12078_v0  ;;  %4589 = vst.msk [vmem:[#allocation3 + $0x98] sm:$0xff] %vm15561_vm1, %v12078_v0 }
  0x5b   : > { %4590 = vst.msk [vmem:[#allocation3 + $0xa0] sm:$0xff] %vm15561_vm1, %v12078_v0  ;;  %4591 = vst.msk [vmem:[#allocation3 + $0xa8] sm:$0xff] %vm15561_vm1, %v12078_v0 }
  0x5c   : > { %4592 = vst.msk [vmem:[#allocation3 + $0xb0] sm:$0xff] %vm15561_vm1, %v12078_v0  ;;  %4593 = vst.msk [vmem:[#allocation3 + $0xb8] sm:$0xff] %vm15561_vm1, %v12078_v0 }
  0x5d   : > { %4594 = vst.msk [vmem:[#allocation3 + $0xc0] sm:$0xff] %vm15561_vm1, %v12078_v0  ;;  %4595 = vst.msk [vmem:[#allocation3 + $0xc8] sm:$0xff] %vm15561_vm1, %v12078_v0 }
  0x5e   : > { %4596 = vst.msk [vmem:[#allocation3 + $0xd0] sm:$0xff] %vm15561_vm1, %v12078_v0  ;;  %4597 = vst.msk [vmem:[#allocation3 + $0xd8] sm:$0xff] %vm15561_vm1, %v12078_v0 }
  0x5f   : > { %4598 = vst.msk [vmem:[#allocation3 + $0xe0] sm:$0xff] %vm15561_vm1, %v12078_v0  ;;  %4599 = vst.msk [vmem:[#allocation3 + $0xe8] sm:$0xff] %vm15561_vm1, %v12078_v0 }
  0x60   : > { %4600 = vst.msk [vmem:[#allocation3 + $0xf0] sm:$0xff] %vm15561_vm1, %v12078_v0  ;;  %4601 = vst.msk [vmem:[#allocation3 + $0xf8] sm:$0xff] %vm15561_vm1, %v12078_v0 }
  0x61   : > { %4602 = vst.msk [vmem:[#allocation3 + $0x100] sm:$0xff] %vm15561_vm1, %v12078_v0  ;;  %4603 = vst.msk [vmem:[#allocation3 + $0x108] sm:$0xff] %vm15561_vm1, %v12078_v0 }
  0x62   : > { %4604 = vst.msk [vmem:[#allocation3 + $0x110] sm:$0xff] %vm15561_vm1, %v12078_v0  ;;  %4605 = vst.msk [vmem:[#allocation3 + $0x118] sm:$0xff] %vm15561_vm1, %v12078_v0 }
  0x63   : > { %4606 = vst.msk [vmem:[#allocation3 + $0x120] sm:$0xff] %vm15561_vm1, %v12078_v0  ;;  %4607 = vst.msk [vmem:[#allocation3 + $0x128] sm:$0xff] %vm15561_vm1, %v12078_v0 }
  0x64   : > { %4608 = vst.msk [vmem:[#allocation3 + $0x130] sm:$0xff] %vm15561_vm1, %v12078_v0  ;;  %4609 = vst.msk [vmem:[#allocation3 + $0x138] sm:$0xff] %vm15561_vm1, %v12078_v0 }
  0x65   : > { %4610 = vst.msk [vmem:[#allocation3 + $0x140] sm:$0xff] %vm15561_vm1, %v12078_v0 }
  0x66   : > { %292 = vst.msk [vmem:[#allocation2 + $0x1b] sm:$0xff] %vm15560_vm0, %v290_v8  ;;  %296 = vst.msk [vmem:[#allocation2 + $0x25] sm:$0xff] %vm15560_vm0, %v8903_v10 }
  0x67   : > { %297 = vst.msk [vmem:[#allocation2 + $0x2d] sm:$0xff] %vm15560_vm0, %v8904_v11  ;;  %301 = vst.msk [vmem:[#allocation2 + $0x37] sm:$0xff] %vm15560_vm0, %v8905_v12 }
  0x68   : > { %302 = vst.msk [vmem:[#allocation2 + $0x3f] sm:$0xff] %vm15560_vm0, %v8906_v13  ;;  %306 = vst.msk [vmem:[#allocation2 + $0x49] sm:$0xff] %vm15560_vm0, %v8907_v14 }
  0x69   : > { %307 = vst.msk [vmem:[#allocation2 + $0x51] sm:$0xff] %vm15560_vm0, %v8908_v15  ;;  %311 = vst.msk [vmem:[#allocation2 + $0x5b] sm:$0xff] %vm15560_vm0, %v8909_v16 }
  0x6a   : > { %312 = vst.msk [vmem:[#allocation2 + $0x63] sm:$0xff] %vm15560_vm0, %v8910_v17  ;;  %316 = vst.msk [vmem:[#allocation2 + $0x6d] sm:$0xff] %vm15560_vm0, %v8911_v19 }
  0x6b   : > { %317 = vst.msk [vmem:[#allocation2 + $0x75] sm:$0xff] %vm15560_vm0, %v8912_v20  ;;  %321 = vst.msk [vmem:[#allocation2 + $0x7f] sm:$0xff] %vm15560_vm0, %v8913_v21 }
  0x6c   : > { %322 = vst.msk [vmem:[#allocation2 + $0x87] sm:$0xff] %vm15560_vm0, %v8914_v22  ;;  %326 = vst.msk [vmem:[#allocation2 + $0x91] sm:$0xff] %vm15560_vm0, %v8915_v23 }
  0x6d   : > { %327 = vst.msk [vmem:[#allocation2 + $0x99] sm:$0xff] %vm15560_vm0, %v8916_v24  ;;  %v1027_v26 = vld [vmem:[#allocation2 + $0x18] sm:$0xff]  ;;  %v1028_v29 = vld [vmem:[#allocation2 + $0x20] sm:$0xff]  ;;  %331 = vst.msk [vmem:[#allocation2 + $0xa3] sm:$0xff] %vm15560_vm0, %v8917_v27 }
  0x6e   : > { %v1061_v28 = vpack.c.bf16 %v1027_v26, %v1026_v25  ;;  %v1029_v30 = vld [vmem:[#allocation2 + $0x28] sm:$0xff]  ;;  %332 = vst.msk [vmem:[#allocation2 + $0xab] sm:$0xff] %vm15560_vm0, %v8918_v31  ;;  %336 = vst.msk [vmem:[#allocation2 + $0xb5] sm:$0xff] %vm15560_vm0, %v8919_v34  ;;  %v1030_v37 = vld [vmem:[#allocation2 + $0x30] sm:$0xff] }
  0x6f   : > { %v1062_v32 = vpack.c.bf16 %v1029_v30, %v1028_v29  ;;  %337 = vst.msk [vmem:[#allocation2 + $0xbd] sm:$0xff] %vm15560_vm0, %v8920_v35  ;;  %v1031_v38 = vld [vmem:[#allocation2 + $0x38] sm:$0xff]  ;;  %v1032_v39 = vld [vmem:[#allocation2 + $0x40] sm:$0xff]  ;;  %v1033_v40 = vld [vmem:[#allocation2 + $0x48] sm:$0xff] }
  0x70   : > { %9971 = vmatmul.mubr.msk.bf16.vlgmr.msra.gmra.mrb[0].mxu0 %vm15560_vm0, %v1061_v28  ;;  %341 = vst.msk [vmem:[#allocation2 + $0xc7] sm:$0xff] %vm15560_vm0, %v8921_v41  ;;  %342 = vst.msk [vmem:[#allocation2 + $0xcf] sm:$0xff] %vm15560_vm0, %v8922_v42  ;;  %v1063_v44 = vpack.c.bf16 %v1031_v38, %v1030_v37  ;;  %v1064_v46 = vpack.c.bf16 %v1033_v40, %v1032_v39  ;;  %v1034_v54 = vld [vmem:[#allocation2 + $0x50] sm:$0xff]  ;;  %v1035_v55 = vld [vmem:[#allocation2 + $0x58] sm:$0xff] }
  0x71   : > { %10007 = vmatpush3.bf16.msra.mxu0 %v11493_v18  ;;  %9974 = vmatprep.mubr.msk.bf16.mxu0 %vm15560_vm0, %v1062_v32  ;;  %346 = vst.msk [vmem:[#allocation2 + $0xd9] sm:$0xff] %vm15560_vm0, %v8923_v43  ;;  %347 = vst.msk [vmem:[#allocation2 + $0xe1] sm:$0xff] %vm15560_vm0, %v8924_v47  ;;  %v1036_v56 = vld [vmem:[#allocation2 + $0x60] sm:$0xff]  ;;  %v1037_v57 = vld [vmem:[#allocation2 + $0x68] sm:$0xff]  ;;  %v1065_v59 = vpack.c.bf16 %v1035_v55, %v1034_v54 }
  0x72   : > { %10008 = vmatprep.subr.bf16.mxu0 %v11494_v33  ;;  %351 = vst.msk [vmem:[#allocation2 + $0xeb] sm:$0xff] %vm15560_vm0, %v8925_v48  ;;  %352 = vst.msk [vmem:[#allocation2 + $0xf3] sm:$0xff] %vm15560_vm0, %v8926_v49  ;;  %v1066_v60 = vpack.c.bf16 %v1037_v57, %v1036_v56  ;;  %v1038_v61 = vld [vmem:[#allocation2 + $0x70] sm:$0xff]  ;;  %v1039_v62 = vld [vmem:[#allocation2 + $0x78] sm:$0xff] }
  0x73   : > { %356 = vst.msk [vmem:[#allocation2 + $0xfd] sm:$0xff] %vm15560_vm0, %v8927_v50  ;;  %357 = vst.msk [vmem:[#allocation2 + $0x105] sm:$0xff] %vm15560_vm0, %v8928_v51  ;;  %v1040_v63 = vld [vmem:[#allocation2 + $0x80] sm:$0xff]  ;;  %v1041_v0 = vld [vmem:[#allocation2 + $0x88] sm:$0xff]  ;;  %v1067_v1 = vpack.c.bf16 %v1039_v62, %v1038_v61 }
  0x74   : > { %361 = vst.msk [vmem:[#allocation2 + $0x10f] sm:$0xff] %vm15560_vm0, %v8929_v52  ;;  %362 = vst.msk [vmem:[#allocation2 + $0x117] sm:$0xff] %vm15560_vm0, %v8930_v53  ;;  %v1068_v2 = vpack.c.bf16 %v1041_v0, %v1040_v63  ;;  %v1042_v3 = vld [vmem:[#allocation2 + $0x90] sm:$0xff]  ;;  %v1043_v4 = vld [vmem:[#allocation2 + $0x98] sm:$0xff] }
  0x75   : > { %10009 = vmatpush3.bf16.msra.mxu0 %v11494_v33  ;;  %v1044_v5 = vld [vmem:[#allocation2 + $0xa0] sm:$0xff]  ;;  %v1045_v6 = vld [vmem:[#allocation2 + $0xa8] sm:$0xff]  ;;  %v1069_v7 = vpack.c.bf16 %v1043_v4, %v1042_v3  ;;  %v1046_v9 = vld [vmem:[#allocation2 + $0xb0] sm:$0xff] }
  0x76   : > { %10010 = vmatprep.subr.bf16.mxu0 %v11495_v36  ;;  %v1070_v8 = vpack.c.bf16 %v1045_v6, %v1044_v5  ;;  %v1047_v10 = vld [vmem:[#allocation2 + $0xb8] sm:$0xff]  ;;  %v1377_v27 = vld [vmem:[#allocation2 + $0x1] sm:$0xff]  ;;  %v1378_v28 = vld [vmem:[#allocation2 + $0x9] sm:$0xff] }
  0x77   : > { %v1048_v11 = vld [vmem:[#allocation2 + $0xc0] sm:$0xff]  ;;  %v1049_v12 = vld [vmem:[#allocation2 + $0xc8] sm:$0xff]  ;;  %v1071_v13 = vpack.c.bf16 %v1047_v10, %v1046_v9  ;;  %v1050_v15 = vld [vmem:[#allocation2 + $0xd0] sm:$0xff]  ;;  %v1413_v32 = vpack.c.bf16 %v1378_v28, %v1377_v27 }
  0x78   : > { %9975 = vmatmul.mubr.msk.bf16.gmra.mrb[4].mxu0 %vm15560_vm0, %v1063_v44  ;;  %v1072_v14 = vpack.c.bf16 %v1049_v12, %v1048_v11  ;;  %v1051_v16 = vld [vmem:[#allocation2 + $0xd8] sm:$0xff]  ;;  %v1052_v17 = vld [vmem:[#allocation2 + $0xe0] sm:$0xff]  ;;  %v11498_v40 = vld [vmem:[%s15554_s1 + $0x48] sm:$0xff]  }
  0x79   : > { %9978 = vmatprep.mubr.msk.bf16.mxu0 %vm15560_vm0, %v1064_v46  ;;  %10011 = vmatpush3.bf16.msra.mxu0 %v11495_v36  ;;  %v1053_v18 = vld [vmem:[#allocation2 + $0xe8] sm:$0xff]  ;;  %v1073_v19 = vpack.c.bf16 %v1051_v16, %v1050_v15  ;;  %v1054_v21 = vld [vmem:[#allocation2 + $0xf0] sm:$0xff]  ;;  %v1380_v34 = vld [vmem:[#allocation2 + $0x19] sm:$0xff] }
  0x7a   : > { %10012 = vmatprep.subr.bf16.mxu0 %v11496_v45  ;;  %v1074_v20 = vpack.c.bf16 %v1053_v18, %v1052_v17  ;;  %v1055_v22 = vld [vmem:[#allocation2 + $0xf8] sm:$0xff]  ;;  %v1056_v23 = vld [vmem:[#allocation2 + $0x100] sm:$0xff]  ;;  %v1382_v36 = vld [vmem:[#allocation2 + $0x29] sm:$0xff] }
  0x7b   : > { %v1057_v24 = vld [vmem:[#allocation2 + $0x108] sm:$0xff]  ;;  %v1075_v25 = vpack.c.bf16 %v1055_v22, %v1054_v21  ;;  %v1058_v29 = vld [vmem:[#allocation2 + $0x110] sm:$0xff]  ;;  %v1059_v30 = vld [vmem:[#allocation2 + $0x118] sm:$0xff] }
  0x7c   : > { %v1076_v26 = vpack.c.bf16 %v1057_v24, %v1056_v23  ;;  %v1077_v31 = vpack.c.bf16 %v1059_v30, %v1058_v29  ;;  %v1379_v33 = vld [vmem:[#allocation2 + $0x11] sm:$0xff]  ;;  %v1381_v35 = vld [vmem:[#allocation2 + $0x21] sm:$0xff]  ;;  %v1384_v42 = vld [vmem:[#allocation2 + $0x39] sm:$0xff] }
  0x7d   : > { %10013 = vmatpush3.bf16.msra.mxu0 %v11496_v45  ;;  %v1414_v37 = vpack.c.bf16 %v1380_v34, %v1379_v33  ;;  %v1415_v38 = vpack.c.bf16 %v1382_v36, %v1381_v35  ;;  %v8931_v39 = vld [vmem:[%s12222_s28 + $0xf0] sm:$0xff]  ;;  %v1383_v41 = vld [vmem:[#allocation2 + $0x31] sm:$0xff]  ;;  %v1386_v44 = vld [vmem:[#allocation2 + $0x49] sm:$0xff] }
  0x7e   : > { %10050 = vmatprep.subr.bf16.mxu0 %v12484_v58  ;;  %366 = vst.msk [vmem:[#allocation2 + $0x121] sm:$0xff] %vm15560_vm0, %v8931_v39  ;;  %v1385_v43 = vld [vmem:[#allocation2 + $0x41] sm:$0xff]  ;;  %v11499_v45 = vld [vmem:[%s15554_s1 + $0x50] sm:$0xff]   ;;  %v1416_v46 = vpack.c.bf16 %v1384_v42, %v1383_v41  ;;  %v11500_v48 = vld [vmem:[%s15554_s1 + $0x58] sm:$0xff]  }
  0x7f   : > { %v1417_v47 = vpack.c.bf16 %v1386_v44, %v1385_v43  ;;  %v1387_v49 = vld [vmem:[#allocation2 + $0x51] sm:$0xff]  ;;  %v1388_v50 = vld [vmem:[#allocation2 + $0x59] sm:$0xff]  ;;  %v1389_v51 = vld [vmem:[#allocation2 + $0x61] sm:$0xff] }
  0x80   : > { %9979 = vmatmul.mubr.msk.bf16.gmra.mrb[8].mxu0 %vm15560_vm0, %v1065_v59  ;;  %v1390_v52 = vld [vmem:[#allocation2 + $0x69] sm:$0xff]  ;;  %v12520_v53 = vld [vmem:[%s15554_s1 + $0x60] sm:$0xff]   ;;  %v1418_v54 = vpack.c.bf16 %v1388_v50, %v1387_v49  ;;  %v1391_v56 = vld [vmem:[#allocation2 + $0x71] sm:$0xff] }
  0x81   : > { %9982 = vmatprep.mubr.msk.bf16.mxu0 %vm15560_vm0, %v1066_v60  ;;  %v1419_v55 = vpack.c.bf16 %v1390_v52, %v1389_v51  ;;  %v1392_v57 = vld [vmem:[#allocation2 + $0x79] sm:$0xff]  ;;  %v1394_v59 = vld [vmem:[#allocation2 + $0x89] sm:$0xff]  ;;  %v1395_v62 = vld [vmem:[#allocation2 + $0x91] sm:$0xff] }
  0x82   : > { %v1420_v60 = vpack.c.bf16 %v1392_v57, %v1391_v56  ;;  %v1396_v63 = vld [vmem:[#allocation2 + $0x99] sm:$0xff]  ;;  %v1397_v0 = vld [vmem:[#allocation2 + $0xa1] sm:$0xff]  ;;  %v1399_v4 = vld [vmem:[#allocation2 + $0xb1] sm:$0xff] }
  0x83   : > { %v1400_v5 = vld [vmem:[#allocation2 + $0xb9] sm:$0xff]  ;;  %v1401_v6 = vld [vmem:[#allocation2 + $0xc1] sm:$0xff]  ;;  %v1403_v10 = vld [vmem:[#allocation2 + $0xd1] sm:$0xff] }
  0x84   : > { %v1404_v11 = vld [vmem:[#allocation2 + $0xd9] sm:$0xff]  ;;  %v1405_v12 = vld [vmem:[#allocation2 + $0xe1] sm:$0xff]  ;;  %v1407_v16 = vld [vmem:[#allocation2 + $0xf1] sm:$0xff] }
  0x85   : > { %v1408_v17 = vld [vmem:[#allocation2 + $0xf9] sm:$0xff]  ;;  %v1409_v18 = vld [vmem:[#allocation2 + $0x101] sm:$0xff]  ;;  %v1411_v22 = vld [vmem:[#allocation2 + $0x111] sm:$0xff] }
  0x86   : > { %v1412_v23 = vld [vmem:[#allocation2 + $0x119] sm:$0xff]  ;;  %v1731_v24 = vld [vmem:[#allocation2 + $0x2] sm:$0xff]  ;;  %v1740_v39 = vld [vmem:[#allocation2 + $0x4a] sm:$0xff] }
  0x87   : > { %v1733_v28 = vld [vmem:[#allocation2 + $0x12] sm:$0xff]  ;;  %v1734_v29 = vld [vmem:[#allocation2 + $0x1a] sm:$0xff]  ;;  %v1735_v30 = vld [vmem:[#allocation2 + $0x22] sm:$0xff] }
  0x88   : > { %9983 = vmatmul.mubr.msk.bf16.gmra.mrb[12].mxu0 %vm15560_vm0, %v1067_v1  ;;  %v1398_v1 = vld [vmem:[#allocation2 + $0xa9] sm:$0xff]  ;;  %v1737_v36 = vld [vmem:[#allocation2 + $0x32] sm:$0xff]  ;;  %v1746_v52 = vld [vmem:[#allocation2 + $0x7a] sm:$0xff] }
  0x89   : > { %9986 = vmatprep.mubr.msk.bf16.mxu0 %vm15560_vm0, %v1068_v2  ;;  %v1422_v2 = vpack.c.bf16 %v1396_v63, %v1395_v62  ;;  %v1423_v3 = vpack.c.bf16 %v1398_v1, %v1397_v0  ;;  %v8932_v34 = vld [vmem:[%s12222_s28 + $0xf8] sm:$0xff]  ;;  %v11504_v43 = vld [vmem:[%s15554_s1 + $0x78] sm:$0xff]  }
  0x8a   : > { %v11502_v35 = vld [vmem:[%s15554_s1 + $0x68] sm:$0xff]   ;;  %367 = vst.msk [vmem:[#allocation2 + $0x129] sm:$0xff] %vm15560_vm0, %v8932_v34  ;;  %v1741_v44 = vld [vmem:[#allocation2 + $0x52] sm:$0xff]  ;;  %v1754_v0 = vld [vmem:[#allocation2 + $0xba] sm:$0xff] }
  0x8b   : > { %v1745_v51 = vld [vmem:[#allocation2 + $0x72] sm:$0xff]  ;;  %v1755_v1 = vld [vmem:[#allocation2 + $0xc2] sm:$0xff] }
  0x8c   : > { %v1749_v57 = vld [vmem:[#allocation2 + $0x92] sm:$0xff] }
  0x8d   : > { %v1753_v63 = vld [vmem:[#allocation2 + $0xb2] sm:$0xff] }
  0x90   : > { %9987 = vmatmul.mubr.msk.bf16.gmra.mrb[16].mxu0 %vm15560_vm0, %v1069_v7  ;;  %v1402_v7 = vld [vmem:[#allocation2 + $0xc9] sm:$0xff] }
  0x91   : > { %9990 = vmatprep.mubr.msk.bf16.mxu0 %vm15560_vm0, %v1070_v8  ;;  %v1424_v8 = vpack.c.bf16 %v1400_v5, %v1399_v4  ;;  %v1425_v9 = vpack.c.bf16 %v1402_v7, %v1401_v6  ;;  %v1757_v5 = vld [vmem:[#allocation2 + $0xd2] sm:$0xff]  ;;  %v1758_v6 = vld [vmem:[#allocation2 + $0xda] sm:$0xff]  ;;  %v1759_v7 = vld [vmem:[#allocation2 + $0xe2] sm:$0xff] }
  0x98   : > { %9991 = vmatmul.mubr.msk.bf16.gmra.mrb[20].mxu0 %vm15560_vm0, %v1071_v13  ;;  %v1406_v13 = vld [vmem:[#allocation2 + $0xe9] sm:$0xff] }
  0x99   : > { %9994 = vmatprep.mubr.msk.bf16.mxu0 %vm15560_vm0, %v1072_v14  ;;  %v1426_v14 = vpack.c.bf16 %v1404_v11, %v1403_v10  ;;  %v1427_v15 = vpack.c.bf16 %v1406_v13, %v1405_v12  ;;  %v1761_v11 = vld [vmem:[#allocation2 + $0xf2] sm:$0xff]  ;;  %v1762_v12 = vld [vmem:[#allocation2 + $0xfa] sm:$0xff]  ;;  %v1763_v13 = vld [vmem:[#allocation2 + $0x102] sm:$0xff] }
  0xa0   : > { %9995 = vmatmul.mubr.msk.bf16.gmra.mrb[24].mxu0 %vm15560_vm0, %v1073_v19  ;;  %v1410_v19 = vld [vmem:[#allocation2 + $0x109] sm:$0xff] }
  0xa1   : > { %9998 = vmatprep.mubr.msk.bf16.mxu0 %vm15560_vm0, %v1074_v20  ;;  %v1428_v20 = vpack.c.bf16 %v1408_v17, %v1407_v16  ;;  %v1429_v21 = vpack.c.bf16 %v1410_v19, %v1409_v18  ;;  %v1765_v17 = vld [vmem:[#allocation2 + $0x112] sm:$0xff]  ;;  %v1766_v18 = vld [vmem:[#allocation2 + $0x11a] sm:$0xff] }
  0xa2   : > { %v1784_v19 = vpack.c.bf16 %v1766_v18, %v1765_v17  ;;  %v2473_v18 = vld [vmem:[#allocation2 + $0x123] sm:$0xff] }
  0xa8   : > { %9999 = vmatmul.mubr.msk.bf16.gmra.mrb[28].mxu0 %vm15560_vm0, %v1075_v25  ;;  %v1732_v25 = vld [vmem:[#allocation2 + $0xa] sm:$0xff] }
  0xa9   : > { %10002 = vmatprep.mubr.msk.bf16.mxu0 %vm15560_vm0, %v1076_v26  ;;  %v1430_v26 = vpack.c.bf16 %v1412_v23, %v1411_v22  ;;  %v1767_v27 = vpack.c.bf16 %v1732_v25, %v1731_v24  ;;  %v11508_v22 = vld [vmem:[%s15554_s1 + $0x98] sm:$0xff]   ;;  %v11509_v23 = vld [vmem:[%s15554_s1 + $0xa0] sm:$0xff]   ;;  %v2120_v25 = vld [vmem:[#allocation2 + $0x12a] sm:$0xff] }
  0xaa   : > { %v2119_v24 = vld [vmem:[#allocation2 + $0x122] sm:$0xff] }
  0xb0   : > { %10003 = vmatmul.mubr.msk.bf16.gmra.mrb[32].mxu0 %vm15560_vm0, %v1077_v31  ;;  %v1736_v31 = vld [vmem:[#allocation2 + $0x2a] sm:$0xff] }
  0xb1   : > { %10014 = vmatprep.mubr.msk.bf16.mxu0 %vm15560_vm0, %v1413_v32  ;;  %v12537_v32 = vpack.c.bf16 %v1734_v29, %v1733_v28  ;;  %v12539_v33 = vpack.c.bf16 %v1736_v31, %v1735_v30  ;;  %v2138_v28 = vpack.c.bf16 %v2120_v25, %v2119_v24  ;;  %v2441_v30 = vld [vmem:[#allocation2 + $0x23] sm:$0xff]  ;;  %v2442_v31 = vld [vmem:[#allocation2 + $0x2b] sm:$0xff] }
  0xb2   : > { %v2476_v34 = vpack.c.bf16 %v2442_v31, %v2441_v30  ;;  %v2795_v24 = vld [vmem:[#allocation2 + $0x24] sm:$0xff]  ;;  %v2796_v25 = vld [vmem:[#allocation2 + $0x2c] sm:$0xff] }
  0xb3   : > { %v11514_v30 = vld [vmem:[%s15554_s1 + $0xc8] sm:$0xff]  }
  0xb4   : > { %v2799_v31 = vld [vmem:[#allocation2 + $0x44] sm:$0xff] }
  0xb8   : > { %10015 = vmatmul.mubr.msk.bf16.vlgmr.msra.gmra.mrb[0].mxu0 %vm15560_vm0, %v1414_v37  ;;  %v1738_v37 = vld [vmem:[#allocation2 + $0x3a] sm:$0xff] }
  0xb9   : > { %10051 = vmatpush3.bf16.msra.mxu0 %v12484_v58  ;;  %10018 = vmatprep.mubr.msk.bf16.mxu0 %vm15560_vm0, %v1415_v38  ;;  %v1393_v58 = vld [vmem:[#allocation2 + $0x81] sm:$0xff]  ;;  %v12554_v41 = vpack.c.bf16 %v1738_v37, %v1737_v36 }
  0xba   : > { %10052 = vmatprep.subr.bf16.mxu0 %v11498_v40  ;;  %v1421_v61 = vpack.c.bf16 %v1394_v59, %v1393_v58  ;;  %v1739_v38 = vld [vmem:[#allocation2 + $0x42] sm:$0xff]  ;;  %v1750_v58 = vld [vmem:[#allocation2 + $0x9a] sm:$0xff] }
  0xbb   : > { %v12556_v42 = vpack.c.bf16 %v1740_v39, %v1739_v38  ;;  %v1751_v59 = vld [vmem:[#allocation2 + $0xa2] sm:$0xff]  ;;  %v2446_v38 = vld [vmem:[#allocation2 + $0x4b] sm:$0xff]  ;;  %v2447_v39 = vld [vmem:[#allocation2 + $0x53] sm:$0xff] }
  0xbc   : > { %v11510_v36 = vld [vmem:[%s15554_s1 + $0xa8] sm:$0xff]  }
  0xbd   : > { %10053 = vmatpush3.bf16.msra.mxu0 %v11498_v40  ;;  %v11503_v40 = vld [vmem:[%s15554_s1 + $0x70] sm:$0xff]   ;;  %v2445_v37 = vld [vmem:[#allocation2 + $0x43] sm:$0xff] }
  0xbe   : > { %10054 = vmatprep.subr.bf16.mxu0 %v11499_v45 }
  0xc0   : > { %10019 = vmatmul.mubr.msk.bf16.gmra.mrb[4].mxu0 %vm15560_vm0, %v1416_v46  ;;  %v1743_v46 = vld [vmem:[#allocation2 + $0x62] sm:$0xff] }
  0xc1   : > { %10022 = vmatprep.mubr.msk.bf16.mxu0 %vm15560_vm0, %v1417_v47  ;;  %10055 = vmatpush3.bf16.msra.mxu0 %v11499_v45  ;;  %v1742_v45 = vld [vmem:[#allocation2 + $0x5a] sm:$0xff]  ;;  %v1744_v47 = vld [vmem:[#allocation2 + $0x6a] sm:$0xff] }
  0xc2   : > { %10056 = vmatprep.subr.bf16.mxu0 %v11500_v48  ;;  %v1772_v49 = vpack.c.bf16 %v1742_v45, %v1741_v44  ;;  %v12568_v50 = vpack.c.bf16 %v1744_v47, %v1743_v46  ;;  %v11512_v44 = vld [vmem:[%s15554_s1 + $0xb8] sm:$0xff]   ;;  %v2449_v45 = vld [vmem:[#allocation2 + $0x63] sm:$0xff]  ;;  %v2450_v46 = vld [vmem:[#allocation2 + $0x6b] sm:$0xff] }
  0xc3   : > { %v2451_v47 = vld [vmem:[#allocation2 + $0x73] sm:$0xff] }
  0xc5   : > { %10057 = vmatpush3.bf16.msra.mxu0 %v11500_v48  ;;  %v11505_v48 = vld [vmem:[%s15554_s1 + $0x80] sm:$0xff]  }
  0xc6   : > { %10094 = vmatprep.subr.bf16.mxu0 %v12520_v53 }
  0xc8   : > { %10023 = vmatmul.mubr.msk.bf16.gmra.mrb[8].mxu0 %vm15560_vm0, %v1418_v54  ;;  %v1748_v54 = vld [vmem:[#allocation2 + $0x8a] sm:$0xff] }
  0xc9   : > { %10026 = vmatprep.mubr.msk.bf16.mxu0 %vm15560_vm0, %v1419_v55  ;;  %v1774_v55 = vpack.c.bf16 %v1746_v52, %v1745_v51  ;;  %v2453_v52 = vld [vmem:[#allocation2 + $0x83] sm:$0xff] }
  0xd0   : > { %10027 = vmatmul.mubr.msk.bf16.gmra.mrb[12].mxu0 %vm15560_vm0, %v1420_v60  ;;  %v1752_v60 = vld [vmem:[#allocation2 + $0xaa] sm:$0xff] }
  0xd1   : > { %10030 = vmatprep.mubr.msk.bf16.mxu0 %vm15560_vm0, %v1421_v61  ;;  %v1776_v61 = vpack.c.bf16 %v1750_v58, %v1749_v57  ;;  %v1777_v62 = vpack.c.bf16 %v1752_v60, %v1751_v59  ;;  %v2457_v58 = vld [vmem:[#allocation2 + $0xa3] sm:$0xff]  ;;  %v2458_v59 = vld [vmem:[#allocation2 + $0xab] sm:$0xff]  ;;  %v2459_v60 = vld [vmem:[#allocation2 + $0xb3] sm:$0xff] }
  0xd8   : > { %10031 = vmatmul.mubr.msk.bf16.gmra.mrb[16].mxu0 %vm15560_vm0, %v1422_v2  ;;  %v1756_v2 = vld [vmem:[#allocation2 + $0xca] sm:$0xff] }
  0xd9   : > { %10034 = vmatprep.mubr.msk.bf16.mxu0 %vm15560_vm0, %v1423_v3  ;;  %v1778_v3 = vpack.c.bf16 %v1754_v0, %v1753_v63  ;;  %v1779_v4 = vpack.c.bf16 %v1756_v2, %v1755_v1  ;;  %v2461_v0 = vld [vmem:[#allocation2 + $0xc3] sm:$0xff]  ;;  %v2462_v1 = vld [vmem:[#allocation2 + $0xcb] sm:$0xff]  ;;  %v2463_v2 = vld [vmem:[#allocation2 + $0xd3] sm:$0xff] }
  0xe0   : > { %10035 = vmatmul.mubr.msk.bf16.gmra.mrb[20].mxu0 %vm15560_vm0, %v1424_v8  ;;  %v1760_v8 = vld [vmem:[#allocation2 + $0xea] sm:$0xff] }
  0xe1   : > { %10038 = vmatprep.mubr.msk.bf16.mxu0 %vm15560_vm0, %v1425_v9  ;;  %v1780_v9 = vpack.c.bf16 %v1758_v6, %v1757_v5  ;;  %v1781_v10 = vpack.c.bf16 %v1760_v8, %v1759_v7  ;;  %v2465_v6 = vld [vmem:[#allocation2 + $0xe3] sm:$0xff]  ;;  %v2466_v7 = vld [vmem:[#allocation2 + $0xeb] sm:$0xff]  ;;  %v2467_v8 = vld [vmem:[#allocation2 + $0xf3] sm:$0xff] }
  0xe8   : > { %10039 = vmatmul.mubr.msk.bf16.gmra.mrb[24].mxu0 %vm15560_vm0, %v1426_v14  ;;  %v1764_v14 = vld [vmem:[#allocation2 + $0x10a] sm:$0xff] }
  0xe9   : > { %10042 = vmatprep.mubr.msk.bf16.mxu0 %vm15560_vm0, %v1427_v15  ;;  %v1782_v15 = vpack.c.bf16 %v1762_v12, %v1761_v11  ;;  %v1783_v16 = vpack.c.bf16 %v1764_v14, %v1763_v13  ;;  %v2469_v12 = vld [vmem:[#allocation2 + $0x103] sm:$0xff]  ;;  %v2470_v13 = vld [vmem:[#allocation2 + $0x10b] sm:$0xff]  ;;  %v2471_v14 = vld [vmem:[#allocation2 + $0x113] sm:$0xff] }
  0xf0   : > { %10043 = vmatmul.mubr.msk.bf16.gmra.mrb[28].mxu0 %vm15560_vm0, %v1428_v20  ;;  %v11506_v20 = vld [vmem:[%s15554_s1 + $0x88] sm:$0xff]  }
  0xf1   : > { %10046 = vmatprep.mubr.msk.bf16.mxu0 %vm15560_vm0, %v1429_v21  ;;  %v11507_v21 = vld [vmem:[%s15554_s1 + $0x90] sm:$0xff]  }
  0xf8   : > { %10047 = vmatmul.mubr.msk.bf16.gmra.mrb[32].mxu0 %vm15560_vm0, %v1430_v26  ;;  %v2439_v26 = vld [vmem:[#allocation2 + $0x13] sm:$0xff] }
  0xf9   : > { %10058 = vmatprep.mubr.msk.bf16.mxu0 %vm15560_vm0, %v1767_v27  ;;  %v2440_v27 = vld [vmem:[#allocation2 + $0x1b] sm:$0xff] }
  0xfa   : > { %v2475_v29 = vpack.c.bf16 %v2440_v27, %v2439_v26  ;;  %v2797_v26 = vld [vmem:[#allocation2 + $0x34] sm:$0xff]  ;;  %v2798_v27 = vld [vmem:[#allocation2 + $0x3c] sm:$0xff] }
 0x100   : > { %10059 = vmatmul.mubr.msk.bf16.vlgmr.msra.gmra.mrb[0].mxu0 %vm15560_vm0, %v12537_v32 }
 0x101   : > { %10095 = vmatpush3.bf16.msra.mxu0 %v12520_v53  ;;  %10062 = vmatprep.mubr.msk.bf16.mxu0 %vm15560_vm0, %v12539_v33  ;;  %v1747_v53 = vld [vmem:[#allocation2 + $0x82] sm:$0xff] }
 0x102   : > { %10096 = vmatprep.subr.bf16.mxu0 %v11502_v35  ;;  %v1775_v56 = vpack.c.bf16 %v1748_v54, %v1747_v53  ;;  %v2454_v53 = vld [vmem:[#allocation2 + $0x8b] sm:$0xff]  ;;  %v2455_v54 = vld [vmem:[#allocation2 + $0x93] sm:$0xff] }
 0x105   : > { %10097 = vmatpush3.bf16.msra.mxu0 %v11502_v35 }
 0x106   : > { %10098 = vmatprep.subr.bf16.mxu0 %v11503_v40 }
 0x108   : > { %10063 = vmatmul.mubr.msk.bf16.gmra.mrb[4].mxu0 %vm15560_vm0, %v12554_v41 }
 0x109   : > { %10066 = vmatprep.mubr.msk.bf16.mxu0 %vm15560_vm0, %v12556_v42  ;;  %10099 = vmatpush3.bf16.msra.mxu0 %v11503_v40  ;;  %v2448_v40 = vld [vmem:[#allocation2 + $0x5b] sm:$0xff] }
 0x10a   : > { %10100 = vmatprep.subr.bf16.mxu0 %v11504_v43 }
 0x10d   : > { %10101 = vmatpush3.bf16.msra.mxu0 %v11504_v43  ;;  %v2479_v43 = vpack.c.bf16 %v2448_v40, %v2447_v39  ;;  %v2803_v39 = vld [vmem:[#allocation2 + $0x64] sm:$0xff]  ;;  %v2804_v40 = vld [vmem:[#allocation2 + $0x6c] sm:$0xff] }
 0x10e   : > { %10138 = vmatprep.subr.bf16.mxu0 %v11505_v48 }
 0x110   : > { %10067 = vmatmul.mubr.msk.bf16.gmra.mrb[8].mxu0 %vm15560_vm0, %v1772_v49 }
 0x111   : > { %10070 = vmatprep.mubr.msk.bf16.mxu0 %vm15560_vm0, %v12568_v50 }
 0x118   : > { %10071 = vmatmul.mubr.msk.bf16.gmra.mrb[12].mxu0 %vm15560_vm0, %v1774_v55 }
 0x119   : > { %10074 = vmatprep.mubr.msk.bf16.mxu0 %vm15560_vm0, %v1775_v56 }
 0x120   : > { %10075 = vmatmul.mubr.msk.bf16.gmra.mrb[16].mxu0 %vm15560_vm0, %v1776_v61 }
 0x121   : > { %10078 = vmatprep.mubr.msk.bf16.mxu0 %vm15560_vm0, %v1777_v62 }
 0x128   : > { %10079 = vmatmul.mubr.msk.bf16.gmra.mrb[20].mxu0 %vm15560_vm0, %v1778_v3 }
 0x129   : > { %10082 = vmatprep.mubr.msk.bf16.mxu0 %vm15560_vm0, %v1779_v4 }
 0x130   : > { %10083 = vmatmul.mubr.msk.bf16.gmra.mrb[24].mxu0 %vm15560_vm0, %v1780_v9 }
 0x131   : > { %10086 = vmatprep.mubr.msk.bf16.mxu0 %vm15560_vm0, %v1781_v10 }
 0x138   : > { %10087 = vmatmul.mubr.msk.bf16.gmra.mrb[28].mxu0 %vm15560_vm0, %v1782_v15 }
 0x139   : > { %10090 = vmatprep.mubr.msk.bf16.mxu0 %vm15560_vm0, %v1783_v16 }
 0x140   : > { %10091 = vmatmul.mubr.msk.bf16.gmra.mrb[32].mxu0 %vm15560_vm0, %v1784_v19 }
 0x141   : > { %10102 = vmatprep.mubr.msk.bf16.mxu0 %vm15560_vm0, %v12537_v32  ;;  %v2443_v32 = vld [vmem:[#allocation2 + $0x33] sm:$0xff] }
 0x148   : > { %10103 = vmatmul.mubr.msk.bf16.vlgmr.msra.gmra.mrb[0].mxu0 %vm15560_vm0, %v12539_v33  ;;  %v2444_v33 = vld [vmem:[#allocation2 + $0x3b] sm:$0xff] }
 0x149   : > { %10139 = vmatpush3.bf16.msra.mxu0 %v11505_v48  ;;  %10106 = vmatprep.mubr.msk.bf16.mxu0 %vm15560_vm0, %v12554_v41  ;;  %v2477_v35 = vpack.c.bf16 %v2444_v33, %v2443_v32  ;;  %v11511_v41 = vld [vmem:[%s15554_s1 + $0xb0] sm:$0xff]   ;;  %v2452_v48 = vld [vmem:[#allocation2 + $0x7b] sm:$0xff] }
 0x14a   : > { %10140 = vmatprep.subr.bf16.mxu0 %v11506_v20  ;;  %v2481_v51 = vpack.c.bf16 %v2452_v48, %v2451_v47  ;;  %v2800_v32 = vld [vmem:[#allocation2 + $0x4c] sm:$0xff]  ;;  %v2801_v33 = vld [vmem:[#allocation2 + $0x54] sm:$0xff] }
 0x14b   : > { %v2808_v47 = vld [vmem:[#allocation2 + $0x8c] sm:$0xff]  ;;  %v2809_v48 = vld [vmem:[#allocation2 + $0x94] sm:$0xff] }
 0x14d   : > { %10141 = vmatpush3.bf16.msra.mxu0 %v11506_v20  ;;  %v2793_v20 = vld [vmem:[#allocation2 + $0x14] sm:$0xff] }
 0x14e   : > { %10142 = vmatprep.subr.bf16.mxu0 %v11507_v21 }
 0x150   : > { %10107 = vmatmul.mubr.msk.bf16.gmra.mrb[4].mxu0 %vm15560_vm0, %v12556_v42  ;;  %v2478_v42 = vpack.c.bf16 %v2446_v38, %v2445_v37  ;;  %v11516_v38 = vld [vmem:[%s15554_s1 + $0xd8] sm:$0xff]  }
 0x151   : > { %10110 = vmatprep.mubr.msk.bf16.mxu0 %vm15560_vm0, %v1772_v49  ;;  %10143 = vmatpush3.bf16.msra.mxu0 %v11507_v21  ;;  %v12636_v49 = vld [vmem:[%s15554_s1 + $0xc0] sm:$0xff]  }
 0x152   : > { %10144 = vmatprep.subr.bf16.mxu0 %v11508_v22  ;;  %v2794_v21 = vld [vmem:[#allocation2 + $0x1c] sm:$0xff] }
 0x155   : > { %10145 = vmatpush3.bf16.msra.mxu0 %v11508_v22 }
 0x156   : > { %10182 = vmatprep.subr.bf16.mxu0 %v11509_v23 }
 0x158   : > { %10111 = vmatmul.mubr.msk.bf16.gmra.mrb[8].mxu0 %vm15560_vm0, %v12568_v50  ;;  %v2480_v50 = vpack.c.bf16 %v2450_v46, %v2449_v45  ;;  %v2807_v46 = vld [vmem:[#allocation2 + $0x84] sm:$0xff] }
 0x159   : > { %10114 = vmatprep.mubr.msk.bf16.mxu0 %vm15560_vm0, %v1774_v55  ;;  %v2456_v55 = vld [vmem:[#allocation2 + $0x9b] sm:$0xff] }
 0x15a   : > { %v2483_v57 = vpack.c.bf16 %v2456_v55, %v2455_v54  ;;  %v2813_v54 = vld [vmem:[#allocation2 + $0xb4] sm:$0xff]  ;;  %v2814_v55 = vld [vmem:[#allocation2 + $0xbc] sm:$0xff] }
 0x160   : > { %10115 = vmatmul.mubr.msk.bf16.gmra.mrb[12].mxu0 %vm15560_vm0, %v1775_v56  ;;  %v2482_v56 = vpack.c.bf16 %v2454_v53, %v2453_v52  ;;  %v2811_v52 = vld [vmem:[#allocation2 + $0xa4] sm:$0xff]  ;;  %v2812_v53 = vld [vmem:[#allocation2 + $0xac] sm:$0xff] }
 0x161   : > { %10118 = vmatprep.mubr.msk.bf16.mxu0 %vm15560_vm0, %v1776_v61  ;;  %v2460_v61 = vld [vmem:[#allocation2 + $0xbb] sm:$0xff] }
 0x162   : > { %v2485_v63 = vpack.c.bf16 %v2460_v61, %v2459_v60  ;;  %v2817_v60 = vld [vmem:[#allocation2 + $0xd4] sm:$0xff]  ;;  %v2818_v61 = vld [vmem:[#allocation2 + $0xdc] sm:$0xff] }
 0x168   : > { %10119 = vmatmul.mubr.msk.bf16.gmra.mrb[16].mxu0 %vm15560_vm0, %v1777_v62  ;;  %v2484_v62 = vpack.c.bf16 %v2458_v59, %v2457_v58  ;;  %v2815_v58 = vld [vmem:[#allocation2 + $0xc4] sm:$0xff]  ;;  %v2816_v59 = vld [vmem:[#allocation2 + $0xcc] sm:$0xff] }
 0x169   : > { %10122 = vmatprep.mubr.msk.bf16.mxu0 %vm15560_vm0, %v1778_v3  ;;  %v2464_v3 = vld [vmem:[#allocation2 + $0xdb] sm:$0xff] }
 0x16a   : > { %v2487_v5 = vpack.c.bf16 %v2464_v3, %v2463_v2  ;;  %v2821_v2 = vld [vmem:[#allocation2 + $0xf4] sm:$0xff]  ;;  %v2822_v3 = vld [vmem:[#allocation2 + $0xfc] sm:$0xff] }
 0x170   : > { %10123 = vmatmul.mubr.msk.bf16.gmra.mrb[20].mxu0 %vm15560_vm0, %v1779_v4  ;;  %v2486_v4 = vpack.c.bf16 %v2462_v1, %v2461_v0  ;;  %v2819_v0 = vld [vmem:[#allocation2 + $0xe4] sm:$0xff]  ;;  %v2820_v1 = vld [vmem:[#allocation2 + $0xec] sm:$0xff] }
 0x171   : > { %10126 = vmatprep.mubr.msk.bf16.mxu0 %vm15560_vm0, %v1780_v9  ;;  %v2468_v9 = vld [vmem:[#allocation2 + $0xfb] sm:$0xff] }
 0x172   : > { %v2489_v11 = vpack.c.bf16 %v2468_v9, %v2467_v8  ;;  %v2825_v8 = vld [vmem:[#allocation2 + $0x114] sm:$0xff]  ;;  %v2826_v9 = vld [vmem:[#allocation2 + $0x11c] sm:$0xff] }
 0x178   : > { %10127 = vmatmul.mubr.msk.bf16.gmra.mrb[24].mxu0 %vm15560_vm0, %v1781_v10  ;;  %v2488_v10 = vpack.c.bf16 %v2466_v7, %v2465_v6  ;;  %v2823_v6 = vld [vmem:[#allocation2 + $0x104] sm:$0xff]  ;;  %v2824_v7 = vld [vmem:[#allocation2 + $0x10c] sm:$0xff] }
 0x179   : > { %10130 = vmatprep.mubr.msk.bf16.mxu0 %vm15560_vm0, %v1782_v15  ;;  %v2472_v15 = vld [vmem:[#allocation2 + $0x11b] sm:$0xff] }
 0x17a   : > { %v2491_v17 = vpack.c.bf16 %v2472_v15, %v2471_v14  ;;  %v11518_v15 = vld [vmem:[%s15554_s1 + $0xe8] sm:$0xff]  }
 0x180   : > { %10131 = vmatmul.mubr.msk.bf16.gmra.mrb[28].mxu0 %vm15560_vm0, %v1783_v16  ;;  %v2490_v16 = vpack.c.bf16 %v2470_v13, %v2469_v12  ;;  %v2827_v12 = vld [vmem:[#allocation2 + $0x124] sm:$0xff]  ;;  %v2828_v13 = vld [vmem:[#allocation2 + $0x12c] sm:$0xff] }
 0x181   : > { %10134 = vmatprep.mubr.msk.bf16.mxu0 %vm15560_vm0, %v1784_v19  ;;  %v2474_v19 = vld [vmem:[#allocation2 + $0x12b] sm:$0xff]  ;;  %v2846_v14 = vpack.c.bf16 %v2828_v13, %v2827_v12  ;;  %v3535_v12 = vld [vmem:[#allocation2 + $0x135] sm:$0xff]  ;;  %v3536_v13 = vld [vmem:[#allocation2 + $0x13d] sm:$0xff] }
 0x182   : > { %v2492_v22 = vpack.c.bf16 %v2474_v19, %v2473_v18  ;;  %v11521_v18 = vld [vmem:[%s15554_s1 + $0x100] sm:$0xff]   ;;  %v3181_v19 = vld [vmem:[#allocation2 + $0x134] sm:$0xff] }
 0x188   : > { %10135 = vmatmul.mubr.msk.bf16.gmra.mrb[32].mxu0 %vm15560_vm0, %v2138_v28  ;;  %v12653_v28 = vpack.c.bf16 %v2796_v25, %v2795_v24  ;;  %v3503_v25 = vld [vmem:[#allocation2 + $0x35] sm:$0xff] }
 0x189   : > { %10146 = vmatprep.mubr.msk.bf16.mxu0 %vm15560_vm0, %v2475_v29  ;;  %v12655_v29 = vpack.c.bf16 %v2798_v27, %v2797_v26  ;;  %v3504_v26 = vld [vmem:[#allocation2 + $0x3d] sm:$0xff]  ;;  %v3505_v27 = vld [vmem:[#allocation2 + $0x45] sm:$0xff] }
 0x190   : > { %10147 = vmatmul.mubr.msk.bf16.vlgmr.msra.gmra.mrb[0].mxu0 %vm15560_vm0, %v2476_v34  ;;  %v2802_v34 = vld [vmem:[#allocation2 + $0x5c] sm:$0xff] }
 0x191   : > { %10183 = vmatpush3.bf16.msra.mxu0 %v11509_v23  ;;  %10150 = vmatprep.mubr.msk.bf16.mxu0 %vm15560_vm0, %v2477_v35  ;;  %v2829_v23 = vpack.c.bf16 %v2794_v21, %v2793_v20  ;;  %v11515_v35 = vld [vmem:[%s15554_s1 + $0xd0] sm:$0xff]   ;;  %v12670_v37 = vpack.c.bf16 %v2802_v34, %v2801_v33  ;;  %v3182_v20 = vld [vmem:[#allocation2 + $0x13c] sm:$0xff]  ;;  %v3501_v21 = vld [vmem:[#allocation2 + $0x25] sm:$0xff] }
 0x192   : > { %10184 = vmatprep.subr.bf16.mxu0 %v11510_v36  ;;  %v3508_v33 = vld [vmem:[#allocation2 + $0x5d] sm:$0xff]  ;;  %v3509_v34 = vld [vmem:[#allocation2 + $0x65] sm:$0xff] }
 0x195   : > { %10185 = vmatpush3.bf16.msra.mxu0 %v11510_v36  ;;  %v12668_v36 = vpack.c.bf16 %v2800_v32, %v2799_v31  ;;  %v11522_v31 = vld [vmem:[%s15554_s1 + $0x108] sm:$0xff]   ;;  %v3507_v32 = vld [vmem:[#allocation2 + $0x55] sm:$0xff] }
 0x196   : > { %10186 = vmatprep.subr.bf16.mxu0 %v11511_v41 }
 0x198   : > { %10151 = vmatmul.mubr.msk.bf16.gmra.mrb[4].mxu0 %vm15560_vm0, %v2478_v42  ;;  %v2806_v42 = vld [vmem:[#allocation2 + $0x7c] sm:$0xff] }
 0x199   : > { %10154 = vmatprep.mubr.msk.bf16.mxu0 %vm15560_vm0, %v2479_v43  ;;  %10187 = vmatpush3.bf16.msra.mxu0 %v11511_v41  ;;  %v2805_v41 = vld [vmem:[#allocation2 + $0x74] sm:$0xff]  ;;  %v11517_v43 = vld [vmem:[%s15554_s1 + $0xe0] sm:$0xff]  }
 0x19a   : > { %10188 = vmatprep.subr.bf16.mxu0 %v11512_v44  ;;  %v12682_v45 = vpack.c.bf16 %v2806_v42, %v2805_v41  ;;  %v3512_v41 = vld [vmem:[#allocation2 + $0x7d] sm:$0xff]  ;;  %v3513_v42 = vld [vmem:[#allocation2 + $0x85] sm:$0xff] }
 0x19d   : > { %10189 = vmatpush3.bf16.msra.mxu0 %v11512_v44  ;;  %v2834_v44 = vpack.c.bf16 %v2804_v40, %v2803_v39  ;;  %v11524_v39 = vld [vmem:[%s15554_s1 + $0x118] sm:$0xff]  }
 0x19e   : > { %10226 = vmatprep.subr.bf16.mxu0 %v12636_v49  ;;  %v3511_v40 = vld [vmem:[#allocation2 + $0x75] sm:$0xff] }
 0x1a0   : > { %10155 = vmatmul.mubr.msk.bf16.gmra.mrb[8].mxu0 %vm15560_vm0, %v2480_v50  ;;  %v2836_v50 = vpack.c.bf16 %v2808_v47, %v2807_v46  ;;  %v3515_v46 = vld [vmem:[#allocation2 + $0x95] sm:$0xff]  ;;  %v3516_v47 = vld [vmem:[#allocation2 + $0x9d] sm:$0xff] }
 0x1a1   : > { %10158 = vmatprep.mubr.msk.bf16.mxu0 %vm15560_vm0, %v2481_v51 }
 0x1a8   : > { %10159 = vmatmul.mubr.msk.bf16.gmra.mrb[12].mxu0 %vm15560_vm0, %v2482_v56  ;;  %v2838_v56 = vpack.c.bf16 %v2812_v53, %v2811_v52  ;;  %v3519_v52 = vld [vmem:[#allocation2 + $0xb5] sm:$0xff]  ;;  %v3520_v53 = vld [vmem:[#allocation2 + $0xbd] sm:$0xff] }
 0x1a9   : > { %10162 = vmatprep.mubr.msk.bf16.mxu0 %vm15560_vm0, %v2483_v57  ;;  %v2839_v57 = vpack.c.bf16 %v2814_v55, %v2813_v54  ;;  %v3521_v54 = vld [vmem:[#allocation2 + $0xc5] sm:$0xff]  ;;  %v3522_v55 = vld [vmem:[#allocation2 + $0xcd] sm:$0xff] }
 0x1b0   : > { %10163 = vmatmul.mubr.msk.bf16.gmra.mrb[16].mxu0 %vm15560_vm0, %v2484_v62  ;;  %v2840_v62 = vpack.c.bf16 %v2816_v59, %v2815_v58  ;;  %v3523_v58 = vld [vmem:[#allocation2 + $0xd5] sm:$0xff]  ;;  %v3524_v59 = vld [vmem:[#allocation2 + $0xdd] sm:$0xff] }
 0x1b1   : > { %10166 = vmatprep.mubr.msk.bf16.mxu0 %vm15560_vm0, %v2485_v63  ;;  %v2841_v63 = vpack.c.bf16 %v2818_v61, %v2817_v60  ;;  %v3525_v60 = vld [vmem:[#allocation2 + $0xe5] sm:$0xff]  ;;  %v3526_v61 = vld [vmem:[#allocation2 + $0xed] sm:$0xff] }
 0x1b8   : > { %10167 = vmatmul.mubr.msk.bf16.gmra.mrb[20].mxu0 %vm15560_vm0, %v2486_v4  ;;  %v2842_v4 = vpack.c.bf16 %v2820_v1, %v2819_v0  ;;  %v3527_v0 = vld [vmem:[#allocation2 + $0xf5] sm:$0xff]  ;;  %v3528_v1 = vld [vmem:[#allocation2 + $0xfd] sm:$0xff] }
 0x1b9   : > { %10170 = vmatprep.mubr.msk.bf16.mxu0 %vm15560_vm0, %v2487_v5  ;;  %v2843_v5 = vpack.c.bf16 %v2822_v3, %v2821_v2  ;;  %v3529_v2 = vld [vmem:[#allocation2 + $0x105] sm:$0xff]  ;;  %v3530_v3 = vld [vmem:[#allocation2 + $0x10d] sm:$0xff] }
 0x1c0   : > { %10171 = vmatmul.mubr.msk.bf16.gmra.mrb[24].mxu0 %vm15560_vm0, %v2488_v10  ;;  %v2844_v10 = vpack.c.bf16 %v2824_v7, %v2823_v6  ;;  %v3531_v6 = vld [vmem:[#allocation2 + $0x115] sm:$0xff]  ;;  %v3532_v7 = vld [vmem:[#allocation2 + $0x11d] sm:$0xff] }
 0x1c1   : > { %10174 = vmatprep.mubr.msk.bf16.mxu0 %vm15560_vm0, %v2489_v11  ;;  %v2845_v11 = vpack.c.bf16 %v2826_v9, %v2825_v8  ;;  %v3533_v8 = vld [vmem:[#allocation2 + $0x125] sm:$0xff]  ;;  %v3534_v9 = vld [vmem:[#allocation2 + $0x12d] sm:$0xff] }
 0x1c8   : > { %10175 = vmatmul.mubr.msk.bf16.gmra.mrb[28].mxu0 %vm15560_vm0, %v2490_v16  ;;  %v11519_v16 = vld [vmem:[%s15554_s1 + $0xf0] sm:$0xff]  }
 0x1c9   : > { %10178 = vmatprep.mubr.msk.bf16.mxu0 %vm15560_vm0, %v2491_v17  ;;  %v11520_v17 = vld [vmem:[%s15554_s1 + $0xf8] sm:$0xff]  }
 0x1d0   : > { %10179 = vmatmul.mubr.msk.bf16.gmra.mrb[32].mxu0 %vm15560_vm0, %v2492_v22  ;;  %v3502_v22 = vld [vmem:[#allocation2 + $0x2d] sm:$0xff] }
 0x1d1   : > { %10190 = vmatprep.mubr.msk.bf16.mxu0 %vm15560_vm0, %v2829_v23  ;;  %v3200_v23 = vpack.c.bf16 %v3182_v20, %v3181_v19  ;;  %v3537_v24 = vpack.c.bf16 %v3502_v22, %v3501_v21  ;;  %v3858_v19 = vld [vmem:[#allocation2 + $0x3e] sm:$0xff]  ;;  %v3859_v20 = vld [vmem:[#allocation2 + $0x46] sm:$0xff]  ;;  %v3860_v21 = vld [vmem:[#allocation2 + $0x4e] sm:$0xff] }
 0x1d8   : > { %10191 = vmatmul.mubr.msk.bf16.vlgmr.msra.gmra.mrb[0].mxu0 %vm15560_vm0, %v12653_v28 }
 0x1d9   : > { %10227 = vmatpush3.bf16.msra.mxu0 %v12636_v49  ;;  %10194 = vmatprep.mubr.msk.bf16.mxu0 %vm15560_vm0, %v12655_v29  ;;  %v2810_v49 = vld [vmem:[#allocation2 + $0x9c] sm:$0xff] }
 0x1da   : > { %10228 = vmatprep.subr.bf16.mxu0 %v11514_v30  ;;  %v2837_v51 = vpack.c.bf16 %v2810_v49, %v2809_v48  ;;  %v3517_v48 = vld [vmem:[#allocation2 + $0xa5] sm:$0xff]  ;;  %v3518_v49 = vld [vmem:[#allocation2 + $0xad] sm:$0xff] }
 0x1dd   : > { %10229 = vmatpush3.bf16.msra.mxu0 %v11514_v30 }
 0x1de   : > { %10230 = vmatprep.subr.bf16.mxu0 %v11515_v35 }
 0x1e0   : > { %10195 = vmatmul.mubr.msk.bf16.gmra.mrb[4].mxu0 %vm15560_vm0, %v12668_v36 }
 0x1e1   : > { %10198 = vmatprep.mubr.msk.bf16.mxu0 %vm15560_vm0, %v12670_v37  ;;  %10231 = vmatpush3.bf16.msra.mxu0 %v11515_v35  ;;  %v3510_v35 = vld [vmem:[#allocation2 + $0x6d] sm:$0xff] }
 0x1e2   : > { %10232 = vmatprep.subr.bf16.mxu0 %v11516_v38 }
 0x1e5   : > { %10233 = vmatpush3.bf16.msra.mxu0 %v11516_v38  ;;  %v3541_v38 = vpack.c.bf16 %v3510_v35, %v3509_v34 }
 0x1e6   : > { %10270 = vmatprep.subr.bf16.mxu0 %v11517_v43 }
 0x1e8   : > { %10199 = vmatmul.mubr.msk.bf16.gmra.mrb[8].mxu0 %vm15560_vm0, %v2834_v44 }
 0x1e9   : > { %10202 = vmatprep.mubr.msk.bf16.mxu0 %vm15560_vm0, %v12682_v45 }
 0x1f0   : > { %10203 = vmatmul.mubr.msk.bf16.gmra.mrb[12].mxu0 %vm15560_vm0, %v2836_v50 }
 0x1f1   : > { %10206 = vmatprep.mubr.msk.bf16.mxu0 %vm15560_vm0, %v2837_v51 }
 0x1f8   : > { %10207 = vmatmul.mubr.msk.bf16.gmra.mrb[16].mxu0 %vm15560_vm0, %v2838_v56 }
 0x1f9   : > { %10210 = vmatprep.mubr.msk.bf16.mxu0 %vm15560_vm0, %v2839_v57 }
 0x200   : > { %10211 = vmatmul.mubr.msk.bf16.gmra.mrb[20].mxu0 %vm15560_vm0, %v2840_v62 }
 0x201   : > { %10214 = vmatprep.mubr.msk.bf16.mxu0 %vm15560_vm0, %v2841_v63 }
 0x208   : > { %10215 = vmatmul.mubr.msk.bf16.gmra.mrb[24].mxu0 %vm15560_vm0, %v2842_v4 }
 0x209   : > { %10218 = vmatprep.mubr.msk.bf16.mxu0 %vm15560_vm0, %v2843_v5 }
 0x210   : > { %10219 = vmatmul.mubr.msk.bf16.gmra.mrb[28].mxu0 %vm15560_vm0, %v2844_v10 }
 0x211   : > { %10222 = vmatprep.mubr.msk.bf16.mxu0 %vm15560_vm0, %v2845_v11 }
 0x218   : > { %10223 = vmatmul.mubr.msk.bf16.gmra.mrb[32].mxu0 %vm15560_vm0, %v2846_v14 }
 0x219   : > { %10234 = vmatprep.mubr.msk.bf16.mxu0 %vm15560_vm0, %v12653_v28  ;;  %v3506_v28 = vld [vmem:[#allocation2 + $0x4d] sm:$0xff] }
 0x21a   : > { %v3539_v30 = vpack.c.bf16 %v3506_v28, %v3505_v27  ;;  %v3864_v27 = vld [vmem:[#allocation2 + $0x6e] sm:$0xff] }
 0x220   : > { %10235 = vmatmul.mubr.msk.bf16.vlgmr.msra.gmra.mrb[0].mxu0 %vm15560_vm0, %v12655_v29  ;;  %v3538_v29 = vpack.c.bf16 %v3504_v26, %v3503_v25  ;;  %v3862_v25 = vld [vmem:[#allocation2 + $0x5e] sm:$0xff]  ;;  %v3863_v26 = vld [vmem:[#allocation2 + $0x66] sm:$0xff] }
 0x221   : > { %10271 = vmatpush3.bf16.msra.mxu0 %v11517_v43  ;;  %10238 = vmatprep.mubr.msk.bf16.mxu0 %vm15560_vm0, %v12668_v36  ;;  %v11523_v36 = vld [vmem:[%s15554_s1 + $0x110] sm:$0xff]  }
 0x222   : > { %10272 = vmatprep.subr.bf16.mxu0 %v11518_v15  ;;  %v3514_v43 = vld [vmem:[#allocation2 + $0x8d] sm:$0xff] }
 0x225   : > { %10273 = vmatpush3.bf16.msra.mxu0 %v11518_v15  ;;  %v3856_v15 = vld [vmem:[#allocation2 + $0x2e] sm:$0xff] }
 0x226   : > { %10274 = vmatprep.subr.bf16.mxu0 %v11519_v16 }
 0x228   : > { %10239 = vmatmul.mubr.msk.bf16.gmra.mrb[4].mxu0 %vm15560_vm0, %v12670_v37  ;;  %v3540_v37 = vpack.c.bf16 %v3508_v33, %v3507_v32  ;;  %v3867_v32 = vld [vmem:[#allocation2 + $0x86] sm:$0xff]  ;;  %v3868_v33 = vld [vmem:[#allocation2 + $0x8e] sm:$0xff] }
 0x229   : > { %10242 = vmatprep.mubr.msk.bf16.mxu0 %vm15560_vm0, %v2834_v44  ;;  %10275 = vmatpush3.bf16.msra.mxu0 %v11519_v16  ;;  %v3542_v44 = vpack.c.bf16 %v3512_v41, %v3511_v40  ;;  %v3554_v16 = vpack.c.bf16 %v3536_v13, %v3535_v12  ;;  %v3897_v35 = vpack.c.bf16 %v3868_v33, %v3867_v32 }
 0x22a   : > { %10276 = vmatprep.subr.bf16.mxu0 %v11520_v17 }
 0x22d   : > { %10277 = vmatpush3.bf16.msra.mxu0 %v11520_v17 }
 0x22e   : > { %10314 = vmatprep.subr.bf16.mxu0 %v11521_v18 }
 0x230   : > { %10243 = vmatmul.mubr.msk.bf16.gmra.mrb[8].mxu0 %vm15560_vm0, %v12682_v45  ;;  %v3543_v45 = vpack.c.bf16 %v3514_v43, %v3513_v42  ;;  %v3873_v42 = vld [vmem:[#allocation2 + $0xb6] sm:$0xff]  ;;  %v3874_v43 = vld [vmem:[#allocation2 + $0xbe] sm:$0xff] }
 0x231   : > { %10246 = vmatprep.mubr.msk.bf16.mxu0 %vm15560_vm0, %v2836_v50  ;;  %v3544_v50 = vpack.c.bf16 %v3516_v47, %v3515_v46  ;;  %v3900_v46 = vpack.c.bf16 %v3874_v43, %v3873_v42  ;;  %v4657_v42 = vld [vmem:[#allocation3] sm:$0xff]  ;;  %v4658_v43 = vld [vmem:[#allocation3 + $0x8] sm:$0xff] }
 0x238   : > { %10247 = vmatmul.mubr.msk.bf16.gmra.mrb[12].mxu0 %vm15560_vm0, %v2837_v51  ;;  %v3545_v51 = vpack.c.bf16 %v3518_v49, %v3517_v48  ;;  %v3877_v48 = vld [vmem:[#allocation2 + $0xd6] sm:$0xff]  ;;  %v3878_v49 = vld [vmem:[#allocation2 + $0xde] sm:$0xff] }
 0x239   : > { %10250 = vmatprep.mubr.msk.bf16.mxu0 %vm15560_vm0, %v2838_v56  ;;  %v3546_v56 = vpack.c.bf16 %v3520_v53, %v3519_v52  ;;  %v3902_v52 = vpack.c.bf16 %v3878_v49, %v3877_v48 }
 0x240   : > { %10251 = vmatmul.mubr.msk.bf16.gmra.mrb[16].mxu0 %vm15560_vm0, %v2839_v57  ;;  %v3547_v57 = vpack.c.bf16 %v3522_v55, %v3521_v54  ;;  %v3881_v54 = vld [vmem:[#allocation2 + $0xf6] sm:$0xff]  ;;  %v3882_v55 = vld [vmem:[#allocation2 + $0xfe] sm:$0xff] }
 0x241   : > { %10254 = vmatprep.mubr.msk.bf16.mxu0 %vm15560_vm0, %v2840_v62  ;;  %v3548_v62 = vpack.c.bf16 %v3524_v59, %v3523_v58  ;;  %v3904_v58 = vpack.c.bf16 %v3882_v55, %v3881_v54 }
 0x248   : > { %10255 = vmatmul.mubr.msk.bf16.gmra.mrb[20].mxu0 %vm15560_vm0, %v2841_v63  ;;  %v3549_v63 = vpack.c.bf16 %v3526_v61, %v3525_v60  ;;  %v3885_v60 = vld [vmem:[#allocation2 + $0x116] sm:$0xff]  ;;  %v3886_v61 = vld [vmem:[#allocation2 + $0x11e] sm:$0xff] }
 0x249   : > { %10258 = vmatprep.mubr.msk.bf16.mxu0 %vm15560_vm0, %v2842_v4  ;;  %v3550_v4 = vpack.c.bf16 %v3528_v1, %v3527_v0  ;;  %v3906_v0 = vpack.c.bf16 %v3886_v61, %v3885_v60 }
 0x250   : > { %10259 = vmatmul.mubr.msk.bf16.gmra.mrb[24].mxu0 %vm15560_vm0, %v2843_v5  ;;  %v3551_v5 = vpack.c.bf16 %v3530_v3, %v3529_v2  ;;  %v3889_v2 = vld [vmem:[#allocation2 + $0x136] sm:$0xff]  ;;  %v3890_v3 = vld [vmem:[#allocation2 + $0x13e] sm:$0xff] }
 0x251   : > { %10262 = vmatprep.mubr.msk.bf16.mxu0 %vm15560_vm0, %v2844_v10  ;;  %v3552_v10 = vpack.c.bf16 %v3532_v7, %v3531_v6  ;;  %v11526_v6 = vld [vmem:[%s15556_s3 + $0x8] sm:$0xff]   ;;  %v368_v7 = vlaneseq }
 0x258   : > { %10263 = vmatmul.mubr.msk.bf16.gmra.mrb[28].mxu0 %vm15560_vm0, %v2845_v11  ;;  %v3553_v11 = vpack.c.bf16 %v3534_v9, %v3533_v8  ;;  %v12784_v8 = vshrl.u32 %v368_v7, 7 }
 0x259   : > { %10266 = vmatprep.mubr.msk.bf16.mxu0 %vm15560_vm0, %v2846_v14  ;;  %v3855_v14 = vld [vmem:[#allocation2 + $0x26] sm:$0xff] }
 0x25a   : > { %v3891_v17 = vpack.c.bf16 %v3856_v15, %v3855_v14  ;;  %v371_v9 = vadd.s32 16, %v12784_v8  ;;  %v12793_v14 = vmul.u32.u64.low 3817748708, %v12784_v8  ;;  %v12794_v15 = vmul.u32.u64.high 3817748708, %v12784_v8, %v12793_v14 }
 0x25b   : > { %v12845_v49 = vadd.s32 64, %v12784_v8  ;;  %v12880_v61 = vadd.s32 72, %v12784_v8 }
 0x25c   : > { %v12789_v12 = vmul.u32.u64.low 3817748708, %v371_v9  ;;  %v12790_v13 = vmul.u32.u64.high 3817748708, %v371_v9, %v12789_v12 }
 0x260   : > { %10267 = vmatmul.mubr.msk.bf16.gmra.mrb[32].mxu0 %vm15560_vm0, %v3200_v23  ;;  %v3893_v23 = vpack.c.bf16 %v3860_v21, %v3859_v20  ;;  %v375_v20 = vadd.s32 48, %v12784_v8  ;;  %v433_v21 = vshrl.u32 %v12790_v13, 4 }
 0x261   : > { %10278 = vmatprep.mubr.msk.bf16.mxu0 %vm15560_vm0, %v3537_v24  ;;  %v3861_v24 = vld [vmem:[#allocation2 + $0x56] sm:$0xff]  ;;  %v12929_v12 = vmul.u32.u64.low 3817748708, %v12880_v61  ;;  %v12930_v13 = vmul.u32.u64.high 3817748708, %v12880_v61, %v12929_v12 }
 0x262   : > { %v3894_v28 = vpack.c.bf16 %v3862_v25, %v3861_v24 }
 0x268   : > { %10279 = vmatmul.mubr.msk.bf16.vlgmr.msra.gmra.mrb[0].mxu0 %vm15560_vm0, %v3538_v29  ;;  %v3895_v29 = vpack.c.bf16 %v3864_v27, %v3863_v26  ;;  %v12809_v26 = vadd.s32 56, %v12784_v8 }
 0x269   : > { %10315 = vmatpush3.bf16.msra.mxu0 %v11521_v18  ;;  %10282 = vmatprep.mubr.msk.bf16.mxu0 %vm15560_vm0, %v3539_v30  ;;  %v3857_v18 = vld [vmem:[#allocation2 + $0x36] sm:$0xff] }
 0x26a   : > { %10316 = vmatprep.subr.bf16.mxu0 %v11522_v31  ;;  %v3892_v22 = vpack.c.bf16 %v3858_v19, %v3857_v18  ;;  %v3865_v30 = vld [vmem:[#allocation2 + $0x76] sm:$0xff] }
 0x26d   : > { %10317 = vmatpush3.bf16.msra.mxu0 %v11522_v31  ;;  %v3866_v31 = vld [vmem:[#allocation2 + $0x7e] sm:$0xff] }
 0x26e   : > { %10318 = vmatprep.subr.bf16.mxu0 %v11523_v36  ;;  %v3896_v34 = vpack.c.bf16 %v3866_v31, %v3865_v30 }
 0x270   : > { %10283 = vmatmul.mubr.msk.bf16.gmra.mrb[4].mxu0 %vm15560_vm0, %v3540_v37  ;;  %v3870_v37 = vld [vmem:[#allocation2 + $0x9e] sm:$0xff] }
 0x271   : > { %10286 = vmatprep.mubr.msk.bf16.mxu0 %vm15560_vm0, %v3541_v38  ;;  %10319 = vmatpush3.bf16.msra.mxu0 %v11523_v36  ;;  %v3869_v36 = vld [vmem:[#allocation2 + $0x96] sm:$0xff]  ;;  %v3871_v38 = vld [vmem:[#allocation2 + $0xa6] sm:$0xff] }
 0x272   : > { %10320 = vmatprep.subr.bf16.mxu0 %v11524_v39  ;;  %v3898_v40 = vpack.c.bf16 %v3870_v37, %v3869_v36  ;;  %v12822_v37 = vadd.s32 40, %v12784_v8 }
 0x275   : > { %10321 = vmatpush3.bf16.msra.mxu0 %v11524_v39  ;;  %v3872_v39 = vld [vmem:[#allocation2 + $0xae] sm:$0xff] }
 0x276   : > { %v3899_v41 = vpack.c.bf16 %v3872_v39, %v3871_v38 }
 0x278   : > { %10287 = vmatmul.mubr.msk.bf16.gmra.mrb[8].mxu0 %vm15560_vm0, %v3542_v44  ;;  %v3875_v44 = vld [vmem:[#allocation2 + $0xc6] sm:$0xff] }
 0x279   : > { %10290 = vmatprep.mubr.msk.bf16.mxu0 %vm15560_vm0, %v3543_v45  ;;  %v3876_v45 = vld [vmem:[#allocation2 + $0xce] sm:$0xff] }
 0x27a   : > { %v3901_v47 = vpack.c.bf16 %v3876_v45, %v3875_v44 }
 0x280   : > { %10291 = vmatmul.mubr.msk.bf16.gmra.mrb[12].mxu0 %vm15560_vm0, %v3544_v50  ;;  %v3879_v50 = vld [vmem:[#allocation2 + $0xe6] sm:$0xff] }
 0x281   : > { %10294 = vmatprep.mubr.msk.bf16.mxu0 %vm15560_vm0, %v3545_v51  ;;  %v3880_v51 = vld [vmem:[#allocation2 + $0xee] sm:$0xff] }
 0x282   : > { %v3903_v53 = vpack.c.bf16 %v3880_v51, %v3879_v50  ;;  %v4693_v50 = vpack.c.bf16 %v4658_v43, %v4657_v42  ;;  %v15745_v43 = vmov 0 }
 0x284   : > { %10362 = vmatprep.mubr.msk.bf16.mxu1 %vm15561_vm1, %v4693_v50 }
 0x288   : > { %10295 = vmatmul.mubr.msk.bf16.gmra.mrb[16].mxu0 %vm15560_vm0, %v3546_v56  ;;  %v3883_v56 = vld [vmem:[#allocation2 + $0x106] sm:$0xff] }
 0x289   : > { %10298 = vmatprep.mubr.msk.bf16.mxu0 %vm15560_vm0, %v3547_v57  ;;  %v3884_v57 = vld [vmem:[#allocation2 + $0x10e] sm:$0xff] }
 0x28a   : > { %v3905_v59 = vpack.c.bf16 %v3884_v57, %v3883_v56  ;;  %v12864_v56 = vadd.s32 88, %v12784_v8 }
 0x290   : > { %10299 = vmatmul.mubr.msk.bf16.gmra.mrb[20].mxu0 %vm15560_vm0, %v3548_v62  ;;  %v3887_v62 = vld [vmem:[#allocation2 + $0x126] sm:$0xff] }
 0x291   : > { %10302 = vmatprep.mubr.msk.bf16.mxu0 %vm15560_vm0, %v3549_v63  ;;  %v3888_v63 = vld [vmem:[#allocation2 + $0x12e] sm:$0xff] }
 0x292   : > { %v3907_v1 = vpack.c.bf16 %v3888_v63, %v3887_v62 }
 0x298   : > { %10303 = vmatmul.mubr.msk.bf16.gmra.mrb[24].mxu0 %vm15560_vm0, %v3550_v4  ;;  %v3908_v4 = vpack.c.bf16 %v3890_v3, %v3889_v2 }
 0x299   : > { %10306 = vmatprep.mubr.msk.bf16.mxu0 %vm15560_vm0, %v3551_v5  ;;  %v11525_v5 = vld [vmem:[%s15556_s3] sm:$0xff]  }
 0x29a   : > { %10358 = vmatprep.subr.bf16.mxu1 %v11525_v5 }
 0x29b   : > { %10359 = vmatpush3.bf16.msra.mxu1 %v11525_v5  ;;  %v15741_v5 = vmov 0 }
 0x29c   : > { %10360 = vmatprep.subr.bf16.mxu1 %v11526_v6 }
 0x29f   : > { %10361 = vmatpush3.bf16.msra.mxu1 %v11526_v6 }
 0x2a0   : > { %10307 = vmatmul.mubr.msk.bf16.gmra.mrb[28].mxu0 %vm15560_vm0, %v3552_v10  ;;  %v372_v10 = vadd.s32 24, %v12784_v8 }
 0x2a1   : > { %10310 = vmatprep.mubr.msk.bf16.mxu0 %vm15560_vm0, %v3553_v11  ;;  %v370_v11 = vadd.s32 8, %v12784_v8 }
 0x2a3   : > { %v12799_v18 = vmul.u32.u64.low 3817748708, %v370_v11  ;;  %v12800_v19 = vmul.u32.u64.high 3817748708, %v370_v11, %v12799_v18 }
 0x2a5   : > { %v422_v25 = vshrl.u32 %v12800_v19, 4 }
 0x2a8   : > { %10311 = vmatmul.mubr.msk.bf16.gmra.mrb[32].mxu0 %vm15560_vm0, %v3554_v16 }
 0x2a9   : > { %10322 = vmatprep.mubr.msk.bf16.mxu0 %vm15560_vm0, %v3891_v17  ;;  %v12796_v16 = vmul.u32.u64.low 3817748708, %v372_v10  ;;  %v12797_v17 = vmul.u32.u64.high 3817748708, %v372_v10, %v12796_v16 }
 0x2ab   : > { %v444_v24 = vshrl.u32 %v12797_v17, 4  ;;  %v13154_v17 = vadd.s32 168, %v12784_v8 }
 0x2ad   : > { %v445_v33 = vmul.u32 18, %v444_v24 }
 0x2b0   : > { %10323 = vmatmul.mubr.msk.bf16.vlgmr.msra.gmra.mrb[0].mxu0 %vm15560_vm0, %v3892_v22  ;;  %v373_v22 = vadd.s32 32, %v12784_v8 }
 0x2b1   : > { %10326 = vmatprep.mubr.msk.bf16.mxu0 %vm15560_vm0, %v3893_v23  ;;  %v411_v23 = vshrl.u32 %v12794_v15, 4  ;;  %v12937_v15 = vadd.s32 112, %v12784_v8 }
 0x2b2   : > { %v12814_v30 = vmul.u32.u64.low 3817748708, %v373_v22  ;;  %v12815_v31 = vmul.u32.u64.high 3817748708, %v373_v22, %v12814_v30 }
 0x2b3   : > { %v412_v32 = vmul.u32 18, %v411_v23  ;;  %v12981_v30 = vadd.s32 144, %v12784_v8 }
 0x2b4   : > { %v455_v48 = vshrl.u32 %v12815_v31, 4 }
 0x2b5   : > { %v12827_v39 = vsub.s32 %v12784_v8, %v412_v32 }
 0x2b7   : > { %vm801_vm4 = vcmp.ne.s32.totalorder %v12827_v39, 0  ;;  %vm837_vm5 = vcmp.lt.s32.totalorder %v12827_v39, 0 }
 0x2b8   : > { %10327 = vmatmul.mubr.msk.bf16.gmra.mrb[4].mxu0 %vm15560_vm0, %v3894_v28  ;;  %v12811_v27 = vmul.u32.u64.low 3817748708, %v375_v20  ;;  %v12812_v28 = vmul.u32.u64.high 3817748708, %v375_v20, %v12811_v27  ;;  %vm12890_vm11 = vmand %vm837_vm5, %vm801_vm4 }
 0x2b9   : > { %10330 = vmatprep.mubr.msk.bf16.mxu0 %vm15560_vm0, %v3895_v29  ;;  %v434_v29 = vmul.u32 18, %v433_v21  ;;  %v12957_v21 = vadd.s32 96, %v12784_v8  ;;  %v12970_v27 = vadd.s32 120, %v12784_v8 }
 0x2ba   : > { %v477_v44 = vshrl.u32 %v12812_v28, 4  ;;  %v12973_v28 = vadd.s32 104, %v12784_v8 }
 0x2bb   : > { %v12824_v38 = vsub.s32 %v371_v9, %v434_v29 }
 0x2bd   : > { %vm803_vm2 = vcmp.ne.s32.totalorder %v12824_v38, 0  ;;  %vm839_vm3 = vcmp.lt.s32.totalorder %v12824_v38, 0  ;;  %v12884_v62 = vadd.s32 18, %v12824_v38 }
 0x2be   : > { %vm12871_vm10 = vmand %vm839_vm3, %vm803_vm2 }
 0x2c0   : > { %10331 = vmatmul.mubr.msk.bf16.gmra.mrb[8].mxu0 %vm15560_vm0, %v3896_v34  ;;  %v423_v34 = vmul.u32 18, %v422_v25 }
 0x2c1   : > { %10334 = vmatprep.mubr.msk.bf16.mxu0 %vm15560_vm0, %v3897_v35  ;;  %v12818_v35 = vmul.u32.u64.low 3817748708, %v12809_v26  ;;  %v12819_v36 = vmul.u32.u64.high 3817748708, %v12809_v26, %v12818_v35 }
 0x2c2   : > { %v15743_v35 = vmov 0 }
 0x2c3   : > { %v488_v51 = vshrl.u32 %v12819_v36, 4 }
 0x2c8   : > { %10335 = vmatmul.mubr.msk.bf16.gmra.mrb[12].mxu0 %vm15560_vm0, %v3898_v40  ;;  %v12829_v40 = vsub.s32 %v372_v10, %v445_v33  ;;  %v12923_v9 = vmul.u32.u64.low 3817748708, %v12864_v56  ;;  %v12924_v10 = vmul.u32.u64.high 3817748708, %v12864_v56, %v12923_v9 }
 0x2c9   : > { %10338 = vmatprep.mubr.msk.bf16.mxu0 %vm15560_vm0, %v3899_v41  ;;  %v12831_v41 = vsub.s32 %v370_v11, %v423_v34  ;;  %v12988_v33 = vmul.u32.u64.low 3817748708, %v12957_v21  ;;  %v12989_v34 = vmul.u32.u64.high 3817748708, %v12957_v21, %v12988_v33  ;;  %v15748_v9 = vmov 0 }
 0x2ca   : > { %vm804_vm6 = vcmp.ne.s32.totalorder %v12829_v40, 0  ;;  %vm840_vm7 = vcmp.lt.s32.totalorder %v12829_v40, 0  ;;  %v12906_v2 = vadd.s32 18, %v12829_v40  ;;  %v532_v32 = vshrl.u32 %v12924_v10, 4 }
 0x2cb   : > { %vm802_vm8 = vcmp.ne.s32.totalorder %v12831_v41, 0  ;;  %vm838_vm9 = vcmp.lt.s32.totalorder %v12831_v41, 0  ;;  %vm12901_vm12 = vmand %vm840_vm7, %vm804_vm6  ;;  %v12909_v3 = vadd.s32 18, %v12831_v41  ;;  %v543_v33 = vshrl.u32 %v12989_v34, 4 }
 0x2cc   : > { %vm12915_vm13 = vmand %vm838_vm9, %vm802_vm8  ;;  %v15860_v63 = vsel %vm12901_vm12, %v12906_v2, %v12829_v40  ;;  %v15866_v40 = vmov 0 }
 0x2cd   : > { %v15742_v5 = vsel %vm12915_vm13, 4294967295, %v15741_v5 }
 0x2d0   : > { %10339 = vmatmul.mubr.msk.bf16.gmra.mrb[16].mxu0 %vm15560_vm0, %v3900_v46  ;;  %v12835_v45 = vmul.u32.u64.low 3817748708, %v12822_v37  ;;  %v12836_v46 = vmul.u32.u64.high 3817748708, %v12822_v37, %v12835_v45 }
 0x2d1   : > { %10342 = vmatprep.mubr.msk.bf16.mxu0 %vm15560_vm0, %v3901_v47  ;;  %v12839_v47 = vadd.s32 80, %v12784_v8 }
 0x2d2   : > { %v466_v7 = vshrl.u32 %v12836_v46, 4 }
 0x2d3   : > { %v12860_v54 = vmul.u32.u64.low 3817748708, %v12839_v47  ;;  %v12861_v55 = vmul.u32.u64.high 3817748708, %v12839_v47, %v12860_v54 }
 0x2d4   : > { %v13023_v54 = vadd.s32 152, %v12784_v8 }
 0x2d5   : > { %v521_v23 = vshrl.u32 %v12861_v55, 4  ;;  %v533_v55 = vmul.u32 18, %v532_v32 }
 0x2d7   : > { %v522_v36 = vmul.u32 18, %v521_v23 }
 0x2d8   : > { %10343 = vmatmul.mubr.msk.bf16.gmra.mrb[20].mxu0 %vm15560_vm0, %v3902_v52  ;;  %v12857_v52 = vld [vmem:[%s15556_s3 + $0x10] sm:$0xff]  }
 0x2d9   : > { %10346 = vmatprep.mubr.msk.bf16.mxu0 %vm15560_vm0, %v3903_v53  ;;  %15734 = vst [vmem:[#allocation10_spill] sm:$0xff] %v12857_v52  ;;  %v478_v53 = vmul.u32 18, %v477_v44  ;;  %10398 = vmatprep.subr.bf16.mxu1 %v12857_v52  ;;  %v13008_v44 = vmul.u32.u64.low 3817748708, %v12970_v27  ;;  %v13009_v45 = vmul.u32.u64.high 3817748708, %v12970_v27, %v13008_v44 }
 0x2db   : > { %v12919_v6 = vsub.s32 %v375_v20, %v478_v53  ;;  %v467_v20 = vmul.u32 18, %v466_v7  ;;  %v13020_v53 = vadd.s32 128, %v12784_v8  ;;  %v13042_v7 = vsub.s32 %v12839_v47, %v522_v36 }
 0x2dc   : > { %v15751_v47 = vmov 0 }
 0x2dd   : > { %vm807_vm14 = vcmp.ne.s32.totalorder %v12919_v6, 0  ;;  %vm843_vm15 = vcmp.lt.s32.totalorder %v12919_v6, 0  ;;  %v12984_v31 = vsub.s32 %v12822_v37, %v467_v20  ;;  %v510_v37 = vshrl.u32 %v12930_v13, 4  ;;  %15747 = vst [vmem:[#allocation11_spill] sm:$0xff] %v13042_v7 }
 0x2de   : > { %vm12995_vm5 = vmand %vm843_vm15, %vm807_vm14 }
 0x2df   : > { %v15744_v35 = vsel %vm12995_vm5, 4294967295, %v15743_v35  ;;  %vm806_vm8 = vcmp.ne.s32.totalorder %v12984_v31, 0  ;;  %vm842_vm9 = vcmp.lt.s32.totalorder %v12984_v31, 0  ;;  %v13053_v10 = vadd.s32 18, %v12984_v31 }
 0x2e0   : > { %10347 = vmatmul.mubr.msk.bf16.gmra.mrb[24].mxu0 %vm15560_vm0, %v3904_v58  ;;  %v456_v58 = vmul.u32 18, %v455_v48  ;;  %v13012_v46 = vmul.u32.u64.low 3817748708, %v12973_v28  ;;  %v13013_v48 = vmul.u32.u64.high 3817748708, %v12973_v28, %v13012_v46  ;;  %vm13061_vm15 = vmand %vm842_vm9, %vm806_vm8  ;;  %vm15869_vm12 = vnez %v15744_v35 }
 0x2e1   : > { %10350 = vmatprep.mubr.msk.bf16.mxu0 %vm15560_vm0, %v3905_v59  ;;  %v12876_v59 = vmul.u32.u64.low 3817748708, %v12845_v49  ;;  %v12877_v60 = vmul.u32.u64.high 3817748708, %v12845_v49, %v12876_v59  ;;  %v511_v13 = vmul.u32 18, %v510_v37  ;;  %v15752_v47 = vsel %vm13061_vm15, 4294967295, %v15751_v47 }
 0x2e2   : > { %v12926_v11 = vsub.s32 %v373_v22, %v456_v58  ;;  %v12960_v22 = vadd.s32 18, %v12919_v6  ;;  %v13028_v58 = vadd.s32 136, %v12784_v8  ;;  %v13088_v37 = vadd.s32 18, %v13042_v7 }
 0x2e3   : > { %v499_v24 = vshrl.u32 %v12877_v60, 4  ;;  %v13095_v34 = vsub.s32 %v12880_v61, %v511_v13  ;;  %v576_v46 = vshrl.u32 %v13009_v45, 4  ;;  %v13107_v61 = vadd.s32 176, %v12784_v8 }
 0x2e4   : > { %vm805_vm2 = vcmp.ne.s32.totalorder %v12926_v11, 0  ;;  %vm841_vm3 = vcmp.lt.s32.totalorder %v12926_v11, 0  ;;  %v12977_v29 = vadd.s32 18, %v12926_v11  ;;  %15754 = vst [vmem:[#allocation14_spill] sm:$0xff] %v13088_v37  ;;  %v13114_v13 = vadd.s32 160, %v12784_v8 }
 0x2e5   : > { %v500_v42 = vmul.u32 18, %v499_v24  ;;  %vm13003_vm7 = vmand %vm841_vm3, %vm805_vm2  ;;  %v13066_v23 = vmul.u32.u64.low 3817748708, %v13020_v53  ;;  %v13067_v24 = vmul.u32.u64.high 3817748708, %v13020_v53, %v13066_v23  ;;  %vm811_vm2 = vcmp.ne.s32.totalorder %v13042_v7, 0  ;;  %15755 = vst [vmem:[#allocation15_spill] sm:$0xff] %v13095_v34 }
 0x2e6   : > { %v15746_v43 = vsel %vm13003_vm7, 4294967295, %v15745_v43  ;;  %vm847_vm3 = vcmp.lt.s32.totalorder %v13042_v7, 0  ;;  %vm810_vm1 = vcmp.ne.s32.totalorder %v13095_v34, 0  ;;  %vm846_vm8 = vcmp.lt.s32.totalorder %v13095_v34, 0 }
 0x2e7   : > { %v13056_v12 = vsub.s32 %v12845_v49, %v500_v42  ;;  %v13074_v49 = vsub.s32 %v12864_v56, %v533_v55  ;;  %v587_v60 = vshrl.u32 %v13067_v24, 4  ;;  %v13173_v16 = vadd.s32 18, %v13095_v34 }
 0x2e8   : > { %10351 = vmatmul.mubr.msk.bf16.gmra.mrb[28].mxu0 %vm15560_vm0, %v3906_v0  ;;  %v12895_v0 = vadd.s32 18, %v12827_v39 }
 0x2e9   : > { %10354 = vmatprep.mubr.msk.bf16.mxu0 %vm15560_vm0, %v3907_v1  ;;  %15750 = vst [vmem:[#allocation12_spill] sm:$0xff] %v13056_v12  ;;  %15753 = vst [vmem:[#allocation13_spill] sm:$0xff] %v13074_v49  ;;  %v13103_v23 = vadd.s32 18, %v13056_v12  ;;  %vm848_vm9 = vcmp.lt.s32.totalorder %v13074_v49, 0  ;;  %v13111_v45 = vadd.s32 18, %v13074_v49 }
 0x2ea   : > { %15768 = vst [vmem:[#allocation21_spill] sm:$0xff] %v13173_v16  ;;  %v15856_v57 = vsel %vm12890_vm11, %v12895_v0, %v12827_v39  ;;  %vm15864_vm11 = vnez %v15742_v5 }
 0x2eb   : > { %15756 = vst [vmem:[#allocation16_spill] sm:$0xff] %v13103_v23  ;;  %15757 = vst [vmem:[#allocation17_spill] sm:$0xff] %v13111_v45  ;;  %v15865_v1 = vsel %vm15864_vm11, %v12909_v3, %v12831_v41  ;;  %vm15874_vm11 = vnez %v15746_v43 }
 0x2f0   : > { %10355 = vmatmul.mubr.msk.bf16.gmra.mrb[32].mxu0 %vm15560_vm0, %v3908_v4  ;;  %v489_v4 = vmul.u32 18, %v488_v51  ;;  %v13016_v50 = vmul.u32.u64.low 3817748708, %v12981_v30  ;;  %v13017_v51 = vmul.u32.u64.high 3817748708, %v12981_v30, %v13016_v50  ;;  %vm13123_vm0 = vmand %vm847_vm3, %vm811_vm2  ;;  %vm15764_vm2 = vcmp.ne.s32.totalorder %v13074_v49, 0 }
 0x2f1   : > { %v554_v50 = vshrl.u32 %v13013_v48, 4  ;;  %v13117_v48 = vadd.s32 184, %v12784_v8  ;;  %vm13144_vm3 = vmand %vm848_vm9, %vm15764_vm2 }
 0x2f2   : > { %v12952_v19 = vsub.s32 %v12809_v26, %v489_v4  ;;  %v12966_v25 = vmul.u32.u64.low 3817748708, %v12937_v15  ;;  %v12967_v26 = vmul.u32.u64.high 3817748708, %v12937_v15, %v12966_v25  ;;  %v609_v55 = vshrl.u32 %v13017_v51, 4 }
 0x2f3   : > { %v13070_v25 = vmul.u32.u64.low 3817748708, %v13023_v54  ;;  %v13071_v32 = vmul.u32.u64.high 3817748708, %v13023_v54, %v13070_v25  ;;  %v15758_v51 = vmov 0  ;;  %v555_v56 = vmul.u32 18, %v554_v50 }
 0x2f4   : > { %vm808_vm4 = vcmp.ne.s32.totalorder %v12952_v19, 0  ;;  %vm844_vm6 = vcmp.lt.s32.totalorder %v12952_v19, 0  ;;  %v13039_v4 = vadd.s32 18, %v12952_v19  ;;  %v565_v20 = vshrl.u32 %v12967_v26, 4 }
 0x2f5   : > { %vm13048_vm14 = vmand %vm844_vm6, %vm808_vm4  ;;  %v13078_v26 = vmul.u32.u64.low 3817748708, %v13028_v58  ;;  %v13079_v36 = vmul.u32.u64.high 3817748708, %v13028_v58, %v13078_v26  ;;  %vm809_vm4 = vcmp.ne.s32.totalorder %v13056_v12, 0  ;;  %vm845_vm6 = vcmp.lt.s32.totalorder %v13056_v12, 0 }
 0x2f6   : > { %v15749_v9 = vsel %vm13048_vm14, 4294967295, %v15748_v9  ;;  %v566_v44 = vmul.u32 18, %v565_v20  ;;  %v544_v25 = vmul.u32 18, %v543_v33  ;;  %v15759_v51 = vsel %vm13123_vm0, 4294967295, %v15758_v51  ;;  %vm13136_vm15 = vmand %vm845_vm6, %vm809_vm4 }
 0x2f7   : > { %v577_v33 = vmul.u32 18, %v576_v46  ;;  %v15761_v26 = vmov 0  ;;  %v610_v42 = vmul.u32 18, %v609_v55  ;;  %v620_v59 = vshrl.u32 %v13071_v32, 4  ;;  %vm13186_vm4 = vmand %vm846_vm8, %vm810_vm1 }
 0x2f8   : > { %v13130_v20 = vsub.s32 %v12937_v15, %v566_v44  ;;  %v15762_v26 = vsel %vm13136_vm15, 4294967295, %v15761_v26  ;;  %v15765_v15 = vmov 0  ;;  %v598_v44 = vshrl.u32 %v13079_v36, 4 }
 0x2f9   : > { %15763 = vst [vmem:[#allocation19_spill] sm:$0xff] %v15762_v26  ;;  %v15766_v15 = vsel %vm13144_vm3, 4294967295, %v15765_v15  ;;  %v13150_v46 = vmul.u32.u64.low 3817748708, %v13107_v61  ;;  %v13151_v18 = vmul.u32.u64.high 3817748708, %v13107_v61, %v13150_v46  ;;  %v13176_v14 = vsub.s32 %v12957_v21, %v544_v25 }
 0x2fa   : > { %15760 = vst [vmem:[#allocation18_spill] sm:$0xff] %v13130_v20  ;;  %15767 = vst [vmem:[#allocation20_spill] sm:$0xff] %v15766_v15  ;;  %v13157_v50 = vmul.u32.u64.low 3817748708, %v13114_v13  ;;  %v13158_v24 = vmul.u32.u64.high 3817748708, %v13114_v13, %v13157_v50  ;;  %v13161_v32 = vmul.u32.u64.low 3817748708, %v13117_v48  ;;  %v13162_v55 = vmul.u32.u64.high 3817748708, %v13117_v48, %v13161_v32 }
 0x2fb   : > { %15769 = vst [vmem:[#allocation22_spill] sm:$0xff] %v13176_v14  ;;  %v15770_v32 = vmov 0  ;;  %v13191_v46 = vsub.s32 %v12970_v27, %v577_v33  ;;  %v588_v36 = vmul.u32 18, %v587_v60  ;;  %v621_v52 = vmul.u32 18, %v620_v59 }
 0x2fc   : > { %v15771_v32 = vsel %vm13186_vm4, 4294967295, %v15770_v32  ;;  %v13194_v21 = vsub.s32 %v12973_v28, %v555_v56  ;;  %v599_v25 = vmul.u32 18, %v598_v44  ;;  %vm815_vm6 = vcmp.ne.s32.totalorder %v13130_v20, 0 }
 0x2fd   : > { %15772 = vst [vmem:[#allocation23_spill] sm:$0xff] %v15771_v32  ;;  %15773 = vst [vmem:[#allocation24_spill] sm:$0xff] %v13191_v46  ;;  %v13197_v15 = vmul.u32.u64.low 3817748708, %v13154_v17  ;;  %v13198_v50 = vmul.u32.u64.high 3817748708, %v13154_v17, %v13197_v15  ;;  %v13203_v49 = vadd.s32 18, %v13130_v20  ;;  %v13206_v27 = vsub.s32 %v12981_v30, %v610_v42 }
 0x2fe   : > { %15774 = vst [vmem:[#allocation25_spill] sm:$0xff] %v13194_v21  ;;  %v13215_v59 = vadd.s32 208, %v12784_v8  ;;  %v13218_v60 = vadd.s32 18, %v13176_v14  ;;  %v13222_v30 = vsub.s32 %v13020_v53, %v588_v36  ;;  %v13225_v42 = vsub.s32 %v13023_v54, %v621_v52 }
 0x2ff   : > { %15775 = vst [vmem:[#allocation26_spill] sm:$0xff] %v13203_v49  ;;  %15776 = vst [vmem:[#allocation27_spill] sm:$0xff] %v13206_v27  ;;  %vm852_vm1 = vcmp.lt.s32.totalorder %v13191_v46, 0  ;;  %v13230_v56 = vsub.s32 %v13028_v58, %v599_v25  ;;  %v653_v33 = vshrl.u32 %v13151_v18, 4  ;;  %vm15780_vm9 = vcmp.lt.s32.totalorder %v13130_v20, 0 }
 0x300   : > { %15777 = vst [vmem:[#allocation28_spill] sm:$0xff] %v13222_v30  ;;  %15778 = vst [vmem:[#allocation29_spill] sm:$0xff] %v13225_v42  ;;  %v15781_v15 = vmov 0  ;;  %vm850_vm4 = vcmp.lt.s32.totalorder %v13194_v21, 0  ;;  %v631_v52 = vshrl.u32 %v13158_v24, 4  ;;  %v664_v53 = vshrl.u32 %v13162_v55, 4 }
 0x301   : > { %15779 = vst [vmem:[#allocation30_spill] sm:$0xff] %v13230_v56  ;;  %vm13237_vm2 = vmand %vm15780_vm9, %vm815_vm6  ;;  %vm15784_vm8 = vcmp.ne.s32.totalorder %v13176_v14, 0  ;;  %vm15785_vm15 = vcmp.lt.s32.totalorder %v13176_v14, 0  ;;  %v15786_v18 = vmov 0  ;;  %vm855_vm6 = vcmp.lt.s32.totalorder %v13206_v27, 0 }
 0x302   : > { %v15782_v15 = vsel %vm13237_vm2, 4294967295, %v15781_v15  ;;  %vm13249_vm0 = vmand %vm15785_vm15, %vm15784_vm8  ;;  %v13255_v54 = vmul.u32.u64.low 3817748708, %v13215_v59  ;;  %v13256_v58 = vmul.u32.u64.high 3817748708, %v13215_v59, %v13255_v54  ;;  %v13259_v44 = vadd.s32 192, %v12784_v8 }
 0x303   : > { %15783 = vst [vmem:[#allocation31_spill] sm:$0xff] %v15782_v15  ;;  %v15787_v18 = vsel %vm13249_vm0, 4294967295, %v15786_v18  ;;  %vm15789_vm9 = vcmp.ne.s32.totalorder %v13191_v46, 0  ;;  %v15790_v24 = vmov 0  ;;  %v13268_v55 = vadd.s32 18, %v13191_v46 }
 0x304   : > { %15788 = vst [vmem:[#allocation32_spill] sm:$0xff] %v15787_v18  ;;  %vm13263_vm3 = vmand %vm852_vm1, %vm15789_vm9  ;;  %vm853_vm8 = vcmp.lt.s32.totalorder %v13222_v30, 0  ;;  %vm15794_vm7 = vcmp.ne.s32.totalorder %v13194_v21, 0  ;;  %v15795_v36 = vmov 0  ;;  %vm856_vm1 = vcmp.lt.s32.totalorder %v13225_v42, 0 }
 0x305   : > { %v15791_v24 = vsel %vm13263_vm3, 4294967295, %v15790_v24  ;;  %15793 = vst [vmem:[#allocation34_spill] sm:$0xff] %v13268_v55  ;;  %vm13275_vm5 = vmand %vm850_vm4, %vm15794_vm7  ;;  %vm818_vm9 = vcmp.ne.s32.totalorder %v13230_v56, 0  ;;  %v654_v25 = vmul.u32 18, %v653_v33  ;;  %v642_v54 = vshrl.u32 %v13198_v50, 4 }
 0x306   : > { %15792 = vst [vmem:[#allocation33_spill] sm:$0xff] %v15791_v24  ;;  %v15796_v36 = vsel %vm13275_vm5, 4294967295, %v15795_v36  ;;  %vm15798_vm13 = vcmp.ne.s32.totalorder %v13206_v27, 0  ;;  %v15799_v28 = vmov 0  ;;  %vm854_vm14 = vcmp.lt.s32.totalorder %v13230_v56, 0 }
 0x307   : > { %15797 = vst [vmem:[#allocation35_spill] sm:$0xff] %v15796_v36  ;;  %vm13284_vm15 = vmand %vm855_vm6, %vm15798_vm13  ;;  %v632_v34 = vmul.u32 18, %v631_v52  ;;  %v665_v16 = vmul.u32 18, %v664_v53  ;;  %v13290_v32 = vadd.s32 216, %v12784_v8  ;;  %v13293_v45 = vadd.s32 18, %v13194_v21 }
 0x308   : > { %v15800_v28 = vsel %vm13284_vm15, 4294967295, %v15799_v28  ;;  %v13296_v33 = vadd.s32 18, %v13206_v27  ;;  %vm15804_vm7 = vcmp.ne.s32.totalorder %v13222_v30, 0  ;;  %v15805_v50 = vmov 0 }
 0x309   : > { %15801 = vst [vmem:[#allocation36_spill] sm:$0xff] %v15800_v28  ;;  %15802 = vst [vmem:[#allocation37_spill] sm:$0xff] %v13293_v45  ;;  %v13305_v12 = vmul.u32.u64.low 3817748708, %v13259_v44  ;;  %v13306_v23 = vmul.u32.u64.high 3817748708, %v13259_v44, %v13305_v12  ;;  %v13313_v53 = vadd.s32 18, %v13222_v30  ;;  %vm15809_vm13 = vcmp.ne.s32.totalorder %v13225_v42, 0 }
 0x30a   : > { %15803 = vst [vmem:[#allocation38_spill] sm:$0xff] %v13296_v33  ;;  %vm13300_vm4 = vmand %vm853_vm8, %vm15804_vm7  ;;  %v15810_v26 = vmov 0  ;;  %v13324_v7 = vadd.s32 18, %v13225_v42  ;;  %v13327_v12 = vadd.s32 18, %v13230_v56  ;;  %v15815_v49 = vmov 0 }
 0x30b   : > { %v15806_v50 = vsel %vm13300_vm4, 4294967295, %v15805_v50  ;;  %15808 = vst [vmem:[#allocation40_spill] sm:$0xff] %v13313_v53  ;;  %vm13319_vm6 = vmand %vm856_vm1, %vm15809_vm13  ;;  %v13346_v15 = vsub.s32 %v13107_v61, %v654_v25  ;;  %v643_v37 = vmul.u32 18, %v642_v54  ;;  %v13349_v18 = vsub.s32 %v13114_v13, %v632_v34  ;;  %v13388_v25 = vld [vmem:[%s15555_s2] ss:$0 sm:$0xff] }
 0x30c   : > { %15807 = vst [vmem:[#allocation39_spill] sm:$0xff] %v15806_v50  ;;  %v15811_v26 = vsel %vm13319_vm6, 4294967295, %v15810_v26  ;;  %15813 = vst [vmem:[#allocation42_spill] sm:$0xff] %v13324_v7  ;;  %v13352_v52 = vsub.s32 %v13117_v48, %v665_v16  ;;  %v13355_v20 = vmul.u32.u64.low 3817748708, %v13290_v32  ;;  %v13356_v46 = vmul.u32.u64.high 3817748708, %v13290_v32, %v13355_v20 }
 0x30d   : > { %15812 = vst [vmem:[#allocation41_spill] sm:$0xff] %v15811_v26  ;;  %15814 = vst [vmem:[#allocation43_spill] sm:$0xff] %v13327_v12  ;;  %v697_v34 = vshrl.u32 %v13256_v58, 4  ;;  %v13368_v13 = vadd.s32 200, %v12784_v8  ;;  %v13383_v58 = vadd.s32 240, %v12784_v8  ;;  %vm859_vm1 = vcmp.lt.s32.totalorder %v13346_v15, 0 }
 0x30e   : > { %vm13341_vm8 = vmand %vm854_vm14, %vm818_vm9  ;;  %15818 = vst [vmem:[#allocation45_spill] sm:$0xff] %v13346_v15  ;;  %vm823_vm14 = vcmp.ne.s32.totalorder %v13346_v15, 0  ;;  %v13393_v54 = vadd.s32 18, %v13346_v15  ;;  %v13396_v48 = vsub.s32 %v13154_v17, %v643_v37  ;;  %vm857_vm7 = vcmp.lt.s32.totalorder %v13349_v18, 0 }
 0x30f   : > { %v15816_v49 = vsel %vm13341_vm8, 4294967295, %v15815_v49  ;;  %15819 = vst [vmem:[#allocation46_spill] sm:$0xff] %v13349_v18  ;;  %15820 = vst [vmem:[#allocation47_spill] sm:$0xff] %v13352_v52  ;;  %v698_v16 = vmul.u32 18, %v697_v34  ;;  %v675_v61 = vshrl.u32 %v13306_v23, 4  ;;  %v15823_v37 = vmov 0 }
 0x310   : > { %15817 = vst [vmem:[#allocation44_spill] sm:$0xff] %v15816_v49  ;;  %15821 = vst [vmem:[#allocation48_spill] sm:$0xff] %v13393_v54  ;;  %v13404_v55 = vmul.u32.u64.low 3817748708, %v13368_v13  ;;  %v13405_v56 = vmul.u32.u64.high 3817748708, %v13368_v13, %v13404_v55  ;;  %v13417_v49 = vadd.s32 18, %v13349_v18  ;;  %vm15827_vm8 = vcmp.ne.s32.totalorder %v13349_v18, 0 }
 0x311   : > { %15822 = vst [vmem:[#allocation49_spill] sm:$0xff] %v13396_v48  ;;  %vm13412_vm9 = vmand %vm859_vm1, %vm823_vm14  ;;  %v13420_v34 = vmul.u32.u64.low 3817748708, %v13383_v58  ;;  %v13421_v23 = vmul.u32.u64.high 3817748708, %v13383_v58, %v13420_v34  ;;  %v13435_v7 = vadd.s32 18, %v13352_v52  ;;  %vm822_vm14 = vcmp.ne.s32.totalorder %v13396_v48, 0 }
 0x312   : > { %v15824_v37 = vsel %vm13412_vm9, 4294967295, %v15823_v37  ;;  %15826 = vst [vmem:[#allocation51_spill] sm:$0xff] %v13417_v49  ;;  %vm13430_vm13 = vmand %vm857_vm7, %vm15827_vm8  ;;  %v13439_v26 = vadd.s32 224, %v12784_v8  ;;  %vm15832_vm1 = vcmp.ne.s32.totalorder %v13352_v52, 0  ;;  %vm15833_vm8 = vcmp.lt.s32.totalorder %v13352_v52, 0 }
 0x313   : > { %15825 = vst [vmem:[#allocation50_spill] sm:$0xff] %v15824_v37  ;;  %15831 = vst [vmem:[#allocation53_spill] sm:$0xff] %v13435_v7  ;;  %v15834_v53 = vmov 0  ;;  %vm858_vm6 = vcmp.lt.s32.totalorder %v13396_v48, 0  ;;  %v708_v50 = vshrl.u32 %v13356_v46, 4  ;;  %v676_v28 = vmul.u32 18, %v675_v61 }
 0x314   : > { %vm13449_vm7 = vmand %vm15833_vm8, %vm15832_vm1  ;;  %v13477_v61 = vadd.s32 18, %v13396_v48  ;;  %v686_v7 = vshrl.u32 %v13405_v56, 4  ;;  %v13533_v48 = vadd.s32 272, %v12784_v8  ;;  %v15847_v54 = vmov 0 }
 0x315   : > { %v15835_v53 = vsel %vm13449_vm7, 4294967295, %v15834_v53  ;;  %vm13483_vm1 = vmand %vm858_vm6, %vm822_vm14 }
 0x316   : > { %15836 = vst [vmem:[#allocation54_spill] sm:$0xff] %v15835_v53  ;;  %15838 = vst [vmem:[#allocation56_spill] sm:$0xff] %v13477_v61  ;;  %v13502_v53 = vadd.s32 248, %v12784_v8  ;;  %v687_v49 = vmul.u32 18, %v686_v7 }
 0x318   : > { %15842 = vst [vmem:[#allocation58_spill] sm:$0xff] %v13502_v53 }
 0x383   : > { %v10324_v20 = vpop.f32.mrb[0].mxu0 }
 0x384   : > { %v13408_v12 = vadd.f32 %v10324_v20, %v13388_v25  ;;  %v4030_v17 = vpop.f32.mrb[1].mxu0  ;;  %v15828_v20 = vmov 0 }
 0x385   : > { %v13424_v42 = vadd.f32 %v13388_v25, %v4030_v17  ;;  %v10325_v55 = vpop.f32.mrb[2].mxu0  ;;  %v15829_v20 = vsel %vm13430_vm13, 4294967295, %v15828_v20  ;;  %vm15879_vm13 = vnez %v15749_v9 }
 0x386   : > { %15830 = vst [vmem:[#allocation52_spill] sm:$0xff] %v15829_v20  ;;  %v9198_v17 = vmul.f32 -1.442695, %v13408_v12  ;;  %v13443_v34 = vadd.f32 %v10325_v55, %v13388_v25  ;;  %v4033_v30 = vpop.f32.mrb[3].mxu0  ;;  %v13460_v55 = vsub.s32 %v13215_v59, %v698_v16  ;;  %v15839_v16 = vmov 0 }
 0x387   : > { %v9196_v27 = vmul.f32 -1.442695, %v13424_v42  ;;  %v13457_v33 = vadd.f32 %v13388_v25, %v4033_v30  ;;  %v15840_v16 = vsel %vm13483_vm1, 4294967295, %v15839_v16  ;;  %v15880_v43 = vsel %vm15879_vm13, %v13039_v4, %v12952_v19 }
 0x388   : > { %15837 = vst [vmem:[#allocation55_spill] sm:$0xff] %v13460_v55  ;;  %11543 = vpow2.f32 %v9198_v17  ;;  %v9199_v21 = vmul.f32 -1.442695, %v13443_v34  ;;  %15841 = vst [vmem:[#allocation57_spill] sm:$0xff] %v15840_v16  ;;  %v13488_v17 = vmul.u32.u64.low 3817748708, %v13439_v26  ;;  %v13489_v46 = vmul.u32.u64.high 3817748708, %v13439_v26, %v13488_v17 }
 0x389   : > { %11545 = vpow2.f32 %v9196_v27  ;;  %v9197_v30 = vmul.f32 -1.442695, %v13457_v33  ;;  %v709_v27 = vmul.u32 18, %v708_v50  ;;  %vm827_vm8 = vcmp.ne.s32.totalorder %v13460_v55, 0 }
 0x38a   : > { %11547 = vpow2.f32 %v9199_v21  ;;  %vm863_vm7 = vcmp.lt.s32.totalorder %v13460_v55, 0  ;;  %v13494_v21 = vsub.s32 %v13259_v44, %v676_v28  ;;  %v741_v50 = vshrl.u32 %v13421_v23, 4 }
 0x38b   : > { %11549 = vpow2.f32 %v9197_v30  ;;  %v10328_v45 = vpop.f32.mrb[4].mxu0  ;;  %v13515_v44 = vadd.s32 232, %v12784_v8  ;;  %vm13525_vm6 = vmand %vm863_vm7, %vm827_vm8  ;;  %v13530_v28 = vsub.s32 %v13290_v32, %v709_v27  ;;  %v719_v7 = vshrl.u32 %v13489_v46, 4 }
 0x38c   : > { %v13497_v59 = vadd.f32 %v10328_v45, %v13388_v25  ;;  %v4046_v52 = vpop.f32.mrb[5].mxu0  ;;  %v13512_v45 = vadd.s32 18, %v13460_v55  ;;  %vm825_vm14 = vcmp.ne.s32.totalorder %v13494_v21, 0  ;;  %vm861_vm1 = vcmp.lt.s32.totalorder %v13494_v21, 0 }
 0x38d   : > { %v13505_v30 = vadd.f32 %v13388_v25, %v4046_v52  ;;  %v10329_v17 = vpop.f32.mrb[6].mxu0  ;;  %v15844_v52 = vmov 0  ;;  %v742_v20 = vmul.u32 18, %v741_v50  ;;  %vm13550_vm7 = vmand %vm861_vm1, %vm825_vm14  ;;  %vm828_vm8 = vcmp.ne.s32.totalorder %v13530_v28, 0 }
 0x38e   : > { %15843 = vst [vmem:[#allocation59_spill] sm:$0xff] %v13512_v45  ;;  %v9202_v56 = vmul.f32 -1.442695, %v13497_v59  ;;  %v13519_v23 = vadd.f32 %v10329_v17, %v13388_v25  ;;  %v4049_v18 = vpop.f32.mrb[7].mxu0  ;;  %v15845_v52 = vsel %vm13525_vm6, 4294967295, %v15844_v52  ;;  %v15848_v54 = vsel %vm13550_vm7, 4294967295, %v15847_v54 }
 0x38f   : > { %15846 = vst [vmem:[#allocation60_spill] sm:$0xff] %v15845_v52  ;;  %v9200_v61 = vmul.f32 -1.442695, %v13505_v30  ;;  %v13537_v17 = vadd.f32 %v13388_v25, %v4049_v18  ;;  %v13548_v18 = vadd.s32 18, %v13494_v21  ;;  %vm864_vm6 = vcmp.lt.s32.totalorder %v13530_v28, 0 }
 0x390   : > { %11551 = vpow2.f32 %v9202_v56  ;;  %v9203_v16 = vmul.f32 -1.442695, %v13519_v23  ;;  %v13566_v46 = vadd.s32 18, %v13530_v28  ;;  %vm13599_vm14 = vmand %vm864_vm6, %vm828_vm8  ;;  %vm13626_vm6 = vcmp.lt.s32.totalorder %v15860_v63, 16 }
 0x391   : > { %11553 = vpow2.f32 %v9200_v61  ;;  %v9201_v32 = vmul.f32 -1.442695, %v13537_v17  ;;  %v13556_v61 = vmul.u32.u64.low 3817748708, %v13502_v53  ;;  %v13557_v50 = vmul.u32.u64.high 3817748708, %v13502_v53, %v13556_v61 }
 0x392   : > { %v11544_v15 = vpop.eup %11543  ;;  %11555 = vpow2.f32 %v9203_v16  ;;  %v13569_v53 = vsub.s32 %v13368_v13, %v687_v49  ;;  %v15849_v13 = vsel %vm12871_vm10, %v12884_v62, %v12824_v38  ;;  %v13604_v38 = vadd.s32 256, %v12784_v8 }
 0x393   : > { %v11546_v56 = vpop.eup %11545  ;;  %v4319_v37 = vadd.f32 1.0, %v11544_v15  ;;  %11557 = vpow2.f32 %v9201_v32  ;;  %v10332_v27 = vpop.f32.mrb[8].mxu0  ;;  %vm13587_vm1 = vcmp.lt.s32.totalorder %v15849_v13, 16  ;;  %vm13611_vm10 = vcmp.lt.s32.totalorder %v15856_v57, 16 }
 0x394   : > { %v11548_v16 = vpop.eup %11547  ;;  %v4317_v55 = vadd.f32 1.0, %v11546_v56  ;;  %v13563_v45 = vadd.f32 %v10332_v27, %v13388_v25  ;;  %v4062_v52 = vpop.f32.mrb[9].mxu0  ;;  %15855 = vst [vmem:[#allocation62_spill] sm:$0xff] %v13604_v38  ;;  %v15857_v62 = vmov 0  ;;  %vm13641_vm8 = vcmp.lt.s32.totalorder %v15865_v1, 16 }
 0x395   : > { %v11550_v61 = vpop.eup %11549  ;;  %11559 = vrcp.f32 %v4319_v37  ;;  %v4320_v15 = vadd.f32 1.0, %v11548_v16  ;;  %v13572_v32 = vadd.f32 %v13388_v25, %v4062_v52  ;;  %v10333_v36 = vpop.f32.mrb[10].mxu0  ;;  %v15850_v37 = vmov 0 }
 0x396   : > { %11561 = vrcp.f32 %v4317_v55  ;;  %v4318_v56 = vadd.f32 1.0, %v11550_v61  ;;  %v9206_v24 = vmul.f32 -1.442695, %v13563_v45  ;;  %v13580_v14 = vadd.f32 %v10333_v36, %v13388_v25  ;;  %v4065_v49 = vpop.f32.mrb[11].mxu0 }
 0x397   : > { %v15851_v37 = vsel %vm13587_vm1, 4294967295, %v15850_v37  ;;  %11563 = vrcp.f32 %v4320_v15  ;;  %v9204_v52 = vmul.f32 -1.442695, %v13572_v32  ;;  %v13593_v55 = vadd.f32 %v13388_v25, %v4065_v49 }
 0x398   : > { %15852 = vst [vmem:[#allocation61_spill] sm:$0xff] %v15851_v37  ;;  %v15853_v36 = vmov 0  ;;  %v15858_v62 = vsel %vm13611_vm10, 4294967295, %v15857_v62  ;;  %11565 = vrcp.f32 %v4318_v56  ;;  %v9207_v16 = vmul.f32 -1.442695, %v13580_v14 }
 0x399   : > { %v15854_v36 = vsel %vm13599_vm14, 4294967295, %v15853_v36  ;;  %15859 = vst [vmem:[#allocation63_spill] sm:$0xff] %v15858_v62  ;;  %v13617_v61 = vsub.s32 %v13383_v58, %v742_v20  ;;  %v13619_v15 = vmul.u32 18, %v719_v7  ;;  %v15861_v49 = vmov 0 }
 0x39a   : > { %v15862_v49 = vsel %vm13626_vm6, 4294967295, %v15861_v49  ;;  %11567 = vpow2.f32 %v9206_v24  ;;  %v9205_v39 = vmul.f32 -1.442695, %v13593_v55  ;;  %v11552_v58 = vpop.eup %11551  ;;  %v15867_v40 = vsel %vm13641_vm8, 4294967295, %v15866_v40 }
 0x39b   : > { %15863 = vst [vmem:[#allocation64_spill] sm:$0xff] %v15862_v49  ;;  %v13632_v0 = vmul.u32.u64.low 3817748708, %v13515_v44  ;;  %v13633_v56 = vmul.u32.u64.high 3817748708, %v13515_v44, %v13632_v0  ;;  %15868 = vst [vmem:[#allocation65_spill] sm:$0xff] %v15867_v40  ;;  %11569 = vpow2.f32 %v9204_v52  ;;  %v11554_v7 = vpop.eup %11553  ;;  %v4323_v5 = vadd.f32 1.0, %v11552_v58  ;;  %v10336_v13 = vpop.f32.mrb[12].mxu0 }
 0x39c   : > { %v13650_v24 = vmul.u32.u64.low 3817748708, %v13533_v48  ;;  %v13651_v20 = vmul.u32.u64.high 3817748708, %v13533_v48, %v13650_v24  ;;  %11571 = vpow2.f32 %v9207_v16  ;;  %v11556_v52 = vpop.eup %11555  ;;  %v4321_v57 = vadd.f32 1.0, %v11554_v7  ;;  %v4078_v0 = vpop.f32.mrb[13].mxu0 }
 0x39d   : > { %v13655_v41 = vmul.u32.u64.low 3817748708, %v13604_v38  ;;  %v13656_v3 = vmul.u32.u64.high 3817748708, %v13604_v38, %v13655_v41  ;;  %11573 = vpow2.f32 %v9205_v39  ;;  %v13660_v63 = vadd.f32 %v10336_v13, %v13388_v25  ;;  %v11558_v1 = vpop.eup %11557  ;;  %v10337_v58 = vpop.f32.mrb[14].mxu0 }
 0x39e   : > { %11575 = vrcp.f32 %v4323_v5  ;;  %v4324_v24 = vadd.f32 1.0, %v11556_v52  ;;  %v13664_v16 = vadd.f32 %v13388_v25, %v4078_v0  ;;  %v4322_v41 = vadd.f32 1.0, %v11558_v1  ;;  %v4081_v13 = vpop.f32.mrb[15].mxu0 }
 0x39f   : > { %11577 = vrcp.f32 %v4321_v57  ;;  %v9210_v7 = vmul.f32 -1.442695, %v13660_v63  ;;  %v13669_v39 = vadd.f32 %v10337_v58, %v13388_v25  ;;  %v11560_v2 = vpop.eup %11559  ;;  %v15870_v5 = vsel %vm15869_vm12, %v12960_v22, %v12919_v6 }
 0x3a0   : > { %vm13676_vm14 = vcmp.lt.s32.totalorder %v15870_v5, 16  ;;  %v15871_v52 = vmov 0  ;;  %11579 = vrcp.f32 %v4324_v24  ;;  %v9208_v57 = vmul.f32 -1.442695, %v13664_v16  ;;  %v11562_v58 = vpop.eup %11561 }
 0x3a1   : > { %v15872_v52 = vsel %vm13676_vm14, 4294967295, %v15871_v52  ;;  %v13682_v0 = vadd.f32 %v13388_v25, %v4081_v13  ;;  %v13685_v1 = vadd.s32 18, %v13569_v53  ;;  %v4427_v27 = vmul.f32 %v11560_v2, %v13408_v12  ;;  %v11564_v24 = vpop.eup %11563 }
 0x3a2   : > { %15873 = vst [vmem:[#allocation66_spill] sm:$0xff] %v15872_v52  ;;  %v15875_v6 = vsel %vm15874_vm11, %v12977_v29, %v12926_v11  ;;  %v15876_v22 = vmov 0  ;;  %11581 = vrcp.f32 %v4322_v41  ;;  %v9211_v35 = vmul.f32 -1.442695, %v13669_v39  ;;  %v11566_v29 = vpop.eup %11565 }
 0x3a3   : > { %vm13693_vm12 = vcmp.lt.s32.totalorder %v15875_v6, 16  ;;  %v4425_v13 = vmul.f32 %v11562_v58, %v13424_v42  ;;  %vm13705_vm9 = vcmp.lt.s32.totalorder %v15880_v43, 16  ;;  %v15881_v12 = vmov 0 }
 0x3a4   : > { %v15877_v22 = vsel %vm13693_vm12, 4294967295, %v15876_v22  ;;  %v15882_v12 = vsel %vm13705_vm9, 4294967295, %v15881_v12  ;;  %11583 = vpow2.f32 %v9210_v7  ;;  %v9209_v11 = vmul.f32 -1.442695, %v13682_v0  ;;  %v11568_v41 = vpop.eup %11567 }
 0x3a5   : > { %15878 = vst [vmem:[#allocation67_spill] sm:$0xff] %v15877_v22  ;;  %15883 = vst [vmem:[#allocation68_spill] sm:$0xff] %v15882_v12  ;;  %v4535_v2 = vsel %vm13587_vm1, %v4427_v27, 0.0  ;;  %v4428_v42 = vmul.f32 %v11564_v24, %v13443_v34  ;;  %vm15884_vm7 = vnez %v15752_v47  ;;  %v15886_v4 = vmov 0  ;;  %v10340_v47 = vpop.f32.mrb[16].mxu0 }
 0x3a6   : > { %v15885_v19 = vsel %vm15884_vm7, %v13053_v10, %v12984_v31  ;;  %11585 = vpow2.f32 %v9208_v57  ;;  %v13724_v9 = vadd.s32 18, %v13617_v61  ;;  %vm15889_vm11 = vcmask 261120   ;;  %v11570_v10 = vpop.eup %11569  ;;  %v4094_v58 = vpop.f32.mrb[17].mxu0 }
 0x3a7   : > { %vm13719_vm13 = vcmp.lt.s32.totalorder %v15885_v19, 16  ;;  %4616 = vst.msk [vmem:[#allocation3 + $0x23] sm:$0xff] %vm15889_vm11, %v4535_v2  ;;  %v4533_v27 = vsel %vm13611_vm10, %v4425_v13, 0.0  ;;  %v4426_v34 = vmul.f32 %v11566_v29, %v13457_v33  ;;  %11587 = vpow2.f32 %v9211_v35  ;;  %vm15890_vm7 = vmmov %vm15889_vm11  ;;  %v11572_v6 = vpop.eup %11571  ;;  %v10341_v35 = vpop.f32.mrb[18].mxu0 }
 0x3a8   : > { %v15887_v4 = vsel %vm13719_vm13, 4294967295, %v15886_v4  ;;  %v13732_v31 = vsub.s32 %v13439_v26, %v13619_v15  ;;  %4614 = vst.msk [vmem:[#allocation3 + $0x13] sm:$0xff] %vm15890_vm7, %v4533_v27  ;;  %v4536_v7 = vsel %vm13626_vm6, %v4428_v42, 0.0  ;;  %v4327_v5 = vadd.f32 1.0, %v11568_v41  ;;  %vm15891_vm11 = vmmov %vm15890_vm7  ;;  %v11574_v13 = vpop.eup %11573  ;;  %v4097_v2 = vpop.f32.mrb[19].mxu0 }
 0x3a9   : > { %15888 = vst [vmem:[#allocation69_spill] sm:$0xff] %v15887_v4  ;;  %11589 = vpow2.f32 %v9209_v11  ;;  %v13738_v57 = vadd.f32 %v10340_v47, %v13388_v25  ;;  %4617 = vst.msk [vmem:[#allocation3 + $0x2b] sm:$0xff] %vm15891_vm11, %v4536_v7  ;;  %v4534_v33 = vsel %vm13641_vm8, %v4426_v34, 0.0  ;;  %v4325_v26 = vadd.f32 1.0, %v11570_v10  ;;  %v11576_v19 = vpop.eup %11575  ;;  %v15897_v7 = vld [vmem:[#allocation14_spill] sm:$0xff] }
 0x3aa   : > { %v13744_v15 = vadd.f32 %v13388_v25, %v4094_v58  ;;  %4615 = vst.msk [vmem:[#allocation3 + $0x1b] sm:$0xff] %vm15890_vm7, %v4534_v33  ;;  %11591 = vrcp.f32 %v4327_v5  ;;  %v4328_v43 = vadd.f32 1.0, %v11572_v6  ;;  %v13750_v29 = vadd.f32 %v10341_v35, %v13388_v25  ;;  %v11578_v47 = vpop.eup %11577  ;;  %v15898_v5 = vld [vmem:[#allocation11_spill] sm:$0xff] }
 0x3ab   : > { %v9214_v11 = vmul.f32 -1.442695, %v13738_v57  ;;  %vm15892_vm11 = vcmp.ne.s32.totalorder %v13569_v53, 0  ;;  %vm15893_vm8 = vcmp.lt.s32.totalorder %v13569_v53, 0  ;;  %11593 = vrcp.f32 %v4325_v26  ;;  %v16080_v26 = vld [vmem:[#allocation62_spill] sm:$0xff] }
 0x3ac   : > { %vm13756_vm6 = vmand %vm15893_vm8, %vm15892_vm11  ;;  %v4326_v41 = vadd.f32 1.0, %v11574_v13  ;;  %v9212_v27 = vmul.f32 -1.442695, %v13744_v15  ;;  %v13762_v34 = vadd.f32 %v13388_v25, %v4097_v2  ;;  %v4431_v10 = vmul.f32 %v11576_v19, %v13497_v59  ;;  %v11580_v59 = vpop.eup %11579  ;;  %v15908_v13 = vld [vmem:[#allocation19_spill] sm:$0xff]  ;;  %v15910_v2 = vld [vmem:[#allocation16_spill] sm:$0xff] }
 0x3ad   : > { %vm15896_vm7 = vnez %v15759_v51  ;;  %v15900_v6 = vmov 0  ;;  %11595 = vrcp.f32 %v4328_v43  ;;  %v9215_v33 = vmul.f32 -1.442695, %v13750_v29  ;;  %v15911_v43 = vld [vmem:[#allocation12_spill] sm:$0xff]  ;;  %v11582_v24 = vpop.eup %11581 }
 0x3ae   : > { %v15899_v58 = vsel %vm15896_vm7, %v15897_v7, %v15898_v5  ;;  %vm15903_vm11 = vcmp.ne.s32.totalorder %v13617_v61, 0  ;;  %vm15904_vm10 = vcmp.lt.s32.totalorder %v13617_v61, 0  ;;  %v13784_v51 = vadd.s32 280, %v12784_v8 }
 0x3af   : > { %vm13770_vm8 = vcmp.lt.s32.totalorder %v15899_v58, 16  ;;  %vm13779_vm1 = vmand %vm15904_vm10, %vm15903_vm11  ;;  %v4429_v35 = vmul.f32 %v11578_v47, %v13505_v30  ;;  %vm15909_vm7 = vnez %v15908_v13  ;;  %v15913_v7 = vmov 0  ;;  %v15916_v13 = vld [vmem:[#allocation20_spill] sm:$0xff]  ;;  %v11584_v58 = vpop.eup %11583  ;;  %v4659_v4 = vld [vmem:[#allocation3 + $0x10] sm:$0xff] }
 0x3b0   : > { %v15901_v6 = vsel %vm13770_vm8, 4294967295, %v15900_v6  ;;  %15907 = vst [vmem:[#allocation11_spill] sm:$0xff] %v13784_v51  ;;  %v15912_v19 = vsel %vm15909_vm7, %v15910_v2, %v15911_v43  ;;  %11597 = vrcp.f32 %v4326_v41  ;;  %v9213_v5 = vmul.f32 -1.442695, %v13762_v34  ;;  %v15918_v2 = vld [vmem:[#allocation17_spill] sm:$0xff] }
 0x3b1   : > { %15902 = vst [vmem:[#allocation14_spill] sm:$0xff] %v15901_v6  ;;  %vm13792_vm4 = vcmp.lt.s32.totalorder %v15912_v19, 16  ;;  %v4539_v30 = vsel %vm13676_vm14, %v4431_v10, 0.0  ;;  %v4432_v47 = vmul.f32 %v11580_v59, %v13519_v23  ;;  %vm15917_vm10 = vnez %v15916_v13  ;;  %v15919_v43 = vld [vmem:[#allocation13_spill] sm:$0xff]  ;;  %v15925_v59 = vld [vmem:[#allocation23_spill] sm:$0xff] }
 0x3b2   : > { %v15914_v7 = vsel %vm13792_vm4, 4294967295, %v15913_v7  ;;  %v15920_v19 = vsel %vm15917_vm10, %v15918_v2, %v15919_v43  ;;  %v15921_v41 = vmov 0  ;;  %11599 = vpow2.f32 %v9214_v11  ;;  %v15927_v13 = vld [vmem:[#allocation21_spill] sm:$0xff]  ;;  %v15928_v2 = vld [vmem:[#allocation15_spill] sm:$0xff]  ;;  %v4660_v11 = vld [vmem:[#allocation3 + $0x18] sm:$0xff] }
 0x3b3   : > { %15915 = vst [vmem:[#allocation19_spill] sm:$0xff] %v15914_v7  ;;  %vm13809_vm11 = vcmp.lt.s32.totalorder %v15920_v19, 16  ;;  %v13814_v40 = vadd.s32 264, %v12784_v8  ;;  %vm15924_vm7 = vcmask 261120   ;;  %v4537_v10 = vsel %vm13693_vm12, %v4429_v35, 0.0  ;;  %v10344_v8 = vpop.f32.mrb[20].mxu0 }
 0x3b4   : > { %v15922_v41 = vsel %vm13809_vm11, 4294967295, %v15921_v41  ;;  %4620 = vst.msk [vmem:[#allocation3 + $0x43] sm:$0xff] %vm15924_vm7, %v4539_v30  ;;  %v4430_v23 = vmul.f32 %v11582_v24, %v13537_v17  ;;  %vm15926_vm14 = vnez %v15925_v59  ;;  %v15930_v19 = vmov 0  ;;  %v11586_v30 = vpop.eup %11585  ;;  %4618 = vst.msk [vmem:[#allocation3 + $0x33] sm:$0xff] %vm15924_vm7, %v4537_v10  ;;  %v4110_v59 = vpop.f32.mrb[21].mxu0 }
 0x3b5   : > { %15923 = vst [vmem:[#allocation16_spill] sm:$0xff] %v15922_v41  ;;  %v15929_v43 = vsel %vm15926_vm14, %v15927_v13, %v15928_v2  ;;  %11601 = vpow2.f32 %v9212_v27  ;;  %v4540_v17 = vsel %vm13705_vm9, %v4432_v47, 0.0  ;;  %v4331_v24 = vadd.f32 1.0, %v11584_v58  ;;  %v11588_v13 = vpop.eup %11587  ;;  %vm15933_vm14 = vmmov %vm15924_vm7  ;;  %v10345_v10 = vpop.f32.mrb[22].mxu0  ;;  %v4661_v47 = vld [vmem:[#allocation3 + $0x20] sm:$0xff]  ;;  %v4662_v58 = vld [vmem:[#allocation3 + $0x28] sm:$0xff] }
 0x3b6   : > { %vm13825_vm10 = vcmp.lt.s32.totalorder %v15929_v43, 16  ;;  %11603 = vpow2.f32 %v9215_v33  ;;  %v13837_v35 = vadd.f32 %v10344_v8, %v13388_v25  ;;  %4621 = vst.msk [vmem:[#allocation3 + $0x4b] sm:$0xff] %vm15933_vm14, %v4540_v17  ;;  %v4538_v27 = vsel %vm13719_vm13, %v4430_v23, 0.0  ;;  %v11590_v33 = vpop.eup %11589  ;;  %v4113_v23 = vpop.f32.mrb[23].mxu0 }
 0x3b7   : > { %v15931_v19 = vsel %vm13825_vm10, 4294967295, %v15930_v19  ;;  %v4329_v2 = vadd.f32 1.0, %v11586_v30  ;;  %11605 = vpow2.f32 %v9213_v5  ;;  %v13843_v43 = vadd.f32 %v13388_v25, %v4110_v59  ;;  %4619 = vst.msk [vmem:[#allocation3 + $0x3b] sm:$0xff] %vm15924_vm7, %v4538_v27  ;;  %v11592_v22 = vpop.eup %11591  ;;  %v15935_v27 = vld [vmem:[#allocation26_spill] sm:$0xff] }
 0x3b8   : > { %15932 = vst [vmem:[#allocation12_spill] sm:$0xff] %v15931_v19  ;;  %11607 = vrcp.f32 %v4331_v24  ;;  %v4332_v8 = vadd.f32 1.0, %v11588_v13  ;;  %v9218_v12 = vmul.f32 -1.442695, %v13837_v35  ;;  %v13848_v17 = vadd.f32 %v10345_v10, %v13388_v25  ;;  %v15936_v24 = vld [vmem:[#allocation18_spill] sm:$0xff]  ;;  %v11594_v62 = vpop.eup %11593 }
 0x3b9   : > { %11609 = vrcp.f32 %v4329_v2  ;;  %v4330_v5 = vadd.f32 1.0, %v11590_v33  ;;  %v9216_v30 = vmul.f32 -1.442695, %v13843_v43  ;;  %v13852_v59 = vadd.f32 %v13388_v25, %v4113_v23  ;;  %v11528_v23 = vld [vmem:[%s15556_s3 + $0x18] sm:$0xff]  }
 0x3ba   : > { %v15937_v13 = vsel %vm13237_vm2, %v15935_v27, %v15936_v24  ;;  %v15938_v49 = vmov 0  ;;  %11611 = vrcp.f32 %v4332_v8  ;;  %v9219_v2 = vmul.f32 -1.442695, %v13848_v17  ;;  %v15942_v27 = vld [vmem:[#allocation22_spill] sm:$0xff] }
 0x3bb   : > { %vm13859_vm14 = vcmp.lt.s32.totalorder %v15937_v13, 16  ;;  %v4694_v10 = vpack.c.bf16 %v4660_v11, %v4659_v4  ;;  %v4695_v33 = vpack.c.bf16 %v4662_v58, %v4661_v47  ;;  %v4435_v37 = vmul.f32 %v11592_v22, %v13563_v45  ;;  %v11596_v58 = vpop.eup %11595  ;;  %v15949_v45 = vld [vmem:[#allocation34_spill] sm:$0xff]  ;;  %v15950_v22 = vld [vmem:[#allocation24_spill] sm:$0xff] }
 0x3bc   : > { %v15939_v49 = vsel %vm13859_vm14, 4294967295, %v15938_v49  ;;  %v15943_v24 = vsel %vm13249_vm0, %v13218_v60, %v15942_v27  ;;  %v15944_v13 = vmov 0  ;;  %11613 = vrcp.f32 %v4330_v5 }
 0x3bd   : > { %15940 = vst [vmem:[#allocation20_spill] sm:$0xff] %v15939_v49  ;;  %vm13873_vm2 = vcmp.lt.s32.totalorder %v15943_v24, 16  ;;  %v9217_v4 = vmul.f32 -1.442695, %v13852_v59  ;;  %v15947_v11 = vshrl.u32 %v13557_v50, 4  ;;  %v4433_v8 = vmul.f32 %v11594_v62, %v13572_v32  ;;  %v11598_v50 = vpop.eup %11597  ;;  %v15957_v24 = vld [vmem:[#allocation37_spill] sm:$0xff] }
 0x3be   : > { %v15945_v13 = vsel %vm13873_vm2, 4294967295, %v15944_v13  ;;  %v15951_v52 = vsel %vm13263_vm3, %v15949_v45, %v15950_v22  ;;  %v15952_v60 = vmov 0  ;;  %11615 = vpow2.f32 %v9218_v12  ;;  %v10348_v22 = vpop.f32.mrb[24].mxu0  ;;  %v16009_v49 = vld [vmem:[#allocation48_spill] sm:$0xff] }
 0x3bf   : > { %15946 = vst [vmem:[#allocation17_spill] sm:$0xff] %v15945_v13  ;;  %v753_v47 = vmul.u32 18, %v15947_v11  ;;  %vm13886_vm7 = vcmp.lt.s32.totalorder %v15951_v52, 16  ;;  %vm15955_vm0 = vcmask 261120   ;;  %v4543_v32 = vsel %vm13770_vm8, %v4435_v37, 0.0  ;;  %v15958_v11 = vld [vmem:[#allocation25_spill] sm:$0xff]  ;;  %v11600_v37 = vpop.eup %11599 }
 0x3c0   : > { %v15953_v60 = vsel %vm13886_vm7, 4294967295, %v15952_v60  ;;  %10363 = vmatmul.mubr.msk.bf16.vlgmr.msra.gmra.mrb[0].mxu1 %vm15955_vm0, %v4694_v10  ;;  %v13892_v5 = vmul.u32.u64.low 3817748708, %v13784_v51  ;;  %v13893_v27 = vmul.u32.u64.high 3817748708, %v13784_v51, %v13892_v5  ;;  %v4436_v38 = vmul.f32 %v11596_v58, %v13580_v14  ;;  %v15963_v10 = vld [vmem:[#allocation10_spill] sm:$0xff]  ;;  %vm15964_vm8 = vmmov %vm15955_vm0  ;;  %v11602_v62 = vpop.eup %11601 }
 0x3c1   : > { %15954 = vst [vmem:[#allocation13_spill] sm:$0xff] %v15953_v60  ;;  %v15959_v45 = vsel %vm13275_vm5, %v15957_v24, %v15958_v11  ;;  %v15960_v12 = vmov 0  ;;  %11617 = vpow2.f32 %v9216_v30  ;;  %10366 = vmatprep.mubr.msk.bf16.mxu1 %vm15955_vm0, %v4695_v33  ;;  %10399 = vmatpush3.bf16.msra.mxu1 %v15963_v10  ;;  %v13911_v52 = vadd.s32 18, %v13732_v31  ;;  %4624 = vst.msk [vmem:[#allocation3 + $0x63] sm:$0xff] %vm15964_vm8, %v4543_v32  ;;  %v4126_v30 = vpop.f32.mrb[25].mxu0  ;;  %v13923_v33 = vld [vmem:[%s15556_s3 + $0x20] sm:$0xff]   ;;  %v11604_v24 = vpop.eup %11603 }
 0x3c2   : > { %vm13904_vm3 = vcmp.lt.s32.totalorder %v15959_v45, 16  ;;  %v4541_v14 = vsel %vm13792_vm4, %v4433_v8, 0.0  ;;  %v4434_v58 = vmul.f32 %v11598_v50, %v13593_v55  ;;  %11619 = vpow2.f32 %v9219_v2  ;;  %10400 = vmatprep.subr.bf16.mxu1 %v11528_v23  ;;  %15965 = vst [vmem:[#allocation21_spill] sm:$0xff] %v13923_v33  ;;  %vm15966_vm5 = vmmov %vm15955_vm0  ;;  %v10349_v2 = vpop.f32.mrb[26].mxu0  ;;  %v4664_v50 = vld [vmem:[#allocation3 + $0x38] sm:$0xff] }
 0x3c3   : > { %v15961_v12 = vsel %vm13904_vm3, 4294967295, %v15960_v12  ;;  %v13918_v5 = vadd.f32 %v10348_v22, %v13388_v25  ;;  %4622 = vst.msk [vmem:[#allocation3 + $0x53] sm:$0xff] %vm15966_vm5, %v4541_v14  ;;  %v4544_v32 = vsel %vm13809_vm11, %v4436_v38, 0.0  ;;  %v4335_v8 = vadd.f32 1.0, %v11600_v37  ;;  %vm15967_vm8 = vmmov %vm15955_vm0  ;;  %v4129_v22 = vpop.f32.mrb[27].mxu0  ;;  %v4665_v14 = vld [vmem:[#allocation3 + $0x40] sm:$0xff] }
 0x3c4   : > { %15962 = vst [vmem:[#allocation23_spill] sm:$0xff] %v15961_v12  ;;  %11621 = vpow2.f32 %v9217_v4  ;;  %v13929_v55 = vadd.f32 %v13388_v25, %v4126_v30  ;;  %4625 = vst.msk [vmem:[#allocation3 + $0x6b] sm:$0xff] %vm15967_vm8, %v4544_v32  ;;  %v4542_v11 = vsel %vm13825_vm10, %v4434_v58, 0.0  ;;  %v4333_v45 = vadd.f32 1.0, %v11602_v62  ;;  %v4666_v38 = vld [vmem:[#allocation3 + $0x48] sm:$0xff]  ;;  %v15968_v37 = vld [vmem:[#allocation58_spill] sm:$0xff]  ;;  %v11606_v30 = vpop.eup %11605 }
 0x3c5   : > { %v13935_v10 = vadd.f32 %v10349_v2, %v13388_v25  ;;  %v13938_v4 = vsub.s32 %v15968_v37, %v753_v47  ;;  %4623 = vst.msk [vmem:[#allocation3 + $0x5b] sm:$0xff] %vm15955_vm0, %v4542_v11  ;;  %11623 = vrcp.f32 %v4335_v8  ;;  %v4336_v41 = vadd.f32 1.0, %v11604_v24  ;;  %v4663_v58 = vld [vmem:[#allocation3 + $0x30] sm:$0xff]  ;;  %10401 = vmatpush3.bf16.msra.mxu1 %v11528_v23  ;;  %v11608_v62 = vpop.eup %11607  ;;  %v15970_v24 = vld [vmem:[#allocation38_spill] sm:$0xff]  ;;  %v15971_v37 = vld [vmem:[#allocation27_spill] sm:$0xff] }
 0x3c6   : > { %v9222_v32 = vmul.f32 -1.442695, %v13918_v5  ;;  %v13943_v19 = vadd.f32 %v13388_v25, %v4129_v22  ;;  %11625 = vrcp.f32 %v4333_v45  ;;  %v4334_v2 = vadd.f32 1.0, %v11606_v30  ;;  %10438 = vmatprep.subr.bf16.mxu1 %v13923_v33  ;;  %v11610_v47 = vpop.eup %11609  ;;  %v15978_v33 = vld [vmem:[#allocation40_spill] sm:$0xff]  ;;  %v16007_v60 = vld [vmem:[#allocation50_spill] sm:$0xff] }
 0x3c7   : > { %v9220_v7 = vmul.f32 -1.442695, %v13929_v55  ;;  %v4696_v6 = vpack.c.bf16 %v4664_v50, %v4663_v58  ;;  %v4439_v11 = vmul.f32 %v11608_v62, %v13660_v63  ;;  %v15972_v51 = vsel %vm13284_vm15, %v15970_v24, %v15971_v37  ;;  %v11612_v30 = vpop.eup %11611  ;;  %v15976_v58 = vld [vmem:[#allocation39_spill] sm:$0xff]  ;;  %v15979_v63 = vld [vmem:[#allocation28_spill] sm:$0xff]  ;;  %v15988_v24 = vld [vmem:[#allocation29_spill] sm:$0xff] }
 0x3c8   : > { %vm13953_vm5 = vcmp.lt.s32.totalorder %v15972_v51, 16  ;;  %v15973_v22 = vmov 0  ;;  %11627 = vrcp.f32 %v4336_v41  ;;  %v9223_v23 = vmul.f32 -1.442695, %v13935_v10 }
 0x3c9   : > { %v15974_v22 = vsel %vm13953_vm5, 4294967295, %v15973_v22  ;;  %v4697_v45 = vpack.c.bf16 %v4666_v38, %v4665_v14  ;;  %v4437_v50 = vmul.f32 %v11610_v47, %v13664_v16  ;;  %vm15977_vm8 = vnez %v15976_v58  ;;  %v11614_v14 = vpop.eup %11613  ;;  %v15985_v47 = vld [vmem:[#allocation41_spill] sm:$0xff] }
 0x3ca   : > { %15975 = vst [vmem:[#allocation15_spill] sm:$0xff] %v15974_v22  ;;  %v15980_v62 = vsel %vm15977_vm8, %v15978_v33, %v15979_v63  ;;  %v15981_v8 = vmov 0  ;;  %11629 = vrcp.f32 %v4334_v2  ;;  %v9221_v51 = vmul.f32 -1.442695, %v13943_v19  ;;  %v15987_v33 = vld [vmem:[#allocation42_spill] sm:$0xff]  ;;  %v11616_v2 = vpop.eup %11615  ;;  %v15997_v63 = vld [vmem:[#allocation43_spill] sm:$0xff] }
 0x3cb   : > { %vm13964_vm0 = vcmp.lt.s32.totalorder %v15980_v62, 16  ;;  %vm15984_vm15 = vcmask 261120   ;;  %v730_v41 = vshrl.u32 %v13633_v56, 4  ;;  %v4547_v16 = vsel %vm13859_vm14, %v4439_v11, 0.0  ;;  %v15998_v62 = vld [vmem:[#allocation30_spill] sm:$0xff]  ;;  %v16040_v22 = vld [vmem:[#allocation59_spill] sm:$0xff] }
 0x3cc   : > { %v15982_v8 = vsel %vm13964_vm0, 4294967295, %v15981_v8  ;;  %10367 = vmatmul.mubr.msk.bf16.gmra.mrb[4].mxu1 %vm15984_vm15, %v4696_v6  ;;  %v4440_v38 = vmul.f32 %v11612_v30, %v13669_v39  ;;  %vm15986_vm11 = vnez %v15985_v47  ;;  %v15990_v58 = vmov 0  ;;  %vm15993_vm10 = vmmov %vm15984_vm15  ;;  %v10352_v6 = vpop.f32.mrb[28].mxu0  ;;  %v15995_v30 = vld [vmem:[#allocation44_spill] sm:$0xff] }
 0x3cd   : > { %15983 = vst [vmem:[#allocation31_spill] sm:$0xff] %v15982_v8  ;;  %v15989_v37 = vsel %vm15986_vm11, %v15987_v33, %v15988_v24  ;;  %11631 = vpow2.f32 %v9222_v32  ;;  %10370 = vmatprep.mubr.msk.bf16.mxu1 %vm15993_vm10, %v4697_v45  ;;  %v13985_v56 = vadd.s32 18, %v13938_v4  ;;  %vm15994_vm15 = vmmov %vm15993_vm10  ;;  %v4545_v39 = vsel %vm13873_vm2, %v4437_v50, 0.0  ;;  %v4142_v33 = vpop.f32.mrb[29].mxu0  ;;  %v16041_v8 = vld [vmem:[#allocation55_spill] sm:$0xff] }
 0x3ce   : > { %vm13979_vm8 = vcmp.lt.s32.totalorder %v15989_v37, 16  ;;  %4628 = vst.msk [vmem:[#allocation3 + $0x83] sm:$0xff] %vm15994_vm15, %v4547_v16  ;;  %v4438_v11 = vmul.f32 %v11614_v14, %v13682_v0  ;;  %vm15996_vm11 = vnez %v15995_v30  ;;  %v16000_v32 = vmov 0  ;;  %v11618_v16 = vpop.eup %11617  ;;  %v10353_v24 = vpop.f32.mrb[30].mxu0  ;;  %v4670_v37 = vld [vmem:[#allocation3 + $0x68] sm:$0xff]  ;;  %vm16005_vm15 = vmmov %vm15993_vm10 }
 0x3cf   : > { %v15991_v58 = vsel %vm13979_vm8, 4294967295, %v15990_v58  ;;  %v15999_v47 = vsel %vm15996_vm11, %v15997_v63, %v15998_v62  ;;  %11633 = vpow2.f32 %v9220_v7  ;;  %v14001_v45 = vadd.f32 %v10352_v6, %v13388_v25  ;;  %4626 = vst.msk [vmem:[#allocation3 + $0x73] sm:$0xff] %vm15993_vm10, %v4545_v39  ;;  %v11620_v30 = vpop.eup %11619  ;;  %v4145_v63 = vpop.f32.mrb[31].mxu0  ;;  %v4668_v62 = vld [vmem:[#allocation3 + $0x58] sm:$0xff]  ;;  %vm16006_vm11 = vmmov %vm15993_vm10 }
 0x3d0   : > { %15992 = vst [vmem:[#allocation26_spill] sm:$0xff] %v15991_v58  ;;  %vm13996_vm14 = vcmp.lt.s32.totalorder %v15999_v47, 16  ;;  %v4548_v0 = vsel %vm13886_vm7, %v4440_v38, 0.0  ;;  %v4339_v50 = vadd.f32 1.0, %v11616_v2  ;;  %11635 = vpow2.f32 %v9223_v23  ;;  %v11622_v38 = vpop.eup %11621 }
 0x3d1   : > { %v16001_v32 = vsel %vm13996_vm14, 4294967295, %v16000_v32  ;;  %16003 = vst [vmem:[#allocation32_spill] sm:$0xff] %v14001_v45  ;;  %v14007_v14 = vadd.f32 %v13388_v25, %v4142_v33  ;;  %4629 = vst.msk [vmem:[#allocation3 + $0x8b] sm:$0xff] %vm16005_vm15, %v4548_v0  ;;  %v4546_v7 = vsel %vm13904_vm3, %v4438_v11, 0.0  ;;  %v4337_v6 = vadd.f32 1.0, %v11618_v16  ;;  %v4667_v33 = vld [vmem:[#allocation3 + $0x50] sm:$0xff]  ;;  %v11624_v12 = vpop.eup %11623 }
 0x3d2   : > { %16002 = vst [vmem:[#allocation18_spill] sm:$0xff] %v16001_v32  ;;  %11637 = vpow2.f32 %v9221_v51  ;;  %v9226_v39 = vmul.f32 -1.442695, %v14001_v45  ;;  %4627 = vst.msk [vmem:[#allocation3 + $0x7b] sm:$0xff] %vm16006_vm11, %v4546_v7  ;;  %v4340_v23 = vadd.f32 1.0, %v11620_v30  ;;  %v14016_v47 = vadd.f32 %v10353_v24, %v13388_v25  ;;  %v4669_v0 = vld [vmem:[#allocation3 + $0x60] sm:$0xff] }
 0x3d3   : > { %16004 = vst [vmem:[#allocation22_spill] sm:$0xff] %v14007_v14  ;;  %11639 = vrcp.f32 %v4339_v50  ;;  %v9224_v2 = vmul.f32 -1.442695, %v14007_v14  ;;  %v4338_v11 = vadd.f32 1.0, %v11622_v38  ;;  %v14019_v51 = vadd.f32 %v13388_v25, %v4145_v63  ;;  %v16010_v7 = vld [vmem:[#allocation45_spill] sm:$0xff]  ;;  %v11626_v38 = vpop.eup %11625  ;;  %v16014_v14 = vld [vmem:[#allocation52_spill] sm:$0xff] }
 0x3d4   : > { %11641 = vrcp.f32 %v4337_v6  ;;  %v4698_v16 = vpack.c.bf16 %v4668_v62, %v4667_v33  ;;  %vm16008_vm10 = vnez %v16007_v60  ;;  %v16012_v30 = vmov 0  ;;  %v16016_v62 = vld [vmem:[#allocation51_spill] sm:$0xff]  ;;  %v16017_v33 = vld [vmem:[#allocation46_spill] sm:$0xff]  ;;  %v16038_v32 = vld [vmem:[#allocation60_spill] sm:$0xff] }
 0x3d5   : > { %v16011_v50 = vsel %vm16008_vm10, %v16009_v49, %v16010_v7  ;;  %11643 = vrcp.f32 %v4340_v23  ;;  %v9227_v24 = vmul.f32 -1.442695, %v14016_v47  ;;  %v731_v13 = vmul.u32 18, %v730_v41  ;;  %v16025_v23 = vld [vmem:[#allocation47_spill] sm:$0xff] }
 0x3d6   : > { %vm14026_vm15 = vcmp.lt.s32.totalorder %v16011_v50, 16  ;;  %v4699_v6 = vpack.c.bf16 %v4670_v37, %v4669_v0  ;;  %v4443_v63 = vmul.f32 %v11624_v12, %v13738_v57  ;;  %vm16015_vm11 = vnez %v16014_v14  ;;  %v11628_v12 = vpop.eup %11627  ;;  %v16022_v14 = vld [vmem:[#allocation54_spill] sm:$0xff]  ;;  %v16024_v37 = vld [vmem:[#allocation53_spill] sm:$0xff] }
 0x3d7   : > { %v16013_v30 = vsel %vm14026_vm15, 4294967295, %v16012_v30  ;;  %v16018_v60 = vsel %vm16015_vm11, %v16016_v62, %v16017_v33  ;;  %v16019_v45 = vmov 0  ;;  %11645 = vrcp.f32 %v4338_v11  ;;  %v11630_v50 = vpop.eup %11629  ;;  %v16029_v33 = vld [vmem:[#allocation57_spill] sm:$0xff] }
 0x3d8   : > { %vm14037_vm3 = vcmp.lt.s32.totalorder %v16018_v60, 16  ;;  %v9225_v49 = vmul.f32 -1.442695, %v14019_v51  ;;  %vm16021_vm2 = vcmask 261120   ;;  %v4441_v41 = vmul.f32 %v11626_v38, %v13744_v15  ;;  %v16032_v60 = vld [vmem:[#allocation49_spill] sm:$0xff] }
 0x3d9   : > { %v16020_v45 = vsel %vm14037_vm3, 4294967295, %v16019_v45  ;;  %10371 = vmatmul.mubr.msk.bf16.gmra.mrb[8].mxu1 %vm16021_vm2, %v4698_v16  ;;  %vm16023_vm11 = vnez %v16022_v14  ;;  %11647 = vpow2.f32 %v9226_v39  ;;  %v10356_v16 = vpop.f32.mrb[32].mxu0  ;;  %v4551_v38 = vsel %vm13953_vm5, %v4443_v63, 0.0  ;;  %v16031_v39 = vld [vmem:[#allocation56_spill] sm:$0xff] }
 0x3da   : > { %v16026_v0 = vsel %vm16023_vm11, %v16024_v37, %v16025_v23  ;;  %10374 = vmatprep.mubr.msk.bf16.mxu1 %vm16021_vm2, %v4699_v6  ;;  %v14060_v7 = vmul.u32.u64.low 3817748708, %v13814_v40  ;;  %v14061_v15 = vmul.u32.u64.high 3817748708, %v13814_v40, %v14060_v7  ;;  %v4444_v62 = vmul.f32 %v11628_v12, %v13750_v29  ;;  %v4158_v23 = vpop.f32.mrb[33].mxu0  ;;  %4632 = vst.msk [vmem:[#allocation3 + $0xa3] sm:$0xff] %vm16021_vm2, %v4551_v38 }
 0x3db   : > { %vm14052_vm4 = vcmp.lt.s32.totalorder %v16026_v0, 16  ;;  %vm16030_vm11 = vnez %v16029_v33  ;;  %11649 = vpow2.f32 %v9224_v2  ;;  %v14076_v6 = vadd.f32 %v10356_v16, %v13388_v25  ;;  %v11632_v0 = vpop.eup %11631  ;;  %v10357_v7 = vpop.f32.mrb[34].mxu0 }
 0x3dc   : > { %v16033_v14 = vsel %vm16030_vm11, %v16031_v39, %v16032_v60  ;;  %v4549_v29 = vsel %vm13964_vm0, %v4441_v41, 0.0  ;;  %v4442_v63 = vmul.f32 %v11630_v50, %v13762_v34  ;;  %11651 = vpow2.f32 %v9227_v24  ;;  %v11634_v33 = vpop.eup %11633  ;;  %vm16036_vm11 = vmmov %vm16021_vm2  ;;  %v4161_v38 = vpop.f32.mrb[35].mxu0  ;;  %v4672_v41 = vld [vmem:[#allocation3 + $0x78] sm:$0xff]  ;;  %v4674_v60 = vld [vmem:[#allocation3 + $0x88] sm:$0xff] }
 0x3dd   : > { %vm14071_vm7 = vcmp.lt.s32.totalorder %v16033_v14, 16  ;;  %v14083_v12 = vadd.f32 %v13388_v25, %v4158_v23  ;;  %4630 = vst.msk [vmem:[#allocation3 + $0x93] sm:$0xff] %vm16036_vm11, %v4549_v29  ;;  %v4552_v2 = vsel %vm13979_vm8, %v4444_v62, 0.0  ;;  %v4343_v16 = vadd.f32 1.0, %v11632_v0  ;;  %v11636_v34 = vpop.eup %11635  ;;  %v4671_v62 = vld [vmem:[#allocation3 + $0x70] sm:$0xff]  ;;  %v4673_v0 = vld [vmem:[#allocation3 + $0x80] sm:$0xff]  ;;  %vm16037_vm11 = vmmov %vm16021_vm2 }
 0x3de   : > { %v14089_v39 = vsub.s32 %v13515_v44, %v731_v13  ;;  %11653 = vpow2.f32 %v9225_v49  ;;  %4633 = vst.msk [vmem:[#allocation3 + $0xab] sm:$0xff] %vm16021_vm2, %v4552_v2  ;;  %v4550_v24 = vsel %vm13996_vm14, %v4442_v63, 0.0  ;;  %v4341_v50 = vadd.f32 1.0, %v11634_v33  ;;  %v11638_v44 = vpop.eup %11637 }
 0x3df   : > { %v9230_v14 = vmul.f32 -1.442695, %v14076_v6  ;;  %v14096_v23 = vadd.f32 %v10357_v7, %v13388_v25  ;;  %4631 = vst.msk [vmem:[#allocation3 + $0x9b] sm:$0xff] %vm16037_vm11, %v4550_v24  ;;  %11655 = vrcp.f32 %v4343_v16  ;;  %v4344_v13 = vadd.f32 1.0, %v11636_v34  ;;  %v11640_v2 = vpop.eup %11639 }
 0x3e0   : > { %v14100_v49 = vadd.f32 %v13388_v25, %v4161_v38  ;;  %v4700_v29 = vpack.c.bf16 %v4672_v41, %v4671_v62  ;;  %11657 = vrcp.f32 %v4341_v50  ;;  %v4342_v63 = vadd.f32 1.0, %v11638_v44  ;;  %v11642_v58 = vpop.eup %11641 }
 0x3e1   : > { %v9228_v33 = vmul.f32 -1.442695, %v14083_v12  ;;  %v4701_v57 = vpack.c.bf16 %v4674_v60, %v4673_v0  ;;  %v4447_v7 = vmul.f32 %v11640_v2, %v13837_v35  ;;  %vm16039_vm2 = vnez %v16038_v32  ;;  %v11644_v41 = vpop.eup %11643 }
 0x3e2   : > { %v16042_v24 = vsel %vm16039_vm2, %v16040_v22, %v16041_v8  ;;  %v16043_v16 = vmov 0  ;;  %11659 = vrcp.f32 %v4344_v13  ;;  %v763_v25 = vshrl.u32 %v13656_v3, 4  ;;  %v11646_v34 = vpop.eup %11645 }
 0x3e3   : > { %vm14109_vm11 = vcmp.lt.s32.totalorder %v16042_v24, 16  ;;  %v9231_v38 = vmul.f32 -1.442695, %v14096_v23  ;;  %vm16045_vm10 = vcmask 261120   ;;  %v4445_v60 = vmul.f32 %v11642_v58, %v13843_v43  ;;  %v11648_v58 = vpop.eup %11647 }
 0x3e4   : > { %v16044_v16 = vsel %vm14109_vm11, 4294967295, %v16043_v16  ;;  %10375 = vmatmul.mubr.msk.bf16.gmra.mrb[12].mxu1 %vm16045_vm10, %v4700_v29  ;;  %vm16046_vm8 = vnez %v15848_v54  ;;  %11661 = vrcp.f32 %v4342_v63  ;;  %v16050_v8 = vshrl.u32 %v13651_v20, 4  ;;  %vm16051_vm14 = vmmov %vm16045_vm10  ;;  %v4675_v13 = vld [vmem:[#allocation3 + $0x90] sm:$0xff] }
 0x3e5   : > { %v16047_v35 = vsel %vm16046_vm8, %v13548_v18, %v13494_v21  ;;  %v9229_v32 = vmul.f32 -1.442695, %v14100_v49  ;;  %10378 = vmatprep.mubr.msk.bf16.mxu1 %vm16051_vm14, %v4701_v57  ;;  %v4555_v43 = vsel %vm14026_vm15, %v4447_v7, 0.0  ;;  %v4448_v54 = vmul.f32 %v11644_v41, %v13848_v17  ;;  %vm16060_vm13 = vmmov %vm16051_vm14  ;;  %v4678_v50 = vld [vmem:[#allocation3 + $0xa8] sm:$0xff] }
 0x3e6   : > { %vm14122_vm2 = vcmp.lt.s32.totalorder %v16047_v35, 16  ;;  %v786_v3 = vmul.u32 18, %v16050_v8  ;;  %vm16052_vm8 = vnez %v15854_v36  ;;  %v16054_v18 = vmov 0  ;;  %4636 = vst.msk [vmem:[#allocation3 + $0xc3] sm:$0xff] %vm16051_vm14, %v4555_v43  ;;  %v4676_v29 = vld [vmem:[#allocation3 + $0x98] sm:$0xff]  ;;  %v4677_v2 = vld [vmem:[#allocation3 + $0xa0] sm:$0xff] }
 0x3e7   : > { %v16053_v21 = vsel %vm16052_vm8, %v13566_v46, %v13530_v28  ;;  %11663 = vpow2.f32 %v9230_v14  ;;  %v796_v20 = vshrl.u32 %v13893_v27, 4  ;;  %v4553_v57 = vsel %vm14037_vm3, %v4445_v60, 0.0  ;;  %v11650_v46 = vpop.eup %11649 }
 0x3e8   : > { %vm14138_vm10 = vcmp.lt.s32.totalorder %v16053_v21, 16  ;;  %v4446_v17 = vmul.f32 %v11646_v34, %v13852_v59  ;;  %vm16056_vm15 = vcmp.ne.s32.totalorder %v13732_v31, 0  ;;  %vm16057_vm5 = vcmp.lt.s32.totalorder %v13732_v31, 0  ;;  %4634 = vst.msk [vmem:[#allocation3 + $0xb3] sm:$0xff] %vm16060_vm13, %v4553_v57  ;;  %v11652_v14 = vpop.eup %11651 }
 0x3e9   : > { %v16055_v18 = vsel %vm14138_vm10, 4294967295, %v16054_v18  ;;  %vm14151_vm8 = vmand %vm16057_vm5, %vm16056_vm15  ;;  %vm830_vm0 = vcmp.ne.s32.totalorder %v14089_v39, 0  ;;  %11665 = vpow2.f32 %v9228_v33  ;;  %v4556_v36 = vsel %vm14052_vm4, %v4448_v54, 0.0  ;;  %v11654_v63 = vpop.eup %11653 }
 0x3ea   : > { %v4347_v27 = vadd.f32 1.0, %v11648_v58  ;;  %vm16061_vm14 = vcmp.ne.s32.totalorder %v13938_v4, 0  ;;  %vm16062_vm3 = vcmp.lt.s32.totalorder %v13938_v4, 0  ;;  %vm866_vm5 = vcmp.lt.s32.totalorder %v14089_v39, 0  ;;  %vm16065_vm15 = vmmov %vm16060_vm13 }
 0x3eb   : > { %vm14163_vm9 = vmand %vm16062_vm3, %vm16061_vm14  ;;  %11667 = vpow2.f32 %v9231_v38  ;;  %4637 = vst.msk [vmem:[#allocation3 + $0xcb] sm:$0xff] %vm16065_vm15, %v4556_v36  ;;  %v4554_v62 = vsel %vm14071_vm7, %v4446_v17, 0.0  ;;  %v4345_v0 = vadd.f32 1.0, %v11650_v46  ;;  %v774_v44 = vshrl.u32 %v14061_v15, 4  ;;  %v11656_v15 = vpop.eup %11655  ;;  %v16083_v36 = vld [vmem:[#allocation11_spill] sm:$0xff] }
 0x3ec   : > { %11669 = vpow2.f32 %v9229_v32  ;;  %4635 = vst.msk [vmem:[#allocation3 + $0xbb] sm:$0xff] %vm16060_vm13, %v4554_v62  ;;  %v4348_v33 = vadd.f32 1.0, %v11652_v14  ;;  %v4702_v7 = vpack.c.bf16 %v4676_v29, %v4675_v13  ;;  %v4703_v24 = vpack.c.bf16 %v4678_v50, %v4677_v2  ;;  %vm16066_vm3 = vmmov %vm16060_vm13  ;;  %v11658_v34 = vpop.eup %11657 }
 0x3ed   : > { %11671 = vrcp.f32 %v4347_v27  ;;  %v973_v38 = vsel %vm14151_vm8, %v13911_v52, %v13732_v31  ;;  %v4346_v41 = vadd.f32 1.0, %v11654_v63  ;;  %v764_v60 = vmul.u32 18, %v763_v25  ;;  %vm14193_vm8 = vmand %vm866_vm5, %vm830_vm0 }
 0x3ee   : > { %11673 = vrcp.f32 %v4345_v0  ;;  %v976_v35 = vsel %vm14163_vm9, %v13985_v56, %v13938_v4  ;;  %v14182_v8 = vadd.s32 18, %v14089_v39  ;;  %v14185_v32 = vsub.s32 %v13533_v48, %v786_v3  ;;  %10379 = vmatmul.mubr.msk.bf16.gmra.mrb[16].mxu1 %vm16066_vm3, %v4702_v7  ;;  %vm16069_vm9 = vmmov %vm16066_vm3  ;;  %v11660_v48 = vpop.eup %11659 }
 0x3ef   : > { %11675 = vrcp.f32 %v4348_v33  ;;  %v4451_v31 = vmul.f32 %v11656_v15, %v13918_v5  ;;  %v797_v4 = vmul.u32 18, %v796_v20  ;;  %v775_v56 = vmul.u32 18, %v774_v44  ;;  %10382 = vmatprep.mubr.msk.bf16.mxu1 %vm16069_vm9, %v4703_v24  ;;  %v11662_v42 = vpop.eup %11661  ;;  %v4679_v59 = vld [vmem:[#allocation3 + $0xb0] sm:$0xff]  ;;  %v16087_v24 = vld [vmem:[#allocation32_spill] sm:$0xff] }
 0x3f0   : > { %11677 = vrcp.f32 %v4346_v41  ;;  %v4449_v25 = vmul.f32 %v11658_v34, %v13929_v55  ;;  %v16070_v5 = vsel %vm13756_vm6, %v13685_v1, %v13569_v53  ;;  %v16073_v43 = vsel %vm13779_vm1, %v13724_v9, %v13617_v61  ;;  %vm16081_vm1 = vmmov %vm16066_vm3 }
 0x3f1   : > { %vm14204_vm14 = vcmp.lt.s32.totalorder %v16070_v5, 16  ;;  %vm14213_vm0 = vcmp.lt.s32.totalorder %v16073_v43, 16  ;;  %v16074_v54 = vmov 0  ;;  %vm14217_vm5 = vcmp.lt.s32.totalorder %v973_v38, 16  ;;  %v11664_v9 = vpop.eup %11663  ;;  %vm16082_vm13 = vmmov %vm16081_vm1 }
 0x3f2   : > { %v16075_v54 = vsel %vm14213_vm0, 4294967295, %v16074_v54  ;;  %v16076_v55 = vmov 0  ;;  %v4559_v53 = vsel %vm14109_vm11, %v4451_v31, 0.0  ;;  %v4452_v1 = vmul.f32 %v11660_v48, %v13935_v10  ;;  %v4682_v57 = vld [vmem:[#allocation3 + $0xc8] sm:$0xff]  ;;  %vm16084_vm3 = vmmov %vm16081_vm1 }
 0x3f3   : > { %v16077_v55 = vsel %vm14217_vm5, 4294967295, %v16076_v55  ;;  %vm14224_vm6 = vcmp.lt.s32.totalorder %v976_v35, 16  ;;  %v16078_v21 = vmov 0  ;;  %v14229_v61 = vsub.s32 %v16080_v26, %v764_v60  ;;  %4640 = vst.msk [vmem:[#allocation3 + $0xe3] sm:$0xff] %vm16081_vm1, %v4559_v53  ;;  %v11666_v17 = vpop.eup %11665  ;;  %v4680_v50 = vld [vmem:[#allocation3 + $0xb8] sm:$0xff]  ;;  %v4681_v14 = vld [vmem:[#allocation3 + $0xc0] sm:$0xff]  ;;  %vm16088_vm15 = vmmov %vm16081_vm1 }
 0x3f4   : > { %v16079_v21 = vsel %vm14224_vm6, 4294967295, %v16078_v21  ;;  %v4557_v20 = vsel %vm14122_vm2, %v4449_v25, 0.0  ;;  %v4450_v58 = vmul.f32 %v11662_v42, %v13943_v19  ;;  %v974_v10 = vsel %vm14193_vm8, %v14182_v8, %v14089_v39  ;;  %vm16085_vm8 = vmmov %vm16081_vm1  ;;  %v16089_v60 = vld [vmem:[#allocation22_spill] sm:$0xff] }
 0x3f5   : > { %4638 = vst.msk [vmem:[#allocation3 + $0xd3] sm:$0xff] %vm16082_vm13, %v4557_v20  ;;  %v4560_v28 = vsel %vm14138_vm10, %v4452_v1, 0.0  ;;  %v4351_v46 = vadd.f32 1.0, %v11664_v9  ;;  %v14244_v27 = vsub.s32 %v16083_v36, %v797_v4  ;;  %v14247_v19 = vsub.s32 %v13814_v40, %v775_v56  ;;  %v11668_v39 = vpop.eup %11667  ;;  %v4997_v35 = vld [vmem:[#allocation3 + $0x19] sm:$0xff] }
 0x3f6   : > { %4641 = vst.msk [vmem:[#allocation3 + $0xeb] sm:$0xff] %vm16084_vm3, %v4560_v28  ;;  %v4558_v62 = vsel %vm14204_vm14, %v4450_v58, 0.0  ;;  %v4349_v0 = vadd.f32 1.0, %v11666_v17  ;;  %v4704_v44 = vpack.c.bf16 %v4680_v50, %v4679_v59  ;;  %v4705_v13 = vpack.c.bf16 %v4682_v57, %v4681_v14  ;;  %v11670_v29 = vpop.eup %11669  ;;  %vm16086_vm3 = vmmov %vm16081_vm1  ;;  %v14377_v25 = vld [vmem:[%s15556_s3 + $0x30] sm:$0xff]  }
 0x3f7   : > { %4639 = vst.msk [vmem:[#allocation3 + $0xdb] sm:$0xff] %vm16085_vm8, %v4558_v62  ;;  %v943_v40 = vadd.s32 18, %v14185_v32  ;;  %11679 = vrcp.f32 %v4351_v46  ;;  %v4352_v2 = vadd.f32 1.0, %v11668_v39  ;;  %v11672_v63 = vpop.eup %11671  ;;  %v4350_v33 = vadd.f32 1.0, %v11670_v29  ;;  %vm16100_vm8 = vmmov %vm16086_vm3 }
 0x3f8   : > { %11681 = vrcp.f32 %v4349_v0  ;;  %10383 = vmatmul.mubr.msk.bf16.gmra.mrb[20].mxu1 %vm16086_vm3, %v4704_v44  ;;  %v11674_v7 = vpop.eup %11673  ;;  %v4455_v38 = vmul.f32 %v11672_v63, %v16087_v24  ;;  %vm16090_vm1 = vcmp.ne.s32.totalorder %v14185_v32, 0  ;;  %vm16091_vm13 = vcmp.lt.s32.totalorder %v14185_v32, 0  ;;  %v4995_v24 = vld [vmem:[#allocation3 + $0x9] sm:$0xff] }
 0x3f9   : > { %11683 = vrcp.f32 %v4352_v2  ;;  %10386 = vmatprep.mubr.msk.bf16.mxu1 %vm16088_vm15, %v4705_v13  ;;  %v11676_v41 = vpop.eup %11675  ;;  %v4453_v15 = vmul.f32 %v11674_v7, %v16089_v60  ;;  %vm14267_vm10 = vmand %vm16091_vm13, %vm16090_vm1  ;;  %vm14276_vm15 = vcmp.lt.s32.totalorder %v974_v10, 16  ;;  %v16094_v52 = vmov 0 }
 0x3fa   : > { %11685 = vrcp.f32 %v4350_v33  ;;  %v11678_v8 = vpop.eup %11677  ;;  %v4563_v34 = vsel %vm14213_vm0, %v4455_v38, 0.0  ;;  %v4456_v31 = vmul.f32 %v11676_v41, %v14016_v47  ;;  %v16095_v52 = vsel %vm14276_vm15, 4294967295, %v16094_v52 }
 0x3fb   : > { %vm16096_vm1 = vcmp.ne.s32.totalorder %v14229_v61, 0  ;;  %vm16097_vm13 = vcmp.lt.s32.totalorder %v14229_v61, 0  ;;  %v941_v56 = vadd.s32 18, %v14229_v61  ;;  %4644 = vst.msk [vmem:[#allocation3 + $0x103] sm:$0xff] %vm16100_vm8, %v4563_v34  ;;  %v4561_v48 = vsel %vm14217_vm5, %v4453_v15, 0.0  ;;  %v4999_v34 = vld [vmem:[#allocation3 + $0x29] sm:$0xff] }
 0x3fc   : > { %vm14284_vm9 = vmand %vm16097_vm13, %vm16096_vm1  ;;  %v4454_v47 = vmul.f32 %v11678_v8, %v14019_v51  ;;  %vm16101_vm3 = vcmp.ne.s32.totalorder %v14244_v27, 0  ;;  %vm16102_vm0 = vcmp.lt.s32.totalorder %v14244_v27, 0  ;;  %v944_v5 = vadd.s32 18, %v14244_v27  ;;  %v4683_v9 = vld [vmem:[#allocation3 + $0xd0] sm:$0xff]  ;;  %v4998_v8 = vld [vmem:[#allocation3 + $0x21] sm:$0xff] }
 0x3fd   : > { %vm14297_vm11 = vmand %vm16102_vm0, %vm16101_vm3  ;;  %v4564_v43 = vsel %vm14224_vm6, %v4456_v31, 0.0  ;;  %vm16107_vm13 = vcmp.lt.s32.totalorder %v14247_v19, 0  ;;  %v942_v42 = vadd.s32 18, %v14247_v19  ;;  %v4686_v53 = vld [vmem:[#allocation3 + $0xe8] sm:$0xff]  ;;  %v979_v26 = vsel %vm14267_vm10, %v943_v40, %v14185_v32  ;;  %v4996_v31 = vld [vmem:[#allocation3 + $0x11] sm:$0xff] }
 0x3fe   : > { %vm16105_vm1 = vmmov %vm16100_vm8  ;;  %vm16106_vm8 = vcmp.ne.s32.totalorder %v14247_v19, 0  ;;  %v4562_v1 = vsel %vm14276_vm15, %v4454_v47, 0.0  ;;  %v4684_v20 = vld [vmem:[#allocation3 + $0xd8] sm:$0xff]  ;;  %v4685_v58 = vld [vmem:[#allocation3 + $0xe0] sm:$0xff]  ;;  %v977_v10 = vsel %vm14284_vm9, %v941_v56, %v14229_v61  ;;  %v980_v28 = vsel %vm14297_vm11, %v944_v5, %v14244_v27 }
 0x3ff   : > { %4642 = vst.msk [vmem:[#allocation3 + $0xf3] sm:$0xff] %vm16105_vm1, %v4561_v48  ;;  %vm14309_vm5 = vmand %vm16107_vm13, %vm16106_vm8  ;;  %v4706_v57 = vpack.c.bf16 %v4684_v20, %v4683_v9  ;;  %v4707_v17 = vpack.c.bf16 %v4686_v53, %v4685_v58  ;;  %v16112_v36 = vmov 0  ;;  %vm14336_vm9 = vcmp.lt.s32.totalorder %v977_v10, 16  ;;  %v11530_v56 = vld [vmem:[%s15556_s3 + $0x28] sm:$0xff]   ;;  %v5001_v5 = vld [vmem:[#allocation3 + $0x39] sm:$0xff] }
 0x400   : > { %vm16110_vm0 = vmmov %vm16105_vm1  ;;  %vm14327_vm1 = vcmp.lt.s32.totalorder %v979_v26, 16  ;;  %v978_v32 = vsel %vm14309_vm5, %v942_v42, %v14247_v19  ;;  %v16115_v50 = vmov 0  ;;  %vm14342_vm11 = vcmp.lt.s32.totalorder %v980_v28, 16  ;;  %v16130_v47 = vld [vmem:[#allocation21_spill] sm:$0xff]  ;;  %v5005_v26 = vld [vmem:[#allocation3 + $0x59] sm:$0xff] }
 0x401   : > { %4645 = vst.msk [vmem:[#allocation3 + $0x10b] sm:$0xff] %vm16110_vm0, %v4564_v43  ;;  %vm16111_vm3 = vmmov %vm16110_vm0  ;;  %v11680_v46 = vpop.eup %11679  ;;  %v16113_v36 = vsel %vm14327_vm1, 4294967295, %v16112_v36  ;;  %v16116_v50 = vsel %vm14336_vm9, 4294967295, %v16115_v50  ;;  %v16118_v39 = vmov 0  ;;  %vm14349_vm5 = vcmp.lt.s32.totalorder %v978_v32, 16  ;;  %v5002_v43 = vld [vmem:[#allocation3 + $0x41] sm:$0xff] }
 0x402   : > { %4643 = vst.msk [vmem:[#allocation3 + $0xfb] sm:$0xff] %vm16111_vm3, %v4562_v1  ;;  %vm16114_vm10 = vmmov %vm16110_vm0  ;;  %v11682_v59 = vpop.eup %11681  ;;  %v4459_v61 = vmul.f32 %v11680_v46, %v14076_v6  ;;  %v16119_v39 = vsel %vm14342_vm11, 4294967295, %v16118_v39  ;;  %v16120_v6 = vmov 0  ;;  %v5031_v4 = vpack.c.bf16 %v4997_v35, %v4996_v31  ;;  %v5003_v51 = vld [vmem:[#allocation3 + $0x49] sm:$0xff]  ;;  %v5000_v42 = vld [vmem:[#allocation3 + $0x31] sm:$0xff] }
 0x403   : > { %10387 = vmatmul.mubr.msk.bf16.gmra.mrb[24].mxu1 %vm16114_vm10, %v4706_v57  ;;  %vm16117_vm8 = vmmov %vm16110_vm0  ;;  %v11684_v27 = vpop.eup %11683  ;;  %v4457_v14 = vmul.f32 %v11682_v59, %v14083_v12  ;;  %v16121_v6 = vsel %vm14349_vm5, 4294967295, %v16120_v6  ;;  %v5032_v48 = vpack.c.bf16 %v4999_v34, %v4998_v8  ;;  %v5033_v53 = vpack.c.bf16 %v5001_v5, %v5000_v42  ;;  %v5006_v9 = vld [vmem:[#allocation3 + $0x61] sm:$0xff]  ;;  %v5007_v20 = vld [vmem:[#allocation3 + $0x69] sm:$0xff] }
 0x404   : > { %10390 = vmatprep.mubr.msk.bf16.mxu1 %vm16117_vm8, %v4707_v17  ;;  %v11686_v62 = vpop.eup %11685  ;;  %v4567_v19 = vsel %vm14327_vm1, %v4459_v61, 0.0  ;;  %v4460_v0 = vmul.f32 %v11684_v27, %v14096_v23  ;;  %vm16122_vm13 = vmmov %vm16110_vm0  ;;  %v5034_v1 = vpack.c.bf16 %v5003_v51, %v5002_v43  ;;  %v5004_v58 = vld [vmem:[#allocation3 + $0x51] sm:$0xff]  ;;  %v5036_v57 = vpack.c.bf16 %v5007_v20, %v5006_v9  ;;  %v5009_v17 = vld [vmem:[#allocation3 + $0x79] sm:$0xff] }
 0x405   : > { %4648 = vst.msk [vmem:[#allocation3 + $0x123] sm:$0xff] %vm16122_vm13, %v4567_v19  ;;  %v4565_v44 = vsel %vm14336_vm9, %v4457_v14, 0.0  ;;  %v4458_v12 = vmul.f32 %v11686_v62, %v14100_v49  ;;  %vm16123_vm3 = vmmov %vm16110_vm0  ;;  %v4994_v49 = vld [vmem:[#allocation3 + $0x1] sm:$0xff]  ;;  %v5035_v10 = vpack.c.bf16 %v5005_v26, %v5004_v58  ;;  %v5011_v46 = vld [vmem:[#allocation3 + $0x89] sm:$0xff] }
 0x406   : > { %4646 = vst.msk [vmem:[#allocation3 + $0x113] sm:$0xff] %vm16110_vm0, %v4565_v44  ;;  %v4568_v29 = vsel %vm14342_vm11, %v4460_v0, 0.0  ;;  %v4687_v40 = vld [vmem:[#allocation3 + $0xf0] sm:$0xff]  ;;  %vm16124_vm10 = vmmov %vm16110_vm0  ;;  %v5030_v60 = vpack.c.bf16 %v4995_v24, %v4994_v49  ;;  %v5010_v28 = vld [vmem:[#allocation3 + $0x81] sm:$0xff] }
 0x407   : > { %4649 = vst.msk [vmem:[#allocation3 + $0x12b] sm:$0xff] %vm16123_vm3, %v4568_v29  ;;  %v4566_v63 = vsel %vm14349_vm5, %v4458_v12, 0.0  ;;  %vm16125_vm8 = vmmov %vm16110_vm0  ;;  %v5008_v32 = vld [vmem:[#allocation3 + $0x71] sm:$0xff]  ;;  %v5038_v61 = vpack.c.bf16 %v5011_v46, %v5010_v28  ;;  %v5013_v27 = vld [vmem:[#allocation3 + $0x99] sm:$0xff] }
 0x408   : > { %v4690_v13 = vld [vmem:[#allocation3 + $0x108] sm:$0xff]  ;;  %4647 = vst.msk [vmem:[#allocation3 + $0x11b] sm:$0xff] %vm16124_vm10, %v4566_v63  ;;  %vm16126_vm13 = vmmov %vm16110_vm0  ;;  %v5037_v59 = vpack.c.bf16 %v5009_v17, %v5008_v32  ;;  %v5012_v19 = vld [vmem:[#allocation3 + $0x91] sm:$0xff] }
 0x409   : > { %v4688_v2 = vld [vmem:[#allocation3 + $0xf8] sm:$0xff]  ;;  %v4689_v23 = vld [vmem:[#allocation3 + $0x100] sm:$0xff]  ;;  %vm16127_vm3 = vmmov %vm16110_vm0  ;;  %v5039_v0 = vpack.c.bf16 %v5013_v27, %v5012_v19 }
 0x40a   : > { %v4708_v33 = vpack.c.bf16 %v4688_v2, %v4687_v40  ;;  %v4709_v7 = vpack.c.bf16 %v4690_v13, %v4689_v23  ;;  %vm16128_vm10 = vmmov %vm16110_vm0  ;;  %v5014_v14 = vld [vmem:[#allocation3 + $0xa1] sm:$0xff]  ;;  %v5015_v62 = vld [vmem:[#allocation3 + $0xa9] sm:$0xff] }
 0x40b   : > { %v5040_v44 = vpack.c.bf16 %v5015_v62, %v5014_v14  ;;  %v5017_v12 = vld [vmem:[#allocation3 + $0xb9] sm:$0xff]  ;;  %v5018_v13 = vld [vmem:[#allocation3 + $0xc1] sm:$0xff]  ;;  %v5019_v29 = vld [vmem:[#allocation3 + $0xc9] sm:$0xff] }
 0x40c   : > { %10391 = vmatmul.mubr.msk.bf16.gmra.mrb[28].mxu1 %vm16125_vm8, %v4708_v33  ;;  %vm16129_vm8 = vmmov %vm16110_vm0  ;;  %v5016_v40 = vld [vmem:[#allocation3 + $0xb1] sm:$0xff]  ;;  %v5042_v23 = vpack.c.bf16 %v5019_v29, %v5018_v13  ;;  %v5021_v63 = vld [vmem:[#allocation3 + $0xd9] sm:$0xff] }
 0x40d   : > { %10394 = vmatprep.mubr.msk.bf16.mxu1 %vm16126_vm13, %v4709_v7  ;;  %v4691_v38 = vld [vmem:[#allocation3 + $0x110] sm:$0xff]  ;;  %vm16131_vm13 = vmmov %vm16110_vm0  ;;  %v5041_v2 = vpack.c.bf16 %v5017_v12, %v5016_v40  ;;  %v5022_v33 = vld [vmem:[#allocation3 + $0xe1] sm:$0xff] }
 0x40e   : > { %v5023_v7 = vld [vmem:[#allocation3 + $0xe9] sm:$0xff]  ;;  %v5020_v49 = vld [vmem:[#allocation3 + $0xd1] sm:$0xff]  ;;  %v5335_v43 = vld [vmem:[#allocation3 + $0x1a] sm:$0xff] }
 0x40f   : > { %v4692_v41 = vld [vmem:[#allocation3 + $0x118] sm:$0xff]  ;;  %v5043_v24 = vpack.c.bf16 %v5021_v63, %v5020_v49  ;;  %v5332_v31 = vld [vmem:[#allocation3 + $0x2] sm:$0xff]  ;;  %v5337_v42 = vld [vmem:[#allocation3 + $0x2a] sm:$0xff] }
 0x410   : > { %v4710_v15 = vpack.c.bf16 %v4692_v41, %v4691_v38  ;;  %v5044_v38 = vpack.c.bf16 %v5023_v7, %v5022_v33  ;;  %v5025_v41 = vld [vmem:[#allocation3 + $0xf9] sm:$0xff]  ;;  %v5024_v35 = vld [vmem:[#allocation3 + $0xf1] sm:$0xff]  ;;  %v5336_v51 = vld [vmem:[#allocation3 + $0x22] sm:$0xff] }
 0x411   : > { %v5045_v8 = vpack.c.bf16 %v5025_v41, %v5024_v35  ;;  %v11532_v26 = vld [vmem:[%s15556_s3 + $0x38] sm:$0xff]   ;;  %v14401_v9 = vpack.c.bf16 %v5337_v42, %v5336_v51  ;;  %v14411_v20 = vld [vmem:[%s15556_s3 + $0x40] sm:$0xff]   ;;  %v5338_v17 = vld [vmem:[#allocation3 + $0x32] sm:$0xff] }
 0x412   : > { %v5339_v58 = vld [vmem:[#allocation3 + $0x3a] sm:$0xff]  ;;  %v5344_v32 = vld [vmem:[#allocation3 + $0x62] sm:$0xff]  ;;  %vm16157_vm5 = vmmov %vm16110_vm0 }
 0x413   : > { %v5371_v28 = vpack.c.bf16 %v5339_v58, %v5338_v17  ;;  %v5347_v62 = vld [vmem:[#allocation3 + $0x7a] sm:$0xff]  ;;  %v5348_v19 = vld [vmem:[#allocation3 + $0x82] sm:$0xff]  ;;  %v11534_v58 = vld [vmem:[%s15556_s3 + $0x48] sm:$0xff]  }
 0x414   : > { %10395 = vmatmul.mubr.msk.bf16.gmra.mrb[32].mxu1 %vm16110_vm0, %v4710_v15  ;;  %v5027_v15 = vld [vmem:[#allocation3 + $0x109] sm:$0xff]  ;;  %v5351_v29 = vld [vmem:[#allocation3 + $0x9a] sm:$0xff]  ;;  %vm16165_vm11 = vmmov %vm16110_vm0 }
 0x415   : > { %10402 = vmatprep.mubr.msk.bf16.mxu1 %vm16127_vm3, %v5030_v60  ;;  %vm16132_vm3 = vmmov %vm16110_vm0  ;;  %v5026_v60 = vld [vmem:[#allocation3 + $0x101] sm:$0xff]  ;;  %v6008_v17 = vld [vmem:[#allocation3 + $0x13] sm:$0xff] }
 0x416   : > { %v5046_v34 = vpack.c.bf16 %v5027_v15, %v5026_v60  ;;  %v5352_v40 = vld [vmem:[#allocation3 + $0xa2] sm:$0xff]  ;;  %v5355_v7 = vld [vmem:[#allocation3 + $0xba] sm:$0xff]  ;;  %vm16166_vm1 = vmmov %vm16110_vm0 }
 0x417   : > { %v5356_v49 = vld [vmem:[#allocation3 + $0xc2] sm:$0xff]  ;;  %v5359_v15 = vld [vmem:[#allocation3 + $0xda] sm:$0xff]  ;;  %vm16167_vm9 = vmmov %vm16110_vm0 }
 0x418   : > { %v5360_v35 = vld [vmem:[#allocation3 + $0xe2] sm:$0xff]  ;;  %v5367_v42 = vld [vmem:[#allocation3 + $0x11a] sm:$0xff]  ;;  %vm16168_vm6 = vmmov %vm16110_vm0 }
 0x419   : > { %vm16169_vm15 = vmmov %vm16110_vm0 }
 0x41c   : > { %10403 = vmatmul.mubr.msk.bf16.vlgmr.msra.gmra.mrb[0].mxu1 %vm16128_vm10, %v5031_v4  ;;  %vm16133_vm10 = vmmov %vm16110_vm0  ;;  %v5333_v4 = vld [vmem:[#allocation3 + $0xa] sm:$0xff] }
 0x41d   : > { %10406 = vmatprep.mubr.msk.bf16.mxu1 %vm16129_vm8, %v5032_v48  ;;  %10439 = vmatpush3.bf16.msra.mxu1 %v16130_v47  ;;  %vm16134_vm8 = vmmov %vm16110_vm0  ;;  %v5028_v48 = vld [vmem:[#allocation3 + $0x111] sm:$0xff]  ;;  %v5368_v47 = vpack.c.bf16 %v5333_v4, %v5332_v31 }
 0x41e   : > { %10440 = vmatprep.subr.bf16.mxu1 %v11530_v56 }
 0x421   : > { %10441 = vmatpush3.bf16.msra.mxu1 %v11530_v56  ;;  %v5029_v56 = vld [vmem:[#allocation3 + $0x119] sm:$0xff] }
 0x422   : > { %10478 = vmatprep.subr.bf16.mxu1 %v14377_v25  ;;  %v5047_v5 = vpack.c.bf16 %v5029_v56, %v5028_v48  ;;  %v5363_v56 = vld [vmem:[#allocation3 + $0xfa] sm:$0xff]  ;;  %v5364_v48 = vld [vmem:[#allocation3 + $0x102] sm:$0xff] }
 0x424   : > { %10407 = vmatmul.mubr.msk.bf16.gmra.mrb[4].mxu1 %vm16131_vm13, %v5033_v53  ;;  %vm16135_vm13 = vmmov %vm16110_vm0  ;;  %v5334_v53 = vld [vmem:[#allocation3 + $0x12] sm:$0xff] }
 0x425   : > { %10410 = vmatprep.mubr.msk.bf16.mxu1 %vm16110_vm0, %v5034_v1  ;;  %v14396_v1 = vpack.c.bf16 %v5335_v43, %v5334_v53  ;;  %v5366_v53 = vld [vmem:[#allocation3 + $0x112] sm:$0xff] }
 0x42c   : > { %10411 = vmatmul.mubr.msk.bf16.gmra.mrb[8].mxu1 %vm16132_vm3, %v5035_v10  ;;  %vm16136_vm3 = vmmov %vm16110_vm0  ;;  %v5340_v10 = vld [vmem:[#allocation3 + $0x42] sm:$0xff] }
 0x42d   : > { %10414 = vmatprep.mubr.msk.bf16.mxu1 %vm16133_vm10, %v5036_v57  ;;  %vm16137_vm10 = vmmov %vm16110_vm0  ;;  %v5341_v57 = vld [vmem:[#allocation3 + $0x4a] sm:$0xff] }
 0x42e   : > { %v14414_v46 = vpack.c.bf16 %v5341_v57, %v5340_v10  ;;  %v11535_v10 = vld [vmem:[%s15556_s3 + $0x50] sm:$0xff]  }
 0x434   : > { %10415 = vmatmul.mubr.msk.bf16.gmra.mrb[12].mxu1 %vm16134_vm8, %v5037_v59  ;;  %vm16138_vm8 = vmmov %vm16110_vm0  ;;  %v5345_v59 = vld [vmem:[#allocation3 + $0x6a] sm:$0xff] }
 0x435   : > { %10418 = vmatprep.mubr.msk.bf16.mxu1 %vm16135_vm13, %v5038_v61  ;;  %vm16139_vm13 = vmmov %vm16110_vm0  ;;  %v5342_v61 = vld [vmem:[#allocation3 + $0x52] sm:$0xff]  ;;  %v5374_v14 = vpack.c.bf16 %v5345_v59, %v5344_v32  ;;  %v6010_v32 = vld [vmem:[#allocation3 + $0x23] sm:$0xff] }
 0x43c   : > { %10419 = vmatmul.mubr.msk.bf16.gmra.mrb[16].mxu1 %vm16110_vm0, %v5039_v0  ;;  %v5349_v0 = vld [vmem:[#allocation3 + $0x8a] sm:$0xff] }
 0x43d   : > { %10422 = vmatprep.mubr.msk.bf16.mxu1 %vm16136_vm3, %v5040_v44  ;;  %vm16140_vm3 = vmmov %vm16110_vm0  ;;  %v5346_v44 = vld [vmem:[#allocation3 + $0x72] sm:$0xff]  ;;  %v5376_v13 = vpack.c.bf16 %v5349_v0, %v5348_v19  ;;  %v6017_v0 = vld [vmem:[#allocation3 + $0x5b] sm:$0xff] }
 0x43e   : > { %v5375_v12 = vpack.c.bf16 %v5347_v62, %v5346_v44  ;;  %v14469_v62 = vld [vmem:[%s15556_s3 + $0x60] sm:$0xff]  }
 0x43f   : > { %v6015_v19 = vld [vmem:[#allocation3 + $0x4b] sm:$0xff]  ;;  %v6014_v44 = vld [vmem:[#allocation3 + $0x43] sm:$0xff] }
 0x444   : > { %10423 = vmatmul.mubr.msk.bf16.gmra.mrb[20].mxu1 %vm16137_vm10, %v5041_v2  ;;  %vm16141_vm10 = vmmov %vm16110_vm0  ;;  %v5353_v2 = vld [vmem:[#allocation3 + $0xaa] sm:$0xff] }
 0x445   : > { %10426 = vmatprep.mubr.msk.bf16.mxu1 %vm16138_vm8, %v5042_v23  ;;  %vm16142_vm8 = vmmov %vm16110_vm0  ;;  %v5350_v23 = vld [vmem:[#allocation3 + $0x92] sm:$0xff]  ;;  %v5378_v33 = vpack.c.bf16 %v5353_v2, %v5352_v40  ;;  %v6021_v2 = vld [vmem:[#allocation3 + $0x7b] sm:$0xff] }
 0x446   : > { %v5377_v63 = vpack.c.bf16 %v5351_v29, %v5350_v23  ;;  %v6019_v40 = vld [vmem:[#allocation3 + $0x6b] sm:$0xff]  ;;  %v6018_v23 = vld [vmem:[#allocation3 + $0x63] sm:$0xff] }
 0x44c   : > { %10427 = vmatmul.mubr.msk.bf16.gmra.mrb[24].mxu1 %vm16139_vm13, %v5043_v24  ;;  %vm16143_vm13 = vmmov %vm16110_vm0  ;;  %v5357_v24 = vld [vmem:[#allocation3 + $0xca] sm:$0xff] }
 0x44d   : > { %10430 = vmatprep.mubr.msk.bf16.mxu1 %vm16110_vm0, %v5044_v38  ;;  %v5354_v38 = vld [vmem:[#allocation3 + $0xb2] sm:$0xff]  ;;  %v5380_v60 = vpack.c.bf16 %v5357_v24, %v5356_v49  ;;  %v6025_v24 = vld [vmem:[#allocation3 + $0x9b] sm:$0xff] }
 0x44e   : > { %v5379_v41 = vpack.c.bf16 %v5355_v7, %v5354_v38  ;;  %v6023_v49 = vld [vmem:[#allocation3 + $0x8b] sm:$0xff]  ;;  %v6022_v38 = vld [vmem:[#allocation3 + $0x83] sm:$0xff] }
 0x454   : > { %10431 = vmatmul.mubr.msk.bf16.gmra.mrb[28].mxu1 %vm16140_vm3, %v5045_v8  ;;  %vm16144_vm3 = vmmov %vm16110_vm0  ;;  %v5361_v8 = vld [vmem:[#allocation3 + $0xea] sm:$0xff] }
 0x455   : > { %10434 = vmatprep.mubr.msk.bf16.mxu1 %vm16141_vm10, %v5046_v34  ;;  %vm16145_vm10 = vmmov %vm16110_vm0  ;;  %v5358_v34 = vld [vmem:[#allocation3 + $0xd2] sm:$0xff]  ;;  %v5382_v4 = vpack.c.bf16 %v5361_v8, %v5360_v35  ;;  %v6029_v8 = vld [vmem:[#allocation3 + $0xbb] sm:$0xff] }
 0x456   : > { %v5381_v31 = vpack.c.bf16 %v5359_v15, %v5358_v34  ;;  %v6027_v35 = vld [vmem:[#allocation3 + $0xab] sm:$0xff]  ;;  %v6026_v34 = vld [vmem:[#allocation3 + $0xa3] sm:$0xff] }
 0x45c   : > { %10435 = vmatmul.mubr.msk.bf16.gmra.mrb[32].mxu1 %vm16142_vm8, %v5047_v5  ;;  %vm16146_vm8 = vmmov %vm16110_vm0  ;;  %v5362_v5 = vld [vmem:[#allocation3 + $0xf2] sm:$0xff] }
 0x45d   : > { %10442 = vmatprep.mubr.msk.bf16.mxu1 %vm16143_vm13, %v5368_v47  ;;  %vm16147_vm13 = vmmov %vm16110_vm0  ;;  %v5365_v47 = vld [vmem:[#allocation3 + $0x10a] sm:$0xff]  ;;  %v5383_v43 = vpack.c.bf16 %v5363_v56, %v5362_v5 }
 0x45e   : > { %v5384_v51 = vpack.c.bf16 %v5365_v47, %v5364_v48  ;;  %v6031_v48 = vld [vmem:[#allocation3 + $0xcb] sm:$0xff]  ;;  %v6033_v47 = vld [vmem:[#allocation3 + $0xdb] sm:$0xff]  ;;  %v6030_v5 = vld [vmem:[#allocation3 + $0xc3] sm:$0xff] }
 0x464   : > { %10443 = vmatmul.mubr.msk.bf16.vlgmr.msra.gmra.mrb[0].mxu1 %vm16110_vm0, %v14396_v1 }
 0x465   : > { %10446 = vmatprep.mubr.msk.bf16.mxu1 %vm16144_vm3, %v14401_v9  ;;  %10479 = vmatpush3.bf16.msra.mxu1 %v14377_v25  ;;  %v5343_v25 = vld [vmem:[#allocation3 + $0x5a] sm:$0xff]  ;;  %vm16148_vm3 = vmmov %vm16110_vm0 }
 0x466   : > { %10480 = vmatprep.subr.bf16.mxu1 %v11532_v26  ;;  %v5373_v27 = vpack.c.bf16 %v5343_v25, %v5342_v61  ;;  %v6013_v25 = vld [vmem:[#allocation3 + $0x3b] sm:$0xff]  ;;  %v6012_v61 = vld [vmem:[#allocation3 + $0x33] sm:$0xff] }
 0x469   : > { %10481 = vmatpush3.bf16.msra.mxu1 %v11532_v26  ;;  %v5385_v26 = vpack.c.bf16 %v5367_v42, %v5366_v53  ;;  %v6035_v53 = vld [vmem:[#allocation3 + $0xeb] sm:$0xff] }
 0x46a   : > { %10518 = vmatprep.subr.bf16.mxu1 %v14411_v20 }
 0x46c   : > { %10447 = vmatmul.mubr.msk.bf16.gmra.mrb[4].mxu1 %vm16145_vm10, %v5371_v28  ;;  %vm16149_vm10 = vmmov %vm16110_vm0 }
 0x46d   : > { %10450 = vmatprep.mubr.msk.bf16.mxu1 %vm16146_vm8, %v14414_v46  ;;  %vm16150_vm8 = vmmov %vm16110_vm0 }
 0x474   : > { %10451 = vmatmul.mubr.msk.bf16.gmra.mrb[8].mxu1 %vm16147_vm13, %v5373_v27  ;;  %vm16151_vm13 = vmmov %vm16110_vm0 }
 0x475   : > { %10454 = vmatprep.mubr.msk.bf16.mxu1 %vm16110_vm0, %v5374_v14 }
 0x47c   : > { %10455 = vmatmul.mubr.msk.bf16.gmra.mrb[12].mxu1 %vm16148_vm3, %v5375_v12  ;;  %vm16152_vm3 = vmmov %vm16110_vm0 }
 0x47d   : > { %10458 = vmatprep.mubr.msk.bf16.mxu1 %vm16149_vm10, %v5376_v13  ;;  %vm16153_vm10 = vmmov %vm16110_vm0 }
 0x484   : > { %10459 = vmatmul.mubr.msk.bf16.gmra.mrb[16].mxu1 %vm16150_vm8, %v5377_v63  ;;  %vm16154_vm8 = vmmov %vm16110_vm0 }
 0x485   : > { %10462 = vmatprep.mubr.msk.bf16.mxu1 %vm16151_vm13, %v5378_v33  ;;  %vm16155_vm13 = vmmov %vm16110_vm0 }
 0x48c   : > { %10463 = vmatmul.mubr.msk.bf16.gmra.mrb[20].mxu1 %vm16110_vm0, %v5379_v41 }
 0x48d   : > { %10466 = vmatprep.mubr.msk.bf16.mxu1 %vm16152_vm3, %v5380_v60  ;;  %vm16156_vm3 = vmmov %vm16110_vm0 }
 0x494   : > { %10467 = vmatmul.mubr.msk.bf16.gmra.mrb[24].mxu1 %vm16153_vm10, %v5381_v31  ;;  %vm16158_vm10 = vmmov %vm16110_vm0 }
 0x495   : > { %10470 = vmatprep.mubr.msk.bf16.mxu1 %vm16154_vm8, %v5382_v4  ;;  %vm16159_vm8 = vmmov %vm16110_vm0 }
 0x49c   : > { %10471 = vmatmul.mubr.msk.bf16.gmra.mrb[28].mxu1 %vm16155_vm13, %v5383_v43  ;;  %vm16161_vm13 = vmmov %vm16110_vm0 }
 0x49d   : > { %10474 = vmatprep.mubr.msk.bf16.mxu1 %vm16110_vm0, %v5384_v51 }
 0x4a4   : > { %10475 = vmatmul.mubr.msk.bf16.gmra.mrb[32].mxu1 %vm16156_vm3, %v5385_v26  ;;  %vm16162_vm3 = vmmov %vm16110_vm0 }
 0x4a5   : > { %10482 = vmatprep.mubr.msk.bf16.mxu1 %vm16157_vm5, %v14396_v1  ;;  %vm16160_vm5 = vmmov %vm16110_vm0  ;;  %v5704_v1 = vld [vmem:[#allocation3 + $0x122] sm:$0xff] }
 0x4ac   : > { %10483 = vmatmul.mubr.msk.bf16.vlgmr.msra.gmra.mrb[0].mxu1 %vm16158_vm10, %v14401_v9  ;;  %vm16163_vm10 = vmmov %vm16110_vm0  ;;  %v5705_v9 = vld [vmem:[#allocation3 + $0x12a] sm:$0xff] }
 0x4ad   : > { %10486 = vmatprep.mubr.msk.bf16.mxu1 %vm16159_vm8, %v5371_v28  ;;  %10519 = vmatpush3.bf16.msra.mxu1 %v14411_v20  ;;  %vm16164_vm8 = vmmov %vm16110_vm0  ;;  %v6009_v20 = vld [vmem:[#allocation3 + $0x1b] sm:$0xff]  ;;  %v5723_v57 = vpack.c.bf16 %v5705_v9, %v5704_v1  ;;  %v6036_v1 = vld [vmem:[#allocation3 + $0xf3] sm:$0xff] }
 0x4ae   : > { %10520 = vmatprep.subr.bf16.mxu1 %v11534_v58  ;;  %v6044_v28 = vpack.c.bf16 %v6009_v20, %v6008_v17  ;;  %v6039_v20 = vld [vmem:[#allocation3 + $0x10b] sm:$0xff]  ;;  %v6038_v17 = vld [vmem:[#allocation3 + $0x103] sm:$0xff] }
 0x4b1   : > { %10521 = vmatpush3.bf16.msra.mxu1 %v11534_v58  ;;  %v6034_v58 = vld [vmem:[#allocation3 + $0xe3] sm:$0xff] }
 0x4b2   : > { %10558 = vmatprep.subr.bf16.mxu1 %v11535_v10 }
 0x4b4   : > { %10487 = vmatmul.mubr.msk.bf16.gmra.mrb[4].mxu1 %vm16160_vm5, %v14414_v46  ;;  %vm16170_vm5 = vmmov %vm16110_vm0  ;;  %v6011_v46 = vld [vmem:[#allocation3 + $0x2b] sm:$0xff] }
 0x4b5   : > { %10490 = vmatprep.mubr.msk.bf16.mxu1 %vm16161_vm13, %v5373_v27  ;;  %vm16171_vm13 = vmmov %vm16110_vm0  ;;  %v6045_v59 = vpack.c.bf16 %v6011_v46, %v6010_v32  ;;  %v11536_v27 = vld [vmem:[%s15556_s3 + $0x58] sm:$0xff]   ;;  %v6040_v46 = vld [vmem:[#allocation3 + $0x113] sm:$0xff] }
 0x4b6   : > { %v6043_v32 = vld [vmem:[#allocation3 + $0x12b] sm:$0xff] }
 0x4bc   : > { %10491 = vmatmul.mubr.msk.bf16.gmra.mrb[8].mxu1 %vm16110_vm0, %v5374_v14  ;;  %v6046_v14 = vpack.c.bf16 %v6013_v25, %v6012_v61  ;;  %v6347_v61 = vld [vmem:[#allocation3 + $0x1c] sm:$0xff] }
 0x4bd   : > { %10494 = vmatprep.mubr.msk.bf16.mxu1 %vm16162_vm3, %v5375_v12  ;;  %v6047_v12 = vpack.c.bf16 %v6015_v19, %v6014_v44  ;;  %vm16177_vm3 = vmmov %vm16110_vm0  ;;  %v6350_v44 = vld [vmem:[#allocation3 + $0x34] sm:$0xff] }
 0x4c4   : > { %10495 = vmatmul.mubr.msk.bf16.gmra.mrb[12].mxu1 %vm16163_vm10, %v5376_v13  ;;  %v6016_v13 = vld [vmem:[#allocation3 + $0x53] sm:$0xff]  ;;  %vm16178_vm10 = vmmov %vm16110_vm0 }
 0x4c5   : > { %10498 = vmatprep.mubr.msk.bf16.mxu1 %vm16164_vm8, %v5377_v63  ;;  %v6048_v29 = vpack.c.bf16 %v6017_v0, %v6016_v13  ;;  %v6049_v63 = vpack.c.bf16 %v6019_v40, %v6018_v23  ;;  %vm16179_vm8 = vmmov %vm16110_vm0  ;;  %v6349_v0 = vld [vmem:[#allocation3 + $0x2c] sm:$0xff]  ;;  %v6348_v13 = vld [vmem:[#allocation3 + $0x24] sm:$0xff] }
 0x4c6   : > { %v11538_v40 = vld [vmem:[%s15556_s3 + $0x68] sm:$0xff]   ;;  %v14503_v23 = vld [vmem:[%s15556_s3 + $0x70] sm:$0xff]  }
 0x4cc   : > { %10499 = vmatmul.mubr.msk.bf16.gmra.mrb[16].mxu1 %vm16165_vm11, %v5378_v33  ;;  %vm16172_vm11 = vmmov %vm16110_vm0  ;;  %v6020_v33 = vld [vmem:[#allocation3 + $0x73] sm:$0xff] }
 0x4cd   : > { %10502 = vmatprep.mubr.msk.bf16.mxu1 %vm16166_vm1, %v5379_v41  ;;  %vm16173_vm1 = vmmov %vm16110_vm0  ;;  %v6050_v7 = vpack.c.bf16 %v6021_v2, %v6020_v33  ;;  %v6051_v41 = vpack.c.bf16 %v6023_v49, %v6022_v38  ;;  %v6354_v33 = vld [vmem:[#allocation3 + $0x54] sm:$0xff]  ;;  %v6352_v49 = vld [vmem:[#allocation3 + $0x44] sm:$0xff] }
 0x4d4   : > { %10503 = vmatmul.mubr.msk.bf16.gmra.mrb[20].mxu1 %vm16167_vm9, %v5380_v60  ;;  %vm16176_vm9 = vmmov %vm16110_vm0  ;;  %v6024_v60 = vld [vmem:[#allocation3 + $0x93] sm:$0xff] }
 0x4d5   : > { %10506 = vmatprep.mubr.msk.bf16.mxu1 %vm16168_vm6, %v5381_v31  ;;  %vm16174_vm6 = vmmov %vm16110_vm0  ;;  %v6052_v15 = vpack.c.bf16 %v6025_v24, %v6024_v60  ;;  %v6053_v31 = vpack.c.bf16 %v6027_v35, %v6026_v34  ;;  %v6359_v60 = vld [vmem:[#allocation3 + $0x7c] sm:$0xff]  ;;  %v6361_v34 = vld [vmem:[#allocation3 + $0x8c] sm:$0xff] }
 0x4dc   : > { %10507 = vmatmul.mubr.msk.bf16.gmra.mrb[24].mxu1 %vm16169_vm15, %v5382_v4  ;;  %vm16175_vm15 = vmmov %vm16110_vm0  ;;  %v6028_v4 = vld [vmem:[#allocation3 + $0xb3] sm:$0xff] }
 0x4dd   : > { %10510 = vmatprep.mubr.msk.bf16.mxu1 %vm16170_vm5, %v5383_v43  ;;  %vm16180_vm5 = vmmov %vm16110_vm0  ;;  %v6054_v56 = vpack.c.bf16 %v6029_v8, %v6028_v4  ;;  %v6055_v43 = vpack.c.bf16 %v6031_v48, %v6030_v5  ;;  %v6363_v4 = vld [vmem:[#allocation3 + $0x9c] sm:$0xff]  ;;  %v6365_v5 = vld [vmem:[#allocation3 + $0xac] sm:$0xff] }
 0x4e4   : > { %10511 = vmatmul.mubr.msk.bf16.gmra.mrb[28].mxu1 %vm16171_vm13, %v5384_v51  ;;  %vm16181_vm13 = vmmov %vm16110_vm0  ;;  %v6032_v51 = vld [vmem:[#allocation3 + $0xd3] sm:$0xff] }
 0x4e5   : > { %10514 = vmatprep.mubr.msk.bf16.mxu1 %vm16110_vm0, %v5385_v26  ;;  %v6056_v42 = vpack.c.bf16 %v6033_v47, %v6032_v51  ;;  %v6037_v26 = vld [vmem:[#allocation3 + $0xfb] sm:$0xff] }
 0x4e6   : > { %v6058_v9 = vpack.c.bf16 %v6037_v26, %v6036_v1  ;;  %v6367_v51 = vld [vmem:[#allocation3 + $0xbc] sm:$0xff] }
 0x4e7   : > { %v6371_v1 = vld [vmem:[#allocation3 + $0xdc] sm:$0xff] }
 0x4ec   : > { %10515 = vmatmul.mubr.msk.bf16.gmra.mrb[32].mxu1 %vm16172_vm11, %v5723_v57  ;;  %vm16182_vm11 = vmmov %vm16110_vm0  ;;  %v6041_v57 = vld [vmem:[#allocation3 + $0x11b] sm:$0xff] }
 0x4ed   : > { %10522 = vmatprep.mubr.msk.bf16.mxu1 %vm16173_vm1, %v6044_v28  ;;  %vm16183_vm1 = vmmov %vm16110_vm0  ;;  %v6059_v28 = vpack.c.bf16 %v6039_v20, %v6038_v17  ;;  %v6060_v25 = vpack.c.bf16 %v6041_v57, %v6040_v46  ;;  %v6373_v17 = vld [vmem:[#allocation3 + $0xec] sm:$0xff]  ;;  %v6375_v46 = vld [vmem:[#allocation3 + $0xfc] sm:$0xff] }
 0x4f4   : > { %10523 = vmatmul.mubr.msk.bf16.vlgmr.msra.gmra.mrb[0].mxu1 %vm16174_vm6, %v6045_v59  ;;  %vm16184_vm6 = vmmov %vm16110_vm0  ;;  %v6346_v59 = vld [vmem:[#allocation3 + $0x14] sm:$0xff] }
 0x4f5   : > { %10526 = vmatprep.mubr.msk.bf16.mxu1 %vm16175_vm15, %v6046_v14  ;;  %10559 = vmatpush3.bf16.msra.mxu1 %v11535_v10  ;;  %v6057_v10 = vpack.c.bf16 %v6035_v53, %v6034_v58  ;;  %vm16185_vm15 = vmmov %vm16110_vm0  ;;  %v6382_v19 = vpack.c.bf16 %v6347_v61, %v6346_v59  ;;  %v6369_v58 = vld [vmem:[#allocation3 + $0xcc] sm:$0xff] }
 0x4f6   : > { %10560 = vmatprep.subr.bf16.mxu1 %v11536_v27  ;;  %v6377_v61 = vld [vmem:[#allocation3 + $0x10c] sm:$0xff] }
 0x4f9   : > { %10561 = vmatpush3.bf16.msra.mxu1 %v11536_v27  ;;  %v6042_v27 = vld [vmem:[#allocation3 + $0x123] sm:$0xff] }
 0x4fa   : > { %10598 = vmatprep.subr.bf16.mxu1 %v14469_v62  ;;  %v6061_v14 = vpack.c.bf16 %v6043_v32, %v6042_v27  ;;  %v6378_v27 = vld [vmem:[#allocation3 + $0x114] sm:$0xff] }
 0x4fc   : > { %10527 = vmatmul.mubr.msk.bf16.gmra.mrb[4].mxu1 %vm16176_vm9, %v6047_v12  ;;  %vm16186_vm9 = vmmov %vm16110_vm0  ;;  %v6351_v12 = vld [vmem:[#allocation3 + $0x3c] sm:$0xff] }
 0x4fd   : > { %10530 = vmatprep.mubr.msk.bf16.mxu1 %vm16177_vm3, %v6048_v29  ;;  %vm16187_vm3 = vmmov %vm16110_vm0  ;;  %v14488_v29 = vpack.c.bf16 %v6349_v0, %v6348_v13  ;;  %v14493_v2 = vpack.c.bf16 %v6351_v12, %v6350_v44  ;;  %v6380_v12 = vld [vmem:[#allocation3 + $0x124] sm:$0xff]  ;;  %v6381_v13 = vld [vmem:[#allocation3 + $0x12c] sm:$0xff] }
 0x504   : > { %10531 = vmatmul.mubr.msk.bf16.gmra.mrb[8].mxu1 %vm16178_vm10, %v6049_v63  ;;  %vm16188_vm10 = vmmov %vm16110_vm0  ;;  %v6353_v63 = vld [vmem:[#allocation3 + $0x4c] sm:$0xff] }
 0x505   : > { %10534 = vmatprep.mubr.msk.bf16.mxu1 %vm16179_vm8, %v6050_v7  ;;  %vm16189_vm8 = vmmov %vm16110_vm0  ;;  %v6355_v7 = vld [vmem:[#allocation3 + $0x5c] sm:$0xff]  ;;  %v6385_v24 = vpack.c.bf16 %v6353_v63, %v6352_v49  ;;  %v7022_v49 = vld [vmem:[#allocation3 + $0x25] sm:$0xff] }
 0x506   : > { %v14506_v38 = vpack.c.bf16 %v6355_v7, %v6354_v33  ;;  %v11540_v63 = vld [vmem:[%s15556_s3 + $0x78] sm:$0xff]   ;;  %v11541_v33 = vld [vmem:[%s15556_s3 + $0x80] sm:$0xff]  }
 0x507   : > { %v7023_v7 = vld [vmem:[#allocation3 + $0x2d] sm:$0xff] }
 0x50c   : > { %10535 = vmatmul.mubr.msk.bf16.gmra.mrb[12].mxu1 %vm16180_vm5, %v6051_v41  ;;  %vm16190_vm5 = vmmov %vm16110_vm0  ;;  %v6358_v41 = vld [vmem:[#allocation3 + $0x74] sm:$0xff] }
 0x50d   : > { %10538 = vmatprep.mubr.msk.bf16.mxu1 %vm16181_vm13, %v6052_v15  ;;  %vm16191_vm13 = vmmov %vm16110_vm0  ;;  %v6356_v15 = vld [vmem:[#allocation3 + $0x64] sm:$0xff]  ;;  %v6388_v8 = vpack.c.bf16 %v6359_v60, %v6358_v41  ;;  %v7027_v41 = vld [vmem:[#allocation3 + $0x4d] sm:$0xff] }
 0x514   : > { %10539 = vmatmul.mubr.msk.bf16.gmra.mrb[16].mxu1 %vm16110_vm0, %v6053_v31  ;;  %v6362_v31 = vld [vmem:[#allocation3 + $0x94] sm:$0xff] }
 0x515   : > { %10542 = vmatprep.mubr.msk.bf16.mxu1 %vm16182_vm11, %v6054_v56  ;;  %vm16192_vm11 = vmmov %vm16110_vm0  ;;  %v6360_v56 = vld [vmem:[#allocation3 + $0x84] sm:$0xff]  ;;  %v6390_v47 = vpack.c.bf16 %v6363_v4, %v6362_v31  ;;  %v7031_v4 = vld [vmem:[#allocation3 + $0x6d] sm:$0xff] }
 0x516   : > { %v6389_v48 = vpack.c.bf16 %v6361_v34, %v6360_v56  ;;  %v7028_v34 = vld [vmem:[#allocation3 + $0x55] sm:$0xff]  ;;  %v7029_v31 = vld [vmem:[#allocation3 + $0x5d] sm:$0xff] }
 0x517   : > { %v7061_v56 = vpack.c.bf16 %v7029_v31, %v7028_v34  ;;  %v7362_v34 = vld [vmem:[#allocation3 + $0x36] sm:$0xff]  ;;  %v7363_v31 = vld [vmem:[#allocation3 + $0x3e] sm:$0xff] }
 0x51c   : > { %10543 = vmatmul.mubr.msk.bf16.gmra.mrb[20].mxu1 %vm16183_vm1, %v6055_v43  ;;  %vm16193_vm1 = vmmov %vm16110_vm0  ;;  %v6366_v43 = vld [vmem:[#allocation3 + $0xb4] sm:$0xff] }
 0x51d   : > { %10546 = vmatprep.mubr.msk.bf16.mxu1 %vm16184_vm6, %v6056_v42  ;;  %vm16194_vm6 = vmmov %vm16110_vm0  ;;  %v6364_v42 = vld [vmem:[#allocation3 + $0xa4] sm:$0xff]  ;;  %v6392_v26 = vpack.c.bf16 %v6367_v51, %v6366_v43  ;;  %v7035_v51 = vld [vmem:[#allocation3 + $0x8d] sm:$0xff] }
 0x51e   : > { %v6391_v53 = vpack.c.bf16 %v6365_v5, %v6364_v42  ;;  %v7032_v5 = vld [vmem:[#allocation3 + $0x75] sm:$0xff]  ;;  %v7033_v43 = vld [vmem:[#allocation3 + $0x7d] sm:$0xff] }
 0x51f   : > { %v7063_v42 = vpack.c.bf16 %v7033_v43, %v7032_v5  ;;  %v7366_v5 = vld [vmem:[#allocation3 + $0x56] sm:$0xff]  ;;  %v7367_v43 = vld [vmem:[#allocation3 + $0x5e] sm:$0xff] }
 0x524   : > { %10547 = vmatmul.mubr.msk.bf16.gmra.mrb[24].mxu1 %vm16185_vm15, %v6057_v10  ;;  %vm16195_vm15 = vmmov %vm16110_vm0  ;;  %v6370_v10 = vld [vmem:[#allocation3 + $0xd4] sm:$0xff] }
 0x525   : > { %10550 = vmatprep.mubr.msk.bf16.mxu1 %vm16186_vm9, %v6058_v9  ;;  %vm16196_vm9 = vmmov %vm16110_vm0  ;;  %v6368_v9 = vld [vmem:[#allocation3 + $0xc4] sm:$0xff]  ;;  %v6394_v57 = vpack.c.bf16 %v6371_v1, %v6370_v10  ;;  %v7039_v1 = vld [vmem:[#allocation3 + $0xad] sm:$0xff] }
 0x526   : > { %v6393_v20 = vpack.c.bf16 %v6369_v58, %v6368_v9  ;;  %v7036_v58 = vld [vmem:[#allocation3 + $0x95] sm:$0xff]  ;;  %v7037_v10 = vld [vmem:[#allocation3 + $0x9d] sm:$0xff] }
 0x527   : > { %v7065_v9 = vpack.c.bf16 %v7037_v10, %v7036_v58  ;;  %v7370_v58 = vld [vmem:[#allocation3 + $0x76] sm:$0xff]  ;;  %v7371_v10 = vld [vmem:[#allocation3 + $0x7e] sm:$0xff] }
 0x52c   : > { %10551 = vmatmul.mubr.msk.bf16.gmra.mrb[28].mxu1 %vm16187_vm3, %v6059_v28  ;;  %vm16197_vm3 = vmmov %vm16110_vm0  ;;  %v6374_v28 = vld [vmem:[#allocation3 + $0xf4] sm:$0xff] }
 0x52d   : > { %10554 = vmatprep.mubr.msk.bf16.mxu1 %vm16188_vm10, %v6060_v25  ;;  %vm16198_vm10 = vmmov %vm16110_vm0  ;;  %v6372_v25 = vld [vmem:[#allocation3 + $0xe4] sm:$0xff]  ;;  %v6396_v59 = vpack.c.bf16 %v6375_v46, %v6374_v28  ;;  %v7043_v46 = vld [vmem:[#allocation3 + $0xcd] sm:$0xff] }
 0x52e   : > { %v6395_v32 = vpack.c.bf16 %v6373_v17, %v6372_v25  ;;  %v7040_v17 = vld [vmem:[#allocation3 + $0xb5] sm:$0xff]  ;;  %v7041_v28 = vld [vmem:[#allocation3 + $0xbd] sm:$0xff] }
 0x52f   : > { %v7067_v25 = vpack.c.bf16 %v7041_v28, %v7040_v17  ;;  %v7374_v17 = vld [vmem:[#allocation3 + $0x96] sm:$0xff]  ;;  %v7375_v28 = vld [vmem:[#allocation3 + $0x9e] sm:$0xff] }
 0x534   : > { %10555 = vmatmul.mubr.msk.bf16.gmra.mrb[32].mxu1 %vm16189_vm8, %v6061_v14  ;;  %vm16199_vm8 = vmmov %vm16110_vm0  ;;  %v6379_v14 = vld [vmem:[#allocation3 + $0x11c] sm:$0xff] }
 0x535   : > { %10562 = vmatprep.mubr.msk.bf16.mxu1 %vm16190_vm5, %v6382_v19  ;;  %vm16200_vm5 = vmmov %vm16110_vm0  ;;  %v6376_v19 = vld [vmem:[#allocation3 + $0x104] sm:$0xff]  ;;  %v6398_v44 = vpack.c.bf16 %v6379_v14, %v6378_v27  ;;  %v7047_v14 = vld [vmem:[#allocation3 + $0xed] sm:$0xff] }
 0x536   : > { %v6397_v0 = vpack.c.bf16 %v6377_v61, %v6376_v19  ;;  %v7044_v61 = vld [vmem:[#allocation3 + $0xd5] sm:$0xff]  ;;  %v7045_v27 = vld [vmem:[#allocation3 + $0xdd] sm:$0xff] }
 0x537   : > { %v7069_v19 = vpack.c.bf16 %v7045_v27, %v7044_v61  ;;  %v7378_v61 = vld [vmem:[#allocation3 + $0xb6] sm:$0xff]  ;;  %v7379_v27 = vld [vmem:[#allocation3 + $0xbe] sm:$0xff] }
 0x53c   : > { %10563 = vmatmul.mubr.msk.bf16.vlgmr.msra.gmra.mrb[0].mxu1 %vm16191_vm13, %v14488_v29  ;;  %vm16201_vm13 = vmmov %vm16110_vm0 }
 0x53d   : > { %10566 = vmatprep.mubr.msk.bf16.mxu1 %vm16110_vm0, %v14493_v2  ;;  %10599 = vmatpush3.bf16.msra.mxu1 %v14469_v62  ;;  %v6357_v62 = vld [vmem:[#allocation3 + $0x6c] sm:$0xff] }
 0x53e   : > { %10600 = vmatprep.subr.bf16.mxu1 %v11538_v40  ;;  %v6387_v35 = vpack.c.bf16 %v6357_v62, %v6356_v15  ;;  %v7025_v62 = vld [vmem:[#allocation3 + $0x3d] sm:$0xff]  ;;  %v7026_v15 = vld [vmem:[#allocation3 + $0x45] sm:$0xff] }
 0x541   : > { %10601 = vmatpush3.bf16.msra.mxu1 %v11538_v40  ;;  %v6399_v40 = vpack.c.bf16 %v6381_v13, %v6380_v12  ;;  %v7048_v12 = vld [vmem:[#allocation3 + $0xf5] sm:$0xff]  ;;  %v7049_v13 = vld [vmem:[#allocation3 + $0xfd] sm:$0xff] }
 0x542   : > { %10638 = vmatprep.subr.bf16.mxu1 %v14503_v23 }
 0x544   : > { %10567 = vmatmul.mubr.msk.bf16.gmra.mrb[4].mxu1 %vm16192_vm11, %v6385_v24  ;;  %vm16202_vm11 = vmmov %vm16110_vm0 }
 0x545   : > { %10570 = vmatprep.mubr.msk.bf16.mxu1 %vm16193_vm1, %v14506_v38  ;;  %vm16203_vm1 = vmmov %vm16110_vm0 }
 0x54c   : > { %10571 = vmatmul.mubr.msk.bf16.gmra.mrb[8].mxu1 %vm16194_vm6, %v6387_v35  ;;  %vm16204_vm6 = vmmov %vm16110_vm0 }
 0x54d   : > { %10574 = vmatprep.mubr.msk.bf16.mxu1 %vm16195_vm15, %v6388_v8  ;;  %vm16205_vm15 = vmmov %vm16110_vm0 }
 0x554   : > { %10575 = vmatmul.mubr.msk.bf16.gmra.mrb[12].mxu1 %vm16196_vm9, %v6389_v48  ;;  %vm16206_vm9 = vmmov %vm16110_vm0 }
 0x555   : > { %10578 = vmatprep.mubr.msk.bf16.mxu1 %vm16197_vm3, %v6390_v47  ;;  %vm16207_vm3 = vmmov %vm16110_vm0 }
 0x55c   : > { %10579 = vmatmul.mubr.msk.bf16.gmra.mrb[16].mxu1 %vm16198_vm10, %v6391_v53  ;;  %vm16208_vm10 = vmmov %vm16110_vm0 }
 0x55d   : > { %10582 = vmatprep.mubr.msk.bf16.mxu1 %vm16199_vm8, %v6392_v26  ;;  %vm16209_vm8 = vmmov %vm16110_vm0 }
 0x564   : > { %10583 = vmatmul.mubr.msk.bf16.gmra.mrb[20].mxu1 %vm16200_vm5, %v6393_v20  ;;  %vm16210_vm5 = vmmov %vm16110_vm0 }
 0x565   : > { %10586 = vmatprep.mubr.msk.bf16.mxu1 %vm16201_vm13, %v6394_v57  ;;  %vm16211_vm13 = vmmov %vm16110_vm0 }
 0x56c   : > { %10587 = vmatmul.mubr.msk.bf16.gmra.mrb[24].mxu1 %vm16110_vm0, %v6395_v32 }
 0x56d   : > { %10590 = vmatprep.mubr.msk.bf16.mxu1 %vm16202_vm11, %v6396_v59  ;;  %vm16212_vm11 = vmmov %vm16110_vm0 }
 0x574   : > { %10591 = vmatmul.mubr.msk.bf16.gmra.mrb[28].mxu1 %vm16203_vm1, %v6397_v0  ;;  %vm16213_vm1 = vmmov %vm16110_vm0 }
 0x575   : > { %10594 = vmatprep.mubr.msk.bf16.mxu1 %vm16204_vm6, %v6398_v44  ;;  %vm16214_vm6 = vmmov %vm16110_vm0 }
 0x57c   : > { %10595 = vmatmul.mubr.msk.bf16.gmra.mrb[32].mxu1 %vm16205_vm15, %v6399_v40  ;;  %vm16215_vm15 = vmmov %vm16110_vm0 }
 0x57d   : > { %10602 = vmatprep.mubr.msk.bf16.mxu1 %vm16206_vm9, %v14488_v29  ;;  %vm16216_vm9 = vmmov %vm16110_vm0  ;;  %v6718_v29 = vld [vmem:[#allocation3 + $0x134] sm:$0xff] }
 0x584   : > { %10603 = vmatmul.mubr.msk.bf16.vlgmr.msra.gmra.mrb[0].mxu1 %vm16207_vm3, %v14493_v2  ;;  %vm16217_vm3 = vmmov %vm16110_vm0  ;;  %v6719_v2 = vld [vmem:[#allocation3 + $0x13c] sm:$0xff] }
 0x585   : > { %10606 = vmatprep.mubr.msk.bf16.mxu1 %vm16208_vm10, %v6385_v24  ;;  %10639 = vmatpush3.bf16.msra.mxu1 %v14503_v23  ;;  %vm16218_vm10 = vmmov %vm16110_vm0  ;;  %v6737_v23 = vpack.c.bf16 %v6719_v2, %v6718_v29  ;;  %v7058_v24 = vpack.c.bf16 %v7023_v7, %v7022_v49  ;;  %v7052_v2 = vld [vmem:[#allocation3 + $0x115] sm:$0xff]  ;;  %v7054_v7 = vld [vmem:[#allocation3 + $0x125] sm:$0xff] }
 0x586   : > { %10640 = vmatprep.subr.bf16.mxu1 %v11540_v63  ;;  %v7055_v49 = vld [vmem:[#allocation3 + $0x12d] sm:$0xff] }
 0x589   : > { %10641 = vmatpush3.bf16.msra.mxu1 %v11540_v63  ;;  %v7071_v63 = vpack.c.bf16 %v7049_v13, %v7048_v12  ;;  %v7382_v12 = vld [vmem:[#allocation3 + $0xd6] sm:$0xff]  ;;  %v7383_v13 = vld [vmem:[#allocation3 + $0xde] sm:$0xff] }
 0x58a   : > { %10678 = vmatprep.subr.bf16.mxu1 %v11541_v33 }
 0x58c   : > { %10607 = vmatmul.mubr.msk.bf16.gmra.mrb[4].mxu1 %vm16209_vm8, %v14506_v38  ;;  %vm16219_vm8 = vmmov %vm16110_vm0  ;;  %v7024_v38 = vld [vmem:[#allocation3 + $0x35] sm:$0xff] }
 0x58d   : > { %10610 = vmatprep.mubr.msk.bf16.mxu1 %vm16210_vm5, %v6387_v35  ;;  %vm16220_vm5 = vmmov %vm16110_vm0  ;;  %v7059_v60 = vpack.c.bf16 %v7025_v62, %v7024_v38  ;;  %v11542_v35 = vld [vmem:[%s15556_s3 + $0x88] sm:$0xff]   ;;  %v7074_v38 = vpack.c.bf16 %v7055_v49, %v7054_v7 }
 0x58e   : > { %v7056_v62 = vld [vmem:[#allocation3 + $0x135] sm:$0xff] }
 0x58f   : > { %v7389_v7 = vld [vmem:[#allocation3 + $0x10e] sm:$0xff] }
 0x594   : > { %10611 = vmatmul.mubr.msk.bf16.gmra.mrb[8].mxu1 %vm16211_vm13, %v6388_v8  ;;  %vm16221_vm13 = vmmov %vm16110_vm0  ;;  %v7060_v8 = vpack.c.bf16 %v7027_v41, %v7026_v15  ;;  %v7057_v41 = vld [vmem:[#allocation3 + $0x13d] sm:$0xff]  ;;  %v7361_v15 = vld [vmem:[#allocation3 + $0x2e] sm:$0xff] }
 0x595   : > { %10614 = vmatprep.mubr.msk.bf16.mxu1 %vm16110_vm0, %v6389_v48  ;;  %v7030_v48 = vld [vmem:[#allocation3 + $0x65] sm:$0xff] }
 0x59c   : > { %10615 = vmatmul.mubr.msk.bf16.gmra.mrb[12].mxu1 %vm16212_vm11, %v6390_v47  ;;  %vm16222_vm11 = vmmov %vm16110_vm0  ;;  %v7062_v47 = vpack.c.bf16 %v7031_v4, %v7030_v48  ;;  %v7365_v4 = vld [vmem:[#allocation3 + $0x4e] sm:$0xff]  ;;  %v7364_v48 = vld [vmem:[#allocation3 + $0x46] sm:$0xff] }
 0x59d   : > { %10618 = vmatprep.mubr.msk.bf16.mxu1 %vm16213_vm1, %v6391_v53  ;;  %vm16223_vm1 = vmmov %vm16110_vm0  ;;  %v7034_v53 = vld [vmem:[#allocation3 + $0x85] sm:$0xff] }
 0x5a4   : > { %10619 = vmatmul.mubr.msk.bf16.gmra.mrb[16].mxu1 %vm16214_vm6, %v6392_v26  ;;  %vm16224_vm6 = vmmov %vm16110_vm0  ;;  %v7064_v26 = vpack.c.bf16 %v7035_v51, %v7034_v53  ;;  %v7369_v51 = vld [vmem:[#allocation3 + $0x6e] sm:$0xff]  ;;  %v7368_v53 = vld [vmem:[#allocation3 + $0x66] sm:$0xff] }
 0x5a5   : > { %10622 = vmatprep.mubr.msk.bf16.mxu1 %vm16215_vm15, %v6393_v20  ;;  %vm16225_vm15 = vmmov %vm16110_vm0  ;;  %v7038_v20 = vld [vmem:[#allocation3 + $0xa5] sm:$0xff] }
 0x5ac   : > { %10623 = vmatmul.mubr.msk.bf16.gmra.mrb[20].mxu1 %vm16216_vm9, %v6394_v57  ;;  %vm16226_vm9 = vmmov %vm16110_vm0  ;;  %v7066_v57 = vpack.c.bf16 %v7039_v1, %v7038_v20  ;;  %v7373_v1 = vld [vmem:[#allocation3 + $0x8e] sm:$0xff]  ;;  %v7372_v20 = vld [vmem:[#allocation3 + $0x86] sm:$0xff] }
 0x5ad   : > { %10626 = vmatprep.mubr.msk.bf16.mxu1 %vm16217_vm3, %v6395_v32  ;;  %vm16227_vm3 = vmmov %vm16110_vm0  ;;  %v7042_v32 = vld [vmem:[#allocation3 + $0xc5] sm:$0xff] }
 0x5b4   : > { %10627 = vmatmul.mubr.msk.bf16.gmra.mrb[24].mxu1 %vm16218_vm10, %v6396_v59  ;;  %vm16228_vm10 = vmmov %vm16110_vm0  ;;  %v7068_v59 = vpack.c.bf16 %v7043_v46, %v7042_v32  ;;  %v7377_v46 = vld [vmem:[#allocation3 + $0xae] sm:$0xff]  ;;  %v7376_v32 = vld [vmem:[#allocation3 + $0xa6] sm:$0xff] }
 0x5b5   : > { %10630 = vmatprep.mubr.msk.bf16.mxu1 %vm16219_vm8, %v6397_v0  ;;  %vm16229_vm8 = vmmov %vm16110_vm0  ;;  %v7046_v0 = vld [vmem:[#allocation3 + $0xe5] sm:$0xff] }
 0x5bc   : > { %10631 = vmatmul.mubr.msk.bf16.gmra.mrb[28].mxu1 %vm16220_vm5, %v6398_v44  ;;  %vm16230_vm5 = vmmov %vm16110_vm0  ;;  %v7070_v44 = vpack.c.bf16 %v7047_v14, %v7046_v0  ;;  %v7381_v14 = vld [vmem:[#allocation3 + $0xce] sm:$0xff]  ;;  %v7380_v0 = vld [vmem:[#allocation3 + $0xc6] sm:$0xff] }
 0x5bd   : > { %10634 = vmatprep.mubr.msk.bf16.mxu1 %vm16221_vm13, %v6399_v40  ;;  %vm16231_vm13 = vmmov %vm16110_vm0  ;;  %v7051_v40 = vld [vmem:[#allocation3 + $0x10d] sm:$0xff] }
 0x5c4   : > { %10635 = vmatmul.mubr.msk.bf16.gmra.mrb[32].mxu1 %vm16110_vm0, %v6737_v23  ;;  %v7053_v23 = vld [vmem:[#allocation3 + $0x11d] sm:$0xff] }
 0x5c5   : > { %10642 = vmatprep.mubr.msk.bf16.mxu1 %vm16222_vm11, %v7058_v24  ;;  %vm16232_vm11 = vmmov %vm16110_vm0  ;;  %v7073_v24 = vpack.c.bf16 %v7053_v23, %v7052_v2  ;;  %v7386_v2 = vld [vmem:[#allocation3 + $0xf6] sm:$0xff]  ;;  %v7387_v23 = vld [vmem:[#allocation3 + $0xfe] sm:$0xff] }
 0x5c6   : > { %v7409_v49 = vpack.c.bf16 %v7387_v23, %v7386_v2 }
 0x5cc   : > { %10643 = vmatmul.mubr.msk.bf16.vlgmr.msra.gmra.mrb[0].mxu1 %vm16223_vm1, %v7059_v60  ;;  %vm16233_vm1 = vmmov %vm16110_vm0  ;;  %v7075_v60 = vpack.c.bf16 %v7057_v41, %v7056_v62  ;;  %v7390_v62 = vld [vmem:[#allocation3 + $0x116] sm:$0xff]  ;;  %v7391_v41 = vld [vmem:[#allocation3 + $0x11e] sm:$0xff] }
 0x5cd   : > { %10646 = vmatprep.mubr.msk.bf16.mxu1 %vm16224_vm6, %v7060_v8  ;;  %10679 = vmatpush3.bf16.msra.mxu1 %v11541_v33  ;;  %v7050_v33 = vld [vmem:[#allocation3 + $0x105] sm:$0xff]  ;;  %vm16234_vm6 = vmmov %vm16110_vm0 }
 0x5ce   : > { %10680 = vmatprep.subr.bf16.mxu1 %v11542_v35  ;;  %v7072_v29 = vpack.c.bf16 %v7051_v40, %v7050_v33  ;;  %v7385_v40 = vld [vmem:[#allocation3 + $0xee] sm:$0xff]  ;;  %v7384_v33 = vld [vmem:[#allocation3 + $0xe6] sm:$0xff] }
 0x5d1   : > { %10681 = vmatpush3.bf16.msra.mxu1 %v11542_v35  ;;  %v7360_v35 = vld [vmem:[#allocation3 + $0x26] sm:$0xff] }
 0x5d2   : > { %v7396_v8 = vpack.c.bf16 %v7361_v15, %v7360_v35  ;;  %v7393_v15 = vld [vmem:[#allocation3 + $0x12e] sm:$0xff]  ;;  %v7411_v35 = vpack.c.bf16 %v7391_v41, %v7390_v62 }
 0x5d4   : > { %10647 = vmatmul.mubr.msk.bf16.gmra.mrb[4].mxu1 %vm16225_vm15, %v7061_v56  ;;  %vm16235_vm15 = vmmov %vm16110_vm0  ;;  %v7397_v56 = vpack.c.bf16 %v7363_v31, %v7362_v34  ;;  %v7394_v34 = vld [vmem:[#allocation3 + $0x136] sm:$0xff]  ;;  %v7395_v31 = vld [vmem:[#allocation3 + $0x13e] sm:$0xff] }
 0x5d5   : > { %10650 = vmatprep.mubr.msk.bf16.mxu1 %vm16226_vm9, %v7062_v47  ;;  %vm16236_vm9 = vmmov %vm16110_vm0  ;;  %v7398_v47 = vpack.c.bf16 %v7365_v4, %v7364_v48  ;;  %v7413_v4 = vpack.c.bf16 %v7395_v31, %v7394_v34 }
 0x5dc   : > { %10651 = vmatmul.mubr.msk.bf16.gmra.mrb[8].mxu1 %vm16227_vm3, %v7063_v42  ;;  %vm16237_vm3 = vmmov %vm16110_vm0  ;;  %v7399_v42 = vpack.c.bf16 %v7367_v43, %v7366_v5 }
 0x5dd   : > { %10654 = vmatprep.mubr.msk.bf16.mxu1 %vm16228_vm10, %v7064_v26  ;;  %vm16238_vm10 = vmmov %vm16110_vm0  ;;  %v7400_v26 = vpack.c.bf16 %v7369_v51, %v7368_v53 }
 0x5e4   : > { %10655 = vmatmul.mubr.msk.bf16.gmra.mrb[12].mxu1 %vm16229_vm8, %v7065_v9  ;;  %vm16239_vm8 = vmmov %vm16110_vm0  ;;  %v7401_v9 = vpack.c.bf16 %v7371_v10, %v7370_v58 }
 0x5e5   : > { %10658 = vmatprep.mubr.msk.bf16.mxu1 %vm16230_vm5, %v7066_v57  ;;  %vm16240_vm5 = vmmov %vm16110_vm0  ;;  %v7402_v57 = vpack.c.bf16 %v7373_v1, %v7372_v20 }
 0x5ec   : > { %10659 = vmatmul.mubr.msk.bf16.gmra.mrb[16].mxu1 %vm16231_vm13, %v7067_v25  ;;  %vm16241_vm13 = vmmov %vm16110_vm0  ;;  %v7403_v25 = vpack.c.bf16 %v7375_v28, %v7374_v17 }
 0x5ed   : > { %10662 = vmatprep.mubr.msk.bf16.mxu1 %vm16110_vm0, %v7068_v59  ;;  %v7404_v59 = vpack.c.bf16 %v7377_v46, %v7376_v32 }
 0x5f4   : > { %10663 = vmatmul.mubr.msk.bf16.gmra.mrb[20].mxu1 %vm16232_vm11, %v7069_v19  ;;  %vm16242_vm11 = vmmov %vm16110_vm0  ;;  %v7405_v19 = vpack.c.bf16 %v7379_v27, %v7378_v61 }
 0x5f5   : > { %10666 = vmatprep.mubr.msk.bf16.mxu1 %vm16233_vm1, %v7070_v44  ;;  %vm16243_vm1 = vmmov %vm16110_vm0  ;;  %v7406_v44 = vpack.c.bf16 %v7381_v14, %v7380_v0 }
 0x5fc   : > { %10667 = vmatmul.mubr.msk.bf16.gmra.mrb[24].mxu1 %vm16234_vm6, %v7071_v63  ;;  %vm16244_vm6 = vmmov %vm16110_vm0  ;;  %v7407_v63 = vpack.c.bf16 %v7383_v13, %v7382_v12 }
 0x5fd   : > { %10670 = vmatprep.mubr.msk.bf16.mxu1 %vm16235_vm15, %v7072_v29  ;;  %vm16245_vm15 = vmmov %vm16110_vm0  ;;  %v7408_v29 = vpack.c.bf16 %v7385_v40, %v7384_v33 }
 0x604   : > { %10671 = vmatmul.mubr.msk.bf16.gmra.mrb[28].mxu1 %vm16236_vm9, %v7073_v24  ;;  %vm16246_vm9 = vmmov %vm16110_vm0  ;;  %v7388_v24 = vld [vmem:[#allocation3 + $0x106] sm:$0xff] }
 0x605   : > { %10674 = vmatprep.mubr.msk.bf16.mxu1 %vm16237_vm3, %v7074_v38  ;;  %vm16247_vm3 = vmmov %vm16110_vm0  ;;  %v7410_v38 = vpack.c.bf16 %v7389_v7, %v7388_v24 }
 0x60c   : > { %10675 = vmatmul.mubr.msk.bf16.gmra.mrb[32].mxu1 %vm16238_vm10, %v7075_v60  ;;  %vm16248_vm10 = vmmov %vm16110_vm0  ;;  %v7392_v60 = vld [vmem:[#allocation3 + $0x126] sm:$0xff] }
 0x60d   : > { %10682 = vmatprep.mubr.msk.bf16.mxu1 %vm16239_vm8, %v7396_v8  ;;  %vm16249_vm8 = vmmov %vm16110_vm0  ;;  %v7412_v8 = vpack.c.bf16 %v7393_v15, %v7392_v60 }
 0x614   : > { %10683 = vmatmul.mubr.msk.bf16.vlgmr.msra.gmra.mrb[0].mxu1 %vm16240_vm5, %v7397_v56  ;;  %vm16250_vm5 = vmmov %vm16110_vm0  ;;  %v14594_v56 = vld [vmem:[%s15557_s4] ss:$0 sm:$0xff] }
 0x615   : > { %10686 = vmatprep.mubr.msk.bf16.mxu1 %vm16241_vm13, %v7398_v47  ;;  %vm16251_vm13 = vmmov %vm16110_vm0 }
 0x61c   : > { %10687 = vmatmul.mubr.msk.bf16.gmra.mrb[4].mxu1 %vm16110_vm0, %v7399_v42 }
 0x61d   : > { %10690 = vmatprep.mubr.msk.bf16.mxu1 %vm16242_vm11, %v7400_v26  ;;  %vm16252_vm11 = vmmov %vm16110_vm0 }
 0x624   : > { %10691 = vmatmul.mubr.msk.bf16.gmra.mrb[8].mxu1 %vm16243_vm1, %v7401_v9  ;;  %vm16253_vm1 = vmmov %vm16110_vm0 }
 0x625   : > { %10694 = vmatprep.mubr.msk.bf16.mxu1 %vm16244_vm6, %v7402_v57  ;;  %vm16254_vm6 = vmmov %vm16110_vm0 }
 0x62c   : > { %10695 = vmatmul.mubr.msk.bf16.gmra.mrb[12].mxu1 %vm16245_vm15, %v7403_v25 }
 0x62d   : > { %10698 = vmatprep.mubr.msk.bf16.mxu1 %vm16246_vm9, %v7404_v59 }
 0x634   : > { %10699 = vmatmul.mubr.msk.bf16.gmra.mrb[16].mxu1 %vm16247_vm3, %v7405_v19 }
 0x635   : > { %10702 = vmatprep.mubr.msk.bf16.mxu1 %vm16248_vm10, %v7406_v44  ;;  %vm16261_vm10 = vcmask 523264  }
 0x63c   : > { %10703 = vmatmul.mubr.msk.bf16.gmra.mrb[20].mxu1 %vm16249_vm8, %v7407_v63  ;;  %vm16262_vm8 = vmmov %vm16261_vm10 }
 0x63d   : > { %10706 = vmatprep.mubr.msk.bf16.mxu1 %vm16250_vm5, %v7408_v29 }
 0x644   : > { %10707 = vmatmul.mubr.msk.bf16.gmra.mrb[24].mxu1 %vm16251_vm13, %v7409_v49  ;;  %vm16265_vm13 = vmmov %vm16262_vm8 }
 0x645   : > { %10710 = vmatprep.mubr.msk.bf16.mxu1 %vm16110_vm0, %v7410_v38  ;;  %vm16266_vm0 = vmmov %vm16262_vm8 }
 0x64c   : > { %10711 = vmatmul.mubr.msk.bf16.gmra.mrb[28].mxu1 %vm16252_vm11, %v7411_v35  ;;  %vm16267_vm11 = vmmov %vm16266_vm0 }
 0x64d   : > { %10714 = vmatprep.mubr.msk.bf16.mxu1 %vm16253_vm1, %v7412_v8  ;;  %vm16268_vm1 = vmmov %vm16266_vm0 }
 0x654   : > { %10715 = vmatmul.mubr.msk.bf16.gmra.mrb[32].mxu1 %vm16254_vm6, %v7413_v4  ;;  %vm16271_vm6 = vmmov %vm16266_vm0 }
 0x6e7   : > { %v10684_v48 = vpop.f32.mrb[0].mxu1 }
 0x6e8   : > { %v14597_v47 = vadd.f32 %v10684_v48, %v14594_v56  ;;  %v7519_v5 = vpop.f32.mrb[1].mxu1 }
 0x6e9   : > { %v14600_v43 = vadd.f32 %v14594_v56, %v7519_v5  ;;  %v10685_v51 = vpop.f32.mrb[2].mxu1 }
 0x6ea   : > { %v9447_v42 = vmul.f32 -1.442695, %v14597_v47  ;;  %v14604_v53 = vadd.f32 %v10685_v51, %v14594_v56  ;;  %v7522_v26 = vpop.f32.mrb[3].mxu1 }
 0x6eb   : > { %v9445_v58 = vmul.f32 -1.442695, %v14600_v43  ;;  %v14608_v10 = vadd.f32 %v14594_v56, %v7522_v26 }
 0x6ec   : > { %11687 = vpow2.f32 %v9447_v42  ;;  %v9448_v1 = vmul.f32 -1.442695, %v14604_v53 }
 0x6ed   : > { %11689 = vpow2.f32 %v9445_v58  ;;  %v9446_v9 = vmul.f32 -1.442695, %v14608_v10 }
 0x6ee   : > { %11691 = vpow2.f32 %v9448_v1 }
 0x6ef   : > { %11693 = vpow2.f32 %v9446_v9  ;;  %v10688_v20 = vpop.f32.mrb[4].mxu1 }
 0x6f0   : > { %v14613_v57 = vadd.f32 %v10688_v20, %v14594_v56  ;;  %v7535_v17 = vpop.f32.mrb[5].mxu1 }
 0x6f1   : > { %v14616_v28 = vadd.f32 %v14594_v56, %v7535_v17  ;;  %v10689_v46 = vpop.f32.mrb[6].mxu1 }
 0x6f2   : > { %v9451_v25 = vmul.f32 -1.442695, %v14613_v57  ;;  %v14620_v32 = vadd.f32 %v10689_v46, %v14594_v56  ;;  %v7538_v59 = vpop.f32.mrb[7].mxu1 }
 0x6f3   : > { %v9449_v61 = vmul.f32 -1.442695, %v14616_v28  ;;  %v14624_v27 = vadd.f32 %v14594_v56, %v7538_v59 }
 0x6f4   : > { %11695 = vpow2.f32 %v9451_v25  ;;  %v9452_v14 = vmul.f32 -1.442695, %v14620_v32 }
 0x6f5   : > { %11697 = vpow2.f32 %v9449_v61  ;;  %v9450_v19 = vmul.f32 -1.442695, %v14624_v27 }
 0x6f6   : > { %v11688_v0 = vpop.eup %11687  ;;  %11699 = vpow2.f32 %v9452_v14 }
 0x6f7   : > { %v11690_v44 = vpop.eup %11689  ;;  %v7808_v12 = vadd.f32 1.0, %v11688_v0  ;;  %11701 = vpow2.f32 %v9450_v19  ;;  %v10692_v13 = vpop.f32.mrb[8].mxu1 }
 0x6f8   : > { %v11692_v40 = vpop.eup %11691  ;;  %v7806_v63 = vadd.f32 1.0, %v11690_v44  ;;  %v14629_v33 = vadd.f32 %v10692_v13, %v14594_v56  ;;  %v7551_v29 = vpop.f32.mrb[9].mxu1 }
 0x6f9   : > { %v11694_v2 = vpop.eup %11693  ;;  %11703 = vrcp.f32 %v7808_v12  ;;  %v7809_v23 = vadd.f32 1.0, %v11692_v40  ;;  %v14632_v7 = vadd.f32 %v14594_v56, %v7551_v29  ;;  %v10693_v49 = vpop.f32.mrb[10].mxu1 }
 0x6fa   : > { %11705 = vrcp.f32 %v7806_v63  ;;  %v7807_v24 = vadd.f32 1.0, %v11694_v2  ;;  %v9455_v38 = vmul.f32 -1.442695, %v14629_v33  ;;  %v14636_v62 = vadd.f32 %v10693_v49, %v14594_v56  ;;  %v7554_v41 = vpop.f32.mrb[11].mxu1  ;;  %v16255_v63 = vld [vmem:[#allocation61_spill] sm:$0xff]  ;;  %v16257_v49 = vld [vmem:[#allocation63_spill] sm:$0xff] }
 0x6fb   : > { %11707 = vrcp.f32 %v7809_v23  ;;  %v9453_v60 = vmul.f32 -1.442695, %v14632_v7  ;;  %v14640_v15 = vadd.f32 %v14594_v56, %v7554_v41  ;;  %vm16256_vm15 = vnez %v16255_v63 }
 0x6fc   : > { %11709 = vrcp.f32 %v7807_v24  ;;  %v9456_v35 = vmul.f32 -1.442695, %v14636_v62  ;;  %vm16258_vm9 = vnez %v16257_v49 }
 0x6fd   : > { %11711 = vpow2.f32 %v9455_v38  ;;  %v9454_v8 = vmul.f32 -1.442695, %v14640_v15 }
 0x6fe   : > { %v11696_v34 = vpop.eup %11695  ;;  %11713 = vpow2.f32 %v9453_v60 }
 0x6ff   : > { %v11698_v31 = vpop.eup %11697  ;;  %v7812_v4 = vadd.f32 1.0, %v11696_v34  ;;  %11715 = vpow2.f32 %v9456_v35  ;;  %v10696_v48 = vpop.f32.mrb[12].mxu1  ;;  %v16259_v35 = vld [vmem:[#allocation64_spill] sm:$0xff] }
 0x700   : > { %v11700_v5 = vpop.eup %11699  ;;  %v7810_v51 = vadd.f32 1.0, %v11698_v31  ;;  %11717 = vpow2.f32 %v9454_v8  ;;  %v14645_v42 = vadd.f32 %v10696_v48, %v14594_v56  ;;  %v7567_v26 = vpop.f32.mrb[13].mxu1  ;;  %vm16260_vm3 = vnez %v16259_v35 }
 0x701   : > { %v11702_v58 = vpop.eup %11701  ;;  %11719 = vrcp.f32 %v7812_v4  ;;  %v7813_v1 = vadd.f32 1.0, %v11700_v5  ;;  %v14648_v9 = vadd.f32 %v14594_v56, %v7567_v26  ;;  %v10697_v20 = vpop.f32.mrb[14].mxu1 }
 0x702   : > { %11721 = vrcp.f32 %v7810_v51  ;;  %v7811_v17 = vadd.f32 1.0, %v11702_v58  ;;  %v9459_v46 = vmul.f32 -1.442695, %v14645_v42  ;;  %v7570_v25 = vpop.f32.mrb[15].mxu1  ;;  %v14656_v0 = vadd.f32 %v10697_v20, %v14594_v56  ;;  %v16263_v51 = vld [vmem:[#allocation65_spill] sm:$0xff] }
 0x703   : > { %v11704_v59 = vpop.eup %11703  ;;  %11723 = vrcp.f32 %v7813_v1  ;;  %v9457_v61 = vmul.f32 -1.442695, %v14648_v9  ;;  %v14662_v13 = vadd.f32 %v14594_v56, %v7570_v25  ;;  %vm16264_vm5 = vnez %v16263_v51 }
 0x704   : > { %v11706_v14 = vpop.eup %11705  ;;  %v14653_v19 = vmul.f32 %v11704_v59, %v14597_v47  ;;  %11725 = vrcp.f32 %v7811_v17 }
 0x705   : > { %v11708_v44 = vpop.eup %11707  ;;  %v14659_v12 = vmul.f32 %v11706_v14, %v14600_v43  ;;  %11727 = vpow2.f32 %v9459_v46  ;;  %v9458_v26 = vmul.f32 -1.442695, %v14662_v13 }
 0x706   : > { %v11710_v40 = vpop.eup %11709  ;;  %v7952_v29 = vsel %vm16256_vm15, %v14653_v19, 0.0  ;;  %v14668_v47 = vmul.f32 %v11708_v44, %v14604_v53  ;;  %11729 = vpow2.f32 %v9457_v61  ;;  %v9460_v53 = vmul.f32 -1.442695, %v14656_v0  ;;  %vm16273_vm15 = vmmov %vm16266_vm0 }
 0x707   : > { %v11712_v2 = vpop.eup %11711  ;;  %v8065_v23 = vmul.f32 %v7952_v29, %v7952_v29  ;;  %v7950_v43 = vsel %vm16258_vm9, %v14659_v12, 0.0  ;;  %v14674_v24 = vmul.f32 %v11710_v40, %v14608_v10  ;;  %v10700_v38 = vpop.f32.mrb[16].mxu1  ;;  %v7989_v48 = vsel %vm16261_vm10, %v7952_v29, 0.0 }
 0x708   : > { %v11714_v41 = vpop.eup %11713  ;;  %v8063_v60 = vmul.f32 %v7950_v43, %v7950_v43  ;;  %v7953_v8 = vsel %vm16260_vm3, %v14668_v47, 0.0  ;;  %v7816_v34 = vadd.f32 1.0, %v11712_v2  ;;  %v7583_v31 = vpop.f32.mrb[17].mxu1  ;;  %v7986_v5 = vsel %vm16262_vm8, %v7950_v43, 0.0  ;;  %vm16277_vm3 = vmmov %vm16266_vm0 }
 0x709   : > { %v11716_v4 = vpop.eup %11715  ;;  %v7951_v10 = vsel %vm16264_vm5, %v14674_v24, 0.0  ;;  %v14686_v58 = vpop.f32.mrb[18].mxu1  ;;  %v8102_v20 = vsel %vm16265_vm13, %v8065_v23, 0.0  ;;  %v8066_v61 = vmul.f32 %v7953_v8, %v7953_v8  ;;  %v7814_v44 = vadd.f32 1.0, %v11714_v41  ;;  %vm16284_vm5 = vmmov %vm16266_vm0 }
 0x70a   : > { %v11718_v1 = vpop.eup %11717  ;;  %v7987_v17 = vsel %vm16266_vm0, %v7951_v10, 0.0  ;;  %v8064_v46 = vmul.f32 %v7951_v10, %v7951_v10  ;;  %11731 = vrcp.f32 %v7816_v34  ;;  %v14690_v25 = vpop.f32.mrb[19].mxu1  ;;  %v7817_v40 = vadd.f32 1.0, %v11716_v4  ;;  %vm16286_vm13 = vmmov %vm16266_vm0 }
 0x70b   : > { %v11720_v59 = vpop.eup %11719  ;;  %v7988_v14 = vadd.f32 %v7987_v17, %v7986_v5  ;;  %v8099_v29 = vsel %vm16267_vm11, %v8063_v60, 0.0  ;;  %11733 = vpow2.f32 %v9460_v53  ;;  %v7991_v41 = vsel %vm16271_vm6, %v7953_v8, 0.0  ;;  %v16274_v53 = vld [vmem:[#allocation66_spill] sm:$0xff]  ;;  %vm16287_vm11 = vmmov %vm16266_vm0 }
 0x70c   : > { %v11722_v63 = vpop.eup %11721  ;;  %v8100_v2 = vsel %vm16268_vm1, %v8064_v46, 0.0  ;;  %v14695_v49 = vmul.f32 %v11720_v59, %v14613_v57  ;;  %11735 = vrcp.f32 %v7814_v44  ;;  %v7815_v60 = vadd.f32 1.0, %v11718_v1  ;;  %v16278_v44 = vld [vmem:[#allocation68_spill] sm:$0xff]  ;;  %vm16288_vm1 = vmmov %vm16266_vm0 }
 0x70d   : > { %v11724_v23 = vpop.eup %11723  ;;  %v7990_v43 = vadd.f32 %v7989_v48, %v7988_v14  ;;  %v8101_v35 = vadd.f32 %v8100_v2, %v8099_v29  ;;  %v14698_v34 = vmul.f32 %v11722_v63, %v14616_v28  ;;  %11737 = vrcp.f32 %v7817_v40  ;;  %vm16289_vm6 = vmmov %vm16266_vm0 }
 0x70e   : > { %16269 = vst [vmem:[#allocation33_spill] sm:$0xff] %v14695_v49  ;;  %v11726_v51 = vpop.eup %11725  ;;  %v14702_v4 = vmul.f32 %v11724_v23, %v14620_v32  ;;  %v8104_v57 = vsel %vm16273_vm15, %v8066_v61, 0.0  ;;  %vm16275_vm9 = vnez %v16274_v53  ;;  %v14715_v1 = vadd.f32 %v10700_v38, %v14594_v56 }
 0x70f   : > { %16270 = vst [vmem:[#allocation34_spill] sm:$0xff] %v14698_v34  ;;  %v11728_v5 = vpop.eup %11727  ;;  %v8103_v10 = vadd.f32 %v8102_v20, %v8101_v35  ;;  %v7956_v48 = vsel %vm16275_vm9, %v14695_v49, 0.0  ;;  %v7954_v17 = vsel %vm13693_vm12, %v14698_v34, 0.0  ;;  %v14711_v46 = vpop.f32.mrb[20].mxu1  ;;  %v7992_v59 = vadd.f32 %v7991_v41, %v7990_v43  ;;  %vm16280_vm12 = vmmov %vm16266_vm0 }
 0x710   : > { %16272 = vst [vmem:[#allocation24_spill] sm:$0xff] %v14702_v4  ;;  %v11730_v8 = vpop.eup %11729  ;;  %v7993_v32 = vsel %vm16277_vm3, %v7954_v17, 0.0  ;;  %v8067_v14 = vmul.f32 %v7954_v17, %v7954_v17  ;;  %v14717_v61 = vpop.f32.mrb[21].mxu1  ;;  %vm16279_vm10 = vnez %v16278_v44  ;;  %v14726_v23 = vmul.f32 %v11726_v51, %v14624_v27  ;;  %vm16296_vm3 = vmmov %vm16266_vm0 }
 0x711   : > { %v8105_v20 = vadd.f32 %v8104_v57, %v8103_v10  ;;  %v7957_v40 = vsel %vm16279_vm10, %v14702_v4, 0.0  ;;  %v14722_v63 = vpop.f32.mrb[22].mxu1  ;;  %v7994_v29 = vadd.f32 %v7993_v32, %v7992_v59  ;;  %11739 = vrcp.f32 %v7815_v60  ;;  %v16282_v10 = vld [vmem:[#allocation69_spill] sm:$0xff]  ;;  %v16291_v4 = vld [vmem:[#allocation14_spill] sm:$0xff]  ;;  %vm16298_vm10 = vmmov %vm16266_vm0 }
 0x712   : > { %v8106_v2 = vsel %vm16280_vm12, %v8067_v14, 0.0  ;;  %16281 = vst [vmem:[#allocation35_spill] sm:$0xff] %v14726_v23  ;;  %v14728_v43 = vpop.f32.mrb[23].mxu1  ;;  %v8069_v38 = vmul.f32 %v7956_v48, %v7956_v48  ;;  %v7820_v41 = vadd.f32 1.0, %v11728_v5  ;;  %v7818_v53 = vadd.f32 1.0, %v11730_v8 }
 0x713   : > { %v8107_v35 = vadd.f32 %v8106_v2, %v8105_v20  ;;  %vm16283_vm8 = vnez %v16282_v10  ;;  %11741 = vpow2.f32 %v9458_v26  ;;  %v9463_v17 = vmul.f32 -1.442695, %v14715_v1 }
 0x714   : > { %v11732_v57 = vpop.eup %11731  ;;  %v7955_v28 = vsel %vm16283_vm8, %v14726_v23, 0.0  ;;  %v14735_v59 = vadd.f32 %v14594_v56, %v7583_v31  ;;  %v8070_v27 = vmul.f32 %v7957_v40, %v7957_v40  ;;  %11743 = vrcp.f32 %v7818_v53 }
 0x715   : > { %v7995_v51 = vsel %vm16284_vm5, %v7955_v28, 0.0  ;;  %v8068_v60 = vmul.f32 %v7955_v28, %v7955_v28  ;;  %v14739_v32 = vmul.f32 %v11732_v57, %v14629_v33  ;;  %v11734_v5 = vpop.eup %11733  ;;  %v14744_v26 = vadd.f32 %v14686_v58, %v14594_v56  ;;  %vm16303_vm5 = vmmov %vm16266_vm0 }
 0x716   : > { %v7996_v8 = vadd.f32 %v7995_v51, %v7994_v29  ;;  %v9461_v14 = vmul.f32 -1.442695, %v14735_v59  ;;  %v11736_v20 = vpop.eup %11735  ;;  %v7997_v31 = vsel %vm16286_vm13, %v7956_v48, 0.0  ;;  %v8110_v44 = vsel %vm16266_vm0, %v8069_v38, 0.0  ;;  %vm16305_vm13 = vmmov %vm16266_vm0 }
 0x717   : > { %16285 = vst [vmem:[#allocation37_spill] sm:$0xff] %v14739_v32  ;;  %v8108_v2 = vsel %vm16287_vm11, %v8068_v60, 0.0  ;;  %11745 = vpow2.f32 %v9463_v17  ;;  %v14749_v10 = vpop.f32.mrb[24].mxu1  ;;  %v11738_v33 = vpop.eup %11737  ;;  %v7821_v53 = vadd.f32 1.0, %v11734_v5  ;;  %v7999_v58 = vsel %vm16288_vm1, %v7957_v40, 0.0  ;;  %v16293_v40 = vld [vmem:[#allocation19_spill] sm:$0xff]  ;;  %vm16308_vm1 = vmmov %vm16266_vm0 }
 0x718   : > { %v7998_v57 = vadd.f32 %v7997_v31, %v7996_v8  ;;  %v8109_v29 = vadd.f32 %v8108_v2, %v8107_v35  ;;  %11747 = vrcp.f32 %v7820_v41  ;;  %v14751_v28 = vpop.f32.mrb[25].mxu1  ;;  %v8112_v51 = vsel %vm16289_vm6, %v8070_v27, 0.0  ;;  %vm16309_vm6 = vmmov %vm16266_vm0 }
 0x719   : > { %v14756_v48 = vmul.f32 %v11736_v20, %v14632_v7  ;;  %v9464_v38 = vmul.f32 -1.442695, %v14744_v26  ;;  %v14759_v60 = vpop.f32.mrb[26].mxu1  ;;  %vm16292_vm15 = vnez %v16291_v4  ;;  %11749 = vpow2.f32 %v9461_v14 }
 0x71a   : > { %v8111_v17 = vadd.f32 %v8110_v44, %v8109_v29  ;;  %v7960_v35 = vsel %vm16292_vm15, %v14739_v32, 0.0  ;;  %v8000_v41 = vadd.f32 %v7999_v58, %v7998_v57  ;;  %v14764_v5 = vpop.f32.mrb[27].mxu1  ;;  %vm16294_vm9 = vnez %v16293_v40  ;;  %vm16311_vm15 = vmmov %vm16266_vm0 }
 0x71b   : > { %16290 = vst [vmem:[#allocation25_spill] sm:$0xff] %v14756_v48  ;;  %v7958_v27 = vsel %vm16294_vm9, %v14756_v48, 0.0  ;;  %v14770_v7 = vmul.f32 %v11738_v33, %v14636_v62  ;;  %11751 = vpow2.f32 %v9464_v38  ;;  %v14774_v8 = vadd.f32 %v14594_v56, %v14690_v25  ;;  %v11740_v20 = vpop.eup %11739  ;;  %v16299_v25 = vld [vmem:[#allocation12_spill] sm:$0xff]  ;;  %vm16312_vm9 = vmmov %vm16266_vm0 }
 0x71c   : > { %v8001_v4 = vsel %vm16296_vm3, %v7958_v27, 0.0  ;;  %v8071_v31 = vmul.f32 %v7958_v27, %v7958_v27  ;;  %v8113_v44 = vadd.f32 %v8112_v51, %v8111_v17  ;;  %11753 = vrcp.f32 %v7821_v53  ;;  %v16301_v53 = vld [vmem:[#allocation16_spill] sm:$0xff] }
 0x71d   : > { %16295 = vst [vmem:[#allocation10_spill] sm:$0xff] %v14770_v7  ;;  %v8002_v14 = vadd.f32 %v8001_v4, %v8000_v41  ;;  %v14778_v2 = vmul.f32 %v11740_v20, %v14640_v15  ;;  %v9462_v57 = vmul.f32 -1.442695, %v14774_v8  ;;  %v11742_v29 = vpop.eup %11741  ;;  %v8073_v33 = vmul.f32 %v7960_v35, %v7960_v35 }
 0x71e   : > { %v8114_v62 = vsel %vm16298_vm10, %v8071_v31, 0.0  ;;  %vm16300_vm12 = vnez %v16299_v25  ;;  %v7819_v40 = vadd.f32 1.0, %v11742_v29  ;;  %v11744_v51 = vpop.eup %11743  ;;  %vm16302_vm8 = vnez %v16301_v53  ;;  %vm16316_vm10 = vmmov %vm16266_vm0 }
 0x71f   : > { %16297 = vst [vmem:[#allocation58_spill] sm:$0xff] %v14778_v2  ;;  %v8115_v58 = vadd.f32 %v8114_v62, %v8113_v44  ;;  %v7959_v38 = vsel %vm16300_vm12, %v14778_v2, 0.0  ;;  %v14785_v32 = vpop.f32.mrb[28].mxu1  ;;  %v7961_v15 = vsel %vm16302_vm8, %v14770_v7, 0.0  ;;  %11755 = vpow2.f32 %v9462_v57 }
 0x720   : > { %v8003_v17 = vsel %vm16303_vm5, %v7959_v38, 0.0  ;;  %v8072_v41 = vmul.f32 %v7959_v38, %v7959_v38  ;;  %v14791_v27 = vpop.f32.mrb[29].mxu1  ;;  %v14794_v31 = vmul.f32 %v11744_v51, %v14648_v9  ;;  %11757 = vrcp.f32 %v7819_v40  ;;  %vm16322_vm5 = vmmov %vm16266_vm0 }
 0x721   : > { %v11746_v20 = vpop.eup %11745  ;;  %v8004_v4 = vadd.f32 %v8003_v17, %v8002_v14  ;;  %v14798_v44 = vadd.f32 %v14711_v46, %v14594_v56  ;;  %v14800_v29 = vpop.f32.mrb[30].mxu1  ;;  %v8005_v25 = vsel %vm16305_vm13, %v7960_v35, 0.0  ;;  %v14808_v9 = vadd.f32 %v14594_v56, %v14717_v61  ;;  %v16306_v46 = vld [vmem:[#allocation17_spill] sm:$0xff]  ;;  %vm16323_vm13 = vmmov %vm16266_vm0 }
 0x722   : > { %16304 = vst [vmem:[#allocation36_spill] sm:$0xff] %v14794_v31  ;;  %v11748_v62 = vpop.eup %11747  ;;  %v8116_v38 = vsel %vm16266_vm0, %v8072_v41, 0.0  ;;  %v14804_v57 = vpop.f32.mrb[31].mxu1  ;;  %v7824_v14 = vadd.f32 1.0, %v11746_v20  ;;  %v8074_v51 = vmul.f32 %v7961_v15, %v7961_v15  ;;  %vm16307_vm11 = vnez %v16306_v46 }
 0x723   : > { %v8006_v53 = vadd.f32 %v8005_v25, %v8004_v4  ;;  %v8117_v7 = vadd.f32 %v8116_v38, %v8115_v58  ;;  %v11750_v40 = vpop.eup %11749  ;;  %v7962_v17 = vsel %vm16307_vm11, %v14794_v31, 0.0  ;;  %v14815_v35 = vadd.f32 %v14722_v63, %v14594_v56  ;;  %vm16324_vm11 = vmmov %vm16266_vm0 }
 0x724   : > { %v8118_v2 = vsel %vm16308_vm1, %v8073_v33, 0.0  ;;  %v8007_v58 = vsel %vm16309_vm6, %v7961_v15, 0.0  ;;  %v14820_v20 = vmul.f32 %v11748_v62, %v14645_v42  ;;  %v9467_v61 = vmul.f32 -1.442695, %v14798_v44  ;;  %vm16325_vm1 = vmmov %vm16266_vm0 }
 0x725   : > { %v11752_v41 = vpop.eup %11751  ;;  %v8119_v25 = vadd.f32 %v8118_v2, %v8117_v7  ;;  %v8008_v38 = vadd.f32 %v8007_v58, %v8006_v53  ;;  %v7822_v48 = vadd.f32 1.0, %v11750_v40  ;;  %v8009_v31 = vsel %vm16311_vm15, %v7962_v17, 0.0  ;;  %v16313_v2 = vld [vmem:[#allocation20_spill] sm:$0xff]  ;;  %vm16327_vm6 = vmmov %vm16266_vm0 }
 0x726   : > { %16310 = vst [vmem:[#allocation38_spill] sm:$0xff] %v14820_v20  ;;  %v11754_v4 = vpop.eup %11753  ;;  %v7825_v46 = vadd.f32 1.0, %v11752_v41  ;;  %v8075_v49 = vmul.f32 %v7962_v17, %v7962_v17  ;;  %11759 = vrcp.f32 %v7824_v14  ;;  %v9465_v63 = vmul.f32 -1.442695, %v14808_v9 }
 0x727   : > { %v14825_v23 = vpop.f32.mrb[32].mxu1  ;;  %v8120_v33 = vsel %vm16312_vm9, %v8074_v51, 0.0  ;;  %11761 = vrcp.f32 %v7822_v48  ;;  %v9468_v42 = vmul.f32 -1.442695, %v14815_v35  ;;  %v14831_v15 = vadd.f32 %v14594_v56, %v14728_v43  ;;  %vm16331_vm9 = vmmov %vm16266_vm0 }
 0x728   : > { %v14833_v7 = vpop.f32.mrb[33].mxu1  ;;  %vm16314_vm3 = vnez %v16313_v2  ;;  %v14839_v53 = vmul.f32 %v11754_v4, %v14656_v0  ;;  %11763 = vrcp.f32 %v7825_v46  ;;  %v14843_v14 = vadd.f32 %v14594_v56, %v14751_v28  ;;  %v16320_v46 = vld [vmem:[#allocation23_spill] sm:$0xff] }
 0x729   : > { %v7964_v62 = vsel %vm16314_vm3, %v14820_v20, 0.0  ;;  %v14845_v48 = vpop.f32.mrb[34].mxu1  ;;  %v11756_v40 = vpop.eup %11755  ;;  %v8010_v51 = vadd.f32 %v8009_v31, %v8008_v38  ;;  %v8121_v43 = vadd.f32 %v8120_v33, %v8119_v25  ;;  %11765 = vpow2.f32 %v9467_v61  ;;  %v16318_v25 = vld [vmem:[#allocation13_spill] sm:$0xff]  ;;  %vm16332_vm3 = vmmov %vm16266_vm0 }
 0x72a   : > { %16315 = vst [vmem:[#allocation27_spill] sm:$0xff] %v14839_v53  ;;  %v9466_v17 = vmul.f32 -1.442695, %v14831_v15  ;;  %v14848_v41 = vpop.f32.mrb[35].mxu1  ;;  %v11758_v58 = vpop.eup %11757  ;;  %v8122_v2 = vsel %vm16316_vm10, %v8075_v49, 0.0  ;;  %v7823_v0 = vadd.f32 1.0, %v11756_v40  ;;  %11767 = vpow2.f32 %v9465_v63 }
 0x72b   : > { %v14853_v4 = vadd.f32 %v14594_v56, %v14764_v5  ;;  %v14856_v28 = vmul.f32 %v11758_v58, %v14662_v13  ;;  %11769 = vpow2.f32 %v9468_v42  ;;  %v14860_v31 = vadd.f32 %v14749_v10, %v14594_v56 }
 0x72c   : > { %v9469_v61 = vmul.f32 -1.442695, %v14843_v14  ;;  %vm16319_vm12 = vnez %v16318_v25  ;;  %11771 = vrcp.f32 %v7823_v0  ;;  %v8123_v38 = vadd.f32 %v8122_v2, %v8121_v43 }
 0x72d   : > { %16317 = vst [vmem:[#allocation39_spill] sm:$0xff] %v14856_v28  ;;  %v7965_v49 = vsel %vm16319_vm12, %v14839_v53, 0.0  ;;  %vm16321_vm8 = vnez %v16320_v46  ;;  %11773 = vpow2.f32 %v9466_v17  ;;  %v14871_v13 = vadd.f32 %v14759_v60, %v14594_v56 }
 0x72e   : > { %v7963_v5 = vsel %vm16321_vm8, %v14856_v28, 0.0  ;;  %v8077_v63 = vmul.f32 %v7964_v62, %v7964_v62  ;;  %v9470_v42 = vmul.f32 -1.442695, %v14853_v4  ;;  %v8078_v40 = vmul.f32 %v7965_v49, %v7965_v49  ;;  %vm16339_vm8 = vmmov %vm16266_vm0 }
 0x72f   : > { %v8011_v10 = vsel %vm16322_vm5, %v7963_v5, 0.0  ;;  %v8076_v33 = vmul.f32 %v7963_v5, %v7963_v5  ;;  %v9471_v0 = vmul.f32 -1.442695, %v14860_v31  ;;  %11775 = vpow2.f32 %v9469_v61  ;;  %vm16340_vm5 = vmmov %vm16266_vm0 }
 0x730   : > { %v8012_v58 = vadd.f32 %v8011_v10, %v8010_v51  ;;  %v11760_v43 = vpop.eup %11759  ;;  %v8013_v2 = vsel %vm16323_vm13, %v7964_v62, 0.0  ;;  %v14880_v60 = vadd.f32 %v14594_v56, %v14791_v27  ;;  %v9472_v5 = vmul.f32 -1.442695, %v14871_v13 }
 0x731   : > { %v8124_v17 = vsel %vm16266_vm0, %v8076_v33, 0.0  ;;  %v11762_v25 = vpop.eup %11761  ;;  %v8126_v51 = vsel %vm16324_vm11, %v8077_v63, 0.0  ;;  %v8015_v10 = vsel %vm16325_vm1, %v7965_v49, 0.0  ;;  %11777 = vpow2.f32 %v9470_v42  ;;  %vm16343_vm11 = vmmov %vm16266_vm0 }
 0x732   : > { %v8014_v46 = vadd.f32 %v8013_v2, %v8012_v58  ;;  %v8125_v53 = vadd.f32 %v8124_v17, %v8123_v38  ;;  %v11764_v20 = vpop.eup %11763  ;;  %v14886_v61 = vmul.f32 %v11762_v25, %v14735_v59  ;;  %v8128_v33 = vsel %vm16327_vm6, %v8078_v40, 0.0  ;;  %v16329_v58 = vld [vmem:[#allocation31_spill] sm:$0xff]  ;;  %vm16345_vm1 = vmmov %vm16266_vm0 }
 0x733   : > { %v11766_v62 = vpop.eup %11765  ;;  %v14890_v27 = vmul.f32 %v11760_v43, %v14715_v1  ;;  %11779 = vpow2.f32 %v9471_v0  ;;  %vm16330_vm15 = vnez %v16329_v58  ;;  %v9473_v49 = vmul.f32 -1.442695, %v14880_v60  ;;  %vm16346_vm6 = vmmov %vm16266_vm0 }
 0x734   : > { %16326 = vst [vmem:[#allocation40_spill] sm:$0xff] %v14886_v61  ;;  %v8127_v28 = vadd.f32 %v8126_v51, %v8125_v53  ;;  %v11768_v38 = vpop.eup %11767  ;;  %v7966_v2 = vsel %vm16330_vm15, %v14886_v61, 0.0  ;;  %v8016_v63 = vadd.f32 %v8015_v10, %v8014_v46  ;;  %v7828_v17 = vadd.f32 1.0, %v11766_v62  ;;  %v16334_v10 = vld [vmem:[#allocation15_spill] sm:$0xff] }
 0x735   : > { %16328 = vst [vmem:[#allocation28_spill] sm:$0xff] %v14890_v27  ;;  %v11770_v59 = vpop.eup %11769  ;;  %v8017_v42 = vsel %vm16331_vm9, %v7966_v2, 0.0  ;;  %v8079_v25 = vmul.f32 %v7966_v2, %v7966_v2  ;;  %11781 = vpow2.f32 %v9472_v5  ;;  %v14899_v1 = vadd.f32 %v14785_v32, %v14594_v56  ;;  %v16337_v2 = vld [vmem:[#allocation18_spill] sm:$0xff] }
 0x736   : > { %v8129_v34 = vadd.f32 %v8128_v33, %v8127_v28  ;;  %v11772_v53 = vpop.eup %11771  ;;  %11783 = vrcp.f32 %v7828_v17  ;;  %v7826_v46 = vadd.f32 1.0, %v11768_v38  ;;  %v7829_v51 = vadd.f32 1.0, %v11770_v59 }
 0x737   : > { %v11774_v40 = vpop.eup %11773  ;;  %v8130_v0 = vsel %vm16332_vm3, %v8079_v25, 0.0  ;;  %v14903_v43 = vmul.f32 %v11772_v53, %v14774_v8  ;;  %vm16335_vm10 = vnez %v16334_v10  ;;  %v8018_v28 = vadd.f32 %v8017_v42, %v8016_v63  ;;  %vm16352_vm3 = vmmov %vm16266_vm0 }
 0x738   : > { %v7968_v62 = vsel %vm16335_vm10, %v14890_v27, 0.0  ;;  %v7827_v5 = vadd.f32 1.0, %v11774_v40  ;;  %11785 = vpow2.f32 %v9473_v49  ;;  %v8131_v58 = vadd.f32 %v8130_v0, %v8129_v34  ;;  %vm16353_vm10 = vmmov %vm16266_vm0 }
 0x739   : > { %16333 = vst [vmem:[#allocation41_spill] sm:$0xff] %v14903_v43  ;;  %v11776_v33 = vpop.eup %11775  ;;  %v14909_v32 = vmul.f32 %v11764_v20, %v14744_v26  ;;  %vm16338_vm12 = vnez %v16337_v2  ;;  %11787 = vrcp.f32 %v7826_v46  ;;  %v8081_v63 = vmul.f32 %v7968_v62, %v7968_v62  ;;  %v16341_v26 = vld [vmem:[#allocation26_spill] sm:$0xff] }
 0x73a   : > { %v7967_v17 = vsel %vm16338_vm12, %v14903_v43, 0.0  ;;  %11789 = vrcp.f32 %v7829_v51  ;;  %v7830_v59 = vadd.f32 1.0, %v11776_v33  ;;  %vm16342_vm13 = vnez %v16341_v26  ;;  %vm16354_vm12 = vmmov %vm16266_vm0 }
 0x73b   : > { %16336 = vst [vmem:[#allocation42_spill] sm:$0xff] %v14909_v32  ;;  %v8019_v8 = vsel %vm16339_vm8, %v7967_v17, 0.0  ;;  %v8080_v38 = vmul.f32 %v7967_v17, %v7967_v17  ;;  %11791 = vrcp.f32 %v7827_v5  ;;  %v11778_v25 = vpop.eup %11777  ;;  %v7969_v20 = vsel %vm16342_vm13, %v14909_v32, 0.0  ;;  %vm16356_vm8 = vmmov %vm16266_vm0 }
 0x73c   : > { %v8020_v42 = vadd.f32 %v8019_v8, %v8018_v28  ;;  %v7831_v40 = vadd.f32 1.0, %v11778_v25  ;;  %v14921_v0 = vadd.f32 %v14594_v56, %v14804_v57  ;;  %11793 = vrcp.f32 %v7830_v59  ;;  %vm16361_vm13 = vmmov %vm16266_vm0 }
 0x73d   : > { %v8132_v49 = vsel %vm16340_vm5, %v8080_v38, 0.0  ;;  %v11780_v34 = vpop.eup %11779  ;;  %v9475_v46 = vmul.f32 -1.442695, %v14899_v1  ;;  %v8021_v10 = vsel %vm16266_vm0, %v7968_v62, 0.0  ;;  %v14927_v28 = vadd.f32 %v14800_v29, %v14594_v56  ;;  %vm16360_vm5 = vmmov %vm16266_vm0 }
 0x73e   : > { %v8133_v53 = vadd.f32 %v8132_v49, %v8131_v58  ;;  %11795 = vrcp.f32 %v7831_v40  ;;  %v8134_v33 = vsel %vm16343_vm11, %v8081_v63, 0.0  ;;  %v8082_v58 = vmul.f32 %v7969_v20, %v7969_v20 }
 0x73f   : > { %v11782_v51 = vpop.eup %11781  ;;  %v8022_v2 = vadd.f32 %v8021_v10, %v8020_v42  ;;  %v7832_v17 = vadd.f32 1.0, %v11780_v34  ;;  %v9474_v57 = vmul.f32 -1.442695, %v14921_v0  ;;  %v14933_v38 = vadd.f32 %v14594_v56, %v14833_v7 }
 0x740   : > { %v11784_v5 = vpop.eup %11783  ;;  %v8135_v8 = vadd.f32 %v8134_v33, %v8133_v53  ;;  %11797 = vpow2.f32 %v9475_v46  ;;  %v8023_v25 = vsel %vm16345_vm1, %v7969_v20, 0.0  ;;  %v7833_v49 = vadd.f32 1.0, %v11782_v51  ;;  %vm16367_vm1 = vmmov %vm16266_vm0 }
 0x741   : > { %v14936_v62 = vmul.f32 %v11784_v5, %v14798_v44  ;;  %v9476_v63 = vmul.f32 -1.442695, %v14927_v28  ;;  %v8136_v34 = vsel %vm16346_vm6, %v8082_v58, 0.0  ;;  %v8024_v53 = vadd.f32 %v8023_v25, %v8022_v2 }
 0x742   : > { %v11786_v59 = vpop.eup %11785  ;;  %11799 = vrcp.f32 %v7832_v17  ;;  %v8137_v40 = vadd.f32 %v8136_v34, %v8135_v8  ;;  %v9477_v44 = vmul.f32 -1.442695, %v14933_v38  ;;  %vm16348_vm15 = vnez %v16013_v30 }
 0x743   : > { %16344 = vst [vmem:[#allocation29_spill] sm:$0xff] %v14936_v62  ;;  %v11788_v29 = vpop.eup %11787  ;;  %11801 = vpow2.f32 %v9474_v57  ;;  %v7972_v20 = vsel %vm16348_vm15, %v14936_v62, 0.0  ;;  %vm16349_vm9 = vnez %v16020_v45  ;;  %v7834_v33 = vadd.f32 1.0, %v11786_v59  ;;  %vm16370_vm15 = vmmov %vm16266_vm0 }
 0x744   : > { %v11790_v42 = vpop.eup %11789  ;;  %v14942_v26 = vmul.f32 %v11788_v29, %v14808_v9  ;;  %11803 = vrcp.f32 %v7833_v49  ;;  %v14963_v45 = vadd.f32 %v14825_v23, %v14594_v56  ;;  %v8085_v17 = vmul.f32 %v7972_v20, %v7972_v20 }
 0x745   : > { %v11792_v7 = vpop.eup %11791  ;;  %v14952_v51 = vmul.f32 %v11790_v42, %v14815_v35  ;;  %11805 = vpow2.f32 %v9476_v63  ;;  %v14980_v11 = vadd.f32 %v14845_v48, %v14594_v56  ;;  %vm16365_vm11 = vnez %v16044_v16 }
 0x746   : > { %16347 = vst [vmem:[#allocation44_spill] sm:$0xff] %v14942_v26  ;;  %v7970_v46 = vsel %vm16349_vm9, %v14942_v26, 0.0  ;;  %v14955_v9 = vmul.f32 %v11792_v7, %v14831_v15  ;;  %v11794_v58 = vpop.eup %11793  ;;  %11807 = vpow2.f32 %v9477_v44  ;;  %vm16369_vm6 = vnez %v16055_v18 }
 0x747   : > { %16350 = vst [vmem:[#allocation43_spill] sm:$0xff] %v14952_v51  ;;  %v8025_v10 = vsel %vm16352_vm3, %v7970_v46, 0.0  ;;  %v8083_v5 = vmul.f32 %v7970_v46, %v7970_v46  ;;  %v7973_v59 = vsel %vm14052_vm4, %v14952_v51, 0.0  ;;  %v14973_v23 = vmul.f32 %v11794_v58, %v14843_v14  ;;  %vm16359_vm4 = vmmov %vm16266_vm0 }
 0x748   : > { %16351 = vst [vmem:[#allocation30_spill] sm:$0xff] %v14955_v9  ;;  %v8026_v2 = vadd.f32 %v8025_v10, %v8024_v53  ;;  %v7971_v30 = vsel %vm14071_vm7, %v14955_v9, 0.0  ;;  %v11796_v35 = vpop.eup %11795  ;;  %vm16355_vm7 = vmmov %vm16266_vm0  ;;  %11809 = vrcp.f32 %v7834_v33  ;;  %v8142_v7 = vsel %vm16359_vm4, %v8085_v17, 0.0 }
 0x749   : > { %v8138_v15 = vsel %vm16353_vm10, %v8083_v5, 0.0  ;;  %v8027_v8 = vsel %vm16354_vm12, %v7971_v30, 0.0  ;;  %v8084_v57 = vmul.f32 %v7971_v30, %v7971_v30  ;;  %v8029_v37 = vsel %vm16355_vm7, %v7972_v20, 0.0  ;;  %16357 = vst [vmem:[#allocation50_spill] sm:$0xff] %v14973_v23  ;;  %vm16372_vm3 = vmmov %vm16266_vm0 }
 0x74a   : > { %v8139_v29 = vadd.f32 %v8138_v15, %v8137_v40  ;;  %v8028_v25 = vadd.f32 %v8027_v8, %v8026_v2  ;;  %v11798_v63 = vpop.eup %11797  ;;  %v14976_v53 = vmul.f32 %v11796_v35, %v14853_v4  ;;  %v8086_v40 = vmul.f32 %v7973_v59, %v7973_v59  ;;  %vm16373_vm10 = vmmov %vm16266_vm0 }
 0x74b   : > { %v8140_v49 = vsel %vm16356_vm8, %v8084_v57, 0.0  ;;  %v7974_v44 = vsel %vm14122_vm2, %v14973_v23, 0.0  ;;  %v9479_v46 = vmul.f32 -1.442695, %v14963_v45  ;;  %v8031_v5 = vsel %vm16360_vm5, %v7973_v59, 0.0  ;;  %vm16362_vm2 = vmmov %vm16266_vm0 }
 0x74c   : > { %v8030_v42 = vadd.f32 %v8029_v37, %v8028_v25  ;;  %v8141_v34 = vadd.f32 %v8140_v49, %v8139_v29  ;;  %16358 = vst [vmem:[#allocation48_spill] sm:$0xff] %v14976_v53  ;;  %v11800_v14 = vpop.eup %11799  ;;  %v8087_v4 = vmul.f32 %v7974_v44, %v7974_v44  ;;  %v7836_v33 = vadd.f32 1.0, %v11798_v63  ;;  %vm16375_vm12 = vmmov %vm16266_vm0 }
 0x74d   : > { %v11802_v10 = vpop.eup %11801  ;;  %v7975_v48 = vsel %vm14204_vm14, %v14976_v53, 0.0  ;;  %v9480_v2 = vmul.f32 -1.442695, %v14980_v11  ;;  %v8144_v22 = vsel %vm16361_vm13, %v8086_v40, 0.0  ;;  %v8033_v35 = vsel %vm16362_vm2, %v7974_v44, 0.0  ;;  %vm16364_vm14 = vmmov %vm16266_vm0 }
 0x74e   : > { %v8143_v20 = vadd.f32 %v8142_v7, %v8141_v34  ;;  %v8032_v58 = vadd.f32 %v8031_v5, %v8030_v42  ;;  %v11804_v30 = vpop.eup %11803  ;;  %v14995_v15 = vmul.f32 %v11800_v14, %v14860_v31  ;;  %11811 = vpow2.f32 %v9479_v46  ;;  %vm16376_vm7 = vmmov %vm16266_vm0 }
 0x74f   : > { %v11806_v17 = vpop.eup %11805  ;;  %v14999_v57 = vadd.f32 %v14594_v56, %v14848_v41  ;;  %v8146_v3 = vsel %vm16266_vm0, %v8087_v4, 0.0  ;;  %v8088_v29 = vmul.f32 %v7975_v48, %v7975_v48  ;;  %11813 = vrcp.f32 %v7836_v33  ;;  %vm16379_vm4 = vmmov %vm16266_vm0 }
 0x750   : > { %16363 = vst [vmem:[#allocation45_spill] sm:$0xff] %v14995_v15  ;;  %v8145_v8 = vadd.f32 %v8144_v22, %v8143_v20  ;;  %v7835_v59 = vadd.f32 1.0, %v11802_v10  ;;  %v11808_v25 = vpop.eup %11807  ;;  %v8034_v37 = vadd.f32 %v8033_v35, %v8032_v58  ;;  %11815 = vpow2.f32 %v9480_v2  ;;  %vm16380_vm5 = vmmov %vm16266_vm0 }
 0x751   : > { %v8035_v63 = vsel %vm16364_vm14, %v7975_v48, 0.0  ;;  %v7837_v42 = vadd.f32 1.0, %v11806_v17  ;;  %v7976_v31 = vsel %vm16365_vm11, %v14995_v15, 0.0  ;;  %v15007_v56 = vmul.f32 %v11804_v30, %v14871_v13  ;;  %vm16383_vm2 = vmmov %vm16266_vm0 }
 0x752   : > { %v11810_v49 = vpop.eup %11809  ;;  %11817 = vrcp.f32 %v7835_v59  ;;  %v8147_v34 = vadd.f32 %v8146_v3, %v8145_v8  ;;  %v9478_v41 = vmul.f32 -1.442695, %v14999_v57  ;;  %v8148_v7 = vsel %vm16367_vm1, %v8088_v29, 0.0  ;;  %vm16385_vm14 = vmmov %vm16367_vm1 }
 0x753   : > { %16366 = vst [vmem:[#allocation52_spill] sm:$0xff] %v15007_v56  ;;  %v7838_v40 = vadd.f32 1.0, %v11808_v25  ;;  %v8036_v44 = vadd.f32 %v8035_v63, %v8034_v37  ;;  %v15012_v14 = vmul.f32 %v11810_v49, %v14880_v60  ;;  %v8089_v20 = vmul.f32 %v7976_v31, %v7976_v31 }
 0x754   : > { %11819 = vrcp.f32 %v7837_v42  ;;  %v7977_v16 = vsel %vm16369_vm6, %v15007_v56, 0.0  ;;  %v8149_v46 = vadd.f32 %v8148_v7, %v8147_v34  ;;  %v8037_v13 = vsel %vm16370_vm15, %v7976_v31, 0.0  ;;  %vm16387_vm6 = vmmov %vm16367_vm1 }
 0x755   : > { %16368 = vst [vmem:[#allocation51_spill] sm:$0xff] %v15012_v14  ;;  %11821 = vpow2.f32 %v9478_v41  ;;  %v8038_v5 = vadd.f32 %v8037_v13, %v8036_v44  ;;  %vm16371_vm9 = vnez %v16077_v55  ;;  %v8150_v60 = vsel %vm16372_vm3, %v8089_v20, 0.0  ;;  %vm16388_vm15 = vmmov %vm16367_vm1 }
 0x756   : > { %11823 = vrcp.f32 %v7838_v40  ;;  %v7978_v4 = vsel %vm16371_vm9, %v15012_v14, 0.0  ;;  %v8090_v58 = vmul.f32 %v7977_v16, %v7977_v16  ;;  %v8151_v2 = vadd.f32 %v8150_v60, %v8149_v46  ;;  %vm16389_vm9 = vmmov %vm16367_vm1 }
 0x757   : > { %v8039_v18 = vsel %vm16373_vm10, %v7977_v16, 0.0  ;;  %v8091_v22 = vmul.f32 %v7978_v4, %v7978_v4  ;;  %v8041_v55 = vsel %vm16376_vm7, %v7978_v4, 0.0  ;;  %vm16378_vm8 = vnez %v16095_v52  ;;  %vm16391_vm3 = vmmov %vm16367_vm1 }
 0x758   : > { %v11812_v10 = vpop.eup %11811  ;;  %v8040_v17 = vadd.f32 %v8039_v18, %v8038_v5  ;;  %v8152_v3 = vsel %vm16375_vm12, %v8090_v58, 0.0  ;;  %vm16381_vm13 = vnez %v16075_v54  ;;  %vm16384_vm0 = vnez %v16079_v21 }
 0x759   : > { %v11814_v33 = vpop.eup %11813  ;;  %v7840_v35 = vadd.f32 1.0, %v11812_v10  ;;  %v8153_v25 = vadd.f32 %v8152_v3, %v8151_v2  ;;  %v8154_v63 = vsel %vm16379_vm4, %v8091_v22, 0.0  ;;  %vm16386_vm11 = vnez %v16116_v50  ;;  %vm16396_vm4 = vmmov %vm16367_vm1 }
 0x75a   : > { %v11816_v48 = vpop.eup %11815  ;;  %v15029_v59 = vmul.f32 %v11814_v33, %v14899_v1  ;;  %v8042_v31 = vadd.f32 %v8041_v55, %v8040_v17  ;;  %vm16392_vm10 = vnez %v16113_v36  ;;  %vm16393_vm12 = vnez %v16119_v39 }
 0x75b   : > { %v7841_v29 = vadd.f32 1.0, %v11816_v48  ;;  %11825 = vrcp.f32 %v7840_v35  ;;  %v8155_v7 = vadd.f32 %v8154_v63, %v8153_v25  ;;  %vm16394_vm7 = vnez %v16121_v6 }
 0x75c   : > { %v11818_v30 = vpop.eup %11817  ;;  %16377 = vst [vmem:[#allocation54_spill] sm:$0xff] %v15029_v59  ;;  %v7980_v1 = vsel %vm16381_vm13, %v15029_v59, 0.0  ;;  %vm16398_vm13 = vmmov %vm16367_vm1 }
 0x75d   : > { %v15024_v8 = vmul.f32 %v11818_v30, %v14921_v0  ;;  %11827 = vrcp.f32 %v7841_v29  ;;  %v8093_v46 = vmul.f32 %v7980_v1, %v7980_v1  ;;  %v8045_v54 = vsel %vm16385_vm14, %v7980_v1, 0.0 }
 0x75e   : > { %v11820_v49 = vpop.eup %11819  ;;  %vm8626_vm14 = vcmask 1041408  }
 0x75f   : > { %16374 = vst [vmem:[#allocation46_spill] sm:$0xff] %v15024_v8  ;;  %v7979_v37 = vsel %vm16378_vm8, %v15024_v8, 0.0  ;;  %v11822_v0 = vpop.eup %11821  ;;  %v15040_v40 = vmul.f32 %v11820_v49, %v14927_v28  ;;  %v8158_v33 = vsel %vm16367_vm1, %v8093_v46, 0.0  ;;  %vm16395_vm8 = vmmov %vm16367_vm1 }
 0x760   : > { %v8092_v42 = vmul.f32 %v7979_v37, %v7979_v37  ;;  %v11824_v34 = vpop.eup %11823  ;;  %v8043_v41 = vsel %vm16380_vm5, %v7979_v37, 0.0  ;;  %v7839_v44 = vadd.f32 1.0, %v11822_v0  ;;  %vm16397_vm5 = vmmov %vm16367_vm1 }
 0x761   : > { %16382 = vst [vmem:[#allocation53_spill] sm:$0xff] %v15040_v40  ;;  %v8044_v20 = vadd.f32 %v8043_v41, %v8042_v31  ;;  %v15044_v16 = vmul.f32 %v11824_v34, %v14933_v38  ;;  %v7981_v13 = vsel %vm16384_vm0, %v15040_v40, 0.0  ;;  %vm16400_vm0 = vmmov %vm16367_vm1 }
 0x762   : > { %v8156_v52 = vsel %vm16383_vm2, %v8092_v42, 0.0  ;;  %11829 = vrcp.f32 %v7839_v44  ;;  %v8094_v60 = vmul.f32 %v7981_v13, %v7981_v13  ;;  %v8047_v48 = vsel %vm16387_vm6, %v7981_v13, 0.0  ;;  %vm16399_vm2 = vmmov %vm16367_vm1 }
 0x763   : > { %v8157_v10 = vadd.f32 %v8156_v52, %v8155_v7  ;;  %v8046_v5 = vadd.f32 %v8045_v54, %v8044_v20  ;;  %v7982_v28 = vsel %vm16386_vm11, %v15044_v16, 0.0  ;;  %vm8609_vm11 = vcmask 1043456   ;;  %vm16413_vm1 = vmmov %vm16400_vm0 }
 0x764   : > { %v8095_v2 = vmul.f32 %v7982_v28, %v7982_v28  ;;  %v8160_v18 = vsel %vm16388_vm15, %v8094_v60, 0.0  ;;  %v8049_v22 = vsel %vm16389_vm9, %v7982_v28, 0.0  ;;  %vm16414_vm6 = vmmov %vm16400_vm0  ;;  %vm8592_vm15 = vcmask 1045504  }
 0x765   : > { %v11826_v4 = vpop.eup %11825  ;;  %v8159_v38 = vadd.f32 %v8158_v33, %v8157_v10  ;;  %v8048_v30 = vadd.f32 %v8047_v48, %v8046_v5  ;;  %vm16416_vm9 = vmmov %vm16400_vm0 }
 0x766   : > { %v15056_v21 = vmul.f32 %v11826_v4, %v14963_v45  ;;  %v8162_v3 = vsel %vm16391_vm3, %v8095_v2, 0.0  ;;  %vm16418_vm3 = vmmov %vm16400_vm0 }
 0x767   : > { %v11828_v58 = vpop.eup %11827  ;;  %v8161_v35 = vadd.f32 %v8160_v18, %v8159_v38  ;;  %v8050_v29 = vadd.f32 %v8049_v22, %v8048_v30 }
 0x768   : > { %v15061_v50 = vmul.f32 %v11828_v58, %v14980_v11  ;;  %v7984_v55 = vsel %vm16392_vm10, %v15056_v21, 0.0  ;;  %vm16424_vm10 = vmmov %vm16400_vm0 }
 0x769   : > { %v8163_v25 = vadd.f32 %v8162_v3, %v8161_v35  ;;  %v8097_v49 = vmul.f32 %v7984_v55, %v7984_v55  ;;  %v8053_v36 = vsel %vm16396_vm4, %v7984_v55, 0.0  ;;  %vm16434_vm4 = vmmov %vm16400_vm0 }
 0x76a   : > { %16390 = vst [vmem:[#allocation47_spill] sm:$0xff] %v15061_v50  ;;  %v7985_v37 = vsel %vm16393_vm12, %v15061_v50, 0.0  ;;  %vm16426_vm12 = vmmov %vm16400_vm0 }
 0x76b   : > { %v8098_v31 = vmul.f32 %v7985_v37, %v7985_v37  ;;  %v8166_v1 = vsel %vm16398_vm13, %v8097_v49, 0.0  ;;  %v8055_v39 = vsel %vm16399_vm2, %v7985_v37, 0.0  ;;  %vm16437_vm13 = vmmov %vm16400_vm0 }
 0x76c   : > { %v11830_v17 = vpop.eup %11829  ;;  %vm16439_vm2 = vmmov %vm16400_vm0 }
 0x76d   : > { %v15068_v45 = vmul.f32 %v11830_v17, %v14999_v57  ;;  %v8168_v6 = vsel %vm16400_vm0, %v8098_v31, 0.0  ;;  %v16401_v31 = vld [vmem:[#allocation34_spill] sm:$0xff] }
 0x76f   : > { %v7983_v11 = vsel %vm16394_vm7, %v15068_v45, 0.0  ;;  %vm16428_vm7 = vmmov %vm16400_vm0 }
 0x770   : > { %v8051_v63 = vsel %vm16395_vm8, %v7983_v11, 0.0  ;;  %v8096_v42 = vmul.f32 %v7983_v11, %v7983_v11  ;;  %vm16432_vm8 = vmmov %vm16400_vm0 }
 0x771   : > { %v8052_v0 = vadd.f32 %v8051_v63, %v8050_v29 }
 0x772   : > { %v8164_v57 = vsel %vm16397_vm5, %v8096_v42, 0.0  ;;  %vm16436_vm5 = vmmov %vm16400_vm0 }
 0x773   : > { %v8054_v34 = vadd.f32 %v8053_v36, %v8052_v0  ;;  %v8165_v41 = vadd.f32 %v8164_v57, %v8163_v25 }
 0x775   : > { %v8056_v7 = vadd.f32 %v8055_v39, %v8054_v34  ;;  %v8167_v52 = vadd.f32 %v8166_v1, %v8165_v41  ;;  %v16402_v34 = vld [vmem:[#allocation35_spill] sm:$0xff]  ;;  %v16403_v1 = vld [vmem:[#allocation33_spill] sm:$0xff] }
 0x777   : > { %v8057_v44 = vrot.slane %v8056_v7, 4  ;;  %v8169_v20 = vadd.f32 %v8168_v6, %v8167_v52  ;;  %v16405_v6 = vld [vmem:[#allocation25_spill] sm:$0xff] }
 0x779   : > { %v8058_v46 = vadd.f32 %v8057_v44, %v8056_v7  ;;  %v8170_v13 = vrot.slane %v8169_v20, 4  ;;  %v16404_v7 = vld [vmem:[#allocation24_spill] sm:$0xff] }
 0x77b   : > { %v8059_v10 = vrot.slane %v8058_v46, 2  ;;  %v8171_v54 = vadd.f32 %v8170_v13, %v8169_v20  ;;  %v16406_v20 = vld [vmem:[#allocation58_spill] sm:$0xff]  ;;  %v16407_v13 = vld [vmem:[#allocation37_spill] sm:$0xff] }
 0x77d   : > { %v8060_v5 = vadd.f32 %v8059_v10, %v8058_v46  ;;  %v8172_v28 = vrot.slane %v8171_v54, 2 }
 0x77f   : > { %v8061_v4 = vrot.slane %v8060_v5, 1  ;;  %v8173_v33 = vadd.f32 %v8172_v28, %v8171_v54  ;;  %v16408_v54 = vld [vmem:[#allocation10_spill] sm:$0xff]  ;;  %v16409_v28 = vld [vmem:[#allocation36_spill] sm:$0xff] }
 0x781   : > { %v8062_v60 = vadd.f32 %v8061_v4, %v8060_v5  ;;  %v8174_v38 = vrot.slane %v8173_v33, 1 }
 0x783   : > { %v8176_v58 = vmul.f32 0.00390625, %v8062_v60  ;;  %v8175_v2 = vadd.f32 %v8174_v38, %v8173_v33  ;;  %v16410_v33 = vld [vmem:[#allocation39_spill] sm:$0xff]  ;;  %v16411_v38 = vld [vmem:[#allocation38_spill] sm:$0xff] }
 0x785   : > { %v8177_v48 = vmul.f32 256.0, %v8176_v58  ;;  %v8217_v3 = vsub.f32 %v15044_v16, %v8176_v58  ;;  %v8218_v55 = vsub.f32 %v15068_v45, %v8176_v58  ;;  %v8219_v25 = vsub.f32 %v15056_v21, %v8176_v58 }
 0x786   : > { %v8185_v37 = vsub.f32 %v14659_v12, %v8176_v58  ;;  %v8186_v11 = vsub.f32 %v14674_v24, %v8176_v58  ;;  %v8187_v42 = vsub.f32 %v14653_v19, %v8176_v58  ;;  %v15089_v0 = vsub.f32 %v14668_v47, %v8176_v58 }
 0x787   : > { %v8178_v30 = vmul.f32 %v8177_v48, %v8176_v58  ;;  %v8253_v49 = vmul.f32 %v8217_v3, %v8217_v3  ;;  %v8254_v63 = vmul.f32 %v8218_v55, %v8218_v55  ;;  %v8255_v36 = vmul.f32 %v8219_v25, %v8219_v25 }
 0x788   : > { %v15092_v57 = vsub.f32 %v16401_v31, %v8176_v58  ;;  %v15095_v41 = vsub.f32 %v16402_v34, %v8176_v58  ;;  %v15098_v39 = vsub.f32 %v16403_v1, %v8176_v58  ;;  %v15101_v52 = vsub.f32 %v16404_v7, %v8176_v58 }
 0x789   : > { %v8179_v18 = vsub.f32 %v8175_v2, %v8178_v30  ;;  %v15104_v44 = vsub.f32 %v16405_v6, %v8176_v58  ;;  %v15107_v46 = vsub.f32 %v16406_v20, %v8176_v58  ;;  %v15110_v10 = vsub.f32 %v16407_v13, %v8176_v58  ;;  %v16412_v2 = vld [vmem:[#allocation27_spill] sm:$0xff] }
 0x78a   : > { %v15113_v5 = vsub.f32 %v16408_v54, %v8176_v58  ;;  %v15116_v4 = vsub.f32 %v16409_v28, %v8176_v58  ;;  %v15119_v60 = vsub.f32 %v16410_v33, %v8176_v58  ;;  %v15122_v48 = vsub.f32 %v16411_v38, %v8176_v58 }
 0x78b   : > { %v8180_v22 = vmax.f32 %v8179_v18, 0.0  ;;  %v8200_v30 = vsub.f32 %v16412_v2, %v8176_v58  ;;  %v8201_v18 = vsub.f32 %v14886_v61, %v8176_v58  ;;  %v8205_v3 = vsub.f32 %v14942_v26, %v8176_v58 }
 0x78c   : > { %v8206_v55 = vsub.f32 %v14955_v9, %v8176_v58  ;;  %v8208_v25 = vsub.f32 %v14952_v51, %v8176_v58  ;;  %v8209_v38 = vsub.f32 %v14973_v23, %v8176_v58  ;;  %v8210_v2 = vsub.f32 %v14976_v53, %v8176_v58 }
 0x78d   : > { %v8181_v35 = vmul.f32 0.003921569, %v8180_v22  ;;  %v8202_v22 = vsub.f32 %v14903_v43, %v8176_v58  ;;  %v8211_v61 = vsub.f32 %v14995_v15, %v8176_v58  ;;  %v8212_v43 = vsub.f32 %v15007_v56, %v8176_v58 }
 0x78e   : > { %v8215_v26 = vsub.f32 %v15029_v59, %v8176_v58  ;;  %v8216_v9 = vsub.f32 %v15040_v40, %v8176_v58  ;;  %v8221_v33 = vmul.f32 %v8185_v37, %v8185_v37  ;;  %v8222_v51 = vmul.f32 %v8186_v11, %v8186_v11 }
 0x78f   : > { %v8182_v17 = vadd.f32 0.0001, %v8181_v35  ;;  %v8203_v35 = vsub.f32 %v14890_v27, %v8176_v58  ;;  %v8213_v27 = vsub.f32 %v15012_v14, %v8176_v58  ;;  %v8223_v23 = vmul.f32 %v8187_v42, %v8187_v42 }
 0x790   : > { %v8236_v53 = vmul.f32 %v8200_v30, %v8200_v30  ;;  %v8237_v54 = vmul.f32 %v8201_v18, %v8201_v18  ;;  %v8238_v15 = vmul.f32 %v8202_v22, %v8202_v22  ;;  %v8241_v20 = vmul.f32 %v8205_v3, %v8205_v3 }
 0x791   : > { %v8183_v29 = vmul.f32 4.0, %v8182_v17  ;;  %v8204_v17 = vsub.f32 %v14909_v32, %v8176_v58  ;;  %v8214_v32 = vsub.f32 %v15024_v8, %v8176_v58  ;;  %v8239_v13 = vmul.f32 %v8203_v35, %v8203_v35 }
 0x792   : > { %v8242_v40 = vmul.f32 %v8206_v55, %v8206_v55  ;;  %v8245_v7 = vmul.f32 %v8209_v38, %v8209_v38  ;;  %v8246_v42 = vmul.f32 %v8210_v2, %v8210_v2  ;;  %v8247_v30 = vmul.f32 %v8211_v61, %v8211_v61 }
 0x793   : > { %11831 = vrcp.f32 %v8183_v29  ;;  %v8207_v29 = vsub.f32 %v14936_v62, %v8176_v58  ;;  %v8220_v62 = vsub.f32 %v15061_v50, %v8176_v58  ;;  %v8240_v59 = vmul.f32 %v8204_v17, %v8204_v17 }
 0x794   : > { %v8244_v50 = vmul.f32 %v8208_v25, %v8208_v25  ;;  %v8248_v18 = vmul.f32 %v8212_v43, %v8212_v43  ;;  %v8249_v34 = vmul.f32 %v8213_v27, %v8213_v27  ;;  %v8251_v31 = vmul.f32 %v8215_v26, %v8215_v26 }
 0x795   : > { %v8243_v6 = vmul.f32 %v8207_v29, %v8207_v29  ;;  %v8256_v35 = vmul.f32 %v8220_v62, %v8220_v62 }
 0x79d   : > { %v15142_v28 = vpop.eup %11831 }
 0x79e   : > { %v8289_v56 = vmul.f32 %v15142_v28, %v8253_v49  ;;  %v8290_v14 = vmul.f32 %v15142_v28, %v8254_v63  ;;  %v8291_v8 = vmul.f32 %v15142_v28, %v8255_v36  ;;  %v8250_v63 = vmul.f32 %v8214_v32, %v8214_v32 }
 0x79f   : > { %v8252_v36 = vmul.f32 %v8216_v9, %v8216_v9  ;;  %v15148_v17 = vmul.f32 %v15142_v28, %v8236_v53  ;;  %v15157_v61 = vmul.f32 %v15142_v28, %v8239_v13  ;;  %v15160_v27 = vmul.f32 %v15142_v28, %v8240_v59 }
 0x7a0   : > { %v8325_v58 = vadd.f32 0.5, %v8289_v56  ;;  %v8326_v37 = vadd.f32 0.5, %v8290_v14  ;;  %v8327_v11 = vadd.f32 0.5, %v8291_v8  ;;  %v15151_v56 = vmul.f32 %v15142_v28, %v8237_v54 }
 0x7a1   : > { %v15154_v14 = vmul.f32 %v15142_v28, %v8238_v15  ;;  %v15163_v43 = vmul.f32 %v15142_v28, %v8241_v20  ;;  %v15166_v32 = vmul.f32 %v15142_v28, %v8242_v40  ;;  %v15169_v62 = vmul.f32 %v15142_v28, %v8243_v6 }
 0x7a2   : > { %v9513_v22 = vmul.f32 -1.442695, %v8325_v58  ;;  %v9514_v1 = vmul.f32 -1.442695, %v8326_v37  ;;  %v9515_v49 = vmul.f32 -1.442695, %v8327_v11  ;;  %v15172_v26 = vmul.f32 %v15142_v28, %v8244_v50 }
 0x7a3   : > { %v15175_v9 = vmul.f32 %v15142_v28, %v8245_v7  ;;  %v15178_v53 = vmul.f32 %v15142_v28, %v8246_v42  ;;  %v15181_v15 = vmul.f32 %v15142_v28, %v8247_v30  ;;  %v15184_v8 = vmul.f32 %v15142_v28, %v8248_v18 }
 0x7a4   : > { %11833 = vpow2.f32 %v9513_v22  ;;  %v15187_v59 = vmul.f32 %v15142_v28, %v8249_v34  ;;  %v15190_v40 = vmul.f32 %v15142_v28, %v8250_v63  ;;  %v15193_v50 = vmul.f32 %v15142_v28, %v8251_v31 }
 0x7a5   : > { %11835 = vpow2.f32 %v9514_v1  ;;  %v15196_v1 = vmul.f32 %v15142_v28, %v8252_v36  ;;  %v8224_v7 = vmul.f32 %v15089_v0, %v15089_v0  ;;  %v8225_v6 = vmul.f32 %v15092_v57, %v15092_v57 }
 0x7a6   : > { %11837 = vpow2.f32 %v9515_v49  ;;  %v8226_v20 = vmul.f32 %v15095_v41, %v15095_v41  ;;  %v15205_v34 = vmul.f32 %v15142_v28, %v8256_v35  ;;  %v8227_v13 = vmul.f32 %v15098_v39, %v15098_v39 }
 0x7a7   : > { %v8228_v31 = vmul.f32 %v15101_v52, %v15101_v52  ;;  %v8229_v54 = vmul.f32 %v15104_v44, %v15104_v44  ;;  %v8257_v0 = vmul.f32 %v15142_v28, %v8221_v33  ;;  %v8230_v57 = vmul.f32 %v15107_v46, %v15107_v46 }
 0x7a8   : > { %v8258_v38 = vmul.f32 %v15142_v28, %v8222_v51  ;;  %v8259_v41 = vmul.f32 %v15142_v28, %v8223_v23  ;;  %v8260_v2 = vmul.f32 %v15142_v28, %v8224_v7  ;;  %v8231_v39 = vmul.f32 %v15110_v10, %v15110_v10 }
 0x7a9   : > { %v8232_v52 = vmul.f32 %v15113_v5, %v15113_v5  ;;  %v8233_v44 = vmul.f32 %v15116_v4, %v15116_v4  ;;  %v8261_v33 = vmul.f32 %v15142_v28, %v8225_v6  ;;  %v8234_v46 = vmul.f32 %v15119_v60, %v15119_v60 }
 0x7aa   : > { %v8235_v51 = vmul.f32 %v15122_v48, %v15122_v48  ;;  %v8262_v23 = vmul.f32 %v15142_v28, %v8226_v20  ;;  %v8263_v3 = vmul.f32 %v15142_v28, %v8227_v13  ;;  %v8264_v10 = vmul.f32 %v15142_v28, %v8228_v31 }
 0x7ab   : > { %v8265_v5 = vmul.f32 %v15142_v28, %v8229_v54  ;;  %v8266_v29 = vmul.f32 %v15142_v28, %v8230_v57  ;;  %v8293_v4 = vadd.f32 0.5, %v8257_v0  ;;  %v8294_v37 = vadd.f32 0.5, %v8258_v38 }
 0x7ac   : > { %v8295_v11 = vadd.f32 0.5, %v8259_v41  ;;  %v8296_v60 = vadd.f32 0.5, %v8260_v2  ;;  %v8267_v48 = vmul.f32 %v15142_v28, %v8231_v39  ;;  %v8268_v18 = vmul.f32 %v15142_v28, %v8232_v52 }
 0x7ad   : > { %v8297_v22 = vadd.f32 0.5, %v8261_v33  ;;  %v8269_v63 = vmul.f32 %v15142_v28, %v8233_v44  ;;  %v8298_v36 = vadd.f32 0.5, %v8262_v23  ;;  %v8299_v35 = vadd.f32 0.5, %v8263_v3 }
 0x7ae   : > { %v11834_v55 = vpop.eup %11833  ;;  %v8300_v7 = vadd.f32 0.5, %v8264_v10  ;;  %v9481_v6 = vmul.f32 -1.442695, %v8293_v4  ;;  %v9482_v20 = vmul.f32 -1.442695, %v8294_v37  ;;  %v8270_v54 = vmul.f32 %v15142_v28, %v8234_v46 }
 0x7af   : > { %v11836_v25 = vpop.eup %11835  ;;  %v8469_v58 = vadd.f32 1.0, %v11834_v55  ;;  %v9483_v13 = vmul.f32 -1.442695, %v8295_v11  ;;  %v9484_v31 = vmul.f32 -1.442695, %v8296_v60  ;;  %v8301_v0 = vadd.f32 0.5, %v8265_v5 }
 0x7b0   : > { %v11838_v42 = vpop.eup %11837  ;;  %v8470_v30 = vadd.f32 1.0, %v11836_v25  ;;  %v9485_v57 = vmul.f32 -1.442695, %v8297_v22  ;;  %v8271_v38 = vmul.f32 %v15142_v28, %v8235_v51  ;;  %v8302_v41 = vadd.f32 0.5, %v8266_v29  ;;  %v9570_v22 = vld [vmem:[%s12222_s28 + $0xe8] sm:$0xff] }
 0x7b1   : > { %v8471_v49 = vadd.f32 1.0, %v11838_v42  ;;  %11839 = vrcp.f32 %v8469_v58  ;;  %v9486_v2 = vmul.f32 -1.442695, %v8298_v36  ;;  %v8303_v39 = vadd.f32 0.5, %v8267_v48 }
 0x7b2   : > { %11841 = vrcp.f32 %v8470_v30  ;;  %v9487_v52 = vmul.f32 -1.442695, %v8299_v35  ;;  %v8304_v44 = vadd.f32 0.5, %v8268_v18  ;;  %v9488_v33 = vmul.f32 -1.442695, %v8300_v7 }
 0x7b3   : > { %11843 = vrcp.f32 %v8471_v49  ;;  %v8305_v23 = vadd.f32 0.5, %v8269_v63  ;;  %v9489_v3 = vmul.f32 -1.442695, %v8301_v0  ;;  %v8306_v46 = vadd.f32 0.5, %v8270_v54 }
 0x7b4   : > { %11845 = vpow2.f32 %v9481_v6  ;;  %v8307_v55 = vadd.f32 0.5, %v8271_v38  ;;  %v9490_v10 = vmul.f32 -1.442695, %v8302_v41  ;;  %v8308_v28 = vadd.f32 0.5, %v15148_v17 }
 0x7b5   : > { %11847 = vpow2.f32 %v9482_v20  ;;  %v8309_v51 = vadd.f32 0.5, %v15151_v56  ;;  %v9491_v5 = vmul.f32 -1.442695, %v8303_v39  ;;  %v8310_v4 = vadd.f32 0.5, %v15154_v14 }
 0x7b6   : > { %11849 = vpow2.f32 %v9483_v13  ;;  %v8311_v25 = vadd.f32 0.5, %v15157_v61  ;;  %v9492_v58 = vmul.f32 -1.442695, %v8304_v44  ;;  %v8312_v60 = vadd.f32 0.5, %v15160_v27 }
 0x7b7   : > { %11851 = vpow2.f32 %v9484_v31  ;;  %v9493_v17 = vmul.f32 -1.442695, %v8305_v23  ;;  %v8313_v30 = vadd.f32 0.5, %v15163_v43  ;;  %v9494_v14 = vmul.f32 -1.442695, %v8306_v46  ;;  %v9573_v43 = vld [vmem:[%s12222_s28 + $0xf0] sm:$0xff] }
 0x7b8   : > { %11853 = vpow2.f32 %v9485_v57  ;;  %v9495_v18 = vmul.f32 -1.442695, %v8307_v55  ;;  %v8314_v7 = vadd.f32 0.5, %v15166_v32  ;;  %v8315_v13 = vadd.f32 0.5, %v15169_v62 }
 0x7b9   : > { %11855 = vpow2.f32 %v9486_v2  ;;  %v9498_v31 = vmul.f32 -1.442695, %v8310_v4  ;;  %v9499_v57 = vmul.f32 -1.442695, %v8311_v25  ;;  %v8316_v2 = vadd.f32 0.5, %v15172_v26 }
 0x7ba   : > { %11857 = vpow2.f32 %v9487_v52  ;;  %v9500_v39 = vmul.f32 -1.442695, %v8312_v60  ;;  %v8317_v62 = vadd.f32 0.5, %v15175_v9  ;;  %v9501_v44 = vmul.f32 -1.442695, %v8313_v30 }
 0x7bb   : > { %v11840_v29 = vpop.eup %11839  ;;  %11859 = vpow2.f32 %v9488_v33  ;;  %v8318_v26 = vadd.f32 0.5, %v15178_v53  ;;  %v9502_v23 = vmul.f32 -1.442695, %v8314_v7  ;;  %v8319_v46 = vadd.f32 0.5, %v15181_v15 }
 0x7bc   : > { %v11842_v37 = vpop.eup %11841  ;;  %v15245_v11 = vmul.f32 %v11840_v29, %v15044_v16  ;;  %11861 = vpow2.f32 %v9489_v3  ;;  %v9503_v55 = vmul.f32 -1.442695, %v8315_v13  ;;  %v8320_v9 = vadd.f32 0.5, %v15184_v8 }
 0x7bd   : > { %v11844_v42 = vpop.eup %11843  ;;  %v8578_v56 = vmul.f32 %v11842_v37, %v15068_v45  ;;  %11863 = vpow2.f32 %v9490_v10  ;;  %v9496_v45 = vmul.f32 -1.442695, %v8308_v28  ;;  %v9504_v28 = vmul.f32 -1.442695, %v8316_v2 }
 0x7be   : > { %v15250_v61 = vpop.eup %11845  ;;  %v15253_v48 = vmul.f32 %v11844_v42, %v15056_v21  ;;  %v8780_v16 = vrot.slane %v15245_v11, 4  ;;  %11865 = vpow2.f32 %v9491_v5  ;;  %v9497_v21 = vmul.f32 -1.442695, %v8309_v51 }
 0x7bf   : > { %v15256_v27 = vpop.eup %11847  ;;  %v8782_v49 = vrot.slane %v8578_v56, 4  ;;  %v8795_v63 = vrot.slane %v8578_v56, 6  ;;  %11867 = vpow2.f32 %v9492_v58  ;;  %v8321_v5 = vadd.f32 0.5, %v15187_v59 }
 0x7c0   : > { %v15259_v36 = vpop.eup %11849  ;;  %v8796_v35 = vrot.slane %v15253_v48, 6  ;;  %11869 = vpow2.f32 %v9493_v17  ;;  %v9505_v29 = vmul.f32 -1.442695, %v8317_v62  ;;  %v8322_v4 = vadd.f32 0.5, %v15190_v40 }
 0x7c1   : > { %v15264_v6 = vpop.eup %11851  ;;  %v8783_v20 = vsel %vm8609_vm11, %v8780_v16, %v8782_v49  ;;  %11871 = vpow2.f32 %v9494_v14  ;;  %v9506_v25 = vmul.f32 -1.442695, %v8318_v26  ;;  %v8323_v15 = vadd.f32 0.5, %v15193_v50 }
 0x7c2   : > { %v15270_v54 = vpop.eup %11853  ;;  %v8787_v0 = vadd.f32 %v9570_v22, %v8783_v20  ;;  %v8797_v32 = vsel %vm8626_vm14, %v8795_v63, %v8796_v35  ;;  %11873 = vpow2.f32 %v9495_v18  ;;  %v9507_v37 = vmul.f32 -1.442695, %v8319_v46 }
 0x7c3   : > { %v15275_v38 = vpop.eup %11855  ;;  %v8802_v41 = vadd.f32 %v9573_v43, %v8797_v32  ;;  %11875 = vpow2.f32 %v9496_v45  ;;  %v8324_v8 = vadd.f32 0.5, %v15196_v1  ;;  %v9508_v17 = vmul.f32 -1.442695, %v8320_v9 }
 0x7c4   : > { %v15278_v52 = vpop.eup %11857  ;;  %9572 = vst.msk [vmem:[%s15282_s10 + $0xe8] sm:$0xff] %vm16413_vm1, %v8787_v0  ;;  %11877 = vpow2.f32 %v9497_v21  ;;  %v8328_v59 = vadd.f32 0.5, %v15205_v34  ;;  %v9509_v56 = vmul.f32 -1.442695, %v8321_v5  ;;  %v9510_v40 = vmul.f32 -1.442695, %v8322_v4  ;;  %vm16444_vm1 = vmmov %vm16400_vm0 }
 0x7c5   : > { %v15287_v33 = vpop.eup %11859  ;;  %9575 = vst.msk [vmem:[%s15282_s10 + $0xf0] sm:$0xff] %vm16414_vm6, %v8802_v41  ;;  %11879 = vpow2.f32 %v9498_v31  ;;  %v9511_v18 = vmul.f32 -1.442695, %v8323_v15  ;;  %v9512_v50 = vmul.f32 -1.442695, %v8324_v8  ;;  %v8437_v45 = vadd.f32 1.0, %v15250_v61  ;;  %vm16447_vm6 = vmmov %vm16400_vm0 }
 0x7c6   : > { %v15292_v3 = vpop.eup %11861  ;;  %11881 = vpow2.f32 %v9499_v57  ;;  %v9516_v63 = vmul.f32 -1.442695, %v8328_v59  ;;  %v8438_v34 = vadd.f32 1.0, %v15256_v27  ;;  %v8439_v21 = vadd.f32 1.0, %v15259_v36  ;;  %v8581_v4 = vld [vmem:[%s12222_s28] sm:$0xff] }
 0x7c7   : > { %v15295_v10 = vpop.eup %11863  ;;  %11883 = vpow2.f32 %v9500_v39  ;;  %v8440_v13 = vadd.f32 1.0, %v15264_v6  ;;  %v8441_v0 = vadd.f32 1.0, %v15270_v54  ;;  %v8442_v57 = vadd.f32 1.0, %v15275_v38 }
 0x7c8   : > { %v11866_v51 = vpop.eup %11865  ;;  %11885 = vpow2.f32 %v9501_v44  ;;  %v8443_v41 = vadd.f32 1.0, %v15278_v52  ;;  %v8444_v2 = vadd.f32 1.0, %v15287_v33  ;;  %v8445_v39 = vadd.f32 1.0, %v15292_v3 }
 0x7c9   : > { %v11868_v53 = vpop.eup %11867  ;;  %11887 = vpow2.f32 %v9502_v23  ;;  %v8446_v54 = vadd.f32 1.0, %v15295_v10  ;;  %v8447_v44 = vadd.f32 1.0, %v11866_v51 }
 0x7ca   : > { %v11870_v58 = vpop.eup %11869  ;;  %11889 = vpow2.f32 %v9503_v55  ;;  %v8448_v38 = vadd.f32 1.0, %v11868_v53 }
 0x7cb   : > { %v11872_v60 = vpop.eup %11871  ;;  %11891 = vpow2.f32 %v9504_v28  ;;  %v8449_v26 = vadd.f32 1.0, %v11870_v58 }
 0x7cc   : > { %v11874_v42 = vpop.eup %11873  ;;  %11893 = vpow2.f32 %v9505_v29  ;;  %v8450_v52 = vadd.f32 1.0, %v11872_v60  ;;  %v8582_v60 = vld [vmem:[%s12222_s28 + $0x8] sm:$0xff] }
 0x7cd   : > { %v11876_v30 = vpop.eup %11875  ;;  %11895 = vpow2.f32 %v9506_v25  ;;  %v8451_v46 = vadd.f32 1.0, %v11874_v42 }
 0x7ce   : > { %v11878_v14 = vpop.eup %11877  ;;  %11897 = vpow2.f32 %v9507_v37  ;;  %v8452_v33 = vadd.f32 1.0, %v11876_v30 }
 0x7cf   : > { %v11880_v22 = vpop.eup %11879  ;;  %11899 = vpow2.f32 %v9508_v17  ;;  %v8453_v9 = vadd.f32 1.0, %v11878_v14 }
 0x7d0   : > { %v11882_v49 = vpop.eup %11881  ;;  %11901 = vpow2.f32 %v9509_v56  ;;  %v8454_v3 = vadd.f32 1.0, %v11880_v22 }
 0x7d1   : > { %v11884_v1 = vpop.eup %11883  ;;  %11903 = vpow2.f32 %v9510_v40  ;;  %v8455_v28 = vadd.f32 1.0, %v11882_v49 }
 0x7d2   : > { %v11886_v43 = vpop.eup %11885  ;;  %11905 = vpow2.f32 %v9511_v18  ;;  %v8456_v5 = vadd.f32 1.0, %v11884_v1 }
 0x7d3   : > { %v11888_v7 = vpop.eup %11887  ;;  %11907 = vpow2.f32 %v9512_v50  ;;  %v8457_v29 = vadd.f32 1.0, %v11886_v43 }
 0x7d4   : > { %v11890_v20 = vpop.eup %11889  ;;  %11909 = vpow2.f32 %v9516_v63  ;;  %v15313_v51 = vadd.f32 1.0, %v11888_v7 }
 0x7d5   : > { %v11892_v31 = vpop.eup %11891  ;;  %11911 = vrcp.f32 %v8437_v45  ;;  %v15316_v25 = vadd.f32 1.0, %v11890_v20 }
 0x7d6   : > { %v11894_v32 = vpop.eup %11893  ;;  %11913 = vrcp.f32 %v8438_v34  ;;  %v15318_v58 = vadd.f32 1.0, %v11892_v31 }
 0x7d7   : > { %v11896_v61 = vpop.eup %11895  ;;  %11915 = vrcp.f32 %v8439_v21  ;;  %v15320_v15 = vadd.f32 1.0, %v11894_v32  ;;  %v9517_v21 = vld [vmem:[%s12222_s28 + $0x10] sm:$0xff]  ;;  %v9518_v32 = vld [vmem:[%s12222_s28 + $0x18] sm:$0xff] }
 0x7d8   : > { %v11898_v27 = vpop.eup %11897  ;;  %11917 = vrcp.f32 %v8440_v13  ;;  %v15323_v8 = vadd.f32 1.0, %v11896_v61  ;;  %v16417_v13 = vld [vmem:[#allocation35_spill] sm:$0xff] }
 0x7d9   : > { %v11900_v36 = vpop.eup %11899  ;;  %11919 = vrcp.f32 %v8441_v0  ;;  %v15325_v17 = vadd.f32 1.0, %v11898_v27 }
 0x7da   : > { %v11902_v6 = vpop.eup %11901  ;;  %11921 = vrcp.f32 %v8442_v57  ;;  %v15328_v56 = vadd.f32 1.0, %v11900_v36  ;;  %v16419_v57 = vld [vmem:[#allocation33_spill] sm:$0xff]  ;;  %v9521_v36 = vld [vmem:[%s12222_s28 + $0x20] sm:$0xff] }
 0x7db   : > { %v11904_v62 = vpop.eup %11903  ;;  %11923 = vrcp.f32 %v8443_v41  ;;  %v15330_v30 = vadd.f32 1.0, %v11902_v6 }
 0x7dc   : > { %v11906_v23 = vpop.eup %11905  ;;  %11925 = vrcp.f32 %v8444_v2  ;;  %v15333_v18 = vadd.f32 1.0, %v11904_v62 }
 0x7dd   : > { %v11908_v55 = vpop.eup %11907  ;;  %11927 = vrcp.f32 %v8445_v39  ;;  %v16420_v39 = vld [vmem:[#allocation24_spill] sm:$0xff] }
 0x7de   : > { %v11910_v10 = vpop.eup %11909  ;;  %11929 = vrcp.f32 %v8446_v54  ;;  %v15339_v43 = vadd.f32 1.0, %v11908_v55 }
 0x7df   : > { %v11912_v53 = vpop.eup %11911  ;;  %11931 = vrcp.f32 %v8447_v44  ;;  %v15345_v20 = vadd.f32 1.0, %v11910_v10  ;;  %v9522_v10 = vld [vmem:[%s12222_s28 + $0x28] sm:$0xff] }
 0x7e0   : > { %v11914_v37 = vpop.eup %11913  ;;  %11933 = vrcp.f32 %v8448_v38  ;;  %v8545_v42 = vmul.f32 %v11912_v53, %v14659_v12  ;;  %v15336_v12 = vadd.f32 1.0, %v11906_v23  ;;  %v16421_v38 = vld [vmem:[#allocation25_spill] sm:$0xff] }
 0x7e1   : > { %v11916_v59 = vpop.eup %11915  ;;  %11935 = vrcp.f32 %v8449_v26  ;;  %v8546_v40 = vmul.f32 %v11914_v37, %v14674_v24  ;;  %v16415_v24 = vld [vmem:[#allocation34_spill] sm:$0xff] }
 0x7e2   : > { %v11918_v14 = vpop.eup %11917  ;;  %11937 = vrcp.f32 %v8450_v52  ;;  %v8547_v22 = vmul.f32 %v11916_v59, %v14653_v19  ;;  %v8583_v50 = vadd.f32 %v8581_v4, %v8545_v42  ;;  %v16425_v42 = vld [vmem:[#allocation10_spill] sm:$0xff] }
 0x7e3   : > { %v11920_v49 = vpop.eup %11919  ;;  %11939 = vrcp.f32 %v8451_v46  ;;  %v8548_v63 = vmul.f32 %v11918_v14, %v14668_v47  ;;  %v8584_v1 = vadd.f32 %v8582_v60, %v8546_v40 }
 0x7e4   : > { %v11922_v45 = vpop.eup %11921  ;;  %11941 = vrcp.f32 %v8452_v33  ;;  %v8549_v34 = vmul.f32 %v11920_v49, %v16415_v24  ;;  %8585 = vst.msk [vmem:[%s15282_s10] sm:$0xff] %vm16416_vm9, %v8583_v50  ;;  %v8593_v19 = vrot.slane %v8547_v22, 2  ;;  %v16422_v33 = vld [vmem:[#allocation58_spill] sm:$0xff]  ;;  %v16427_v49 = vld [vmem:[#allocation36_spill] sm:$0xff]  ;;  %v9530_v24 = vld [vmem:[%s12222_s28 + $0x48] sm:$0xff] }
 0x7e5   : > { %v11924_v7 = vpop.eup %11923  ;;  %11943 = vrcp.f32 %v8453_v9  ;;  %v8550_v31 = vmul.f32 %v11922_v45, %v16417_v13  ;;  %8586 = vst.msk [vmem:[%s15282_s10 + $0x8] sm:$0xff] %vm16418_vm3, %v8584_v1  ;;  %v8594_v47 = vrot.slane %v8548_v63, 2  ;;  %v9529_v50 = vld [vmem:[%s12222_s28 + $0x40] sm:$0xff]  ;;  %vm16449_vm9 = vmmov %vm16400_vm0 }
 0x7e6   : > { %v11926_v0 = vpop.eup %11925  ;;  %11945 = vrcp.f32 %v8454_v3  ;;  %v8551_v61 = vmul.f32 %v11924_v7, %v16419_v57  ;;  %v8596_v41 = vrot.slane %v8549_v34, 2  ;;  %v8610_v27 = vrot.slane %v8549_v34, 4  ;;  %v16429_v34 = vld [vmem:[#allocation39_spill] sm:$0xff]  ;;  %vm16451_vm3 = vmmov %vm16400_vm0 }
 0x7e7   : > { %v11928_v2 = vpop.eup %11927  ;;  %11947 = vrcp.f32 %v8455_v28  ;;  %v8552_v6 = vmul.f32 %v11926_v0, %v16420_v39  ;;  %v8595_v54 = vsel %vm8592_vm15, %v8593_v19, %v8594_v47  ;;  %v8611_v62 = vrot.slane %v8550_v31, 4 }
 0x7e8   : > { %v11930_v44 = vpop.eup %11929  ;;  %11949 = vrcp.f32 %v8456_v5  ;;  %v8553_v26 = vmul.f32 %v11928_v2, %v16421_v38  ;;  %v8597_v23 = vsel %vm8592_vm15, %v8594_v47, %v8596_v41  ;;  %v8600_v52 = vadd.f32 %v9517_v21, %v8595_v54  ;;  %v16423_v5 = vld [vmem:[#allocation37_spill] sm:$0xff] }
 0x7e9   : > { %v11932_v46 = vpop.eup %11931  ;;  %11951 = vrcp.f32 %v8457_v29  ;;  %v8554_v55 = vmul.f32 %v11930_v44, %v16422_v33  ;;  %v8601_v9 = vadd.f32 %v9518_v32, %v8597_v23  ;;  %v8612_v3 = vsel %vm8609_vm11, %v8610_v27, %v8611_v62  ;;  %v9525_v29 = vld [vmem:[%s12222_s28 + $0x30] sm:$0xff]  ;;  %v9534_v54 = vld [vmem:[%s12222_s28 + $0x58] sm:$0xff] }
 0x7ea   : > { %v11934_v28 = vpop.eup %11933  ;;  %11953 = vrcp.f32 %v15313_v51  ;;  %v8555_v53 = vmul.f32 %v11932_v46, %v16423_v5  ;;  %9519 = vst.msk [vmem:[%s15282_s10 + $0x10] sm:$0xff] %vm16424_vm10, %v8600_v52  ;;  %v8613_v4 = vrot.slane %v8551_v61, 4  ;;  %v8617_v37 = vadd.f32 %v9521_v36, %v8612_v3  ;;  %v9526_v51 = vld [vmem:[%s12222_s28 + $0x38] sm:$0xff]  ;;  %v16433_v27 = vld [vmem:[#allocation40_spill] sm:$0xff]  ;;  %v9545_v5 = vld [vmem:[%s12222_s28 + $0x80] sm:$0xff] }
 0x7eb   : > { %v11936_v60 = vpop.eup %11935  ;;  %11955 = vrcp.f32 %v15316_v25  ;;  %v8556_v59 = vmul.f32 %v11934_v28, %v16425_v42  ;;  %9520 = vst.msk [vmem:[%s15282_s10 + $0x18] sm:$0xff] %vm16426_vm12, %v8601_v9  ;;  %v8627_v40 = vrot.slane %v8551_v61, 6  ;;  %v8628_v14 = vrot.slane %v8552_v6, 6  ;;  %v9533_v6 = vld [vmem:[%s12222_s28 + $0x50] sm:$0xff]  ;;  %v16440_v9 = vld [vmem:[#allocation42_spill] sm:$0xff]  ;;  %v9546_v42 = vld [vmem:[%s12222_s28 + $0x88] sm:$0xff] }
 0x7ec   : > { %v11938_v22 = vpop.eup %11937  ;;  %11957 = vrcp.f32 %v15318_v58  ;;  %v8557_v63 = vmul.f32 %v11936_v60, %v16427_v49  ;;  %v8614_v1 = vsel %vm8609_vm11, %v8611_v62, %v8613_v4  ;;  %9523 = vst.msk [vmem:[%s15282_s10 + $0x20] sm:$0xff] %vm16428_vm7, %v8617_v37  ;;  %v8630_v45 = vrot.slane %v8553_v26, 6  ;;  %v16430_v58 = vld [vmem:[#allocation38_spill] sm:$0xff]  ;;  %v16435_v62 = vld [vmem:[#allocation41_spill] sm:$0xff]  ;;  %v16438_v23 = vld [vmem:[#allocation28_spill] sm:$0xff] }
 0x7ed   : > { %v11940_v25 = vpop.eup %11939  ;;  %11959 = vrcp.f32 %v15320_v15  ;;  %v8558_v19 = vmul.f32 %v11938_v22, %v16429_v34  ;;  %v8618_v7 = vadd.f32 %v9522_v10, %v8614_v1  ;;  %v8629_v21 = vsel %vm8626_vm14, %v8627_v40, %v8628_v14  ;;  %v16431_v15 = vld [vmem:[#allocation27_spill] sm:$0xff]  ;;  %v16443_v49 = vld [vmem:[#allocation29_spill] sm:$0xff]  ;;  %vm16452_vm10 = vmmov %vm16400_vm0 }
 0x7ee   : > { %v11942_v13 = vpop.eup %11941  ;;  %11961 = vrcp.f32 %v15323_v8  ;;  %v8559_v31 = vmul.f32 %v11940_v25, %v16430_v58  ;;  %v8631_v47 = vsel %vm8626_vm14, %v8628_v14, %v8630_v45  ;;  %v8634_v0 = vadd.f32 %v9525_v29, %v8629_v21  ;;  %v9542_v25 = vld [vmem:[%s12222_s28 + $0x78] sm:$0xff]  ;;  %v16446_v58 = vld [vmem:[#allocation50_spill] sm:$0xff]  ;;  %vm16454_vm12 = vmmov %vm16400_vm0 }
 0x7ef   : > { %v11944_v32 = vpop.eup %11943  ;;  %11963 = vrcp.f32 %v15325_v17  ;;  %v15385_v57 = vmul.f32 %v11942_v13, %v16431_v15  ;;  %9524 = vst.msk [vmem:[%s15282_s10 + $0x28] sm:$0xff] %vm16432_vm8, %v8618_v7  ;;  %v8635_v61 = vadd.f32 %v9526_v51, %v8631_v47  ;;  %v8641_v41 = vadd.f32 %v9529_v50, %v8554_v55  ;;  %v9537_v55 = vld [vmem:[%s12222_s28 + $0x60] sm:$0xff]  ;;  %v9541_v50 = vld [vmem:[%s12222_s28 + $0x70] sm:$0xff]  ;;  %vm16456_vm7 = vmmov %vm16400_vm0 }
 0x7f0   : > { %v11946_v8 = vpop.eup %11945  ;;  %11965 = vrcp.f32 %v15328_v56  ;;  %v8561_v2 = vmul.f32 %v11944_v32, %v16433_v27  ;;  %9527 = vst.msk [vmem:[%s15282_s10 + $0x30] sm:$0xff] %vm16434_vm4, %v8634_v0  ;;  %v8642_v36 = vadd.f32 %v9530_v24, %v8555_v53  ;;  %v8651_v39 = vrot.slane %v8556_v59, 2  ;;  %v16441_v53 = vld [vmem:[#allocation44_spill] sm:$0xff]  ;;  %v16442_v59 = vld [vmem:[#allocation30_spill] sm:$0xff]  ;;  %v16445_v24 = vld [vmem:[#allocation43_spill] sm:$0xff] }
 0x7f1   : > { %v11948_v17 = vpop.eup %11947  ;;  %11967 = vrcp.f32 %v15330_v30  ;;  %v8562_v44 = vmul.f32 %v11946_v8, %v16435_v62  ;;  %9528 = vst.msk [vmem:[%s15282_s10 + $0x38] sm:$0xff] %vm16436_vm5, %v8635_v61  ;;  %v8652_v56 = vrot.slane %v8557_v63, 2  ;;  %v8654_v38 = vrot.slane %v8558_v19, 2  ;;  %vm16460_vm8 = vmmov %vm16400_vm0 }
 0x7f2   : > { %9531 = vst.msk [vmem:[%s15282_s10 + $0x40] sm:$0xff] %vm16437_vm13, %v8641_v41  ;;  %v11950_v26 = vpop.eup %11949  ;;  %11969 = vrcp.f32 %v15333_v18  ;;  %v8563_v52 = vmul.f32 %v11948_v17, %v16438_v23  ;;  %v8667_v46 = vrot.slane %v8558_v19, 4  ;;  %v8668_v30 = vrot.slane %v8559_v31, 4  ;;  %v16450_v17 = vld [vmem:[#allocation45_spill] sm:$0xff]  ;;  %vm16461_vm4 = vmmov %vm16400_vm0 }
 0x7f3   : > { %9532 = vst.msk [vmem:[%s15282_s10 + $0x48] sm:$0xff] %vm16439_vm2, %v8642_v36  ;;  %v11952_v33 = vpop.eup %11951  ;;  %11971 = vrcp.f32 %v15336_v12  ;;  %v8564_v3 = vmul.f32 %v11950_v26, %v16440_v9  ;;  %v8653_v28 = vsel %vm8592_vm15, %v8651_v39, %v8652_v56  ;;  %v8655_v10 = vsel %vm8592_vm15, %v8652_v56, %v8654_v38  ;;  %v9538_v12 = vld [vmem:[%s12222_s28 + $0x68] sm:$0xff]  ;;  %v9549_v36 = vld [vmem:[%s12222_s28 + $0x90] sm:$0xff]  ;;  %v9550_v39 = vld [vmem:[%s12222_s28 + $0x98] sm:$0xff] }
 0x7f4   : > { %v11954_v18 = vpop.eup %11953  ;;  %11973 = vrcp.f32 %v15339_v43  ;;  %v8565_v4 = vmul.f32 %v11952_v33, %v16441_v53  ;;  %v8658_v37 = vadd.f32 %v9533_v6, %v8653_v28  ;;  %v8659_v60 = vadd.f32 %v9534_v54, %v8655_v10  ;;  %v9553_v38 = vld [vmem:[%s12222_s28 + $0xa0] sm:$0xff]  ;;  %v16453_v26 = vld [vmem:[#allocation52_spill] sm:$0xff]  ;;  %vm16463_vm5 = vmmov %vm16400_vm0 }
 0x7f5   : > { %v11956_v29 = vpop.eup %11955  ;;  %11975 = vrcp.f32 %v15345_v20  ;;  %v8566_v40 = vmul.f32 %v11954_v18, %v16442_v59  ;;  %v8669_v14 = vsel %vm8609_vm11, %v8667_v46, %v8668_v30  ;;  %v8670_v22 = vrot.slane %v15385_v57, 4  ;;  %v9561_v9 = vld [vmem:[%s12222_s28 + $0xc0] sm:$0xff]  ;;  %vm16464_vm13 = vmmov %vm16400_vm0 }
 0x7f6   : > { %v11958_v51 = vpop.eup %11957  ;;  %v8567_v43 = vmul.f32 %v11956_v29, %v16443_v49  ;;  %9535 = vst.msk [vmem:[%s15282_s10 + $0x50] sm:$0xff] %vm16400_vm0, %v8658_v37  ;;  %v8674_v63 = vadd.f32 %v9537_v55, %v8669_v14  ;;  %v8683_v1 = vrot.slane %v15385_v57, 6  ;;  %v8684_v45 = vrot.slane %v8561_v2, 6  ;;  %v16448_v57 = vld [vmem:[#allocation48_spill] sm:$0xff]  ;;  %v9554_v55 = vld [vmem:[%s12222_s28 + $0xa8] sm:$0xff]  ;;  %v16457_v37 = vld [vmem:[#allocation46_spill] sm:$0xff] }
 0x7f7   : > { %9536 = vst.msk [vmem:[%s15282_s10 + $0x58] sm:$0xff] %vm16444_vm1, %v8659_v60  ;;  %v11960_v20 = vpop.eup %11959  ;;  %v8568_v34 = vmul.f32 %v11958_v51, %v16445_v24  ;;  %v8671_v19 = vsel %vm8609_vm11, %v8668_v30, %v8670_v22  ;;  %v8686_v7 = vrot.slane %v8562_v44, 6  ;;  %v8697_v21 = vadd.f32 %v9545_v5, %v8563_v52  ;;  %v16458_v14 = vld [vmem:[#allocation54_spill] sm:$0xff]  ;;  %vm16465_vm2 = vmmov %vm16400_vm0 }
 0x7f8   : > { %v11962_v13 = vpop.eup %11961  ;;  %v8569_v31 = vmul.f32 %v11960_v20, %v16446_v58  ;;  %v8675_v47 = vadd.f32 %v9538_v12, %v8671_v19  ;;  %9539 = vst.msk [vmem:[%s15282_s10 + $0x60] sm:$0xff] %vm16447_vm6, %v8674_v63  ;;  %v8685_v0 = vsel %vm8626_vm14, %v8683_v1, %v8684_v45  ;;  %v8698_v32 = vadd.f32 %v9546_v42, %v8564_v3  ;;  %v16455_v3 = vld [vmem:[#allocation51_spill] sm:$0xff]  ;;  %v9558_v63 = vld [vmem:[%s12222_s28 + $0xb8] sm:$0xff]  ;;  %vm16466_vm1 = vmmov %vm16400_vm0 }
 0x7f9   : > { %v11964_v15 = vpop.eup %11963  ;;  %v8570_v61 = vmul.f32 %v11962_v13, %v16448_v57  ;;  %v8687_v41 = vsel %vm8626_vm14, %v8684_v45, %v8686_v7  ;;  %v8690_v8 = vadd.f32 %v9541_v50, %v8685_v0  ;;  %9547 = vst.msk [vmem:[%s15282_s10 + $0x80] sm:$0xff] %vm16449_vm9, %v8697_v21  ;;  %v8707_v27 = vrot.slane %v8565_v4, 2  ;;  %v9562_v4 = vld [vmem:[%s12222_s28 + $0xc8] sm:$0xff]  ;;  %v16459_v1 = vld [vmem:[#allocation53_spill] sm:$0xff]  ;;  %v9569_v57 = vld [vmem:[%s12222_s28 + $0xe0] sm:$0xff] }
 0x7fa   : > { %v11966_v2 = vpop.eup %11965  ;;  %v8571_v6 = vmul.f32 %v11964_v15, %v16450_v17  ;;  %9540 = vst.msk [vmem:[%s15282_s10 + $0x68] sm:$0xff] %vm16451_vm3, %v8675_v47  ;;  %v8691_v54 = vadd.f32 %v9542_v25, %v8687_v41  ;;  %v8708_v62 = vrot.slane %v8566_v40, 2  ;;  %v8710_v44 = vrot.slane %v8567_v43, 2  ;;  %v9557_v40 = vld [vmem:[%s12222_s28 + $0xb0] sm:$0xff]  ;;  %v9566_v58 = vld [vmem:[%s12222_s28 + $0xd8] sm:$0xff]  ;;  %vm16467_vm6 = vmmov %vm16400_vm0 }
 0x7fb   : > { %9548 = vst.msk [vmem:[%s15282_s10 + $0x88] sm:$0xff] %vm16452_vm10, %v8698_v32  ;;  %v11968_v56 = vpop.eup %11967  ;;  %v8572_v23 = vmul.f32 %v11966_v2, %v16453_v26  ;;  %v8723_v52 = vrot.slane %v8567_v43, 4  ;;  %v8724_v46 = vrot.slane %v8568_v34, 4  ;;  %v8726_v30 = vrot.slane %v8569_v31, 4  ;;  %v16462_v34 = vld [vmem:[#allocation47_spill] sm:$0xff]  ;;  %vm16469_vm9 = vmmov %vm16400_vm0 }
 0x7fc   : > { %9543 = vst.msk [vmem:[%s15282_s10 + $0x70] sm:$0xff] %vm16454_vm12, %v8690_v8  ;;  %v11970_v33 = vpop.eup %11969  ;;  %v8573_v28 = vmul.f32 %v11968_v56, %v16455_v3  ;;  %v8709_v10 = vsel %vm8592_vm15, %v8707_v27, %v8708_v62  ;;  %v8711_v18 = vsel %vm8592_vm15, %v8708_v62, %v8710_v44  ;;  %v8739_v5 = vrot.slane %v8569_v31, 6  ;;  %v9565_v31 = vld [vmem:[%s12222_s28 + $0xd0] sm:$0xff]  ;;  %vm16471_vm3 = vmmov %vm16400_vm0 }
 0x7fd   : > { %9544 = vst.msk [vmem:[%s15282_s10 + $0x78] sm:$0xff] %vm16456_vm7, %v8691_v54  ;;  %v11972_v53 = vpop.eup %11971  ;;  %v8574_v60 = vmul.f32 %v11970_v33, %v16457_v37  ;;  %v8714_v29 = vadd.f32 %v9549_v36, %v8709_v10  ;;  %v8715_v12 = vadd.f32 %v9550_v39, %v8711_v18  ;;  %v8725_v42 = vsel %vm8609_vm11, %v8723_v52, %v8724_v46 }
 0x7fe   : > { %v11974_v59 = vpop.eup %11973  ;;  %v8575_v22 = vmul.f32 %v11972_v53, %v16458_v14  ;;  %v8727_v51 = vsel %vm8609_vm11, %v8724_v46, %v8726_v30  ;;  %v8730_v50 = vadd.f32 %v9553_v38, %v8725_v42  ;;  %v8740_v49 = vrot.slane %v8570_v61, 6  ;;  %v9574_v61 = vld [vmem:[%s12222_s28 + $0xf8] sm:$0xff] }
 0x7ff   : > { %v11976_v43 = vpop.eup %11975  ;;  %v8576_v45 = vmul.f32 %v11974_v59, %v16459_v1  ;;  %9551 = vst.msk [vmem:[%s15282_s10 + $0x90] sm:$0xff] %vm16460_vm8, %v8714_v29  ;;  %v8731_v20 = vadd.f32 %v9554_v55, %v8727_v51  ;;  %v8742_v25 = vrot.slane %v8571_v6, 6  ;;  %v8753_v24 = vadd.f32 %v9561_v9, %v8572_v23 }
 0x800   : > { %9552 = vst.msk [vmem:[%s15282_s10 + $0x98] sm:$0xff] %vm16461_vm4, %v8715_v12  ;;  %v8580_v19 = vmul.f32 %v11976_v43, %v16462_v34  ;;  %v8741_v7 = vsel %vm8626_vm14, %v8739_v5, %v8740_v49  ;;  %v8754_v21 = vadd.f32 %v9562_v4, %v8573_v28  ;;  %v8763_v13 = vrot.slane %v8574_v60, 2 }
 0x801   : > { %9555 = vst.msk [vmem:[%s15282_s10 + $0xa0] sm:$0xff] %vm16463_vm5, %v8730_v50  ;;  %v8743_v47 = vsel %vm8626_vm14, %v8740_v49, %v8742_v25  ;;  %v8746_v0 = vadd.f32 %v9557_v40, %v8741_v7  ;;  %v8764_v32 = vrot.slane %v8575_v22, 2  ;;  %v8766_v15 = vrot.slane %v8576_v45, 2 }
 0x802   : > { %9556 = vst.msk [vmem:[%s15282_s10 + $0xa8] sm:$0xff] %vm16464_vm13, %v8731_v20  ;;  %v8747_v41 = vadd.f32 %v9558_v63, %v8743_v47  ;;  %v8779_v8 = vrot.slane %v8576_v45, 4  ;;  %v8798_v27 = vrot.slane %v8580_v19, 6 }
 0x803   : > { %9563 = vst.msk [vmem:[%s15282_s10 + $0xc0] sm:$0xff] %vm16465_vm2, %v8753_v24  ;;  %v8765_v2 = vsel %vm8592_vm15, %v8763_v13, %v8764_v32  ;;  %v8767_v36 = vsel %vm8592_vm15, %v8764_v32, %v8766_v15  ;;  %vm16468_vm15 = vmmov %vm16400_vm0 }
 0x804   : > { %9564 = vst.msk [vmem:[%s15282_s10 + $0xc8] sm:$0xff] %vm16400_vm0, %v8754_v21  ;;  %v8770_v39 = vadd.f32 %v9565_v31, %v8765_v2  ;;  %v8771_v17 = vadd.f32 %v9566_v58, %v8767_v36  ;;  %v8781_v6 = vsel %vm8609_vm11, %v8779_v8, %v8780_v16  ;;  %v8799_v54 = vsel %vm8626_vm14, %v8796_v35, %v8798_v27  ;;  %vm16470_vm11 = vmmov %vm16400_vm0 }
 0x805   : > { %9559 = vst.msk [vmem:[%s15282_s10 + $0xb0] sm:$0xff] %vm16466_vm1, %v8746_v0  ;;  %v8786_v62 = vadd.f32 %v9569_v57, %v8781_v6  ;;  %v8803_v44 = vadd.f32 %v9574_v61, %v8799_v54 }
 0x806   : > { %9560 = vst.msk [vmem:[%s15282_s10 + $0xb8] sm:$0xff] %vm16467_vm6, %v8747_v41 }
 0x807   : > { %9567 = vst.msk [vmem:[%s15282_s10 + $0xd0] sm:$0xff] %vm16468_vm15, %v8770_v39 }
 0x808   : > { %9568 = vst.msk [vmem:[%s15282_s10 + $0xd8] sm:$0xff] %vm16469_vm9, %v8771_v17 }
 0x809   : > { %9571 = vst.msk [vmem:[%s15282_s10 + $0xe0] sm:$0xff] %vm16470_vm11, %v8786_v62 }
 0x80a   : > { %9576 = vst.msk [vmem:[%s15282_s10 + $0xf8] sm:$0xff] %vm16471_vm3, %v8803_v44 }
 0x80b   : > { %12020 = shalt.err (!%p12017_p2)
}
 0x80c   : > { %s12021_s15 = scalar_lea.hbm %s15499_s13, 4096  ;;  %s12025_s7 = scalar_lea.hbm %s15558_s5, 8192 }
 0x80d   : > { %p12022_p4 = scmp.ne.s32.totalorder %s15499_s13, %s12021_s15  ;;  %p12026_p9 = scmp.lt.u32.totalorder %s15499_s13, %s15558_s5 }
 0x80e   : > { %p12027_p1 = scmp.lt.u32.totalorder %s12025_s7, %s12021_s15  ;;  %p12029_p6 = scmp.lt.u32.totalorder %s12021_s15, %s15499_s13 }
 0x80f   : > { %p12023_p5 = pnand %p12022_p4, %p16472_p11 }
 0x810   : > { %p12028_p3 = por %p12027_p1, %p12026_p9 }
 0x811   : > { %p12024_p7 = pneg %p12023_p5 }
 0x812   : > { %p12030_p12 = por %p12029_p6, %p12028_p3 }
 0x814   : > { %p12031_p13 = pnand %p12030_p12, %p12024_p7 }
 0x816   : > { %12034 = shalt.err (!%p12031_p13)
}
 0x817   : > { %s12080_s25 = smov 128   ;;  %s12081_s22 = smov 8  }
 0x818   : > { %11440 = dma.vmem_to_hbm [thread:$0]  (%p16472_p11), %s15501_s11, 4096, %s15499_s13, %s8808_s17, %s12080_s25, %s12080_s25, %s12081_s22  }
 0x819 PF: > { %s8836_s28 = sand.u32 1, %s12061_s18   ;;  %p16473_p8 = scmp.ne.s32.totalorder %s15732_s6, 0 }
 0x81a   : > { %p16474_p10 = scmp.ge.s32.totalorder %s12073_s21, 2  ;;  %s8837_s26 = scalar_lea.sflag [#allocation6], %s8836_s28 }
 0x81c   : > { %p11447_p0 = pnand %p16474_p10, %p16473_p8 }
 0x81e   : > { %12056 = dma.done.wait (!%p11447_p0), %s8837_s26, 4096  }
 0x81f   : > { %12058 = vsyncadd (!%p11447_p0), %s8837_s26, 4294963200  ;;  %p18_p2 = scmp.ge.s32.totalorder %s12137_s24, 4   ;;  %s16475_s18 = smov %s12065_s19 }
 0x820   : > { %s16476_s19 = smov %s12069_s20  ;;  %s16477_s20 = smov %s12149_s27 }
 0x821   : > { %s16478_s21 = smov %s12137_s24  ;;  %20 = sbr.rel (!%p18_p2) target bundleno = 5 (0x5), region = 131 }
 0x828   :  { %8842 = vsyncpa [#allocation5], 1 }
 0x829   :  { %8844 = vsyncpa [#allocation5 + $0x1], 1 }
 0x82a   :  { %8845 = vsyncpa [#allocation6], 1 }
 0x82b   :  { %8847 = vsyncpa [#allocation6 + $0x1], 1 }

</bundles_post_ra>
